<compile_context>
chip_gen: v7x
topology: tpu7x:2x2x1
jax: 0.10.0
libtpu: 0.0.40
codegen_flags: <defaults>
</compile_context>

<pallas_src>
import functools
import numpy as np
import jax
import jax.numpy as jnp
from jax.experimental import pallas as pl
from jax.experimental.pallas import tpu as pltpu

EPS = 1e-5
GROWTH = 32
BLOCK_CONFIG = (3, 3, 3, 3)
BN_SIZES = (2, 3, 4, 4)


def _round_up(x, m):
    return ((x + m - 1) // m) * m


# ------------------------------ fused kernel ---------------------------------

def _make_kernel(block_config, growth):
    n_gcbn = 1 + sum(2 * L + 1 for L in block_config)   # conv0 + (conv1,conv2)*L + trans

    def kernel(*refs):
        # refs = [adj, x, pool, (w, aff) * n_gcbn, clf_w, clf_b, out, slab, agg_slab]
        adj_ref, x_ref, pool_ref = refs[0], refs[1], refs[2]
        param_refs = refs[3:3 + 2 * n_gcbn]
        clf_w_ref = refs[3 + 2 * n_gcbn]
        clf_b_ref = refs[4 + 2 * n_gcbn]
        o_ref = refs[5 + 2 * n_gcbn]
        slab_ref = refs[6 + 2 * n_gcbn]
        aggs_ref = refs[7 + 2 * n_gcbn]

        adj = adj_ref[...]                   # reused by every aggregation
        idx = [0]

        def next_params():
            i = idx[0]
            idx[0] += 1
            return param_refs[2 * i], param_refs[2 * i + 1]

        def bn_relu(h, gamma, beta):
            # NodeLevelBatchNorm (batch stats, biased variance) + ReLU, f32.
            mean = jnp.mean(h, axis=0, keepdims=True)
            var = jnp.mean(jnp.square(h - mean), axis=0, keepdims=True)
            scale = gamma * jax.lax.rsqrt(var + EPS)
            shift = beta - mean * scale
            return jnp.maximum(h * scale + shift, 0.0)

        def gcbn_stacked(x, agg, w_ref, aff_ref):
            # w_ref = [W_root ; W_rel] stacked on axis 0 ([2*cin, cout]); `agg`
            # is the precomputed A @ x (from the aggregated slab).  cin % 8 == 0
            # for every caller, so the ref slices are sublane-aligned loads.
            cin = x.shape[1]
            aff = aff_ref[...]               # [3, cout] = (b_rel, gamma, beta)
            h = (jnp.dot(x, w_ref[pl.ds(0, cin), :],
                         preferred_element_type=jnp.float32)
                 + jnp.dot(agg, w_ref[pl.ds(cin, cin), :],
                           preferred_element_type=jnp.float32)
                 + aff[0:1, :])
            return bn_relu(h, aff[1:2, :], aff[2:3, :])

        def gcbn_proj(x, w_ref, aff_ref):
            # cout < cin: project first, aggregate the narrow result.
            # w_ref = [W_root | W_rel]  ([cin, 2*cout]).
            aff = aff_ref[...]
            cout = aff.shape[1]
            t = jnp.dot(x, w_ref[...], preferred_element_type=jnp.float32)
            h = (t[:, :cout]
                 + jnp.dot(adj, t[:, cout:], preferred_element_type=jnp.float32)
                 + aff[0:1, :])
            return bn_relu(h, aff[1:2, :], aff[2:3, :])

        # ---- conv0 (cin tiny): concat [x | A@x] and one small MXU matmul ----
        x = x_ref[...]
        w0_ref, aff0_ref = next_params()
        agg0 = jnp.dot(adj, x, preferred_element_type=jnp.float32)
        aff0 = aff0_ref[...]
        h0 = (jnp.dot(jnp.concatenate([x, agg0], axis=-1), w0_ref[...],
                      preferred_element_type=jnp.float32) + aff0[0:1, :])
        cur = bn_relu(h0, aff0[1:2, :], aff0[2:3, :])

        # ---- dense blocks with feature slab + incremental aggregated slab ---
        for num_layers in block_config:
            nf = cur.shape[1]
            slab_ref[:, :nf] = cur
            aggs_ref[:, :nf] = jnp.dot(adj, cur, preferred_element_type=jnp.float32)
            off = nf
            for _ in range(num_layers):
                w1_ref, a1_ref = next_params()            # conv1: reuse cached A@prefix
                h1 = gcbn_stacked(slab_ref[:, :off], aggs_ref[:, :off], w1_ref, a1_ref)
                w2_ref, a2_ref = next_params()            # conv2: project-then-aggregate
                h2 = gcbn_proj(h1, w2_ref, a2_ref)
                slab_ref[:, off:off + growth] = h2        # in-place "concat"
                aggs_ref[:, off:off + growth] = jnp.dot(
                    adj, h2, preferred_element_type=jnp.float32)
                off += growth
            wt_ref, at_ref = next_params()                # transition: cached aggregate too
            cur = gcbn_stacked(slab_ref[:, :off], aggs_ref[:, :off], wt_ref, at_ref)

        # ---- global_mean_pool (pooling matrix) + Linear classifier ----------
        pooled = jnp.dot(pool_ref[...], cur, preferred_element_type=jnp.float32)
        o_ref[...] = (jnp.dot(pooled, clf_w_ref[...],
                              preferred_element_type=jnp.float32)
                      + clf_b_ref[...])

    return kernel


# --------------------------- parameter packing --------------------------------

def _pack_stacked(p):
    w = jnp.concatenate([p["w_root"], p["w_rel"]], axis=0)            # [2*cin, cout]
    aff = jnp.concatenate([p["b_rel"], p["gamma"], p["beta"]], axis=0)  # [3, cout]
    return w, aff


def _pack_proj(p):
    w = jnp.concatenate([p["w_root"], p["w_rel"]], axis=1)            # [cin, 2*cout]
    aff = jnp.concatenate([p["b_rel"], p["gamma"], p["beta"]], axis=0)
    return w, aff


def _flatten_params(params, block_config):
    arrays = []

    def add(pair):
        arrays.extend(pair)

    add(_pack_stacked(params["conv0"]))
    for i, num_layers in enumerate(block_config):
        for layer in params["block%d" % (i + 1)]:
            add(_pack_stacked(layer["conv1"]))
            add(_pack_proj(layer["conv2"]))
        add(_pack_stacked(params["transition%d" % (i + 1)]))
    arrays.extend([params["classifier"]["w"], params["classifier"]["b"]])
    return arrays


# ------------------------------- forward pass ---------------------------------

def graph_densenet_forward(params, adj, x, pool_mat,
                           block_config=BLOCK_CONFIG, growth=GROWTH):
    n = x.shape[0]
    g = pool_mat.shape[0]
    out_dim = params["classifier"]["w"].shape[1]
    arrays = _flatten_params(params, block_config)

    # widest dense-block slab (block input + L*growth), padded to a lane multiple
    nf = params["conv0"]["w_root"].shape[1]
    slab_max = 0
    for num_layers in block_config:
        width = nf + num_layers * growth
        slab_max = max(slab_max, width)
        nf = width // 2
    slab_pad = _round_up(slab_max, 128)

    kernel = _make_kernel(block_config, growth)
    vmem = pl.BlockSpec(memory_space=pltpu.MemorySpace.VMEM)
    n_inputs = 3 + len(arrays)

    return pl.pallas_call(
        kernel,
        out_shape=jax.ShapeDtypeStruct((g, out_dim), jnp.float32),
        in_specs=[vmem] * n_inputs,
        out_specs=vmem,
        scratch_shapes=[pltpu.VMEM((n, slab_pad), jnp.float32),   # feature slab
                        pltpu.VMEM((n, slab_pad), jnp.float32)],  # aggregated slab (A @ slab)
        compiler_params=pltpu.CompilerParams(vmem_limit_bytes=64 * 1024 * 1024),
    )(adj, x, pool_mat, *arrays)


# ----------------------------- parameter setup --------------------------------

def _init_gcbn(key, cin, cout):
    k1, k2, k3 = jax.random.split(key, 3)
    s = 1.0 / np.sqrt(cin)
    return {
        "w_root": jax.random.uniform(k1, (cin, cout), jnp.float32, -s, s),
        "w_rel": jax.random.uniform(k2, (cin, cout), jnp.float32, -s, s),
        "b_rel": jax.random.uniform(k3, (1, cout), jnp.float32, -s, s),
        "gamma": jnp.ones((1, cout), jnp.float32),
        "beta": jnp.zeros((1, cout), jnp.float32),
    }


def init_graph_densenet(key, num_input_features, out_dim, growth_rate=GROWTH,
                        block_config=BLOCK_CONFIG, bn_sizes=BN_SIZES):
    params = {}
    key, sub = jax.random.split(key)
    params["conv0"] = _init_gcbn(sub, num_input_features, 32)
    nf = 32
    for i, num_layers in enumerate(block_config):
        block = []
        for l in range(num_layers):
            key, k1, k2 = jax.random.split(key, 3)
            in_feat = nf + l * growth_rate
            inter = int(growth_rate * bn_sizes[i])
            block.append({"conv1": _init_gcbn(k1, in_feat, inter),
                          "conv2": _init_gcbn(k2, inter, growth_rate)})
        params["block%d" % (i + 1)] = block
        nf += int(num_layers * growth_rate)
        key, sub = jax.random.split(key)
        params["transition%d" % (i + 1)] = _init_gcbn(sub, nf, nf // 2)
        nf //= 2
    key, k1, k2 = jax.random.split(key, 3)
    s = 1.0 / np.sqrt(nf)
    params["classifier"] = {
        "w": jax.random.uniform(k1, (nf, out_dim), jnp.float32, -s, s),
        "b": jax.random.uniform(k2, (1, out_dim), jnp.float32, -s, s),
    }
    return params


# ----------------------------------- main --------------------------------------

if __name__ == "__main__":
    key = jax.random.PRNGKey(0)
    num_nodes, feat_dim, out_dim = 16, 4, 8
    nodes_per_graph = 8
    num_graphs = num_nodes // nodes_per_graph

    # Deterministic example batch-graph: two 8-node bidirectional rings.
    src, dst = [], []
    for gidx in range(num_graphs):
        base = gidx * nodes_per_graph
        for i in range(nodes_per_graph):
            a, b = base + i, base + (i + 1) % nodes_per_graph
            src += [a, b]
            dst += [b, a]
    edge_index = np.stack([np.asarray(src), np.asarray(dst)])       # [2, E]
    batch = np.repeat(np.arange(num_graphs), nodes_per_graph)       # [N]

    key, kx, kp = jax.random.split(key, 3)
    x = jax.random.normal(kx, (num_nodes, feat_dim), jnp.float32)

    # Glue: dense aggregation matrix A[dst, src] and mean-pool matrix P[g, n].
    adj = jnp.zeros((num_nodes, num_nodes), jnp.float32).at[
        edge_index[1], edge_index[0]].add(1.0)
    counts = jnp.zeros((num_graphs,), jnp.float32).at[jnp.asarray(batch)].add(1.0)
    pool_mat = ((jnp.arange(num_graphs)[:, None] == jnp.asarray(batch)[None, :])
                .astype(jnp.float32) / counts[:, None])

    params = init_graph_densenet(kp, feat_dim, out_dim)
    fwd = jax.jit(functools.partial(graph_densenet_forward, params))

    out = fwd(adj, x, pool_mat)
    jax.block_until_ready(out)
    assert out.shape == (num_graphs, out_dim)
    assert jnp.all(jnp.isfinite(out))
    print("KERNEL_OK")
</pallas_src>

<mosaic_0001>
module attributes {stable_mosaic.version = 11 : i64} {
  func.func @kernel(%arg0: memref<16x16xf32, #tpu.memory_space<vmem>>, %arg1: memref<16x4xf32, #tpu.memory_space<vmem>>, %arg2: memref<2x16xf32, #tpu.memory_space<vmem>>, %arg3: memref<8x32xf32, #tpu.memory_space<vmem>>, %arg4: memref<3x32xf32, #tpu.memory_space<vmem>>, %arg5: memref<64x64xf32, #tpu.memory_space<vmem>>, %arg6: memref<3x64xf32, #tpu.memory_space<vmem>>, %arg7: memref<64x64xf32, #tpu.memory_space<vmem>>, %arg8: memref<3x32xf32, #tpu.memory_space<vmem>>, %arg9: memref<128x64xf32, #tpu.memory_space<vmem>>, %arg10: memref<3x64xf32, #tpu.memory_space<vmem>>, %arg11: memref<64x64xf32, #tpu.memory_space<vmem>>, %arg12: memref<3x32xf32, #tpu.memory_space<vmem>>, %arg13: memref<192x64xf32, #tpu.memory_space<vmem>>, %arg14: memref<3x64xf32, #tpu.memory_space<vmem>>, %arg15: memref<64x64xf32, #tpu.memory_space<vmem>>, %arg16: memref<3x32xf32, #tpu.memory_space<vmem>>, %arg17: memref<256x64xf32, #tpu.memory_space<vmem>>, %arg18: memref<3x64xf32, #tpu.memory_space<vmem>>, %arg19: memref<128x96xf32, #tpu.memory_space<vmem>>, %arg20: memref<3x96xf32, #tpu.memory_space<vmem>>, %arg21: memref<96x64xf32, #tpu.memory_space<vmem>>, %arg22: memref<3x32xf32, #tpu.memory_space<vmem>>, %arg23: memref<192x96xf32, #tpu.memory_space<vmem>>, %arg24: memref<3x96xf32, #tpu.memory_space<vmem>>, %arg25: memref<96x64xf32, #tpu.memory_space<vmem>>, %arg26: memref<3x32xf32, #tpu.memory_space<vmem>>, %arg27: memref<256x96xf32, #tpu.memory_space<vmem>>, %arg28: memref<3x96xf32, #tpu.memory_space<vmem>>, %arg29: memref<96x64xf32, #tpu.memory_space<vmem>>, %arg30: memref<3x32xf32, #tpu.memory_space<vmem>>, %arg31: memref<320x80xf32, #tpu.memory_space<vmem>>, %arg32: memref<3x80xf32, #tpu.memory_space<vmem>>, %arg33: memref<160x128xf32, #tpu.memory_space<vmem>>, %arg34: memref<3x128xf32, #tpu.memory_space<vmem>>, %arg35: memref<128x64xf32, #tpu.memory_space<vmem>>, %arg36: memref<3x32xf32, #tpu.memory_space<vmem>>, %arg37: memref<224x128xf32, #tpu.memory_space<vmem>>, %arg38: memref<3x128xf32, #tpu.memory_space<vmem>>, %arg39: memref<128x64xf32, #tpu.memory_space<vmem>>, %arg40: memref<3x32xf32, #tpu.memory_space<vmem>>, %arg41: memref<288x128xf32, #tpu.memory_space<vmem>>, %arg42: memref<3x128xf32, #tpu.memory_space<vmem>>, %arg43: memref<128x64xf32, #tpu.memory_space<vmem>>, %arg44: memref<3x32xf32, #tpu.memory_space<vmem>>, %arg45: memref<352x88xf32, #tpu.memory_space<vmem>>, %arg46: memref<3x88xf32, #tpu.memory_space<vmem>>, %arg47: memref<176x128xf32, #tpu.memory_space<vmem>>, %arg48: memref<3x128xf32, #tpu.memory_space<vmem>>, %arg49: memref<128x64xf32, #tpu.memory_space<vmem>>, %arg50: memref<3x32xf32, #tpu.memory_space<vmem>>, %arg51: memref<240x128xf32, #tpu.memory_space<vmem>>, %arg52: memref<3x128xf32, #tpu.memory_space<vmem>>, %arg53: memref<128x64xf32, #tpu.memory_space<vmem>>, %arg54: memref<3x32xf32, #tpu.memory_space<vmem>>, %arg55: memref<304x128xf32, #tpu.memory_space<vmem>>, %arg56: memref<3x128xf32, #tpu.memory_space<vmem>>, %arg57: memref<128x64xf32, #tpu.memory_space<vmem>>, %arg58: memref<3x32xf32, #tpu.memory_space<vmem>>, %arg59: memref<368x92xf32, #tpu.memory_space<vmem>>, %arg60: memref<3x92xf32, #tpu.memory_space<vmem>>, %arg61: memref<92x8xf32, #tpu.memory_space<vmem>>, %arg62: memref<1x8xf32, #tpu.memory_space<vmem>>, %arg63: memref<2x8xf32, #tpu.memory_space<vmem>>, %arg64: memref<16x256xf32, #tpu.memory_space<vmem>>, %arg65: memref<16x256xf32, #tpu.memory_space<vmem>>) attributes {dimension_semantics = [], scalar_prefetch = 0 : i64, scratch_operands = 2 : i64, tpu.core_type = #tpu.core_type<tc>} {
    %c0 = arith.constant 0 : index
    %c0_0 = arith.constant 0 : index
    %0 = vector.load %arg0[%c0, %c0_0] : memref<16x16xf32, #tpu.memory_space<vmem>>, vector<16x16xf32>
    %c0_1 = arith.constant 0 : index
    %c0_2 = arith.constant 0 : index
    %1 = vector.load %arg1[%c0_1, %c0_2] : memref<16x4xf32, #tpu.memory_space<vmem>>, vector<16x4xf32>
    %cst = arith.constant dense<0.000000e+00> : vector<16x4xf32>
    %2 = tpu.matmul %0, %1, %cst {dimension_numbers = #tpu.dot_dimension_numbers<[1], [0], [0], [1], [0, 0, 1, 1], [], []>} : vector<16x16xf32>, vector<16x4xf32>, vector<16x4xf32> -> vector<16x4xf32>
    %c0_3 = arith.constant 0 : index
    %c0_4 = arith.constant 0 : index
    %3 = vector.load %arg4[%c0_3, %c0_4] : memref<3x32xf32, #tpu.memory_space<vmem>>, vector<3x32xf32>
    %4 = tpu.concatenate %1, %2 in 1 : vector<16x4xf32>, vector<16x4xf32> -> vector<16x8xf32>
    %c0_5 = arith.constant 0 : index
    %c0_6 = arith.constant 0 : index
    %5 = vector.load %arg3[%c0_5, %c0_6] : memref<8x32xf32, #tpu.memory_space<vmem>>, vector<8x32xf32>
    %cst_7 = arith.constant dense<0.000000e+00> : vector<16x32xf32>
    %6 = tpu.matmul %4, %5, %cst_7 {dimension_numbers = #tpu.dot_dimension_numbers<[1], [0], [0], [1], [0, 0, 1, 1], [], []>} : vector<16x8xf32>, vector<8x32xf32>, vector<16x32xf32> -> vector<16x32xf32>
    %7 = vector.extract_strided_slice %3 {offsets = [0, 0], sizes = [1, 32], strides = [1, 1]} : vector<3x32xf32> to vector<1x32xf32>
    %8 = vector.broadcast %7 : vector<1x32xf32> to vector<16x32xf32>
    %9 = arith.addf %6, %8 : vector<16x32xf32>
    %10 = vector.extract_strided_slice %3 {offsets = [1, 0], sizes = [1, 32], strides = [1, 1]} : vector<3x32xf32> to vector<1x32xf32>
    %11 = vector.extract_strided_slice %3 {offsets = [2, 0], sizes = [1, 32], strides = [1, 1]} : vector<3x32xf32> to vector<1x32xf32>
    %cst_8 = arith.constant dense<0.000000e+00> : vector<32xf32>
    %12 = vector.multi_reduction <add>, %9, %cst_8 [0] : vector<16x32xf32> to vector<32xf32>
    %13 = vector.shape_cast %12 : vector<32xf32> to vector<1x32xf32>
    %cst_9 = arith.constant 1.600000e+01 : f32
    %14 = vector.broadcast %cst_9 : f32 to vector<1x32xf32>
    %15 = arith.divf %13, %14 : vector<1x32xf32>
    %16 = vector.broadcast %15 : vector<1x32xf32> to vector<16x32xf32>
    %17 = arith.subf %9, %16 : vector<16x32xf32>
    %18 = arith.mulf %17, %17 : vector<16x32xf32>
    %cst_10 = arith.constant dense<0.000000e+00> : vector<32xf32>
    %19 = vector.multi_reduction <add>, %18, %cst_10 [0] : vector<16x32xf32> to vector<32xf32>
    %20 = vector.shape_cast %19 : vector<32xf32> to vector<1x32xf32>
    %cst_11 = arith.constant 1.600000e+01 : f32
    %21 = vector.broadcast %cst_11 : f32 to vector<1x32xf32>
    %22 = arith.divf %20, %21 : vector<1x32xf32>
    %cst_12 = arith.constant 9.99999974E-6 : f32
    %23 = vector.broadcast %cst_12 : f32 to vector<1x32xf32>
    %24 = arith.addf %22, %23 : vector<1x32xf32>
    %25 = math.rsqrt %24 : vector<1x32xf32>
    %26 = arith.mulf %10, %25 : vector<1x32xf32>
    %27 = arith.mulf %15, %26 : vector<1x32xf32>
    %28 = arith.subf %11, %27 : vector<1x32xf32>
    %29 = vector.broadcast %26 : vector<1x32xf32> to vector<16x32xf32>
    %30 = arith.mulf %9, %29 : vector<16x32xf32>
    %31 = vector.broadcast %28 : vector<1x32xf32> to vector<16x32xf32>
    %32 = arith.addf %30, %31 : vector<16x32xf32>
    %cst_13 = arith.constant 0.000000e+00 : f32
    %33 = vector.broadcast %cst_13 : f32 to vector<16x32xf32>
    %34 = arith.maximumf %32, %33 : vector<16x32xf32>
    %c0_14 = arith.constant 0 : index
    %c0_15 = arith.constant 0 : index
    %35 = vector.load %arg64[%c0_14, %c0_15] : memref<16x256xf32, #tpu.memory_space<vmem>>, vector<16x32xf32>
    tpu.vector_store %arg64[%c0_14, %c0_15], %34 {strides = array<i32>} : memref<16x256xf32, #tpu.memory_space<vmem>>, vector<16x32xf32>,
    %cst_16 = arith.constant dense<0.000000e+00> : vector<16x32xf32>
    %36 = tpu.matmul %0, %34, %cst_16 {dimension_numbers = #tpu.dot_dimension_numbers<[1], [0], [0], [1], [0, 0, 1, 1], [], []>} : vector<16x16xf32>, vector<16x32xf32>, vector<16x32xf32> -> vector<16x32xf32>
    %c0_17 = arith.constant 0 : index
    %c0_18 = arith.constant 0 : index
    %37 = vector.load %arg65[%c0_17, %c0_18] : memref<16x256xf32, #tpu.memory_space<vmem>>, vector<16x32xf32>
    tpu.vector_store %arg65[%c0_17, %c0_18], %36 {strides = array<i32>} : memref<16x256xf32, #tpu.memory_space<vmem>>, vector<16x32xf32>,
    %c0_19 = arith.constant 0 : index
    %c0_20 = arith.constant 0 : index
    %38 = vector.load %arg64[%c0_19, %c0_20] : memref<16x256xf32, #tpu.memory_space<vmem>>, vector<16x32xf32>
    %c0_21 = arith.constant 0 : index
    %c0_22 = arith.constant 0 : index
    %39 = vector.load %arg65[%c0_21, %c0_22] : memref<16x256xf32, #tpu.memory_space<vmem>>, vector<16x32xf32>
    %c0_23 = arith.constant 0 : index
    %c0_24 = arith.constant 0 : index
    %40 = vector.load %arg6[%c0_23, %c0_24] : memref<3x64xf32, #tpu.memory_space<vmem>>, vector<3x64xf32>
    %c0_25 = arith.constant 0 : index
    %c0_26 = arith.constant 0 : index
    %41 = vector.load %arg5[%c0_25, %c0_26] : memref<64x64xf32, #tpu.memory_space<vmem>>, vector<32x64xf32>
    %cst_27 = arith.constant dense<0.000000e+00> : vector<16x64xf32>
    %42 = tpu.matmul %38, %41, %cst_27 {dimension_numbers = #tpu.dot_dimension_numbers<[1], [0], [0], [1], [0, 0, 1, 1], [], []>} : vector<16x32xf32>, vector<32x64xf32>, vector<16x64xf32> -> vector<16x64xf32>
    %c32 = arith.constant 32 : index
    %c0_28 = arith.constant 0 : index
    %43 = vector.load %arg5[%c32, %c0_28] : memref<64x64xf32, #tpu.memory_space<vmem>>, vector<32x64xf32>
    %cst_29 = arith.constant dense<0.000000e+00> : vector<16x64xf32>
    %44 = tpu.matmul %39, %43, %cst_29 {dimension_numbers = #tpu.dot_dimension_numbers<[1], [0], [0], [1], [0, 0, 1, 1], [], []>} : vector<16x32xf32>, vector<32x64xf32>, vector<16x64xf32> -> vector<16x64xf32>
    %45 = arith.addf %42, %44 : vector<16x64xf32>
    %46 = vector.extract_strided_slice %40 {offsets = [0, 0], sizes = [1, 64], strides = [1, 1]} : vector<3x64xf32> to vector<1x64xf32>
    %47 = vector.broadcast %46 : vector<1x64xf32> to vector<16x64xf32>
    %48 = arith.addf %45, %47 : vector<16x64xf32>
    %49 = vector.extract_strided_slice %40 {offsets = [1, 0], sizes = [1, 64], strides = [1, 1]} : vector<3x64xf32> to vector<1x64xf32>
    %50 = vector.extract_strided_slice %40 {offsets = [2, 0], sizes = [1, 64], strides = [1, 1]} : vector<3x64xf32> to vector<1x64xf32>
    %cst_30 = arith.constant dense<0.000000e+00> : vector<64xf32>
    %51 = vector.multi_reduction <add>, %48, %cst_30 [0] : vector<16x64xf32> to vector<64xf32>
    %52 = vector.shape_cast %51 : vector<64xf32> to vector<1x64xf32>
    %cst_31 = arith.constant 1.600000e+01 : f32
    %53 = vector.broadcast %cst_31 : f32 to vector<1x64xf32>
    %54 = arith.divf %52, %53 : vector<1x64xf32>
    %55 = vector.broadcast %54 : vector<1x64xf32> to vector<16x64xf32>
    %56 = arith.subf %48, %55 : vector<16x64xf32>
    %57 = arith.mulf %56, %56 : vector<16x64xf32>
    %cst_32 = arith.constant dense<0.000000e+00> : vector<64xf32>
    %58 = vector.multi_reduction <add>, %57, %cst_32 [0] : vector<16x64xf32> to vector<64xf32>
    %59 = vector.shape_cast %58 : vector<64xf32> to vector<1x64xf32>
    %cst_33 = arith.constant 1.600000e+01 : f32
    %60 = vector.broadcast %cst_33 : f32 to vector<1x64xf32>
    %61 = arith.divf %59, %60 : vector<1x64xf32>
    %cst_34 = arith.constant 9.99999974E-6 : f32
    %62 = vector.broadcast %cst_34 : f32 to vector<1x64xf32>
    %63 = arith.addf %61, %62 : vector<1x64xf32>
    %64 = math.rsqrt %63 : vector<1x64xf32>
    %65 = arith.mulf %49, %64 : vector<1x64xf32>
    %66 = arith.mulf %54, %65 : vector<1x64xf32>
    %67 = arith.subf %50, %66 : vector<1x64xf32>
    %68 = vector.broadcast %65 : vector<1x64xf32> to vector<16x64xf32>
    %69 = arith.mulf %48, %68 : vector<16x64xf32>
    %70 = vector.broadcast %67 : vector<1x64xf32> to vector<16x64xf32>
    %71 = arith.addf %69, %70 : vector<16x64xf32>
    %cst_35 = arith.constant 0.000000e+00 : f32
    %72 = vector.broadcast %cst_35 : f32 to vector<16x64xf32>
    %73 = arith.maximumf %71, %72 : vector<16x64xf32>
    %c0_36 = arith.constant 0 : index
    %c0_37 = arith.constant 0 : index
    %74 = vector.load %arg8[%c0_36, %c0_37] : memref<3x32xf32, #tpu.memory_space<vmem>>, vector<3x32xf32>
    %c0_38 = arith.constant 0 : index
    %c0_39 = arith.constant 0 : index
    %75 = vector.load %arg7[%c0_38, %c0_39] : memref<64x64xf32, #tpu.memory_space<vmem>>, vector<64x64xf32>
    %cst_40 = arith.constant dense<0.000000e+00> : vector<16x64xf32>
    %76 = tpu.matmul %73, %75, %cst_40 {dimension_numbers = #tpu.dot_dimension_numbers<[1], [0], [0], [1], [0, 0, 1, 1], [], []>} : vector<16x64xf32>, vector<64x64xf32>, vector<16x64xf32> -> vector<16x64xf32>
    %77 = vector.extract_strided_slice %76 {offsets = [0, 0], sizes = [16, 32], strides = [1, 1]} : vector<16x64xf32> to vector<16x32xf32>
    %78 = vector.extract_strided_slice %76 {offsets = [0, 32], sizes = [16, 32], strides = [1, 1]} : vector<16x64xf32> to vector<16x32xf32>
    %cst_41 = arith.constant dense<0.000000e+00> : vector<16x32xf32>
    %79 = tpu.matmul %0, %78, %cst_41 {dimension_numbers = #tpu.dot_dimension_numbers<[1], [0], [0], [1], [0, 0, 1, 1], [], []>} : vector<16x16xf32>, vector<16x32xf32>, vector<16x32xf32> -> vector<16x32xf32>
    %80 = arith.addf %77, %79 : vector<16x32xf32>
    %81 = vector.extract_strided_slice %74 {offsets = [0, 0], sizes = [1, 32], strides = [1, 1]} : vector<3x32xf32> to vector<1x32xf32>
    %82 = vector.broadcast %81 : vector<1x32xf32> to vector<16x32xf32>
    %83 = arith.addf %80, %82 : vector<16x32xf32>
    %84 = vector.extract_strided_slice %74 {offsets = [1, 0], sizes = [1, 32], strides = [1, 1]} : vector<3x32xf32> to vector<1x32xf32>
    %85 = vector.extract_strided_slice %74 {offsets = [2, 0], sizes = [1, 32], strides = [1, 1]} : vector<3x32xf32> to vector<1x32xf32>
    %cst_42 = arith.constant dense<0.000000e+00> : vector<32xf32>
    %86 = vector.multi_reduction <add>, %83, %cst_42 [0] : vector<16x32xf32> to vector<32xf32>
    %87 = vector.shape_cast %86 : vector<32xf32> to vector<1x32xf32>
    %cst_43 = arith.constant 1.600000e+01 : f32
    %88 = vector.broadcast %cst_43 : f32 to vector<1x32xf32>
    %89 = arith.divf %87, %88 : vector<1x32xf32>
    %90 = vector.broadcast %89 : vector<1x32xf32> to vector<16x32xf32>
    %91 = arith.subf %83, %90 : vector<16x32xf32>
    %92 = arith.mulf %91, %91 : vector<16x32xf32>
    %cst_44 = arith.constant dense<0.000000e+00> : vector<32xf32>
    %93 = vector.multi_reduction <add>, %92, %cst_44 [0] : vector<16x32xf32> to vector<32xf32>
    %94 = vector.shape_cast %93 : vector<32xf32> to vector<1x32xf32>
    %cst_45 = arith.constant 1.600000e+01 : f32
    %95 = vector.broadcast %cst_45 : f32 to vector<1x32xf32>
    %96 = arith.divf %94, %95 : vector<1x32xf32>
    %cst_46 = arith.constant 9.99999974E-6 : f32
    %97 = vector.broadcast %cst_46 : f32 to vector<1x32xf32>
    %98 = arith.addf %96, %97 : vector<1x32xf32>
    %99 = math.rsqrt %98 : vector<1x32xf32>
    %100 = arith.mulf %84, %99 : vector<1x32xf32>
    %101 = arith.mulf %89, %100 : vector<1x32xf32>
    %102 = arith.subf %85, %101 : vector<1x32xf32>
    %103 = vector.broadcast %100 : vector<1x32xf32> to vector<16x32xf32>
    %104 = arith.mulf %83, %103 : vector<16x32xf32>
    %105 = vector.broadcast %102 : vector<1x32xf32> to vector<16x32xf32>
    %106 = arith.addf %104, %105 : vector<16x32xf32>
    %cst_47 = arith.constant 0.000000e+00 : f32
    %107 = vector.broadcast %cst_47 : f32 to vector<16x32xf32>
    %108 = arith.maximumf %106, %107 : vector<16x32xf32>
    %c0_48 = arith.constant 0 : index
    %c32_49 = arith.constant 32 : index
    %109 = vector.load %arg64[%c0_48, %c32_49] : memref<16x256xf32, #tpu.memory_space<vmem>>, vector<16x32xf32>
    tpu.vector_store %arg64[%c0_48, %c32_49], %108 {strides = array<i32>} : memref<16x256xf32, #tpu.memory_space<vmem>>, vector<16x32xf32>,
    %cst_50 = arith.constant dense<0.000000e+00> : vector<16x32xf32>
    %110 = tpu.matmul %0, %108, %cst_50 {dimension_numbers = #tpu.dot_dimension_numbers<[1], [0], [0], [1], [0, 0, 1, 1], [], []>} : vector<16x16xf32>, vector<16x32xf32>, vector<16x32xf32> -> vector<16x32xf32>
    %c0_51 = arith.constant 0 : index
    %c32_52 = arith.constant 32 : index
    %111 = vector.load %arg65[%c0_51, %c32_52] : memref<16x256xf32, #tpu.memory_space<vmem>>, vector<16x32xf32>
    tpu.vector_store %arg65[%c0_51, %c32_52], %110 {strides = array<i32>} : memref<16x256xf32, #tpu.memory_space<vmem>>, vector<16x32xf32>,
    %c0_53 = arith.constant 0 : index
    %c0_54 = arith.constant 0 : index
    %112 = vector.load %arg64[%c0_53, %c0_54] : memref<16x256xf32, #tpu.memory_space<vmem>>, vector<16x64xf32>
    %c0_55 = arith.constant 0 : index
    %c0_56 = arith.constant 0 : index
    %113 = vector.load %arg65[%c0_55, %c0_56] : memref<16x256xf32, #tpu.memory_space<vmem>>, vector<16x64xf32>
    %c0_57 = arith.constant 0 : index
    %c0_58 = arith.constant 0 : index
    %114 = vector.load %arg10[%c0_57, %c0_58] : memref<3x64xf32, #tpu.memory_space<vmem>>, vector<3x64xf32>
    %c0_59 = arith.constant 0 : index
    %c0_60 = arith.constant 0 : index
    %115 = vector.load %arg9[%c0_59, %c0_60] : memref<128x64xf32, #tpu.memory_space<vmem>>, vector<64x64xf32>
    %cst_61 = arith.constant dense<0.000000e+00> : vector<16x64xf32>
    %116 = tpu.matmul %112, %115, %cst_61 {dimension_numbers = #tpu.dot_dimension_numbers<[1], [0], [0], [1], [0, 0, 1, 1], [], []>} : vector<16x64xf32>, vector<64x64xf32>, vector<16x64xf32> -> vector<16x64xf32>
    %c64 = arith.constant 64 : index
    %c0_62 = arith.constant 0 : index
    %117 = vector.load %arg9[%c64, %c0_62] : memref<128x64xf32, #tpu.memory_space<vmem>>, vector<64x64xf32>
    %cst_63 = arith.constant dense<0.000000e+00> : vector<16x64xf32>
    %118 = tpu.matmul %113, %117, %cst_63 {dimension_numbers = #tpu.dot_dimension_numbers<[1], [0], [0], [1], [0, 0, 1, 1], [], []>} : vector<16x64xf32>, vector<64x64xf32>, vector<16x64xf32> -> vector<16x64xf32>
    %119 = arith.addf %116, %118 : vector<16x64xf32>
    %120 = vector.extract_strided_slice %114 {offsets = [0, 0], sizes = [1, 64], strides = [1, 1]} : vector<3x64xf32> to vector<1x64xf32>
    %121 = vector.broadcast %120 : vector<1x64xf32> to vector<16x64xf32>
    %122 = arith.addf %119, %121 : vector<16x64xf32>
    %123 = vector.extract_strided_slice %114 {offsets = [1, 0], sizes = [1, 64], strides = [1, 1]} : vector<3x64xf32> to vector<1x64xf32>
    %124 = vector.extract_strided_slice %114 {offsets = [2, 0], sizes = [1, 64], strides = [1, 1]} : vector<3x64xf32> to vector<1x64xf32>
    %cst_64 = arith.constant dense<0.000000e+00> : vector<64xf32>
    %125 = vector.multi_reduction <add>, %122, %cst_64 [0] : vector<16x64xf32> to vector<64xf32>
    %126 = vector.shape_cast %125 : vector<64xf32> to vector<1x64xf32>
    %cst_65 = arith.constant 1.600000e+01 : f32
    %127 = vector.broadcast %cst_65 : f32 to vector<1x64xf32>
    %128 = arith.divf %126, %127 : vector<1x64xf32>
    %129 = vector.broadcast %128 : vector<1x64xf32> to vector<16x64xf32>
    %130 = arith.subf %122, %129 : vector<16x64xf32>
    %131 = arith.mulf %130, %130 : vector<16x64xf32>
    %cst_66 = arith.constant dense<0.000000e+00> : vector<64xf32>
    %132 = vector.multi_reduction <add>, %131, %cst_66 [0] : vector<16x64xf32> to vector<64xf32>
    %133 = vector.shape_cast %132 : vector<64xf32> to vector<1x64xf32>
    %cst_67 = arith.constant 1.600000e+01 : f32
    %134 = vector.broadcast %cst_67 : f32 to vector<1x64xf32>
    %135 = arith.divf %133, %134 : vector<1x64xf32>
    %cst_68 = arith.constant 9.99999974E-6 : f32
    %136 = vector.broadcast %cst_68 : f32 to vector<1x64xf32>
    %137 = arith.addf %135, %136 : vector<1x64xf32>
    %138 = math.rsqrt %137 : vector<1x64xf32>
    %139 = arith.mulf %123, %138 : vector<1x64xf32>
    %140 = arith.mulf %128, %139 : vector<1x64xf32>
    %141 = arith.subf %124, %140 : vector<1x64xf32>
    %142 = vector.broadcast %139 : vector<1x64xf32> to vector<16x64xf32>
    %143 = arith.mulf %122, %142 : vector<16x64xf32>
    %144 = vector.broadcast %141 : vector<1x64xf32> to vector<16x64xf32>
    %145 = arith.addf %143, %144 : vector<16x64xf32>
    %cst_69 = arith.constant 0.000000e+00 : f32
    %146 = vector.broadcast %cst_69 : f32 to vector<16x64xf32>
    %147 = arith.maximumf %145, %146 : vector<16x64xf32>
    %c0_70 = arith.constant 0 : index
    %c0_71 = arith.constant 0 : index
    %148 = vector.load %arg12[%c0_70, %c0_71] : memref<3x32xf32, #tpu.memory_space<vmem>>, vector<3x32xf32>
    %c0_72 = arith.constant 0 : index
    %c0_73 = arith.constant 0 : index
    %149 = vector.load %arg11[%c0_72, %c0_73] : memref<64x64xf32, #tpu.memory_space<vmem>>, vector<64x64xf32>
    %cst_74 = arith.constant dense<0.000000e+00> : vector<16x64xf32>
    %150 = tpu.matmul %147, %149, %cst_74 {dimension_numbers = #tpu.dot_dimension_numbers<[1], [0], [0], [1], [0, 0, 1, 1], [], []>} : vector<16x64xf32>, vector<64x64xf32>, vector<16x64xf32> -> vector<16x64xf32>
    %151 = vector.extract_strided_slice %150 {offsets = [0, 0], sizes = [16, 32], strides = [1, 1]} : vector<16x64xf32> to vector<16x32xf32>
    %152 = vector.extract_strided_slice %150 {offsets = [0, 32], sizes = [16, 32], strides = [1, 1]} : vector<16x64xf32> to vector<16x32xf32>
    %cst_75 = arith.constant dense<0.000000e+00> : vector<16x32xf32>
    %153 = tpu.matmul %0, %152, %cst_75 {dimension_numbers = #tpu.dot_dimension_numbers<[1], [0], [0], [1], [0, 0, 1, 1], [], []>} : vector<16x16xf32>, vector<16x32xf32>, vector<16x32xf32> -> vector<16x32xf32>
    %154 = arith.addf %151, %153 : vector<16x32xf32>
    %155 = vector.extract_strided_slice %148 {offsets = [0, 0], sizes = [1, 32], strides = [1, 1]} : vector<3x32xf32> to vector<1x32xf32>
    %156 = vector.broadcast %155 : vector<1x32xf32> to vector<16x32xf32>
    %157 = arith.addf %154, %156 : vector<16x32xf32>
    %158 = vector.extract_strided_slice %148 {offsets = [1, 0], sizes = [1, 32], strides = [1, 1]} : vector<3x32xf32> to vector<1x32xf32>
    %159 = vector.extract_strided_slice %148 {offsets = [2, 0], sizes = [1, 32], strides = [1, 1]} : vector<3x32xf32> to vector<1x32xf32>
    %cst_76 = arith.constant dense<0.000000e+00> : vector<32xf32>
    %160 = vector.multi_reduction <add>, %157, %cst_76 [0] : vector<16x32xf32> to vector<32xf32>
    %161 = vector.shape_cast %160 : vector<32xf32> to vector<1x32xf32>
    %cst_77 = arith.constant 1.600000e+01 : f32
    %162 = vector.broadcast %cst_77 : f32 to vector<1x32xf32>
    %163 = arith.divf %161, %162 : vector<1x32xf32>
    %164 = vector.broadcast %163 : vector<1x32xf32> to vector<16x32xf32>
    %165 = arith.subf %157, %164 : vector<16x32xf32>
    %166 = arith.mulf %165, %165 : vector<16x32xf32>
    %cst_78 = arith.constant dense<0.000000e+00> : vector<32xf32>
    %167 = vector.multi_reduction <add>, %166, %cst_78 [0] : vector<16x32xf32> to vector<32xf32>
    %168 = vector.shape_cast %167 : vector<32xf32> to vector<1x32xf32>
    %cst_79 = arith.constant 1.600000e+01 : f32
    %169 = vector.broadcast %cst_79 : f32 to vector<1x32xf32>
    %170 = arith.divf %168, %169 : vector<1x32xf32>
    %cst_80 = arith.constant 9.99999974E-6 : f32
    %171 = vector.broadcast %cst_80 : f32 to vector<1x32xf32>
    %172 = arith.addf %170, %171 : vector<1x32xf32>
    %173 = math.rsqrt %172 : vector<1x32xf32>
    %174 = arith.mulf %158, %173 : vector<1x32xf32>
    %175 = arith.mulf %163, %174 : vector<1x32xf32>
    %176 = arith.subf %159, %175 : vector<1x32xf32>
    %177 = vector.broadcast %174 : vector<1x32xf32> to vector<16x32xf32>
    %178 = arith.mulf %157, %177 : vector<16x32xf32>
    %179 = vector.broadcast %176 : vector<1x32xf32> to vector<16x32xf32>
    %180 = arith.addf %178, %179 : vector<16x32xf32>
    %cst_81 = arith.constant 0.000000e+00 : f32
    %181 = vector.broadcast %cst_81 : f32 to vector<16x32xf32>
    %182 = arith.maximumf %180, %181 : vector<16x32xf32>
    %c0_82 = arith.constant 0 : index
    %c64_83 = arith.constant 64 : index
    %183 = vector.load %arg64[%c0_82, %c64_83] : memref<16x256xf32, #tpu.memory_space<vmem>>, vector<16x32xf32>
    tpu.vector_store %arg64[%c0_82, %c64_83], %182 {strides = array<i32>} : memref<16x256xf32, #tpu.memory_space<vmem>>, vector<16x32xf32>,
    %cst_84 = arith.constant dense<0.000000e+00> : vector<16x32xf32>
    %184 = tpu.matmul %0, %182, %cst_84 {dimension_numbers = #tpu.dot_dimension_numbers<[1], [0], [0], [1], [0, 0, 1, 1], [], []>} : vector<16x16xf32>, vector<16x32xf32>, vector<16x32xf32> -> vector<16x32xf32>
    %c0_85 = arith.constant 0 : index
    %c64_86 = arith.constant 64 : index
    %185 = vector.load %arg65[%c0_85, %c64_86] : memref<16x256xf32, #tpu.memory_space<vmem>>, vector<16x32xf32>
    tpu.vector_store %arg65[%c0_85, %c64_86], %184 {strides = array<i32>} : memref<16x256xf32, #tpu.memory_space<vmem>>, vector<16x32xf32>,
    %c0_87 = arith.constant 0 : index
    %c0_88 = arith.constant 0 : index
    %186 = vector.load %arg64[%c0_87, %c0_88] : memref<16x256xf32, #tpu.memory_space<vmem>>, vector<16x96xf32>
    %c0_89 = arith.constant 0 : index
    %c0_90 = arith.constant 0 : index
    %187 = vector.load %arg65[%c0_89, %c0_90] : memref<16x256xf32, #tpu.memory_space<vmem>>, vector<16x96xf32>
    %c0_91 = arith.constant 0 : index
    %c0_92 = arith.constant 0 : index
    %188 = vector.load %arg14[%c0_91, %c0_92] : memref<3x64xf32, #tpu.memory_space<vmem>>, vector<3x64xf32>
    %c0_93 = arith.constant 0 : index
    %c0_94 = arith.constant 0 : index
    %189 = vector.load %arg13[%c0_93, %c0_94] : memref<192x64xf32, #tpu.memory_space<vmem>>, vector<96x64xf32>
    %cst_95 = arith.constant dense<0.000000e+00> : vector<16x64xf32>
    %190 = tpu.matmul %186, %189, %cst_95 {dimension_numbers = #tpu.dot_dimension_numbers<[1], [0], [0], [1], [0, 0, 1, 1], [], []>} : vector<16x96xf32>, vector<96x64xf32>, vector<16x64xf32> -> vector<16x64xf32>
    %c96 = arith.constant 96 : index
    %c0_96 = arith.constant 0 : index
    %191 = vector.load %arg13[%c96, %c0_96] : memref<192x64xf32, #tpu.memory_space<vmem>>, vector<96x64xf32>
    %cst_97 = arith.constant dense<0.000000e+00> : vector<16x64xf32>
    %192 = tpu.matmul %187, %191, %cst_97 {dimension_numbers = #tpu.dot_dimension_numbers<[1], [0], [0], [1], [0, 0, 1, 1], [], []>} : vector<16x96xf32>, vector<96x64xf32>, vector<16x64xf32> -> vector<16x64xf32>
    %193 = arith.addf %190, %192 : vector<16x64xf32>
    %194 = vector.extract_strided_slice %188 {offsets = [0, 0], sizes = [1, 64], strides = [1, 1]} : vector<3x64xf32> to vector<1x64xf32>
    %195 = vector.broadcast %194 : vector<1x64xf32> to vector<16x64xf32>
    %196 = arith.addf %193, %195 : vector<16x64xf32>
    %197 = vector.extract_strided_slice %188 {offsets = [1, 0], sizes = [1, 64], strides = [1, 1]} : vector<3x64xf32> to vector<1x64xf32>
    %198 = vector.extract_strided_slice %188 {offsets = [2, 0], sizes = [1, 64], strides = [1, 1]} : vector<3x64xf32> to vector<1x64xf32>
    %cst_98 = arith.constant dense<0.000000e+00> : vector<64xf32>
    %199 = vector.multi_reduction <add>, %196, %cst_98 [0] : vector<16x64xf32> to vector<64xf32>
    %200 = vector.shape_cast %199 : vector<64xf32> to vector<1x64xf32>
    %cst_99 = arith.constant 1.600000e+01 : f32
    %201 = vector.broadcast %cst_99 : f32 to vector<1x64xf32>
    %202 = arith.divf %200, %201 : vector<1x64xf32>
    %203 = vector.broadcast %202 : vector<1x64xf32> to vector<16x64xf32>
    %204 = arith.subf %196, %203 : vector<16x64xf32>
    %205 = arith.mulf %204, %204 : vector<16x64xf32>
    %cst_100 = arith.constant dense<0.000000e+00> : vector<64xf32>
    %206 = vector.multi_reduction <add>, %205, %cst_100 [0] : vector<16x64xf32> to vector<64xf32>
    %207 = vector.shape_cast %206 : vector<64xf32> to vector<1x64xf32>
    %cst_101 = arith.constant 1.600000e+01 : f32
    %208 = vector.broadcast %cst_101 : f32 to vector<1x64xf32>
    %209 = arith.divf %207, %208 : vector<1x64xf32>
    %cst_102 = arith.constant 9.99999974E-6 : f32
    %210 = vector.broadcast %cst_102 : f32 to vector<1x64xf32>
    %211 = arith.addf %209, %210 : vector<1x64xf32>
    %212 = math.rsqrt %211 : vector<1x64xf32>
    %213 = arith.mulf %197, %212 : vector<1x64xf32>
    %214 = arith.mulf %202, %213 : vector<1x64xf32>
    %215 = arith.subf %198, %214 : vector<1x64xf32>
    %216 = vector.broadcast %213 : vector<1x64xf32> to vector<16x64xf32>
    %217 = arith.mulf %196, %216 : vector<16x64xf32>
    %218 = vector.broadcast %215 : vector<1x64xf32> to vector<16x64xf32>
    %219 = arith.addf %217, %218 : vector<16x64xf32>
    %cst_103 = arith.constant 0.000000e+00 : f32
    %220 = vector.broadcast %cst_103 : f32 to vector<16x64xf32>
    %221 = arith.maximumf %219, %220 : vector<16x64xf32>
    %c0_104 = arith.constant 0 : index
    %c0_105 = arith.constant 0 : index
    %222 = vector.load %arg16[%c0_104, %c0_105] : memref<3x32xf32, #tpu.memory_space<vmem>>, vector<3x32xf32>
    %c0_106 = arith.constant 0 : index
    %c0_107 = arith.constant 0 : index
    %223 = vector.load %arg15[%c0_106, %c0_107] : memref<64x64xf32, #tpu.memory_space<vmem>>, vector<64x64xf32>
    %cst_108 = arith.constant dense<0.000000e+00> : vector<16x64xf32>
    %224 = tpu.matmul %221, %223, %cst_108 {dimension_numbers = #tpu.dot_dimension_numbers<[1], [0], [0], [1], [0, 0, 1, 1], [], []>} : vector<16x64xf32>, vector<64x64xf32>, vector<16x64xf32> -> vector<16x64xf32>
    %225 = vector.extract_strided_slice %224 {offsets = [0, 0], sizes = [16, 32], strides = [1, 1]} : vector<16x64xf32> to vector<16x32xf32>
    %226 = vector.extract_strided_slice %224 {offsets = [0, 32], sizes = [16, 32], strides = [1, 1]} : vector<16x64xf32> to vector<16x32xf32>
    %cst_109 = arith.constant dense<0.000000e+00> : vector<16x32xf32>
    %227 = tpu.matmul %0, %226, %cst_109 {dimension_numbers = #tpu.dot_dimension_numbers<[1], [0], [0], [1], [0, 0, 1, 1], [], []>} : vector<16x16xf32>, vector<16x32xf32>, vector<16x32xf32> -> vector<16x32xf32>
    %228 = arith.addf %225, %227 : vector<16x32xf32>
    %229 = vector.extract_strided_slice %222 {offsets = [0, 0], sizes = [1, 32], strides = [1, 1]} : vector<3x32xf32> to vector<1x32xf32>
    %230 = vector.broadcast %229 : vector<1x32xf32> to vector<16x32xf32>
    %231 = arith.addf %228, %230 : vector<16x32xf32>
    %232 = vector.extract_strided_slice %222 {offsets = [1, 0], sizes = [1, 32], strides = [1, 1]} : vector<3x32xf32> to vector<1x32xf32>
    %233 = vector.extract_strided_slice %222 {offsets = [2, 0], sizes = [1, 32], strides = [1, 1]} : vector<3x32xf32> to vector<1x32xf32>
    %cst_110 = arith.constant dense<0.000000e+00> : vector<32xf32>
    %234 = vector.multi_reduction <add>, %231, %cst_110 [0] : vector<16x32xf32> to vector<32xf32>
    %235 = vector.shape_cast %234 : vector<32xf32> to vector<1x32xf32>
    %cst_111 = arith.constant 1.600000e+01 : f32
    %236 = vector.broadcast %cst_111 : f32 to vector<1x32xf32>
    %237 = arith.divf %235, %236 : vector<1x32xf32>
    %238 = vector.broadcast %237 : vector<1x32xf32> to vector<16x32xf32>
    %239 = arith.subf %231, %238 : vector<16x32xf32>
    %240 = arith.mulf %239, %239 : vector<16x32xf32>
    %cst_112 = arith.constant dense<0.000000e+00> : vector<32xf32>
    %241 = vector.multi_reduction <add>, %240, %cst_112 [0] : vector<16x32xf32> to vector<32xf32>
    %242 = vector.shape_cast %241 : vector<32xf32> to vector<1x32xf32>
    %cst_113 = arith.constant 1.600000e+01 : f32
    %243 = vector.broadcast %cst_113 : f32 to vector<1x32xf32>
    %244 = arith.divf %242, %243 : vector<1x32xf32>
    %cst_114 = arith.constant 9.99999974E-6 : f32
    %245 = vector.broadcast %cst_114 : f32 to vector<1x32xf32>
    %246 = arith.addf %244, %245 : vector<1x32xf32>
    %247 = math.rsqrt %246 : vector<1x32xf32>
    %248 = arith.mulf %232, %247 : vector<1x32xf32>
    %249 = arith.mulf %237, %248 : vector<1x32xf32>
    %250 = arith.subf %233, %249 : vector<1x32xf32>
    %251 = vector.broadcast %248 : vector<1x32xf32> to vector<16x32xf32>
    %252 = arith.mulf %231, %251 : vector<16x32xf32>
    %253 = vector.broadcast %250 : vector<1x32xf32> to vector<16x32xf32>
    %254 = arith.addf %252, %253 : vector<16x32xf32>
    %cst_115 = arith.constant 0.000000e+00 : f32
    %255 = vector.broadcast %cst_115 : f32 to vector<16x32xf32>
    %256 = arith.maximumf %254, %255 : vector<16x32xf32>
    %c0_116 = arith.constant 0 : index
    %c96_117 = arith.constant 96 : index
    %257 = vector.load %arg64[%c0_116, %c96_117] : memref<16x256xf32, #tpu.memory_space<vmem>>, vector<16x32xf32>
    tpu.vector_store %arg64[%c0_116, %c96_117], %256 {strides = array<i32>} : memref<16x256xf32, #tpu.memory_space<vmem>>, vector<16x32xf32>,
    %cst_118 = arith.constant dense<0.000000e+00> : vector<16x32xf32>
    %258 = tpu.matmul %0, %256, %cst_118 {dimension_numbers = #tpu.dot_dimension_numbers<[1], [0], [0], [1], [0, 0, 1, 1], [], []>} : vector<16x16xf32>, vector<16x32xf32>, vector<16x32xf32> -> vector<16x32xf32>
    %c0_119 = arith.constant 0 : index
    %c96_120 = arith.constant 96 : index
    %259 = vector.load %arg65[%c0_119, %c96_120] : memref<16x256xf32, #tpu.memory_space<vmem>>, vector<16x32xf32>
    tpu.vector_store %arg65[%c0_119, %c96_120], %258 {strides = array<i32>} : memref<16x256xf32, #tpu.memory_space<vmem>>, vector<16x32xf32>,
    %c0_121 = arith.constant 0 : index
    %c0_122 = arith.constant 0 : index
    %260 = vector.load %arg64[%c0_121, %c0_122] : memref<16x256xf32, #tpu.memory_space<vmem>>, vector<16x128xf32>
    %c0_123 = arith.constant 0 : index
    %c0_124 = arith.constant 0 : index
    %261 = vector.load %arg65[%c0_123, %c0_124] : memref<16x256xf32, #tpu.memory_space<vmem>>, vector<16x128xf32>
    %c0_125 = arith.constant 0 : index
    %c0_126 = arith.constant 0 : index
    %262 = vector.load %arg18[%c0_125, %c0_126] : memref<3x64xf32, #tpu.memory_space<vmem>>, vector<3x64xf32>
    %c0_127 = arith.constant 0 : index
    %c0_128 = arith.constant 0 : index
    %263 = vector.load %arg17[%c0_127, %c0_128] : memref<256x64xf32, #tpu.memory_space<vmem>>, vector<128x64xf32>
    %cst_129 = arith.constant dense<0.000000e+00> : vector<16x64xf32>
    %264 = tpu.matmul %260, %263, %cst_129 {dimension_numbers = #tpu.dot_dimension_numbers<[1], [0], [0], [1], [0, 0, 1, 1], [], []>} : vector<16x128xf32>, vector<128x64xf32>, vector<16x64xf32> -> vector<16x64xf32>
    %c128 = arith.constant 128 : index
    %c0_130 = arith.constant 0 : index
    %265 = vector.load %arg17[%c128, %c0_130] : memref<256x64xf32, #tpu.memory_space<vmem>>, vector<128x64xf32>
    %cst_131 = arith.constant dense<0.000000e+00> : vector<16x64xf32>
    %266 = tpu.matmul %261, %265, %cst_131 {dimension_numbers = #tpu.dot_dimension_numbers<[1], [0], [0], [1], [0, 0, 1, 1], [], []>} : vector<16x128xf32>, vector<128x64xf32>, vector<16x64xf32> -> vector<16x64xf32>
    %267 = arith.addf %264, %266 : vector<16x64xf32>
    %268 = vector.extract_strided_slice %262 {offsets = [0, 0], sizes = [1, 64], strides = [1, 1]} : vector<3x64xf32> to vector<1x64xf32>
    %269 = vector.broadcast %268 : vector<1x64xf32> to vector<16x64xf32>
    %270 = arith.addf %267, %269 : vector<16x64xf32>
    %271 = vector.extract_strided_slice %262 {offsets = [1, 0], sizes = [1, 64], strides = [1, 1]} : vector<3x64xf32> to vector<1x64xf32>
    %272 = vector.extract_strided_slice %262 {offsets = [2, 0], sizes = [1, 64], strides = [1, 1]} : vector<3x64xf32> to vector<1x64xf32>
    %cst_132 = arith.constant dense<0.000000e+00> : vector<64xf32>
    %273 = vector.multi_reduction <add>, %270, %cst_132 [0] : vector<16x64xf32> to vector<64xf32>
    %274 = vector.shape_cast %273 : vector<64xf32> to vector<1x64xf32>
    %cst_133 = arith.constant 1.600000e+01 : f32
    %275 = vector.broadcast %cst_133 : f32 to vector<1x64xf32>
    %276 = arith.divf %274, %275 : vector<1x64xf32>
    %277 = vector.broadcast %276 : vector<1x64xf32> to vector<16x64xf32>
    %278 = arith.subf %270, %277 : vector<16x64xf32>
    %279 = arith.mulf %278, %278 : vector<16x64xf32>
    %cst_134 = arith.constant dense<0.000000e+00> : vector<64xf32>
    %280 = vector.multi_reduction <add>, %279, %cst_134 [0] : vector<16x64xf32> to vector<64xf32>
    %281 = vector.shape_cast %280 : vector<64xf32> to vector<1x64xf32>
    %cst_135 = arith.constant 1.600000e+01 : f32
    %282 = vector.broadcast %cst_135 : f32 to vector<1x64xf32>
    %283 = arith.divf %281, %282 : vector<1x64xf32>
    %cst_136 = arith.constant 9.99999974E-6 : f32
    %284 = vector.broadcast %cst_136 : f32 to vector<1x64xf32>
    %285 = arith.addf %283, %284 : vector<1x64xf32>
    %286 = math.rsqrt %285 : vector<1x64xf32>
    %287 = arith.mulf %271, %286 : vector<1x64xf32>
    %288 = arith.mulf %276, %287 : vector<1x64xf32>
    %289 = arith.subf %272, %288 : vector<1x64xf32>
    %290 = vector.broadcast %287 : vector<1x64xf32> to vector<16x64xf32>
    %291 = arith.mulf %270, %290 : vector<16x64xf32>
    %292 = vector.broadcast %289 : vector<1x64xf32> to vector<16x64xf32>
    %293 = arith.addf %291, %292 : vector<16x64xf32>
    %cst_137 = arith.constant 0.000000e+00 : f32
    %294 = vector.broadcast %cst_137 : f32 to vector<16x64xf32>
    %295 = arith.maximumf %293, %294 : vector<16x64xf32>
    %c0_138 = arith.constant 0 : index
    %c0_139 = arith.constant 0 : index
    %296 = vector.load %arg64[%c0_138, %c0_139] : memref<16x256xf32, #tpu.memory_space<vmem>>, vector<16x64xf32>
    tpu.vector_store %arg64[%c0_138, %c0_139], %295 {strides = array<i32>} : memref<16x256xf32, #tpu.memory_space<vmem>>, vector<16x64xf32>,
    %cst_140 = arith.constant dense<0.000000e+00> : vector<16x64xf32>
    %297 = tpu.matmul %0, %295, %cst_140 {dimension_numbers = #tpu.dot_dimension_numbers<[1], [0], [0], [1], [0, 0, 1, 1], [], []>} : vector<16x16xf32>, vector<16x64xf32>, vector<16x64xf32> -> vector<16x64xf32>
    %c0_141 = arith.constant 0 : index
    %c0_142 = arith.constant 0 : index
    %298 = vector.load %arg65[%c0_141, %c0_142] : memref<16x256xf32, #tpu.memory_space<vmem>>, vector<16x64xf32>
    tpu.vector_store %arg65[%c0_141, %c0_142], %297 {strides = array<i32>} : memref<16x256xf32, #tpu.memory_space<vmem>>, vector<16x64xf32>,
    %c0_143 = arith.constant 0 : index
    %c0_144 = arith.constant 0 : index
    %299 = vector.load %arg64[%c0_143, %c0_144] : memref<16x256xf32, #tpu.memory_space<vmem>>, vector<16x64xf32>
    %c0_145 = arith.constant 0 : index
    %c0_146 = arith.constant 0 : index
    %300 = vector.load %arg65[%c0_145, %c0_146] : memref<16x256xf32, #tpu.memory_space<vmem>>, vector<16x64xf32>
    %c0_147 = arith.constant 0 : index
    %c0_148 = arith.constant 0 : index
    %301 = vector.load %arg20[%c0_147, %c0_148] : memref<3x96xf32, #tpu.memory_space<vmem>>, vector<3x96xf32>
    %c0_149 = arith.constant 0 : index
    %c0_150 = arith.constant 0 : index
    %302 = vector.load %arg19[%c0_149, %c0_150] : memref<128x96xf32, #tpu.memory_space<vmem>>, vector<64x96xf32>
    %cst_151 = arith.constant dense<0.000000e+00> : vector<16x96xf32>
    %303 = tpu.matmul %299, %302, %cst_151 {dimension_numbers = #tpu.dot_dimension_numbers<[1], [0], [0], [1], [0, 0, 1, 1], [], []>} : vector<16x64xf32>, vector<64x96xf32>, vector<16x96xf32> -> vector<16x96xf32>
    %c64_152 = arith.constant 64 : index
    %c0_153 = arith.constant 0 : index
    %304 = vector.load %arg19[%c64_152, %c0_153] : memref<128x96xf32, #tpu.memory_space<vmem>>, vector<64x96xf32>
    %cst_154 = arith.constant dense<0.000000e+00> : vector<16x96xf32>
    %305 = tpu.matmul %300, %304, %cst_154 {dimension_numbers = #tpu.dot_dimension_numbers<[1], [0], [0], [1], [0, 0, 1, 1], [], []>} : vector<16x64xf32>, vector<64x96xf32>, vector<16x96xf32> -> vector<16x96xf32>
    %306 = arith.addf %303, %305 : vector<16x96xf32>
    %307 = vector.extract_strided_slice %301 {offsets = [0, 0], sizes = [1, 96], strides = [1, 1]} : vector<3x96xf32> to vector<1x96xf32>
    %308 = vector.broadcast %307 : vector<1x96xf32> to vector<16x96xf32>
    %309 = arith.addf %306, %308 : vector<16x96xf32>
    %310 = vector.extract_strided_slice %301 {offsets = [1, 0], sizes = [1, 96], strides = [1, 1]} : vector<3x96xf32> to vector<1x96xf32>
    %311 = vector.extract_strided_slice %301 {offsets = [2, 0], sizes = [1, 96], strides = [1, 1]} : vector<3x96xf32> to vector<1x96xf32>
    %cst_155 = arith.constant dense<0.000000e+00> : vector<96xf32>
    %312 = vector.multi_reduction <add>, %309, %cst_155 [0] : vector<16x96xf32> to vector<96xf32>
    %313 = vector.shape_cast %312 : vector<96xf32> to vector<1x96xf32>
    %cst_156 = arith.constant 1.600000e+01 : f32
    %314 = vector.broadcast %cst_156 : f32 to vector<1x96xf32>
    %315 = arith.divf %313, %314 : vector<1x96xf32>
    %316 = vector.broadcast %315 : vector<1x96xf32> to vector<16x96xf32>
    %317 = arith.subf %309, %316 : vector<16x96xf32>
    %318 = arith.mulf %317, %317 : vector<16x96xf32>
    %cst_157 = arith.constant dense<0.000000e+00> : vector<96xf32>
    %319 = vector.multi_reduction <add>, %318, %cst_157 [0] : vector<16x96xf32> to vector<96xf32>
    %320 = vector.shape_cast %319 : vector<96xf32> to vector<1x96xf32>
    %cst_158 = arith.constant 1.600000e+01 : f32
    %321 = vector.broadcast %cst_158 : f32 to vector<1x96xf32>
    %322 = arith.divf %320, %321 : vector<1x96xf32>
    %cst_159 = arith.constant 9.99999974E-6 : f32
    %323 = vector.broadcast %cst_159 : f32 to vector<1x96xf32>
    %324 = arith.addf %322, %323 : vector<1x96xf32>
    %325 = math.rsqrt %324 : vector<1x96xf32>
    %326 = arith.mulf %310, %325 : vector<1x96xf32>
    %327 = arith.mulf %315, %326 : vector<1x96xf32>
    %328 = arith.subf %311, %327 : vector<1x96xf32>
    %329 = vector.broadcast %326 : vector<1x96xf32> to vector<16x96xf32>
    %330 = arith.mulf %309, %329 : vector<16x96xf32>
    %331 = vector.broadcast %328 : vector<1x96xf32> to vector<16x96xf32>
    %332 = arith.addf %330, %331 : vector<16x96xf32>
    %cst_160 = arith.constant 0.000000e+00 : f32
    %333 = vector.broadcast %cst_160 : f32 to vector<16x96xf32>
    %334 = arith.maximumf %332, %333 : vector<16x96xf32>
    %c0_161 = arith.constant 0 : index
    %c0_162 = arith.constant 0 : index
    %335 = vector.load %arg22[%c0_161, %c0_162] : memref<3x32xf32, #tpu.memory_space<vmem>>, vector<3x32xf32>
    %c0_163 = arith.constant 0 : index
    %c0_164 = arith.constant 0 : index
    %336 = vector.load %arg21[%c0_163, %c0_164] : memref<96x64xf32, #tpu.memory_space<vmem>>, vector<96x64xf32>
    %cst_165 = arith.constant dense<0.000000e+00> : vector<16x64xf32>
    %337 = tpu.matmul %334, %336, %cst_165 {dimension_numbers = #tpu.dot_dimension_numbers<[1], [0], [0], [1], [0, 0, 1, 1], [], []>} : vector<16x96xf32>, vector<96x64xf32>, vector<16x64xf32> -> vector<16x64xf32>
    %338 = vector.extract_strided_slice %337 {offsets = [0, 0], sizes = [16, 32], strides = [1, 1]} : vector<16x64xf32> to vector<16x32xf32>
    %339 = vector.extract_strided_slice %337 {offsets = [0, 32], sizes = [16, 32], strides = [1, 1]} : vector<16x64xf32> to vector<16x32xf32>
    %cst_166 = arith.constant dense<0.000000e+00> : vector<16x32xf32>
    %340 = tpu.matmul %0, %339, %cst_166 {dimension_numbers = #tpu.dot_dimension_numbers<[1], [0], [0], [1], [0, 0, 1, 1], [], []>} : vector<16x16xf32>, vector<16x32xf32>, vector<16x32xf32> -> vector<16x32xf32>
    %341 = arith.addf %338, %340 : vector<16x32xf32>
    %342 = vector.extract_strided_slice %335 {offsets = [0, 0], sizes = [1, 32], strides = [1, 1]} : vector<3x32xf32> to vector<1x32xf32>
    %343 = vector.broadcast %342 : vector<1x32xf32> to vector<16x32xf32>
    %344 = arith.addf %341, %343 : vector<16x32xf32>
    %345 = vector.extract_strided_slice %335 {offsets = [1, 0], sizes = [1, 32], strides = [1, 1]} : vector<3x32xf32> to vector<1x32xf32>
    %346 = vector.extract_strided_slice %335 {offsets = [2, 0], sizes = [1, 32], strides = [1, 1]} : vector<3x32xf32> to vector<1x32xf32>
    %cst_167 = arith.constant dense<0.000000e+00> : vector<32xf32>
    %347 = vector.multi_reduction <add>, %344, %cst_167 [0] : vector<16x32xf32> to vector<32xf32>
    %348 = vector.shape_cast %347 : vector<32xf32> to vector<1x32xf32>
    %cst_168 = arith.constant 1.600000e+01 : f32
    %349 = vector.broadcast %cst_168 : f32 to vector<1x32xf32>
    %350 = arith.divf %348, %349 : vector<1x32xf32>
    %351 = vector.broadcast %350 : vector<1x32xf32> to vector<16x32xf32>
    %352 = arith.subf %344, %351 : vector<16x32xf32>
    %353 = arith.mulf %352, %352 : vector<16x32xf32>
    %cst_169 = arith.constant dense<0.000000e+00> : vector<32xf32>
    %354 = vector.multi_reduction <add>, %353, %cst_169 [0] : vector<16x32xf32> to vector<32xf32>
    %355 = vector.shape_cast %354 : vector<32xf32> to vector<1x32xf32>
    %cst_170 = arith.constant 1.600000e+01 : f32
    %356 = vector.broadcast %cst_170 : f32 to vector<1x32xf32>
    %357 = arith.divf %355, %356 : vector<1x32xf32>
    %cst_171 = arith.constant 9.99999974E-6 : f32
    %358 = vector.broadcast %cst_171 : f32 to vector<1x32xf32>
    %359 = arith.addf %357, %358 : vector<1x32xf32>
    %360 = math.rsqrt %359 : vector<1x32xf32>
    %361 = arith.mulf %345, %360 : vector<1x32xf32>
    %362 = arith.mulf %350, %361 : vector<1x32xf32>
    %363 = arith.subf %346, %362 : vector<1x32xf32>
    %364 = vector.broadcast %361 : vector<1x32xf32> to vector<16x32xf32>
    %365 = arith.mulf %344, %364 : vector<16x32xf32>
    %366 = vector.broadcast %363 : vector<1x32xf32> to vector<16x32xf32>
    %367 = arith.addf %365, %366 : vector<16x32xf32>
    %cst_172 = arith.constant 0.000000e+00 : f32
    %368 = vector.broadcast %cst_172 : f32 to vector<16x32xf32>
    %369 = arith.maximumf %367, %368 : vector<16x32xf32>
    %c0_173 = arith.constant 0 : index
    %c64_174 = arith.constant 64 : index
    %370 = vector.load %arg64[%c0_173, %c64_174] : memref<16x256xf32, #tpu.memory_space<vmem>>, vector<16x32xf32>
    tpu.vector_store %arg64[%c0_173, %c64_174], %369 {strides = array<i32>} : memref<16x256xf32, #tpu.memory_space<vmem>>, vector<16x32xf32>,
    %cst_175 = arith.constant dense<0.000000e+00> : vector<16x32xf32>
    %371 = tpu.matmul %0, %369, %cst_175 {dimension_numbers = #tpu.dot_dimension_numbers<[1], [0], [0], [1], [0, 0, 1, 1], [], []>} : vector<16x16xf32>, vector<16x32xf32>, vector<16x32xf32> -> vector<16x32xf32>
    %c0_176 = arith.constant 0 : index
    %c64_177 = arith.constant 64 : index
    %372 = vector.load %arg65[%c0_176, %c64_177] : memref<16x256xf32, #tpu.memory_space<vmem>>, vector<16x32xf32>
    tpu.vector_store %arg65[%c0_176, %c64_177], %371 {strides = array<i32>} : memref<16x256xf32, #tpu.memory_space<vmem>>, vector<16x32xf32>,
    %c0_178 = arith.constant 0 : index
    %c0_179 = arith.constant 0 : index
    %373 = vector.load %arg64[%c0_178, %c0_179] : memref<16x256xf32, #tpu.memory_space<vmem>>, vector<16x96xf32>
    %c0_180 = arith.constant 0 : index
    %c0_181 = arith.constant 0 : index
    %374 = vector.load %arg65[%c0_180, %c0_181] : memref<16x256xf32, #tpu.memory_space<vmem>>, vector<16x96xf32>
    %c0_182 = arith.constant 0 : index
    %c0_183 = arith.constant 0 : index
    %375 = vector.load %arg24[%c0_182, %c0_183] : memref<3x96xf32, #tpu.memory_space<vmem>>, vector<3x96xf32>
    %c0_184 = arith.constant 0 : index
    %c0_185 = arith.constant 0 : index
    %376 = vector.load %arg23[%c0_184, %c0_185] : memref<192x96xf32, #tpu.memory_space<vmem>>, vector<96x96xf32>
    %cst_186 = arith.constant dense<0.000000e+00> : vector<16x96xf32>
    %377 = tpu.matmul %373, %376, %cst_186 {dimension_numbers = #tpu.dot_dimension_numbers<[1], [0], [0], [1], [0, 0, 1, 1], [], []>} : vector<16x96xf32>, vector<96x96xf32>, vector<16x96xf32> -> vector<16x96xf32>
    %c96_187 = arith.constant 96 : index
    %c0_188 = arith.constant 0 : index
    %378 = vector.load %arg23[%c96_187, %c0_188] : memref<192x96xf32, #tpu.memory_space<vmem>>, vector<96x96xf32>
    %cst_189 = arith.constant dense<0.000000e+00> : vector<16x96xf32>
    %379 = tpu.matmul %374, %378, %cst_189 {dimension_numbers = #tpu.dot_dimension_numbers<[1], [0], [0], [1], [0, 0, 1, 1], [], []>} : vector<16x96xf32>, vector<96x96xf32>, vector<16x96xf32> -> vector<16x96xf32>
    %380 = arith.addf %377, %379 : vector<16x96xf32>
    %381 = vector.extract_strided_slice %375 {offsets = [0, 0], sizes = [1, 96], strides = [1, 1]} : vector<3x96xf32> to vector<1x96xf32>
    %382 = vector.broadcast %381 : vector<1x96xf32> to vector<16x96xf32>
    %383 = arith.addf %380, %382 : vector<16x96xf32>
    %384 = vector.extract_strided_slice %375 {offsets = [1, 0], sizes = [1, 96], strides = [1, 1]} : vector<3x96xf32> to vector<1x96xf32>
    %385 = vector.extract_strided_slice %375 {offsets = [2, 0], sizes = [1, 96], strides = [1, 1]} : vector<3x96xf32> to vector<1x96xf32>
    %cst_190 = arith.constant dense<0.000000e+00> : vector<96xf32>
    %386 = vector.multi_reduction <add>, %383, %cst_190 [0] : vector<16x96xf32> to vector<96xf32>
    %387 = vector.shape_cast %386 : vector<96xf32> to vector<1x96xf32>
    %cst_191 = arith.constant 1.600000e+01 : f32
    %388 = vector.broadcast %cst_191 : f32 to vector<1x96xf32>
    %389 = arith.divf %387, %388 : vector<1x96xf32>
    %390 = vector.broadcast %389 : vector<1x96xf32> to vector<16x96xf32>
    %391 = arith.subf %383, %390 : vector<16x96xf32>
    %392 = arith.mulf %391, %391 : vector<16x96xf32>
    %cst_192 = arith.constant dense<0.000000e+00> : vector<96xf32>
    %393 = vector.multi_reduction <add>, %392, %cst_192 [0] : vector<16x96xf32> to vector<96xf32>
    %394 = vector.shape_cast %393 : vector<96xf32> to vector<1x96xf32>
    %cst_193 = arith.constant 1.600000e+01 : f32
    %395 = vector.broadcast %cst_193 : f32 to vector<1x96xf32>
    %396 = arith.divf %394, %395 : vector<1x96xf32>
    %cst_194 = arith.constant 9.99999974E-6 : f32
    %397 = vector.broadcast %cst_194 : f32 to vector<1x96xf32>
    %398 = arith.addf %396, %397 : vector<1x96xf32>
    %399 = math.rsqrt %398 : vector<1x96xf32>
    %400 = arith.mulf %384, %399 : vector<1x96xf32>
    %401 = arith.mulf %389, %400 : vector<1x96xf32>
    %402 = arith.subf %385, %401 : vector<1x96xf32>
    %403 = vector.broadcast %400 : vector<1x96xf32> to vector<16x96xf32>
    %404 = arith.mulf %383, %403 : vector<16x96xf32>
    %405 = vector.broadcast %402 : vector<1x96xf32> to vector<16x96xf32>
    %406 = arith.addf %404, %405 : vector<16x96xf32>
    %cst_195 = arith.constant 0.000000e+00 : f32
    %407 = vector.broadcast %cst_195 : f32 to vector<16x96xf32>
    %408 = arith.maximumf %406, %407 : vector<16x96xf32>
    %c0_196 = arith.constant 0 : index
    %c0_197 = arith.constant 0 : index
    %409 = vector.load %arg26[%c0_196, %c0_197] : memref<3x32xf32, #tpu.memory_space<vmem>>, vector<3x32xf32>
    %c0_198 = arith.constant 0 : index
    %c0_199 = arith.constant 0 : index
    %410 = vector.load %arg25[%c0_198, %c0_199] : memref<96x64xf32, #tpu.memory_space<vmem>>, vector<96x64xf32>
    %cst_200 = arith.constant dense<0.000000e+00> : vector<16x64xf32>
    %411 = tpu.matmul %408, %410, %cst_200 {dimension_numbers = #tpu.dot_dimension_numbers<[1], [0], [0], [1], [0, 0, 1, 1], [], []>} : vector<16x96xf32>, vector<96x64xf32>, vector<16x64xf32> -> vector<16x64xf32>
    %412 = vector.extract_strided_slice %411 {offsets = [0, 0], sizes = [16, 32], strides = [1, 1]} : vector<16x64xf32> to vector<16x32xf32>
    %413 = vector.extract_strided_slice %411 {offsets = [0, 32], sizes = [16, 32], strides = [1, 1]} : vector<16x64xf32> to vector<16x32xf32>
    %cst_201 = arith.constant dense<0.000000e+00> : vector<16x32xf32>
    %414 = tpu.matmul %0, %413, %cst_201 {dimension_numbers = #tpu.dot_dimension_numbers<[1], [0], [0], [1], [0, 0, 1, 1], [], []>} : vector<16x16xf32>, vector<16x32xf32>, vector<16x32xf32> -> vector<16x32xf32>
    %415 = arith.addf %412, %414 : vector<16x32xf32>
    %416 = vector.extract_strided_slice %409 {offsets = [0, 0], sizes = [1, 32], strides = [1, 1]} : vector<3x32xf32> to vector<1x32xf32>
    %417 = vector.broadcast %416 : vector<1x32xf32> to vector<16x32xf32>
    %418 = arith.addf %415, %417 : vector<16x32xf32>
    %419 = vector.extract_strided_slice %409 {offsets = [1, 0], sizes = [1, 32], strides = [1, 1]} : vector<3x32xf32> to vector<1x32xf32>
    %420 = vector.extract_strided_slice %409 {offsets = [2, 0], sizes = [1, 32], strides = [1, 1]} : vector<3x32xf32> to vector<1x32xf32>
    %cst_202 = arith.constant dense<0.000000e+00> : vector<32xf32>
    %421 = vector.multi_reduction <add>, %418, %cst_202 [0] : vector<16x32xf32> to vector<32xf32>
    %422 = vector.shape_cast %421 : vector<32xf32> to vector<1x32xf32>
    %cst_203 = arith.constant 1.600000e+01 : f32
    %423 = vector.broadcast %cst_203 : f32 to vector<1x32xf32>
    %424 = arith.divf %422, %423 : vector<1x32xf32>
    %425 = vector.broadcast %424 : vector<1x32xf32> to vector<16x32xf32>
    %426 = arith.subf %418, %425 : vector<16x32xf32>
    %427 = arith.mulf %426, %426 : vector<16x32xf32>
    %cst_204 = arith.constant dense<0.000000e+00> : vector<32xf32>
    %428 = vector.multi_reduction <add>, %427, %cst_204 [0] : vector<16x32xf32> to vector<32xf32>
    %429 = vector.shape_cast %428 : vector<32xf32> to vector<1x32xf32>
    %cst_205 = arith.constant 1.600000e+01 : f32
    %430 = vector.broadcast %cst_205 : f32 to vector<1x32xf32>
    %431 = arith.divf %429, %430 : vector<1x32xf32>
    %cst_206 = arith.constant 9.99999974E-6 : f32
    %432 = vector.broadcast %cst_206 : f32 to vector<1x32xf32>
    %433 = arith.addf %431, %432 : vector<1x32xf32>
    %434 = math.rsqrt %433 : vector<1x32xf32>
    %435 = arith.mulf %419, %434 : vector<1x32xf32>
    %436 = arith.mulf %424, %435 : vector<1x32xf32>
    %437 = arith.subf %420, %436 : vector<1x32xf32>
    %438 = vector.broadcast %435 : vector<1x32xf32> to vector<16x32xf32>
    %439 = arith.mulf %418, %438 : vector<16x32xf32>
    %440 = vector.broadcast %437 : vector<1x32xf32> to vector<16x32xf32>
    %441 = arith.addf %439, %440 : vector<16x32xf32>
    %cst_207 = arith.constant 0.000000e+00 : f32
    %442 = vector.broadcast %cst_207 : f32 to vector<16x32xf32>
    %443 = arith.maximumf %441, %442 : vector<16x32xf32>
    %c0_208 = arith.constant 0 : index
    %c96_209 = arith.constant 96 : index
    %444 = vector.load %arg64[%c0_208, %c96_209] : memref<16x256xf32, #tpu.memory_space<vmem>>, vector<16x32xf32>
    tpu.vector_store %arg64[%c0_208, %c96_209], %443 {strides = array<i32>} : memref<16x256xf32, #tpu.memory_space<vmem>>, vector<16x32xf32>,
    %cst_210 = arith.constant dense<0.000000e+00> : vector<16x32xf32>
    %445 = tpu.matmul %0, %443, %cst_210 {dimension_numbers = #tpu.dot_dimension_numbers<[1], [0], [0], [1], [0, 0, 1, 1], [], []>} : vector<16x16xf32>, vector<16x32xf32>, vector<16x32xf32> -> vector<16x32xf32>
    %c0_211 = arith.constant 0 : index
    %c96_212 = arith.constant 96 : index
    %446 = vector.load %arg65[%c0_211, %c96_212] : memref<16x256xf32, #tpu.memory_space<vmem>>, vector<16x32xf32>
    tpu.vector_store %arg65[%c0_211, %c96_212], %445 {strides = array<i32>} : memref<16x256xf32, #tpu.memory_space<vmem>>, vector<16x32xf32>,
    %c0_213 = arith.constant 0 : index
    %c0_214 = arith.constant 0 : index
    %447 = vector.load %arg64[%c0_213, %c0_214] : memref<16x256xf32, #tpu.memory_space<vmem>>, vector<16x128xf32>
    %c0_215 = arith.constant 0 : index
    %c0_216 = arith.constant 0 : index
    %448 = vector.load %arg65[%c0_215, %c0_216] : memref<16x256xf32, #tpu.memory_space<vmem>>, vector<16x128xf32>
    %c0_217 = arith.constant 0 : index
    %c0_218 = arith.constant 0 : index
    %449 = vector.load %arg28[%c0_217, %c0_218] : memref<3x96xf32, #tpu.memory_space<vmem>>, vector<3x96xf32>
    %c0_219 = arith.constant 0 : index
    %c0_220 = arith.constant 0 : index
    %450 = vector.load %arg27[%c0_219, %c0_220] : memref<256x96xf32, #tpu.memory_space<vmem>>, vector<128x96xf32>
    %cst_221 = arith.constant dense<0.000000e+00> : vector<16x96xf32>
    %451 = tpu.matmul %447, %450, %cst_221 {dimension_numbers = #tpu.dot_dimension_numbers<[1], [0], [0], [1], [0, 0, 1, 1], [], []>} : vector<16x128xf32>, vector<128x96xf32>, vector<16x96xf32> -> vector<16x96xf32>
    %c128_222 = arith.constant 128 : index
    %c0_223 = arith.constant 0 : index
    %452 = vector.load %arg27[%c128_222, %c0_223] : memref<256x96xf32, #tpu.memory_space<vmem>>, vector<128x96xf32>
    %cst_224 = arith.constant dense<0.000000e+00> : vector<16x96xf32>
    %453 = tpu.matmul %448, %452, %cst_224 {dimension_numbers = #tpu.dot_dimension_numbers<[1], [0], [0], [1], [0, 0, 1, 1], [], []>} : vector<16x128xf32>, vector<128x96xf32>, vector<16x96xf32> -> vector<16x96xf32>
    %454 = arith.addf %451, %453 : vector<16x96xf32>
    %455 = vector.extract_strided_slice %449 {offsets = [0, 0], sizes = [1, 96], strides = [1, 1]} : vector<3x96xf32> to vector<1x96xf32>
    %456 = vector.broadcast %455 : vector<1x96xf32> to vector<16x96xf32>
    %457 = arith.addf %454, %456 : vector<16x96xf32>
    %458 = vector.extract_strided_slice %449 {offsets = [1, 0], sizes = [1, 96], strides = [1, 1]} : vector<3x96xf32> to vector<1x96xf32>
    %459 = vector.extract_strided_slice %449 {offsets = [2, 0], sizes = [1, 96], strides = [1, 1]} : vector<3x96xf32> to vector<1x96xf32>
    %cst_225 = arith.constant dense<0.000000e+00> : vector<96xf32>
    %460 = vector.multi_reduction <add>, %457, %cst_225 [0] : vector<16x96xf32> to vector<96xf32>
    %461 = vector.shape_cast %460 : vector<96xf32> to vector<1x96xf32>
    %cst_226 = arith.constant 1.600000e+01 : f32
    %462 = vector.broadcast %cst_226 : f32 to vector<1x96xf32>
    %463 = arith.divf %461, %462 : vector<1x96xf32>
    %464 = vector.broadcast %463 : vector<1x96xf32> to vector<16x96xf32>
    %465 = arith.subf %457, %464 : vector<16x96xf32>
    %466 = arith.mulf %465, %465 : vector<16x96xf32>
    %cst_227 = arith.constant dense<0.000000e+00> : vector<96xf32>
    %467 = vector.multi_reduction <add>, %466, %cst_227 [0] : vector<16x96xf32> to vector<96xf32>
    %468 = vector.shape_cast %467 : vector<96xf32> to vector<1x96xf32>
    %cst_228 = arith.constant 1.600000e+01 : f32
    %469 = vector.broadcast %cst_228 : f32 to vector<1x96xf32>
    %470 = arith.divf %468, %469 : vector<1x96xf32>
    %cst_229 = arith.constant 9.99999974E-6 : f32
    %471 = vector.broadcast %cst_229 : f32 to vector<1x96xf32>
    %472 = arith.addf %470, %471 : vector<1x96xf32>
    %473 = math.rsqrt %472 : vector<1x96xf32>
    %474 = arith.mulf %458, %473 : vector<1x96xf32>
    %475 = arith.mulf %463, %474 : vector<1x96xf32>
    %476 = arith.subf %459, %475 : vector<1x96xf32>
    %477 = vector.broadcast %474 : vector<1x96xf32> to vector<16x96xf32>
    %478 = arith.mulf %457, %477 : vector<16x96xf32>
    %479 = vector.broadcast %476 : vector<1x96xf32> to vector<16x96xf32>
    %480 = arith.addf %478, %479 : vector<16x96xf32>
    %cst_230 = arith.constant 0.000000e+00 : f32
    %481 = vector.broadcast %cst_230 : f32 to vector<16x96xf32>
    %482 = arith.maximumf %480, %481 : vector<16x96xf32>
    %c0_231 = arith.constant 0 : index
    %c0_232 = arith.constant 0 : index
    %483 = vector.load %arg30[%c0_231, %c0_232] : memref<3x32xf32, #tpu.memory_space<vmem>>, vector<3x32xf32>
    %c0_233 = arith.constant 0 : index
    %c0_234 = arith.constant 0 : index
    %484 = vector.load %arg29[%c0_233, %c0_234] : memref<96x64xf32, #tpu.memory_space<vmem>>, vector<96x64xf32>
    %cst_235 = arith.constant dense<0.000000e+00> : vector<16x64xf32>
    %485 = tpu.matmul %482, %484, %cst_235 {dimension_numbers = #tpu.dot_dimension_numbers<[1], [0], [0], [1], [0, 0, 1, 1], [], []>} : vector<16x96xf32>, vector<96x64xf32>, vector<16x64xf32> -> vector<16x64xf32>
    %486 = vector.extract_strided_slice %485 {offsets = [0, 0], sizes = [16, 32], strides = [1, 1]} : vector<16x64xf32> to vector<16x32xf32>
    %487 = vector.extract_strided_slice %485 {offsets = [0, 32], sizes = [16, 32], strides = [1, 1]} : vector<16x64xf32> to vector<16x32xf32>
    %cst_236 = arith.constant dense<0.000000e+00> : vector<16x32xf32>
    %488 = tpu.matmul %0, %487, %cst_236 {dimension_numbers = #tpu.dot_dimension_numbers<[1], [0], [0], [1], [0, 0, 1, 1], [], []>} : vector<16x16xf32>, vector<16x32xf32>, vector<16x32xf32> -> vector<16x32xf32>
    %489 = arith.addf %486, %488 : vector<16x32xf32>
    %490 = vector.extract_strided_slice %483 {offsets = [0, 0], sizes = [1, 32], strides = [1, 1]} : vector<3x32xf32> to vector<1x32xf32>
    %491 = vector.broadcast %490 : vector<1x32xf32> to vector<16x32xf32>
    %492 = arith.addf %489, %491 : vector<16x32xf32>
    %493 = vector.extract_strided_slice %483 {offsets = [1, 0], sizes = [1, 32], strides = [1, 1]} : vector<3x32xf32> to vector<1x32xf32>
    %494 = vector.extract_strided_slice %483 {offsets = [2, 0], sizes = [1, 32], strides = [1, 1]} : vector<3x32xf32> to vector<1x32xf32>
    %cst_237 = arith.constant dense<0.000000e+00> : vector<32xf32>
    %495 = vector.multi_reduction <add>, %492, %cst_237 [0] : vector<16x32xf32> to vector<32xf32>
    %496 = vector.shape_cast %495 : vector<32xf32> to vector<1x32xf32>
    %cst_238 = arith.constant 1.600000e+01 : f32
    %497 = vector.broadcast %cst_238 : f32 to vector<1x32xf32>
    %498 = arith.divf %496, %497 : vector<1x32xf32>
    %499 = vector.broadcast %498 : vector<1x32xf32> to vector<16x32xf32>
    %500 = arith.subf %492, %499 : vector<16x32xf32>
    %501 = arith.mulf %500, %500 : vector<16x32xf32>
    %cst_239 = arith.constant dense<0.000000e+00> : vector<32xf32>
    %502 = vector.multi_reduction <add>, %501, %cst_239 [0] : vector<16x32xf32> to vector<32xf32>
    %503 = vector.shape_cast %502 : vector<32xf32> to vector<1x32xf32>
    %cst_240 = arith.constant 1.600000e+01 : f32
    %504 = vector.broadcast %cst_240 : f32 to vector<1x32xf32>
    %505 = arith.divf %503, %504 : vector<1x32xf32>
    %cst_241 = arith.constant 9.99999974E-6 : f32
    %506 = vector.broadcast %cst_241 : f32 to vector<1x32xf32>
    %507 = arith.addf %505, %506 : vector<1x32xf32>
    %508 = math.rsqrt %507 : vector<1x32xf32>
    %509 = arith.mulf %493, %508 : vector<1x32xf32>
    %510 = arith.mulf %498, %509 : vector<1x32xf32>
    %511 = arith.subf %494, %510 : vector<1x32xf32>
    %512 = vector.broadcast %509 : vector<1x32xf32> to vector<16x32xf32>
    %513 = arith.mulf %492, %512 : vector<16x32xf32>
    %514 = vector.broadcast %511 : vector<1x32xf32> to vector<16x32xf32>
    %515 = arith.addf %513, %514 : vector<16x32xf32>
    %cst_242 = arith.constant 0.000000e+00 : f32
    %516 = vector.broadcast %cst_242 : f32 to vector<16x32xf32>
    %517 = arith.maximumf %515, %516 : vector<16x32xf32>
    %c0_243 = arith.constant 0 : index
    %c128_244 = arith.constant 128 : index
    %518 = vector.load %arg64[%c0_243, %c128_244] : memref<16x256xf32, #tpu.memory_space<vmem>>, vector<16x32xf32>
    tpu.vector_store %arg64[%c0_243, %c128_244], %517 {strides = array<i32>} : memref<16x256xf32, #tpu.memory_space<vmem>>, vector<16x32xf32>,
    %cst_245 = arith.constant dense<0.000000e+00> : vector<16x32xf32>
    %519 = tpu.matmul %0, %517, %cst_245 {dimension_numbers = #tpu.dot_dimension_numbers<[1], [0], [0], [1], [0, 0, 1, 1], [], []>} : vector<16x16xf32>, vector<16x32xf32>, vector<16x32xf32> -> vector<16x32xf32>
    %c0_246 = arith.constant 0 : index
    %c128_247 = arith.constant 128 : index
    %520 = vector.load %arg65[%c0_246, %c128_247] : memref<16x256xf32, #tpu.memory_space<vmem>>, vector<16x32xf32>
    tpu.vector_store %arg65[%c0_246, %c128_247], %519 {strides = array<i32>} : memref<16x256xf32, #tpu.memory_space<vmem>>, vector<16x32xf32>,
    %c0_248 = arith.constant 0 : index
    %c0_249 = arith.constant 0 : index
    %521 = vector.load %arg64[%c0_248, %c0_249] : memref<16x256xf32, #tpu.memory_space<vmem>>, vector<16x160xf32>
    %c0_250 = arith.constant 0 : index
    %c0_251 = arith.constant 0 : index
    %522 = vector.load %arg65[%c0_250, %c0_251] : memref<16x256xf32, #tpu.memory_space<vmem>>, vector<16x160xf32>
    %c0_252 = arith.constant 0 : index
    %c0_253 = arith.constant 0 : index
    %523 = vector.load %arg32[%c0_252, %c0_253] : memref<3x80xf32, #tpu.memory_space<vmem>>, vector<3x80xf32>
    %c0_254 = arith.constant 0 : index
    %c0_255 = arith.constant 0 : index
    %524 = vector.load %arg31[%c0_254, %c0_255] : memref<320x80xf32, #tpu.memory_space<vmem>>, vector<160x80xf32>
    %cst_256 = arith.constant dense<0.000000e+00> : vector<16x80xf32>
    %525 = tpu.matmul %521, %524, %cst_256 {dimension_numbers = #tpu.dot_dimension_numbers<[1], [0], [0], [1], [0, 0, 1, 1], [], []>} : vector<16x160xf32>, vector<160x80xf32>, vector<16x80xf32> -> vector<16x80xf32>
    %c160 = arith.constant 160 : index
    %c0_257 = arith.constant 0 : index
    %526 = vector.load %arg31[%c160, %c0_257] : memref<320x80xf32, #tpu.memory_space<vmem>>, vector<160x80xf32>
    %cst_258 = arith.constant dense<0.000000e+00> : vector<16x80xf32>
    %527 = tpu.matmul %522, %526, %cst_258 {dimension_numbers = #tpu.dot_dimension_numbers<[1], [0], [0], [1], [0, 0, 1, 1], [], []>} : vector<16x160xf32>, vector<160x80xf32>, vector<16x80xf32> -> vector<16x80xf32>
    %528 = arith.addf %525, %527 : vector<16x80xf32>
    %529 = vector.extract_strided_slice %523 {offsets = [0, 0], sizes = [1, 80], strides = [1, 1]} : vector<3x80xf32> to vector<1x80xf32>
    %530 = vector.broadcast %529 : vector<1x80xf32> to vector<16x80xf32>
    %531 = arith.addf %528, %530 : vector<16x80xf32>
    %532 = vector.extract_strided_slice %523 {offsets = [1, 0], sizes = [1, 80], strides = [1, 1]} : vector<3x80xf32> to vector<1x80xf32>
    %533 = vector.extract_strided_slice %523 {offsets = [2, 0], sizes = [1, 80], strides = [1, 1]} : vector<3x80xf32> to vector<1x80xf32>
    %cst_259 = arith.constant dense<0.000000e+00> : vector<80xf32>
    %534 = vector.multi_reduction <add>, %531, %cst_259 [0] : vector<16x80xf32> to vector<80xf32>
    %535 = vector.shape_cast %534 : vector<80xf32> to vector<1x80xf32>
    %cst_260 = arith.constant 1.600000e+01 : f32
    %536 = vector.broadcast %cst_260 : f32 to vector<1x80xf32>
    %537 = arith.divf %535, %536 : vector<1x80xf32>
    %538 = vector.broadcast %537 : vector<1x80xf32> to vector<16x80xf32>
    %539 = arith.subf %531, %538 : vector<16x80xf32>
    %540 = arith.mulf %539, %539 : vector<16x80xf32>
    %cst_261 = arith.constant dense<0.000000e+00> : vector<80xf32>
    %541 = vector.multi_reduction <add>, %540, %cst_261 [0] : vector<16x80xf32> to vector<80xf32>
    %542 = vector.shape_cast %541 : vector<80xf32> to vector<1x80xf32>
    %cst_262 = arith.constant 1.600000e+01 : f32
    %543 = vector.broadcast %cst_262 : f32 to vector<1x80xf32>
    %544 = arith.divf %542, %543 : vector<1x80xf32>
    %cst_263 = arith.constant 9.99999974E-6 : f32
    %545 = vector.broadcast %cst_263 : f32 to vector<1x80xf32>
    %546 = arith.addf %544, %545 : vector<1x80xf32>
    %547 = math.rsqrt %546 : vector<1x80xf32>
    %548 = arith.mulf %532, %547 : vector<1x80xf32>
    %549 = arith.mulf %537, %548 : vector<1x80xf32>
    %550 = arith.subf %533, %549 : vector<1x80xf32>
    %551 = vector.broadcast %548 : vector<1x80xf32> to vector<16x80xf32>
    %552 = arith.mulf %531, %551 : vector<16x80xf32>
    %553 = vector.broadcast %550 : vector<1x80xf32> to vector<16x80xf32>
    %554 = arith.addf %552, %553 : vector<16x80xf32>
    %cst_264 = arith.constant 0.000000e+00 : f32
    %555 = vector.broadcast %cst_264 : f32 to vector<16x80xf32>
    %556 = arith.maximumf %554, %555 : vector<16x80xf32>
    %c0_265 = arith.constant 0 : index
    %c0_266 = arith.constant 0 : index
    %557 = vector.load %arg64[%c0_265, %c0_266] : memref<16x256xf32, #tpu.memory_space<vmem>>, vector<16x80xf32>
    tpu.vector_store %arg64[%c0_265, %c0_266], %556 {strides = array<i32>} : memref<16x256xf32, #tpu.memory_space<vmem>>, vector<16x80xf32>,
    %cst_267 = arith.constant dense<0.000000e+00> : vector<16x80xf32>
    %558 = tpu.matmul %0, %556, %cst_267 {dimension_numbers = #tpu.dot_dimension_numbers<[1], [0], [0], [1], [0, 0, 1, 1], [], []>} : vector<16x16xf32>, vector<16x80xf32>, vector<16x80xf32> -> vector<16x80xf32>
    %c0_268 = arith.constant 0 : index
    %c0_269 = arith.constant 0 : index
    %559 = vector.load %arg65[%c0_268, %c0_269] : memref<16x256xf32, #tpu.memory_space<vmem>>, vector<16x80xf32>
    tpu.vector_store %arg65[%c0_268, %c0_269], %558 {strides = array<i32>} : memref<16x256xf32, #tpu.memory_space<vmem>>, vector<16x80xf32>,
    %c0_270 = arith.constant 0 : index
    %c0_271 = arith.constant 0 : index
    %560 = vector.load %arg64[%c0_270, %c0_271] : memref<16x256xf32, #tpu.memory_space<vmem>>, vector<16x80xf32>
    %c0_272 = arith.constant 0 : index
    %c0_273 = arith.constant 0 : index
    %561 = vector.load %arg65[%c0_272, %c0_273] : memref<16x256xf32, #tpu.memory_space<vmem>>, vector<16x80xf32>
    %c0_274 = arith.constant 0 : index
    %c0_275 = arith.constant 0 : index
    %562 = vector.load %arg34[%c0_274, %c0_275] : memref<3x128xf32, #tpu.memory_space<vmem>>, vector<3x128xf32>
    %c0_276 = arith.constant 0 : index
    %c0_277 = arith.constant 0 : index
    %563 = vector.load %arg33[%c0_276, %c0_277] : memref<160x128xf32, #tpu.memory_space<vmem>>, vector<80x128xf32>
    %cst_278 = arith.constant dense<0.000000e+00> : vector<16x128xf32>
    %564 = tpu.matmul %560, %563, %cst_278 {dimension_numbers = #tpu.dot_dimension_numbers<[1], [0], [0], [1], [0, 0, 1, 1], [], []>} : vector<16x80xf32>, vector<80x128xf32>, vector<16x128xf32> -> vector<16x128xf32>
    %c80 = arith.constant 80 : index
    %c0_279 = arith.constant 0 : index
    %565 = vector.load %arg33[%c80, %c0_279] : memref<160x128xf32, #tpu.memory_space<vmem>>, vector<80x128xf32>
    %cst_280 = arith.constant dense<0.000000e+00> : vector<16x128xf32>
    %566 = tpu.matmul %561, %565, %cst_280 {dimension_numbers = #tpu.dot_dimension_numbers<[1], [0], [0], [1], [0, 0, 1, 1], [], []>} : vector<16x80xf32>, vector<80x128xf32>, vector<16x128xf32> -> vector<16x128xf32>
    %567 = arith.addf %564, %566 : vector<16x128xf32>
    %568 = vector.extract_strided_slice %562 {offsets = [0, 0], sizes = [1, 128], strides = [1, 1]} : vector<3x128xf32> to vector<1x128xf32>
    %569 = vector.broadcast %568 : vector<1x128xf32> to vector<16x128xf32>
    %570 = arith.addf %567, %569 : vector<16x128xf32>
    %571 = vector.extract_strided_slice %562 {offsets = [1, 0], sizes = [1, 128], strides = [1, 1]} : vector<3x128xf32> to vector<1x128xf32>
    %572 = vector.extract_strided_slice %562 {offsets = [2, 0], sizes = [1, 128], strides = [1, 1]} : vector<3x128xf32> to vector<1x128xf32>
    %cst_281 = arith.constant dense<0.000000e+00> : vector<128xf32>
    %573 = vector.multi_reduction <add>, %570, %cst_281 [0] : vector<16x128xf32> to vector<128xf32>
    %574 = vector.shape_cast %573 : vector<128xf32> to vector<1x128xf32>
    %cst_282 = arith.constant 1.600000e+01 : f32
    %575 = vector.broadcast %cst_282 : f32 to vector<1x128xf32>
    %576 = arith.divf %574, %575 : vector<1x128xf32>
    %577 = vector.broadcast %576 : vector<1x128xf32> to vector<16x128xf32>
    %578 = arith.subf %570, %577 : vector<16x128xf32>
    %579 = arith.mulf %578, %578 : vector<16x128xf32>
    %cst_283 = arith.constant dense<0.000000e+00> : vector<128xf32>
    %580 = vector.multi_reduction <add>, %579, %cst_283 [0] : vector<16x128xf32> to vector<128xf32>
    %581 = vector.shape_cast %580 : vector<128xf32> to vector<1x128xf32>
    %cst_284 = arith.constant 1.600000e+01 : f32
    %582 = vector.broadcast %cst_284 : f32 to vector<1x128xf32>
    %583 = arith.divf %581, %582 : vector<1x128xf32>
    %cst_285 = arith.constant 9.99999974E-6 : f32
    %584 = vector.broadcast %cst_285 : f32 to vector<1x128xf32>
    %585 = arith.addf %583, %584 : vector<1x128xf32>
    %586 = math.rsqrt %585 : vector<1x128xf32>
    %587 = arith.mulf %571, %586 : vector<1x128xf32>
    %588 = arith.mulf %576, %587 : vector<1x128xf32>
    %589 = arith.subf %572, %588 : vector<1x128xf32>
    %590 = vector.broadcast %587 : vector<1x128xf32> to vector<16x128xf32>
    %591 = arith.mulf %570, %590 : vector<16x128xf32>
    %592 = vector.broadcast %589 : vector<1x128xf32> to vector<16x128xf32>
    %593 = arith.addf %591, %592 : vector<16x128xf32>
    %cst_286 = arith.constant 0.000000e+00 : f32
    %594 = vector.broadcast %cst_286 : f32 to vector<16x128xf32>
    %595 = arith.maximumf %593, %594 : vector<16x128xf32>
    %c0_287 = arith.constant 0 : index
    %c0_288 = arith.constant 0 : index
    %596 = vector.load %arg36[%c0_287, %c0_288] : memref<3x32xf32, #tpu.memory_space<vmem>>, vector<3x32xf32>
    %c0_289 = arith.constant 0 : index
    %c0_290 = arith.constant 0 : index
    %597 = vector.load %arg35[%c0_289, %c0_290] : memref<128x64xf32, #tpu.memory_space<vmem>>, vector<128x64xf32>
    %cst_291 = arith.constant dense<0.000000e+00> : vector<16x64xf32>
    %598 = tpu.matmul %595, %597, %cst_291 {dimension_numbers = #tpu.dot_dimension_numbers<[1], [0], [0], [1], [0, 0, 1, 1], [], []>} : vector<16x128xf32>, vector<128x64xf32>, vector<16x64xf32> -> vector<16x64xf32>
    %599 = vector.extract_strided_slice %598 {offsets = [0, 0], sizes = [16, 32], strides = [1, 1]} : vector<16x64xf32> to vector<16x32xf32>
    %600 = vector.extract_strided_slice %598 {offsets = [0, 32], sizes = [16, 32], strides = [1, 1]} : vector<16x64xf32> to vector<16x32xf32>
    %cst_292 = arith.constant dense<0.000000e+00> : vector<16x32xf32>
    %601 = tpu.matmul %0, %600, %cst_292 {dimension_numbers = #tpu.dot_dimension_numbers<[1], [0], [0], [1], [0, 0, 1, 1], [], []>} : vector<16x16xf32>, vector<16x32xf32>, vector<16x32xf32> -> vector<16x32xf32>
    %602 = arith.addf %599, %601 : vector<16x32xf32>
    %603 = vector.extract_strided_slice %596 {offsets = [0, 0], sizes = [1, 32], strides = [1, 1]} : vector<3x32xf32> to vector<1x32xf32>
    %604 = vector.broadcast %603 : vector<1x32xf32> to vector<16x32xf32>
    %605 = arith.addf %602, %604 : vector<16x32xf32>
    %606 = vector.extract_strided_slice %596 {offsets = [1, 0], sizes = [1, 32], strides = [1, 1]} : vector<3x32xf32> to vector<1x32xf32>
    %607 = vector.extract_strided_slice %596 {offsets = [2, 0], sizes = [1, 32], strides = [1, 1]} : vector<3x32xf32> to vector<1x32xf32>
    %cst_293 = arith.constant dense<0.000000e+00> : vector<32xf32>
    %608 = vector.multi_reduction <add>, %605, %cst_293 [0] : vector<16x32xf32> to vector<32xf32>
    %609 = vector.shape_cast %608 : vector<32xf32> to vector<1x32xf32>
    %cst_294 = arith.constant 1.600000e+01 : f32
    %610 = vector.broadcast %cst_294 : f32 to vector<1x32xf32>
    %611 = arith.divf %609, %610 : vector<1x32xf32>
    %612 = vector.broadcast %611 : vector<1x32xf32> to vector<16x32xf32>
    %613 = arith.subf %605, %612 : vector<16x32xf32>
    %614 = arith.mulf %613, %613 : vector<16x32xf32>
    %cst_295 = arith.constant dense<0.000000e+00> : vector<32xf32>
    %615 = vector.multi_reduction <add>, %614, %cst_295 [0] : vector<16x32xf32> to vector<32xf32>
    %616 = vector.shape_cast %615 : vector<32xf32> to vector<1x32xf32>
    %cst_296 = arith.constant 1.600000e+01 : f32
    %617 = vector.broadcast %cst_296 : f32 to vector<1x32xf32>
    %618 = arith.divf %616, %617 : vector<1x32xf32>
    %cst_297 = arith.constant 9.99999974E-6 : f32
    %619 = vector.broadcast %cst_297 : f32 to vector<1x32xf32>
    %620 = arith.addf %618, %619 : vector<1x32xf32>
    %621 = math.rsqrt %620 : vector<1x32xf32>
    %622 = arith.mulf %606, %621 : vector<1x32xf32>
    %623 = arith.mulf %611, %622 : vector<1x32xf32>
    %624 = arith.subf %607, %623 : vector<1x32xf32>
    %625 = vector.broadcast %622 : vector<1x32xf32> to vector<16x32xf32>
    %626 = arith.mulf %605, %625 : vector<16x32xf32>
    %627 = vector.broadcast %624 : vector<1x32xf32> to vector<16x32xf32>
    %628 = arith.addf %626, %627 : vector<16x32xf32>
    %cst_298 = arith.constant 0.000000e+00 : f32
    %629 = vector.broadcast %cst_298 : f32 to vector<16x32xf32>
    %630 = arith.maximumf %628, %629 : vector<16x32xf32>
    %c0_299 = arith.constant 0 : index
    %c80_300 = arith.constant 80 : index
    %631 = vector.load %arg64[%c0_299, %c80_300] : memref<16x256xf32, #tpu.memory_space<vmem>>, vector<16x32xf32>
    tpu.vector_store %arg64[%c0_299, %c80_300], %630 {strides = array<i32>} : memref<16x256xf32, #tpu.memory_space<vmem>>, vector<16x32xf32>,
    %cst_301 = arith.constant dense<0.000000e+00> : vector<16x32xf32>
    %632 = tpu.matmul %0, %630, %cst_301 {dimension_numbers = #tpu.dot_dimension_numbers<[1], [0], [0], [1], [0, 0, 1, 1], [], []>} : vector<16x16xf32>, vector<16x32xf32>, vector<16x32xf32> -> vector<16x32xf32>
    %c0_302 = arith.constant 0 : index
    %c80_303 = arith.constant 80 : index
    %633 = vector.load %arg65[%c0_302, %c80_303] : memref<16x256xf32, #tpu.memory_space<vmem>>, vector<16x32xf32>
    tpu.vector_store %arg65[%c0_302, %c80_303], %632 {strides = array<i32>} : memref<16x256xf32, #tpu.memory_space<vmem>>, vector<16x32xf32>,
    %c0_304 = arith.constant 0 : index
    %c0_305 = arith.constant 0 : index
    %634 = vector.load %arg64[%c0_304, %c0_305] : memref<16x256xf32, #tpu.memory_space<vmem>>, vector<16x112xf32>
    %c0_306 = arith.constant 0 : index
    %c0_307 = arith.constant 0 : index
    %635 = vector.load %arg65[%c0_306, %c0_307] : memref<16x256xf32, #tpu.memory_space<vmem>>, vector<16x112xf32>
    %c0_308 = arith.constant 0 : index
    %c0_309 = arith.constant 0 : index
    %636 = vector.load %arg38[%c0_308, %c0_309] : memref<3x128xf32, #tpu.memory_space<vmem>>, vector<3x128xf32>
    %c0_310 = arith.constant 0 : index
    %c0_311 = arith.constant 0 : index
    %637 = vector.load %arg37[%c0_310, %c0_311] : memref<224x128xf32, #tpu.memory_space<vmem>>, vector<112x128xf32>
    %cst_312 = arith.constant dense<0.000000e+00> : vector<16x128xf32>
    %638 = tpu.matmul %634, %637, %cst_312 {dimension_numbers = #tpu.dot_dimension_numbers<[1], [0], [0], [1], [0, 0, 1, 1], [], []>} : vector<16x112xf32>, vector<112x128xf32>, vector<16x128xf32> -> vector<16x128xf32>
    %c112 = arith.constant 112 : index
    %c0_313 = arith.constant 0 : index
    %639 = vector.load %arg37[%c112, %c0_313] : memref<224x128xf32, #tpu.memory_space<vmem>>, vector<112x128xf32>
    %cst_314 = arith.constant dense<0.000000e+00> : vector<16x128xf32>
    %640 = tpu.matmul %635, %639, %cst_314 {dimension_numbers = #tpu.dot_dimension_numbers<[1], [0], [0], [1], [0, 0, 1, 1], [], []>} : vector<16x112xf32>, vector<112x128xf32>, vector<16x128xf32> -> vector<16x128xf32>
    %641 = arith.addf %638, %640 : vector<16x128xf32>
    %642 = vector.extract_strided_slice %636 {offsets = [0, 0], sizes = [1, 128], strides = [1, 1]} : vector<3x128xf32> to vector<1x128xf32>
    %643 = vector.broadcast %642 : vector<1x128xf32> to vector<16x128xf32>
    %644 = arith.addf %641, %643 : vector<16x128xf32>
    %645 = vector.extract_strided_slice %636 {offsets = [1, 0], sizes = [1, 128], strides = [1, 1]} : vector<3x128xf32> to vector<1x128xf32>
    %646 = vector.extract_strided_slice %636 {offsets = [2, 0], sizes = [1, 128], strides = [1, 1]} : vector<3x128xf32> to vector<1x128xf32>
    %cst_315 = arith.constant dense<0.000000e+00> : vector<128xf32>
    %647 = vector.multi_reduction <add>, %644, %cst_315 [0] : vector<16x128xf32> to vector<128xf32>
    %648 = vector.shape_cast %647 : vector<128xf32> to vector<1x128xf32>
    %cst_316 = arith.constant 1.600000e+01 : f32
    %649 = vector.broadcast %cst_316 : f32 to vector<1x128xf32>
    %650 = arith.divf %648, %649 : vector<1x128xf32>
    %651 = vector.broadcast %650 : vector<1x128xf32> to vector<16x128xf32>
    %652 = arith.subf %644, %651 : vector<16x128xf32>
    %653 = arith.mulf %652, %652 : vector<16x128xf32>
    %cst_317 = arith.constant dense<0.000000e+00> : vector<128xf32>
    %654 = vector.multi_reduction <add>, %653, %cst_317 [0] : vector<16x128xf32> to vector<128xf32>
    %655 = vector.shape_cast %654 : vector<128xf32> to vector<1x128xf32>
    %cst_318 = arith.constant 1.600000e+01 : f32
    %656 = vector.broadcast %cst_318 : f32 to vector<1x128xf32>
    %657 = arith.divf %655, %656 : vector<1x128xf32>
    %cst_319 = arith.constant 9.99999974E-6 : f32
    %658 = vector.broadcast %cst_319 : f32 to vector<1x128xf32>
    %659 = arith.addf %657, %658 : vector<1x128xf32>
    %660 = math.rsqrt %659 : vector<1x128xf32>
    %661 = arith.mulf %645, %660 : vector<1x128xf32>
    %662 = arith.mulf %650, %661 : vector<1x128xf32>
    %663 = arith.subf %646, %662 : vector<1x128xf32>
    %664 = vector.broadcast %661 : vector<1x128xf32> to vector<16x128xf32>
    %665 = arith.mulf %644, %664 : vector<16x128xf32>
    %666 = vector.broadcast %663 : vector<1x128xf32> to vector<16x128xf32>
    %667 = arith.addf %665, %666 : vector<16x128xf32>
    %cst_320 = arith.constant 0.000000e+00 : f32
    %668 = vector.broadcast %cst_320 : f32 to vector<16x128xf32>
    %669 = arith.maximumf %667, %668 : vector<16x128xf32>
    %c0_321 = arith.constant 0 : index
    %c0_322 = arith.constant 0 : index
    %670 = vector.load %arg40[%c0_321, %c0_322] : memref<3x32xf32, #tpu.memory_space<vmem>>, vector<3x32xf32>
    %c0_323 = arith.constant 0 : index
    %c0_324 = arith.constant 0 : index
    %671 = vector.load %arg39[%c0_323, %c0_324] : memref<128x64xf32, #tpu.memory_space<vmem>>, vector<128x64xf32>
    %cst_325 = arith.constant dense<0.000000e+00> : vector<16x64xf32>
    %672 = tpu.matmul %669, %671, %cst_325 {dimension_numbers = #tpu.dot_dimension_numbers<[1], [0], [0], [1], [0, 0, 1, 1], [], []>} : vector<16x128xf32>, vector<128x64xf32>, vector<16x64xf32> -> vector<16x64xf32>
    %673 = vector.extract_strided_slice %672 {offsets = [0, 0], sizes = [16, 32], strides = [1, 1]} : vector<16x64xf32> to vector<16x32xf32>
    %674 = vector.extract_strided_slice %672 {offsets = [0, 32], sizes = [16, 32], strides = [1, 1]} : vector<16x64xf32> to vector<16x32xf32>
    %cst_326 = arith.constant dense<0.000000e+00> : vector<16x32xf32>
    %675 = tpu.matmul %0, %674, %cst_326 {dimension_numbers = #tpu.dot_dimension_numbers<[1], [0], [0], [1], [0, 0, 1, 1], [], []>} : vector<16x16xf32>, vector<16x32xf32>, vector<16x32xf32> -> vector<16x32xf32>
    %676 = arith.addf %673, %675 : vector<16x32xf32>
    %677 = vector.extract_strided_slice %670 {offsets = [0, 0], sizes = [1, 32], strides = [1, 1]} : vector<3x32xf32> to vector<1x32xf32>
    %678 = vector.broadcast %677 : vector<1x32xf32> to vector<16x32xf32>
    %679 = arith.addf %676, %678 : vector<16x32xf32>
    %680 = vector.extract_strided_slice %670 {offsets = [1, 0], sizes = [1, 32], strides = [1, 1]} : vector<3x32xf32> to vector<1x32xf32>
    %681 = vector.extract_strided_slice %670 {offsets = [2, 0], sizes = [1, 32], strides = [1, 1]} : vector<3x32xf32> to vector<1x32xf32>
    %cst_327 = arith.constant dense<0.000000e+00> : vector<32xf32>
    %682 = vector.multi_reduction <add>, %679, %cst_327 [0] : vector<16x32xf32> to vector<32xf32>
    %683 = vector.shape_cast %682 : vector<32xf32> to vector<1x32xf32>
    %cst_328 = arith.constant 1.600000e+01 : f32
    %684 = vector.broadcast %cst_328 : f32 to vector<1x32xf32>
    %685 = arith.divf %683, %684 : vector<1x32xf32>
    %686 = vector.broadcast %685 : vector<1x32xf32> to vector<16x32xf32>
    %687 = arith.subf %679, %686 : vector<16x32xf32>
    %688 = arith.mulf %687, %687 : vector<16x32xf32>
    %cst_329 = arith.constant dense<0.000000e+00> : vector<32xf32>
    %689 = vector.multi_reduction <add>, %688, %cst_329 [0] : vector<16x32xf32> to vector<32xf32>
    %690 = vector.shape_cast %689 : vector<32xf32> to vector<1x32xf32>
    %cst_330 = arith.constant 1.600000e+01 : f32
    %691 = vector.broadcast %cst_330 : f32 to vector<1x32xf32>
    %692 = arith.divf %690, %691 : vector<1x32xf32>
    %cst_331 = arith.constant 9.99999974E-6 : f32
    %693 = vector.broadcast %cst_331 : f32 to vector<1x32xf32>
    %694 = arith.addf %692, %693 : vector<1x32xf32>
    %695 = math.rsqrt %694 : vector<1x32xf32>
    %696 = arith.mulf %680, %695 : vector<1x32xf32>
    %697 = arith.mulf %685, %696 : vector<1x32xf32>
    %698 = arith.subf %681, %697 : vector<1x32xf32>
    %699 = vector.broadcast %696 : vector<1x32xf32> to vector<16x32xf32>
    %700 = arith.mulf %679, %699 : vector<16x32xf32>
    %701 = vector.broadcast %698 : vector<1x32xf32> to vector<16x32xf32>
    %702 = arith.addf %700, %701 : vector<16x32xf32>
    %cst_332 = arith.constant 0.000000e+00 : f32
    %703 = vector.broadcast %cst_332 : f32 to vector<16x32xf32>
    %704 = arith.maximumf %702, %703 : vector<16x32xf32>
    %c0_333 = arith.constant 0 : index
    %c112_334 = arith.constant 112 : index
    %705 = vector.load %arg64[%c0_333, %c112_334] : memref<16x256xf32, #tpu.memory_space<vmem>>, vector<16x32xf32>
    tpu.vector_store %arg64[%c0_333, %c112_334], %704 {strides = array<i32>} : memref<16x256xf32, #tpu.memory_space<vmem>>, vector<16x32xf32>,
    %cst_335 = arith.constant dense<0.000000e+00> : vector<16x32xf32>
    %706 = tpu.matmul %0, %704, %cst_335 {dimension_numbers = #tpu.dot_dimension_numbers<[1], [0], [0], [1], [0, 0, 1, 1], [], []>} : vector<16x16xf32>, vector<16x32xf32>, vector<16x32xf32> -> vector<16x32xf32>
    %c0_336 = arith.constant 0 : index
    %c112_337 = arith.constant 112 : index
    %707 = vector.load %arg65[%c0_336, %c112_337] : memref<16x256xf32, #tpu.memory_space<vmem>>, vector<16x32xf32>
    tpu.vector_store %arg65[%c0_336, %c112_337], %706 {strides = array<i32>} : memref<16x256xf32, #tpu.memory_space<vmem>>, vector<16x32xf32>,
    %c0_338 = arith.constant 0 : index
    %c0_339 = arith.constant 0 : index
    %708 = vector.load %arg64[%c0_338, %c0_339] : memref<16x256xf32, #tpu.memory_space<vmem>>, vector<16x144xf32>
    %c0_340 = arith.constant 0 : index
    %c0_341 = arith.constant 0 : index
    %709 = vector.load %arg65[%c0_340, %c0_341] : memref<16x256xf32, #tpu.memory_space<vmem>>, vector<16x144xf32>
    %c0_342 = arith.constant 0 : index
    %c0_343 = arith.constant 0 : index
    %710 = vector.load %arg42[%c0_342, %c0_343] : memref<3x128xf32, #tpu.memory_space<vmem>>, vector<3x128xf32>
    %c0_344 = arith.constant 0 : index
    %c0_345 = arith.constant 0 : index
    %711 = vector.load %arg41[%c0_344, %c0_345] : memref<288x128xf32, #tpu.memory_space<vmem>>, vector<144x128xf32>
    %cst_346 = arith.constant dense<0.000000e+00> : vector<16x128xf32>
    %712 = tpu.matmul %708, %711, %cst_346 {dimension_numbers = #tpu.dot_dimension_numbers<[1], [0], [0], [1], [0, 0, 1, 1], [], []>} : vector<16x144xf32>, vector<144x128xf32>, vector<16x128xf32> -> vector<16x128xf32>
    %c144 = arith.constant 144 : index
    %c0_347 = arith.constant 0 : index
    %713 = vector.load %arg41[%c144, %c0_347] : memref<288x128xf32, #tpu.memory_space<vmem>>, vector<144x128xf32>
    %cst_348 = arith.constant dense<0.000000e+00> : vector<16x128xf32>
    %714 = tpu.matmul %709, %713, %cst_348 {dimension_numbers = #tpu.dot_dimension_numbers<[1], [0], [0], [1], [0, 0, 1, 1], [], []>} : vector<16x144xf32>, vector<144x128xf32>, vector<16x128xf32> -> vector<16x128xf32>
    %715 = arith.addf %712, %714 : vector<16x128xf32>
    %716 = vector.extract_strided_slice %710 {offsets = [0, 0], sizes = [1, 128], strides = [1, 1]} : vector<3x128xf32> to vector<1x128xf32>
    %717 = vector.broadcast %716 : vector<1x128xf32> to vector<16x128xf32>
    %718 = arith.addf %715, %717 : vector<16x128xf32>
    %719 = vector.extract_strided_slice %710 {offsets = [1, 0], sizes = [1, 128], strides = [1, 1]} : vector<3x128xf32> to vector<1x128xf32>
    %720 = vector.extract_strided_slice %710 {offsets = [2, 0], sizes = [1, 128], strides = [1, 1]} : vector<3x128xf32> to vector<1x128xf32>
    %cst_349 = arith.constant dense<0.000000e+00> : vector<128xf32>
    %721 = vector.multi_reduction <add>, %718, %cst_349 [0] : vector<16x128xf32> to vector<128xf32>
    %722 = vector.shape_cast %721 : vector<128xf32> to vector<1x128xf32>
    %cst_350 = arith.constant 1.600000e+01 : f32
    %723 = vector.broadcast %cst_350 : f32 to vector<1x128xf32>
    %724 = arith.divf %722, %723 : vector<1x128xf32>
    %725 = vector.broadcast %724 : vector<1x128xf32> to vector<16x128xf32>
    %726 = arith.subf %718, %725 : vector<16x128xf32>
    %727 = arith.mulf %726, %726 : vector<16x128xf32>
    %cst_351 = arith.constant dense<0.000000e+00> : vector<128xf32>
    %728 = vector.multi_reduction <add>, %727, %cst_351 [0] : vector<16x128xf32> to vector<128xf32>
    %729 = vector.shape_cast %728 : vector<128xf32> to vector<1x128xf32>
    %cst_352 = arith.constant 1.600000e+01 : f32
    %730 = vector.broadcast %cst_352 : f32 to vector<1x128xf32>
    %731 = arith.divf %729, %730 : vector<1x128xf32>
    %cst_353 = arith.constant 9.99999974E-6 : f32
    %732 = vector.broadcast %cst_353 : f32 to vector<1x128xf32>
    %733 = arith.addf %731, %732 : vector<1x128xf32>
    %734 = math.rsqrt %733 : vector<1x128xf32>
    %735 = arith.mulf %719, %734 : vector<1x128xf32>
    %736 = arith.mulf %724, %735 : vector<1x128xf32>
    %737 = arith.subf %720, %736 : vector<1x128xf32>
    %738 = vector.broadcast %735 : vector<1x128xf32> to vector<16x128xf32>
    %739 = arith.mulf %718, %738 : vector<16x128xf32>
    %740 = vector.broadcast %737 : vector<1x128xf32> to vector<16x128xf32>
    %741 = arith.addf %739, %740 : vector<16x128xf32>
    %cst_354 = arith.constant 0.000000e+00 : f32
    %742 = vector.broadcast %cst_354 : f32 to vector<16x128xf32>
    %743 = arith.maximumf %741, %742 : vector<16x128xf32>
    %c0_355 = arith.constant 0 : index
    %c0_356 = arith.constant 0 : index
    %744 = vector.load %arg44[%c0_355, %c0_356] : memref<3x32xf32, #tpu.memory_space<vmem>>, vector<3x32xf32>
    %c0_357 = arith.constant 0 : index
    %c0_358 = arith.constant 0 : index
    %745 = vector.load %arg43[%c0_357, %c0_358] : memref<128x64xf32, #tpu.memory_space<vmem>>, vector<128x64xf32>
    %cst_359 = arith.constant dense<0.000000e+00> : vector<16x64xf32>
    %746 = tpu.matmul %743, %745, %cst_359 {dimension_numbers = #tpu.dot_dimension_numbers<[1], [0], [0], [1], [0, 0, 1, 1], [], []>} : vector<16x128xf32>, vector<128x64xf32>, vector<16x64xf32> -> vector<16x64xf32>
    %747 = vector.extract_strided_slice %746 {offsets = [0, 0], sizes = [16, 32], strides = [1, 1]} : vector<16x64xf32> to vector<16x32xf32>
    %748 = vector.extract_strided_slice %746 {offsets = [0, 32], sizes = [16, 32], strides = [1, 1]} : vector<16x64xf32> to vector<16x32xf32>
    %cst_360 = arith.constant dense<0.000000e+00> : vector<16x32xf32>
    %749 = tpu.matmul %0, %748, %cst_360 {dimension_numbers = #tpu.dot_dimension_numbers<[1], [0], [0], [1], [0, 0, 1, 1], [], []>} : vector<16x16xf32>, vector<16x32xf32>, vector<16x32xf32> -> vector<16x32xf32>
    %750 = arith.addf %747, %749 : vector<16x32xf32>
    %751 = vector.extract_strided_slice %744 {offsets = [0, 0], sizes = [1, 32], strides = [1, 1]} : vector<3x32xf32> to vector<1x32xf32>
    %752 = vector.broadcast %751 : vector<1x32xf32> to vector<16x32xf32>
    %753 = arith.addf %750, %752 : vector<16x32xf32>
    %754 = vector.extract_strided_slice %744 {offsets = [1, 0], sizes = [1, 32], strides = [1, 1]} : vector<3x32xf32> to vector<1x32xf32>
    %755 = vector.extract_strided_slice %744 {offsets = [2, 0], sizes = [1, 32], strides = [1, 1]} : vector<3x32xf32> to vector<1x32xf32>
    %cst_361 = arith.constant dense<0.000000e+00> : vector<32xf32>
    %756 = vector.multi_reduction <add>, %753, %cst_361 [0] : vector<16x32xf32> to vector<32xf32>
    %757 = vector.shape_cast %756 : vector<32xf32> to vector<1x32xf32>
    %cst_362 = arith.constant 1.600000e+01 : f32
    %758 = vector.broadcast %cst_362 : f32 to vector<1x32xf32>
    %759 = arith.divf %757, %758 : vector<1x32xf32>
    %760 = vector.broadcast %759 : vector<1x32xf32> to vector<16x32xf32>
    %761 = arith.subf %753, %760 : vector<16x32xf32>
    %762 = arith.mulf %761, %761 : vector<16x32xf32>
    %cst_363 = arith.constant dense<0.000000e+00> : vector<32xf32>
    %763 = vector.multi_reduction <add>, %762, %cst_363 [0] : vector<16x32xf32> to vector<32xf32>
    %764 = vector.shape_cast %763 : vector<32xf32> to vector<1x32xf32>
    %cst_364 = arith.constant 1.600000e+01 : f32
    %765 = vector.broadcast %cst_364 : f32 to vector<1x32xf32>
    %766 = arith.divf %764, %765 : vector<1x32xf32>
    %cst_365 = arith.constant 9.99999974E-6 : f32
    %767 = vector.broadcast %cst_365 : f32 to vector<1x32xf32>
    %768 = arith.addf %766, %767 : vector<1x32xf32>
    %769 = math.rsqrt %768 : vector<1x32xf32>
    %770 = arith.mulf %754, %769 : vector<1x32xf32>
    %771 = arith.mulf %759, %770 : vector<1x32xf32>
    %772 = arith.subf %755, %771 : vector<1x32xf32>
    %773 = vector.broadcast %770 : vector<1x32xf32> to vector<16x32xf32>
    %774 = arith.mulf %753, %773 : vector<16x32xf32>
    %775 = vector.broadcast %772 : vector<1x32xf32> to vector<16x32xf32>
    %776 = arith.addf %774, %775 : vector<16x32xf32>
    %cst_366 = arith.constant 0.000000e+00 : f32
    %777 = vector.broadcast %cst_366 : f32 to vector<16x32xf32>
    %778 = arith.maximumf %776, %777 : vector<16x32xf32>
    %c0_367 = arith.constant 0 : index
    %c144_368 = arith.constant 144 : index
    %779 = vector.load %arg64[%c0_367, %c144_368] : memref<16x256xf32, #tpu.memory_space<vmem>>, vector<16x32xf32>
    tpu.vector_store %arg64[%c0_367, %c144_368], %778 {strides = array<i32>} : memref<16x256xf32, #tpu.memory_space<vmem>>, vector<16x32xf32>,
    %cst_369 = arith.constant dense<0.000000e+00> : vector<16x32xf32>
    %780 = tpu.matmul %0, %778, %cst_369 {dimension_numbers = #tpu.dot_dimension_numbers<[1], [0], [0], [1], [0, 0, 1, 1], [], []>} : vector<16x16xf32>, vector<16x32xf32>, vector<16x32xf32> -> vector<16x32xf32>
    %c0_370 = arith.constant 0 : index
    %c144_371 = arith.constant 144 : index
    %781 = vector.load %arg65[%c0_370, %c144_371] : memref<16x256xf32, #tpu.memory_space<vmem>>, vector<16x32xf32>
    tpu.vector_store %arg65[%c0_370, %c144_371], %780 {strides = array<i32>} : memref<16x256xf32, #tpu.memory_space<vmem>>, vector<16x32xf32>,
    %c0_372 = arith.constant 0 : index
    %c0_373 = arith.constant 0 : index
    %782 = vector.load %arg64[%c0_372, %c0_373] : memref<16x256xf32, #tpu.memory_space<vmem>>, vector<16x176xf32>
    %c0_374 = arith.constant 0 : index
    %c0_375 = arith.constant 0 : index
    %783 = vector.load %arg65[%c0_374, %c0_375] : memref<16x256xf32, #tpu.memory_space<vmem>>, vector<16x176xf32>
    %c0_376 = arith.constant 0 : index
    %c0_377 = arith.constant 0 : index
    %784 = vector.load %arg46[%c0_376, %c0_377] : memref<3x88xf32, #tpu.memory_space<vmem>>, vector<3x88xf32>
    %c0_378 = arith.constant 0 : index
    %c0_379 = arith.constant 0 : index
    %785 = vector.load %arg45[%c0_378, %c0_379] : memref<352x88xf32, #tpu.memory_space<vmem>>, vector<176x88xf32>
    %cst_380 = arith.constant dense<0.000000e+00> : vector<16x88xf32>
    %786 = tpu.matmul %782, %785, %cst_380 {dimension_numbers = #tpu.dot_dimension_numbers<[1], [0], [0], [1], [0, 0, 1, 1], [], []>} : vector<16x176xf32>, vector<176x88xf32>, vector<16x88xf32> -> vector<16x88xf32>
    %c176 = arith.constant 176 : index
    %c0_381 = arith.constant 0 : index
    %787 = vector.load %arg45[%c176, %c0_381] : memref<352x88xf32, #tpu.memory_space<vmem>>, vector<176x88xf32>
    %cst_382 = arith.constant dense<0.000000e+00> : vector<16x88xf32>
    %788 = tpu.matmul %783, %787, %cst_382 {dimension_numbers = #tpu.dot_dimension_numbers<[1], [0], [0], [1], [0, 0, 1, 1], [], []>} : vector<16x176xf32>, vector<176x88xf32>, vector<16x88xf32> -> vector<16x88xf32>
    %789 = arith.addf %786, %788 : vector<16x88xf32>
    %790 = vector.extract_strided_slice %784 {offsets = [0, 0], sizes = [1, 88], strides = [1, 1]} : vector<3x88xf32> to vector<1x88xf32>
    %791 = vector.broadcast %790 : vector<1x88xf32> to vector<16x88xf32>
    %792 = arith.addf %789, %791 : vector<16x88xf32>
    %793 = vector.extract_strided_slice %784 {offsets = [1, 0], sizes = [1, 88], strides = [1, 1]} : vector<3x88xf32> to vector<1x88xf32>
    %794 = vector.extract_strided_slice %784 {offsets = [2, 0], sizes = [1, 88], strides = [1, 1]} : vector<3x88xf32> to vector<1x88xf32>
    %cst_383 = arith.constant dense<0.000000e+00> : vector<88xf32>
    %795 = vector.multi_reduction <add>, %792, %cst_383 [0] : vector<16x88xf32> to vector<88xf32>
    %796 = vector.shape_cast %795 : vector<88xf32> to vector<1x88xf32>
    %cst_384 = arith.constant 1.600000e+01 : f32
    %797 = vector.broadcast %cst_384 : f32 to vector<1x88xf32>
    %798 = arith.divf %796, %797 : vector<1x88xf32>
    %799 = vector.broadcast %798 : vector<1x88xf32> to vector<16x88xf32>
    %800 = arith.subf %792, %799 : vector<16x88xf32>
    %801 = arith.mulf %800, %800 : vector<16x88xf32>
    %cst_385 = arith.constant dense<0.000000e+00> : vector<88xf32>
    %802 = vector.multi_reduction <add>, %801, %cst_385 [0] : vector<16x88xf32> to vector<88xf32>
    %803 = vector.shape_cast %802 : vector<88xf32> to vector<1x88xf32>
    %cst_386 = arith.constant 1.600000e+01 : f32
    %804 = vector.broadcast %cst_386 : f32 to vector<1x88xf32>
    %805 = arith.divf %803, %804 : vector<1x88xf32>
    %cst_387 = arith.constant 9.99999974E-6 : f32
    %806 = vector.broadcast %cst_387 : f32 to vector<1x88xf32>
    %807 = arith.addf %805, %806 : vector<1x88xf32>
    %808 = math.rsqrt %807 : vector<1x88xf32>
    %809 = arith.mulf %793, %808 : vector<1x88xf32>
    %810 = arith.mulf %798, %809 : vector<1x88xf32>
    %811 = arith.subf %794, %810 : vector<1x88xf32>
    %812 = vector.broadcast %809 : vector<1x88xf32> to vector<16x88xf32>
    %813 = arith.mulf %792, %812 : vector<16x88xf32>
    %814 = vector.broadcast %811 : vector<1x88xf32> to vector<16x88xf32>
    %815 = arith.addf %813, %814 : vector<16x88xf32>
    %cst_388 = arith.constant 0.000000e+00 : f32
    %816 = vector.broadcast %cst_388 : f32 to vector<16x88xf32>
    %817 = arith.maximumf %815, %816 : vector<16x88xf32>
    %c0_389 = arith.constant 0 : index
    %c0_390 = arith.constant 0 : index
    %818 = vector.load %arg64[%c0_389, %c0_390] : memref<16x256xf32, #tpu.memory_space<vmem>>, vector<16x88xf32>
    tpu.vector_store %arg64[%c0_389, %c0_390], %817 {strides = array<i32>} : memref<16x256xf32, #tpu.memory_space<vmem>>, vector<16x88xf32>,
    %cst_391 = arith.constant dense<0.000000e+00> : vector<16x88xf32>
    %819 = tpu.matmul %0, %817, %cst_391 {dimension_numbers = #tpu.dot_dimension_numbers<[1], [0], [0], [1], [0, 0, 1, 1], [], []>} : vector<16x16xf32>, vector<16x88xf32>, vector<16x88xf32> -> vector<16x88xf32>
    %c0_392 = arith.constant 0 : index
    %c0_393 = arith.constant 0 : index
    %820 = vector.load %arg65[%c0_392, %c0_393] : memref<16x256xf32, #tpu.memory_space<vmem>>, vector<16x88xf32>
    tpu.vector_store %arg65[%c0_392, %c0_393], %819 {strides = array<i32>} : memref<16x256xf32, #tpu.memory_space<vmem>>, vector<16x88xf32>,
    %c0_394 = arith.constant 0 : index
    %c0_395 = arith.constant 0 : index
    %821 = vector.load %arg64[%c0_394, %c0_395] : memref<16x256xf32, #tpu.memory_space<vmem>>, vector<16x88xf32>
    %c0_396 = arith.constant 0 : index
    %c0_397 = arith.constant 0 : index
    %822 = vector.load %arg65[%c0_396, %c0_397] : memref<16x256xf32, #tpu.memory_space<vmem>>, vector<16x88xf32>
    %c0_398 = arith.constant 0 : index
    %c0_399 = arith.constant 0 : index
    %823 = vector.load %arg48[%c0_398, %c0_399] : memref<3x128xf32, #tpu.memory_space<vmem>>, vector<3x128xf32>
    %c0_400 = arith.constant 0 : index
    %c0_401 = arith.constant 0 : index
    %824 = vector.load %arg47[%c0_400, %c0_401] : memref<176x128xf32, #tpu.memory_space<vmem>>, vector<88x128xf32>
    %cst_402 = arith.constant dense<0.000000e+00> : vector<16x128xf32>
    %825 = tpu.matmul %821, %824, %cst_402 {dimension_numbers = #tpu.dot_dimension_numbers<[1], [0], [0], [1], [0, 0, 1, 1], [], []>} : vector<16x88xf32>, vector<88x128xf32>, vector<16x128xf32> -> vector<16x128xf32>
    %c88 = arith.constant 88 : index
    %c0_403 = arith.constant 0 : index
    %826 = vector.load %arg47[%c88, %c0_403] : memref<176x128xf32, #tpu.memory_space<vmem>>, vector<88x128xf32>
    %cst_404 = arith.constant dense<0.000000e+00> : vector<16x128xf32>
    %827 = tpu.matmul %822, %826, %cst_404 {dimension_numbers = #tpu.dot_dimension_numbers<[1], [0], [0], [1], [0, 0, 1, 1], [], []>} : vector<16x88xf32>, vector<88x128xf32>, vector<16x128xf32> -> vector<16x128xf32>
    %828 = arith.addf %825, %827 : vector<16x128xf32>
    %829 = vector.extract_strided_slice %823 {offsets = [0, 0], sizes = [1, 128], strides = [1, 1]} : vector<3x128xf32> to vector<1x128xf32>
    %830 = vector.broadcast %829 : vector<1x128xf32> to vector<16x128xf32>
    %831 = arith.addf %828, %830 : vector<16x128xf32>
    %832 = vector.extract_strided_slice %823 {offsets = [1, 0], sizes = [1, 128], strides = [1, 1]} : vector<3x128xf32> to vector<1x128xf32>
    %833 = vector.extract_strided_slice %823 {offsets = [2, 0], sizes = [1, 128], strides = [1, 1]} : vector<3x128xf32> to vector<1x128xf32>
    %cst_405 = arith.constant dense<0.000000e+00> : vector<128xf32>
    %834 = vector.multi_reduction <add>, %831, %cst_405 [0] : vector<16x128xf32> to vector<128xf32>
    %835 = vector.shape_cast %834 : vector<128xf32> to vector<1x128xf32>
    %cst_406 = arith.constant 1.600000e+01 : f32
    %836 = vector.broadcast %cst_406 : f32 to vector<1x128xf32>
    %837 = arith.divf %835, %836 : vector<1x128xf32>
    %838 = vector.broadcast %837 : vector<1x128xf32> to vector<16x128xf32>
    %839 = arith.subf %831, %838 : vector<16x128xf32>
    %840 = arith.mulf %839, %839 : vector<16x128xf32>
    %cst_407 = arith.constant dense<0.000000e+00> : vector<128xf32>
    %841 = vector.multi_reduction <add>, %840, %cst_407 [0] : vector<16x128xf32> to vector<128xf32>
    %842 = vector.shape_cast %841 : vector<128xf32> to vector<1x128xf32>
    %cst_408 = arith.constant 1.600000e+01 : f32
    %843 = vector.broadcast %cst_408 : f32 to vector<1x128xf32>
    %844 = arith.divf %842, %843 : vector<1x128xf32>
    %cst_409 = arith.constant 9.99999974E-6 : f32
    %845 = vector.broadcast %cst_409 : f32 to vector<1x128xf32>
    %846 = arith.addf %844, %845 : vector<1x128xf32>
    %847 = math.rsqrt %846 : vector<1x128xf32>
    %848 = arith.mulf %832, %847 : vector<1x128xf32>
    %849 = arith.mulf %837, %848 : vector<1x128xf32>
    %850 = arith.subf %833, %849 : vector<1x128xf32>
    %851 = vector.broadcast %848 : vector<1x128xf32> to vector<16x128xf32>
    %852 = arith.mulf %831, %851 : vector<16x128xf32>
    %853 = vector.broadcast %850 : vector<1x128xf32> to vector<16x128xf32>
    %854 = arith.addf %852, %853 : vector<16x128xf32>
    %cst_410 = arith.constant 0.000000e+00 : f32
    %855 = vector.broadcast %cst_410 : f32 to vector<16x128xf32>
    %856 = arith.maximumf %854, %855 : vector<16x128xf32>
    %c0_411 = arith.constant 0 : index
    %c0_412 = arith.constant 0 : index
    %857 = vector.load %arg50[%c0_411, %c0_412] : memref<3x32xf32, #tpu.memory_space<vmem>>, vector<3x32xf32>
    %c0_413 = arith.constant 0 : index
    %c0_414 = arith.constant 0 : index
    %858 = vector.load %arg49[%c0_413, %c0_414] : memref<128x64xf32, #tpu.memory_space<vmem>>, vector<128x64xf32>
    %cst_415 = arith.constant dense<0.000000e+00> : vector<16x64xf32>
    %859 = tpu.matmul %856, %858, %cst_415 {dimension_numbers = #tpu.dot_dimension_numbers<[1], [0], [0], [1], [0, 0, 1, 1], [], []>} : vector<16x128xf32>, vector<128x64xf32>, vector<16x64xf32> -> vector<16x64xf32>
    %860 = vector.extract_strided_slice %859 {offsets = [0, 0], sizes = [16, 32], strides = [1, 1]} : vector<16x64xf32> to vector<16x32xf32>
    %861 = vector.extract_strided_slice %859 {offsets = [0, 32], sizes = [16, 32], strides = [1, 1]} : vector<16x64xf32> to vector<16x32xf32>
    %cst_416 = arith.constant dense<0.000000e+00> : vector<16x32xf32>
    %862 = tpu.matmul %0, %861, %cst_416 {dimension_numbers = #tpu.dot_dimension_numbers<[1], [0], [0], [1], [0, 0, 1, 1], [], []>} : vector<16x16xf32>, vector<16x32xf32>, vector<16x32xf32> -> vector<16x32xf32>
    %863 = arith.addf %860, %862 : vector<16x32xf32>
    %864 = vector.extract_strided_slice %857 {offsets = [0, 0], sizes = [1, 32], strides = [1, 1]} : vector<3x32xf32> to vector<1x32xf32>
    %865 = vector.broadcast %864 : vector<1x32xf32> to vector<16x32xf32>
    %866 = arith.addf %863, %865 : vector<16x32xf32>
    %867 = vector.extract_strided_slice %857 {offsets = [1, 0], sizes = [1, 32], strides = [1, 1]} : vector<3x32xf32> to vector<1x32xf32>
    %868 = vector.extract_strided_slice %857 {offsets = [2, 0], sizes = [1, 32], strides = [1, 1]} : vector<3x32xf32> to vector<1x32xf32>
    %cst_417 = arith.constant dense<0.000000e+00> : vector<32xf32>
    %869 = vector.multi_reduction <add>, %866, %cst_417 [0] : vector<16x32xf32> to vector<32xf32>
    %870 = vector.shape_cast %869 : vector<32xf32> to vector<1x32xf32>
    %cst_418 = arith.constant 1.600000e+01 : f32
    %871 = vector.broadcast %cst_418 : f32 to vector<1x32xf32>
    %872 = arith.divf %870, %871 : vector<1x32xf32>
    %873 = vector.broadcast %872 : vector<1x32xf32> to vector<16x32xf32>
    %874 = arith.subf %866, %873 : vector<16x32xf32>
    %875 = arith.mulf %874, %874 : vector<16x32xf32>
    %cst_419 = arith.constant dense<0.000000e+00> : vector<32xf32>
    %876 = vector.multi_reduction <add>, %875, %cst_419 [0] : vector<16x32xf32> to vector<32xf32>
    %877 = vector.shape_cast %876 : vector<32xf32> to vector<1x32xf32>
    %cst_420 = arith.constant 1.600000e+01 : f32
    %878 = vector.broadcast %cst_420 : f32 to vector<1x32xf32>
    %879 = arith.divf %877, %878 : vector<1x32xf32>
    %cst_421 = arith.constant 9.99999974E-6 : f32
    %880 = vector.broadcast %cst_421 : f32 to vector<1x32xf32>
    %881 = arith.addf %879, %880 : vector<1x32xf32>
    %882 = math.rsqrt %881 : vector<1x32xf32>
    %883 = arith.mulf %867, %882 : vector<1x32xf32>
    %884 = arith.mulf %872, %883 : vector<1x32xf32>
    %885 = arith.subf %868, %884 : vector<1x32xf32>
    %886 = vector.broadcast %883 : vector<1x32xf32> to vector<16x32xf32>
    %887 = arith.mulf %866, %886 : vector<16x32xf32>
    %888 = vector.broadcast %885 : vector<1x32xf32> to vector<16x32xf32>
    %889 = arith.addf %887, %888 : vector<16x32xf32>
    %cst_422 = arith.constant 0.000000e+00 : f32
    %890 = vector.broadcast %cst_422 : f32 to vector<16x32xf32>
    %891 = arith.maximumf %889, %890 : vector<16x32xf32>
    %c0_423 = arith.constant 0 : index
    %c88_424 = arith.constant 88 : index
    %892 = vector.load %arg64[%c0_423, %c88_424] : memref<16x256xf32, #tpu.memory_space<vmem>>, vector<16x32xf32>
    tpu.vector_store %arg64[%c0_423, %c88_424], %891 {strides = array<i32>} : memref<16x256xf32, #tpu.memory_space<vmem>>, vector<16x32xf32>,
    %cst_425 = arith.constant dense<0.000000e+00> : vector<16x32xf32>
    %893 = tpu.matmul %0, %891, %cst_425 {dimension_numbers = #tpu.dot_dimension_numbers<[1], [0], [0], [1], [0, 0, 1, 1], [], []>} : vector<16x16xf32>, vector<16x32xf32>, vector<16x32xf32> -> vector<16x32xf32>
    %c0_426 = arith.constant 0 : index
    %c88_427 = arith.constant 88 : index
    %894 = vector.load %arg65[%c0_426, %c88_427] : memref<16x256xf32, #tpu.memory_space<vmem>>, vector<16x32xf32>
    tpu.vector_store %arg65[%c0_426, %c88_427], %893 {strides = array<i32>} : memref<16x256xf32, #tpu.memory_space<vmem>>, vector<16x32xf32>,
    %c0_428 = arith.constant 0 : index
    %c0_429 = arith.constant 0 : index
    %895 = vector.load %arg64[%c0_428, %c0_429] : memref<16x256xf32, #tpu.memory_space<vmem>>, vector<16x120xf32>
    %c0_430 = arith.constant 0 : index
    %c0_431 = arith.constant 0 : index
    %896 = vector.load %arg65[%c0_430, %c0_431] : memref<16x256xf32, #tpu.memory_space<vmem>>, vector<16x120xf32>
    %c0_432 = arith.constant 0 : index
    %c0_433 = arith.constant 0 : index
    %897 = vector.load %arg52[%c0_432, %c0_433] : memref<3x128xf32, #tpu.memory_space<vmem>>, vector<3x128xf32>
    %c0_434 = arith.constant 0 : index
    %c0_435 = arith.constant 0 : index
    %898 = vector.load %arg51[%c0_434, %c0_435] : memref<240x128xf32, #tpu.memory_space<vmem>>, vector<120x128xf32>
    %cst_436 = arith.constant dense<0.000000e+00> : vector<16x128xf32>
    %899 = tpu.matmul %895, %898, %cst_436 {dimension_numbers = #tpu.dot_dimension_numbers<[1], [0], [0], [1], [0, 0, 1, 1], [], []>} : vector<16x120xf32>, vector<120x128xf32>, vector<16x128xf32> -> vector<16x128xf32>
    %c120 = arith.constant 120 : index
    %c0_437 = arith.constant 0 : index
    %900 = vector.load %arg51[%c120, %c0_437] : memref<240x128xf32, #tpu.memory_space<vmem>>, vector<120x128xf32>
    %cst_438 = arith.constant dense<0.000000e+00> : vector<16x128xf32>
    %901 = tpu.matmul %896, %900, %cst_438 {dimension_numbers = #tpu.dot_dimension_numbers<[1], [0], [0], [1], [0, 0, 1, 1], [], []>} : vector<16x120xf32>, vector<120x128xf32>, vector<16x128xf32> -> vector<16x128xf32>
    %902 = arith.addf %899, %901 : vector<16x128xf32>
    %903 = vector.extract_strided_slice %897 {offsets = [0, 0], sizes = [1, 128], strides = [1, 1]} : vector<3x128xf32> to vector<1x128xf32>
    %904 = vector.broadcast %903 : vector<1x128xf32> to vector<16x128xf32>
    %905 = arith.addf %902, %904 : vector<16x128xf32>
    %906 = vector.extract_strided_slice %897 {offsets = [1, 0], sizes = [1, 128], strides = [1, 1]} : vector<3x128xf32> to vector<1x128xf32>
    %907 = vector.extract_strided_slice %897 {offsets = [2, 0], sizes = [1, 128], strides = [1, 1]} : vector<3x128xf32> to vector<1x128xf32>
    %cst_439 = arith.constant dense<0.000000e+00> : vector<128xf32>
    %908 = vector.multi_reduction <add>, %905, %cst_439 [0] : vector<16x128xf32> to vector<128xf32>
    %909 = vector.shape_cast %908 : vector<128xf32> to vector<1x128xf32>
    %cst_440 = arith.constant 1.600000e+01 : f32
    %910 = vector.broadcast %cst_440 : f32 to vector<1x128xf32>
    %911 = arith.divf %909, %910 : vector<1x128xf32>
    %912 = vector.broadcast %911 : vector<1x128xf32> to vector<16x128xf32>
    %913 = arith.subf %905, %912 : vector<16x128xf32>
    %914 = arith.mulf %913, %913 : vector<16x128xf32>
    %cst_441 = arith.constant dense<0.000000e+00> : vector<128xf32>
    %915 = vector.multi_reduction <add>, %914, %cst_441 [0] : vector<16x128xf32> to vector<128xf32>
    %916 = vector.shape_cast %915 : vector<128xf32> to vector<1x128xf32>
    %cst_442 = arith.constant 1.600000e+01 : f32
    %917 = vector.broadcast %cst_442 : f32 to vector<1x128xf32>
    %918 = arith.divf %916, %917 : vector<1x128xf32>
    %cst_443 = arith.constant 9.99999974E-6 : f32
    %919 = vector.broadcast %cst_443 : f32 to vector<1x128xf32>
    %920 = arith.addf %918, %919 : vector<1x128xf32>
    %921 = math.rsqrt %920 : vector<1x128xf32>
    %922 = arith.mulf %906, %921 : vector<1x128xf32>
    %923 = arith.mulf %911, %922 : vector<1x128xf32>
    %924 = arith.subf %907, %923 : vector<1x128xf32>
    %925 = vector.broadcast %922 : vector<1x128xf32> to vector<16x128xf32>
    %926 = arith.mulf %905, %925 : vector<16x128xf32>
    %927 = vector.broadcast %924 : vector<1x128xf32> to vector<16x128xf32>
    %928 = arith.addf %926, %927 : vector<16x128xf32>
    %cst_444 = arith.constant 0.000000e+00 : f32
    %929 = vector.broadcast %cst_444 : f32 to vector<16x128xf32>
    %930 = arith.maximumf %928, %929 : vector<16x128xf32>
    %c0_445 = arith.constant 0 : index
    %c0_446 = arith.constant 0 : index
    %931 = vector.load %arg54[%c0_445, %c0_446] : memref<3x32xf32, #tpu.memory_space<vmem>>, vector<3x32xf32>
    %c0_447 = arith.constant 0 : index
    %c0_448 = arith.constant 0 : index
    %932 = vector.load %arg53[%c0_447, %c0_448] : memref<128x64xf32, #tpu.memory_space<vmem>>, vector<128x64xf32>
    %cst_449 = arith.constant dense<0.000000e+00> : vector<16x64xf32>
    %933 = tpu.matmul %930, %932, %cst_449 {dimension_numbers = #tpu.dot_dimension_numbers<[1], [0], [0], [1], [0, 0, 1, 1], [], []>} : vector<16x128xf32>, vector<128x64xf32>, vector<16x64xf32> -> vector<16x64xf32>
    %934 = vector.extract_strided_slice %933 {offsets = [0, 0], sizes = [16, 32], strides = [1, 1]} : vector<16x64xf32> to vector<16x32xf32>
    %935 = vector.extract_strided_slice %933 {offsets = [0, 32], sizes = [16, 32], strides = [1, 1]} : vector<16x64xf32> to vector<16x32xf32>
    %cst_450 = arith.constant dense<0.000000e+00> : vector<16x32xf32>
    %936 = tpu.matmul %0, %935, %cst_450 {dimension_numbers = #tpu.dot_dimension_numbers<[1], [0], [0], [1], [0, 0, 1, 1], [], []>} : vector<16x16xf32>, vector<16x32xf32>, vector<16x32xf32> -> vector<16x32xf32>
    %937 = arith.addf %934, %936 : vector<16x32xf32>
    %938 = vector.extract_strided_slice %931 {offsets = [0, 0], sizes = [1, 32], strides = [1, 1]} : vector<3x32xf32> to vector<1x32xf32>
    %939 = vector.broadcast %938 : vector<1x32xf32> to vector<16x32xf32>
    %940 = arith.addf %937, %939 : vector<16x32xf32>
    %941 = vector.extract_strided_slice %931 {offsets = [1, 0], sizes = [1, 32], strides = [1, 1]} : vector<3x32xf32> to vector<1x32xf32>
    %942 = vector.extract_strided_slice %931 {offsets = [2, 0], sizes = [1, 32], strides = [1, 1]} : vector<3x32xf32> to vector<1x32xf32>
    %cst_451 = arith.constant dense<0.000000e+00> : vector<32xf32>
    %943 = vector.multi_reduction <add>, %940, %cst_451 [0] : vector<16x32xf32> to vector<32xf32>
    %944 = vector.shape_cast %943 : vector<32xf32> to vector<1x32xf32>
    %cst_452 = arith.constant 1.600000e+01 : f32
    %945 = vector.broadcast %cst_452 : f32 to vector<1x32xf32>
    %946 = arith.divf %944, %945 : vector<1x32xf32>
    %947 = vector.broadcast %946 : vector<1x32xf32> to vector<16x32xf32>
    %948 = arith.subf %940, %947 : vector<16x32xf32>
    %949 = arith.mulf %948, %948 : vector<16x32xf32>
    %cst_453 = arith.constant dense<0.000000e+00> : vector<32xf32>
    %950 = vector.multi_reduction <add>, %949, %cst_453 [0] : vector<16x32xf32> to vector<32xf32>
    %951 = vector.shape_cast %950 : vector<32xf32> to vector<1x32xf32>
    %cst_454 = arith.constant 1.600000e+01 : f32
    %952 = vector.broadcast %cst_454 : f32 to vector<1x32xf32>
    %953 = arith.divf %951, %952 : vector<1x32xf32>
    %cst_455 = arith.constant 9.99999974E-6 : f32
    %954 = vector.broadcast %cst_455 : f32 to vector<1x32xf32>
    %955 = arith.addf %953, %954 : vector<1x32xf32>
    %956 = math.rsqrt %955 : vector<1x32xf32>
    %957 = arith.mulf %941, %956 : vector<1x32xf32>
    %958 = arith.mulf %946, %957 : vector<1x32xf32>
    %959 = arith.subf %942, %958 : vector<1x32xf32>
    %960 = vector.broadcast %957 : vector<1x32xf32> to vector<16x32xf32>
    %961 = arith.mulf %940, %960 : vector<16x32xf32>
    %962 = vector.broadcast %959 : vector<1x32xf32> to vector<16x32xf32>
    %963 = arith.addf %961, %962 : vector<16x32xf32>
    %cst_456 = arith.constant 0.000000e+00 : f32
    %964 = vector.broadcast %cst_456 : f32 to vector<16x32xf32>
    %965 = arith.maximumf %963, %964 : vector<16x32xf32>
    %c0_457 = arith.constant 0 : index
    %c120_458 = arith.constant 120 : index
    %966 = vector.load %arg64[%c0_457, %c120_458] : memref<16x256xf32, #tpu.memory_space<vmem>>, vector<16x32xf32>
    tpu.vector_store %arg64[%c0_457, %c120_458], %965 {strides = array<i32>} : memref<16x256xf32, #tpu.memory_space<vmem>>, vector<16x32xf32>,
    %cst_459 = arith.constant dense<0.000000e+00> : vector<16x32xf32>
    %967 = tpu.matmul %0, %965, %cst_459 {dimension_numbers = #tpu.dot_dimension_numbers<[1], [0], [0], [1], [0, 0, 1, 1], [], []>} : vector<16x16xf32>, vector<16x32xf32>, vector<16x32xf32> -> vector<16x32xf32>
    %c0_460 = arith.constant 0 : index
    %c120_461 = arith.constant 120 : index
    %968 = vector.load %arg65[%c0_460, %c120_461] : memref<16x256xf32, #tpu.memory_space<vmem>>, vector<16x32xf32>
    tpu.vector_store %arg65[%c0_460, %c120_461], %967 {strides = array<i32>} : memref<16x256xf32, #tpu.memory_space<vmem>>, vector<16x32xf32>,
    %c0_462 = arith.constant 0 : index
    %c0_463 = arith.constant 0 : index
    %969 = vector.load %arg64[%c0_462, %c0_463] : memref<16x256xf32, #tpu.memory_space<vmem>>, vector<16x152xf32>
    %c0_464 = arith.constant 0 : index
    %c0_465 = arith.constant 0 : index
    %970 = vector.load %arg65[%c0_464, %c0_465] : memref<16x256xf32, #tpu.memory_space<vmem>>, vector<16x152xf32>
    %c0_466 = arith.constant 0 : index
    %c0_467 = arith.constant 0 : index
    %971 = vector.load %arg56[%c0_466, %c0_467] : memref<3x128xf32, #tpu.memory_space<vmem>>, vector<3x128xf32>
    %c0_468 = arith.constant 0 : index
    %c0_469 = arith.constant 0 : index
    %972 = vector.load %arg55[%c0_468, %c0_469] : memref<304x128xf32, #tpu.memory_space<vmem>>, vector<152x128xf32>
    %cst_470 = arith.constant dense<0.000000e+00> : vector<16x128xf32>
    %973 = tpu.matmul %969, %972, %cst_470 {dimension_numbers = #tpu.dot_dimension_numbers<[1], [0], [0], [1], [0, 0, 1, 1], [], []>} : vector<16x152xf32>, vector<152x128xf32>, vector<16x128xf32> -> vector<16x128xf32>
    %c152 = arith.constant 152 : index
    %c0_471 = arith.constant 0 : index
    %974 = vector.load %arg55[%c152, %c0_471] : memref<304x128xf32, #tpu.memory_space<vmem>>, vector<152x128xf32>
    %cst_472 = arith.constant dense<0.000000e+00> : vector<16x128xf32>
    %975 = tpu.matmul %970, %974, %cst_472 {dimension_numbers = #tpu.dot_dimension_numbers<[1], [0], [0], [1], [0, 0, 1, 1], [], []>} : vector<16x152xf32>, vector<152x128xf32>, vector<16x128xf32> -> vector<16x128xf32>
    %976 = arith.addf %973, %975 : vector<16x128xf32>
    %977 = vector.extract_strided_slice %971 {offsets = [0, 0], sizes = [1, 128], strides = [1, 1]} : vector<3x128xf32> to vector<1x128xf32>
    %978 = vector.broadcast %977 : vector<1x128xf32> to vector<16x128xf32>
    %979 = arith.addf %976, %978 : vector<16x128xf32>
    %980 = vector.extract_strided_slice %971 {offsets = [1, 0], sizes = [1, 128], strides = [1, 1]} : vector<3x128xf32> to vector<1x128xf32>
    %981 = vector.extract_strided_slice %971 {offsets = [2, 0], sizes = [1, 128], strides = [1, 1]} : vector<3x128xf32> to vector<1x128xf32>
    %cst_473 = arith.constant dense<0.000000e+00> : vector<128xf32>
    %982 = vector.multi_reduction <add>, %979, %cst_473 [0] : vector<16x128xf32> to vector<128xf32>
    %983 = vector.shape_cast %982 : vector<128xf32> to vector<1x128xf32>
    %cst_474 = arith.constant 1.600000e+01 : f32
    %984 = vector.broadcast %cst_474 : f32 to vector<1x128xf32>
    %985 = arith.divf %983, %984 : vector<1x128xf32>
    %986 = vector.broadcast %985 : vector<1x128xf32> to vector<16x128xf32>
    %987 = arith.subf %979, %986 : vector<16x128xf32>
    %988 = arith.mulf %987, %987 : vector<16x128xf32>
    %cst_475 = arith.constant dense<0.000000e+00> : vector<128xf32>
    %989 = vector.multi_reduction <add>, %988, %cst_475 [0] : vector<16x128xf32> to vector<128xf32>
    %990 = vector.shape_cast %989 : vector<128xf32> to vector<1x128xf32>
    %cst_476 = arith.constant 1.600000e+01 : f32
    %991 = vector.broadcast %cst_476 : f32 to vector<1x128xf32>
    %992 = arith.divf %990, %991 : vector<1x128xf32>
    %cst_477 = arith.constant 9.99999974E-6 : f32
    %993 = vector.broadcast %cst_477 : f32 to vector<1x128xf32>
    %994 = arith.addf %992, %993 : vector<1x128xf32>
    %995 = math.rsqrt %994 : vector<1x128xf32>
    %996 = arith.mulf %980, %995 : vector<1x128xf32>
    %997 = arith.mulf %985, %996 : vector<1x128xf32>
    %998 = arith.subf %981, %997 : vector<1x128xf32>
    %999 = vector.broadcast %996 : vector<1x128xf32> to vector<16x128xf32>
    %1000 = arith.mulf %979, %999 : vector<16x128xf32>
    %1001 = vector.broadcast %998 : vector<1x128xf32> to vector<16x128xf32>
    %1002 = arith.addf %1000, %1001 : vector<16x128xf32>
    %cst_478 = arith.constant 0.000000e+00 : f32
    %1003 = vector.broadcast %cst_478 : f32 to vector<16x128xf32>
    %1004 = arith.maximumf %1002, %1003 : vector<16x128xf32>
    %c0_479 = arith.constant 0 : index
    %c0_480 = arith.constant 0 : index
    %1005 = vector.load %arg58[%c0_479, %c0_480] : memref<3x32xf32, #tpu.memory_space<vmem>>, vector<3x32xf32>
    %c0_481 = arith.constant 0 : index
    %c0_482 = arith.constant 0 : index
    %1006 = vector.load %arg57[%c0_481, %c0_482] : memref<128x64xf32, #tpu.memory_space<vmem>>, vector<128x64xf32>
    %cst_483 = arith.constant dense<0.000000e+00> : vector<16x64xf32>
    %1007 = tpu.matmul %1004, %1006, %cst_483 {dimension_numbers = #tpu.dot_dimension_numbers<[1], [0], [0], [1], [0, 0, 1, 1], [], []>} : vector<16x128xf32>, vector<128x64xf32>, vector<16x64xf32> -> vector<16x64xf32>
    %1008 = vector.extract_strided_slice %1007 {offsets = [0, 0], sizes = [16, 32], strides = [1, 1]} : vector<16x64xf32> to vector<16x32xf32>
    %1009 = vector.extract_strided_slice %1007 {offsets = [0, 32], sizes = [16, 32], strides = [1, 1]} : vector<16x64xf32> to vector<16x32xf32>
    %cst_484 = arith.constant dense<0.000000e+00> : vector<16x32xf32>
    %1010 = tpu.matmul %0, %1009, %cst_484 {dimension_numbers = #tpu.dot_dimension_numbers<[1], [0], [0], [1], [0, 0, 1, 1], [], []>} : vector<16x16xf32>, vector<16x32xf32>, vector<16x32xf32> -> vector<16x32xf32>
    %1011 = arith.addf %1008, %1010 : vector<16x32xf32>
    %1012 = vector.extract_strided_slice %1005 {offsets = [0, 0], sizes = [1, 32], strides = [1, 1]} : vector<3x32xf32> to vector<1x32xf32>
    %1013 = vector.broadcast %1012 : vector<1x32xf32> to vector<16x32xf32>
    %1014 = arith.addf %1011, %1013 : vector<16x32xf32>
    %1015 = vector.extract_strided_slice %1005 {offsets = [1, 0], sizes = [1, 32], strides = [1, 1]} : vector<3x32xf32> to vector<1x32xf32>
    %1016 = vector.extract_strided_slice %1005 {offsets = [2, 0], sizes = [1, 32], strides = [1, 1]} : vector<3x32xf32> to vector<1x32xf32>
    %cst_485 = arith.constant dense<0.000000e+00> : vector<32xf32>
    %1017 = vector.multi_reduction <add>, %1014, %cst_485 [0] : vector<16x32xf32> to vector<32xf32>
    %1018 = vector.shape_cast %1017 : vector<32xf32> to vector<1x32xf32>
    %cst_486 = arith.constant 1.600000e+01 : f32
    %1019 = vector.broadcast %cst_486 : f32 to vector<1x32xf32>
    %1020 = arith.divf %1018, %1019 : vector<1x32xf32>
    %1021 = vector.broadcast %1020 : vector<1x32xf32> to vector<16x32xf32>
    %1022 = arith.subf %1014, %1021 : vector<16x32xf32>
    %1023 = arith.mulf %1022, %1022 : vector<16x32xf32>
    %cst_487 = arith.constant dense<0.000000e+00> : vector<32xf32>
    %1024 = vector.multi_reduction <add>, %1023, %cst_487 [0] : vector<16x32xf32> to vector<32xf32>
    %1025 = vector.shape_cast %1024 : vector<32xf32> to vector<1x32xf32>
    %cst_488 = arith.constant 1.600000e+01 : f32
    %1026 = vector.broadcast %cst_488 : f32 to vector<1x32xf32>
    %1027 = arith.divf %1025, %1026 : vector<1x32xf32>
    %cst_489 = arith.constant 9.99999974E-6 : f32
    %1028 = vector.broadcast %cst_489 : f32 to vector<1x32xf32>
    %1029 = arith.addf %1027, %1028 : vector<1x32xf32>
    %1030 = math.rsqrt %1029 : vector<1x32xf32>
    %1031 = arith.mulf %1015, %1030 : vector<1x32xf32>
    %1032 = arith.mulf %1020, %1031 : vector<1x32xf32>
    %1033 = arith.subf %1016, %1032 : vector<1x32xf32>
    %1034 = vector.broadcast %1031 : vector<1x32xf32> to vector<16x32xf32>
    %1035 = arith.mulf %1014, %1034 : vector<16x32xf32>
    %1036 = vector.broadcast %1033 : vector<1x32xf32> to vector<16x32xf32>
    %1037 = arith.addf %1035, %1036 : vector<16x32xf32>
    %cst_490 = arith.constant 0.000000e+00 : f32
    %1038 = vector.broadcast %cst_490 : f32 to vector<16x32xf32>
    %1039 = arith.maximumf %1037, %1038 : vector<16x32xf32>
    %c0_491 = arith.constant 0 : index
    %c152_492 = arith.constant 152 : index
    %1040 = vector.load %arg64[%c0_491, %c152_492] : memref<16x256xf32, #tpu.memory_space<vmem>>, vector<16x32xf32>
    tpu.vector_store %arg64[%c0_491, %c152_492], %1039 {strides = array<i32>} : memref<16x256xf32, #tpu.memory_space<vmem>>, vector<16x32xf32>,
    %cst_493 = arith.constant dense<0.000000e+00> : vector<16x32xf32>
    %1041 = tpu.matmul %0, %1039, %cst_493 {dimension_numbers = #tpu.dot_dimension_numbers<[1], [0], [0], [1], [0, 0, 1, 1], [], []>} : vector<16x16xf32>, vector<16x32xf32>, vector<16x32xf32> -> vector<16x32xf32>
    %c0_494 = arith.constant 0 : index
    %c152_495 = arith.constant 152 : index
    %1042 = vector.load %arg65[%c0_494, %c152_495] : memref<16x256xf32, #tpu.memory_space<vmem>>, vector<16x32xf32>
    tpu.vector_store %arg65[%c0_494, %c152_495], %1041 {strides = array<i32>} : memref<16x256xf32, #tpu.memory_space<vmem>>, vector<16x32xf32>,
    %c0_496 = arith.constant 0 : index
    %c0_497 = arith.constant 0 : index
    %1043 = vector.load %arg64[%c0_496, %c0_497] : memref<16x256xf32, #tpu.memory_space<vmem>>, vector<16x184xf32>
    %c0_498 = arith.constant 0 : index
    %c0_499 = arith.constant 0 : index
    %1044 = vector.load %arg65[%c0_498, %c0_499] : memref<16x256xf32, #tpu.memory_space<vmem>>, vector<16x184xf32>
    %c0_500 = arith.constant 0 : index
    %c0_501 = arith.constant 0 : index
    %1045 = vector.load %arg60[%c0_500, %c0_501] : memref<3x92xf32, #tpu.memory_space<vmem>>, vector<3x92xf32>
    %c0_502 = arith.constant 0 : index
    %c0_503 = arith.constant 0 : index
    %1046 = vector.load %arg59[%c0_502, %c0_503] : memref<368x92xf32, #tpu.memory_space<vmem>>, vector<184x92xf32>
    %cst_504 = arith.constant dense<0.000000e+00> : vector<16x92xf32>
    %1047 = tpu.matmul %1043, %1046, %cst_504 {dimension_numbers = #tpu.dot_dimension_numbers<[1], [0], [0], [1], [0, 0, 1, 1], [], []>} : vector<16x184xf32>, vector<184x92xf32>, vector<16x92xf32> -> vector<16x92xf32>
    %c184 = arith.constant 184 : index
    %c0_505 = arith.constant 0 : index
    %1048 = vector.load %arg59[%c184, %c0_505] : memref<368x92xf32, #tpu.memory_space<vmem>>, vector<184x92xf32>
    %cst_506 = arith.constant dense<0.000000e+00> : vector<16x92xf32>
    %1049 = tpu.matmul %1044, %1048, %cst_506 {dimension_numbers = #tpu.dot_dimension_numbers<[1], [0], [0], [1], [0, 0, 1, 1], [], []>} : vector<16x184xf32>, vector<184x92xf32>, vector<16x92xf32> -> vector<16x92xf32>
    %1050 = arith.addf %1047, %1049 : vector<16x92xf32>
    %1051 = vector.extract_strided_slice %1045 {offsets = [0, 0], sizes = [1, 92], strides = [1, 1]} : vector<3x92xf32> to vector<1x92xf32>
    %1052 = vector.broadcast %1051 : vector<1x92xf32> to vector<16x92xf32>
    %1053 = arith.addf %1050, %1052 : vector<16x92xf32>
    %1054 = vector.extract_strided_slice %1045 {offsets = [1, 0], sizes = [1, 92], strides = [1, 1]} : vector<3x92xf32> to vector<1x92xf32>
    %1055 = vector.extract_strided_slice %1045 {offsets = [2, 0], sizes = [1, 92], strides = [1, 1]} : vector<3x92xf32> to vector<1x92xf32>
    %cst_507 = arith.constant dense<0.000000e+00> : vector<92xf32>
    %1056 = vector.multi_reduction <add>, %1053, %cst_507 [0] : vector<16x92xf32> to vector<92xf32>
    %1057 = vector.shape_cast %1056 : vector<92xf32> to vector<1x92xf32>
    %cst_508 = arith.constant 1.600000e+01 : f32
    %1058 = vector.broadcast %cst_508 : f32 to vector<1x92xf32>
    %1059 = arith.divf %1057, %1058 : vector<1x92xf32>
    %1060 = vector.broadcast %1059 : vector<1x92xf32> to vector<16x92xf32>
    %1061 = arith.subf %1053, %1060 : vector<16x92xf32>
    %1062 = arith.mulf %1061, %1061 : vector<16x92xf32>
    %cst_509 = arith.constant dense<0.000000e+00> : vector<92xf32>
    %1063 = vector.multi_reduction <add>, %1062, %cst_509 [0] : vector<16x92xf32> to vector<92xf32>
    %1064 = vector.shape_cast %1063 : vector<92xf32> to vector<1x92xf32>
    %cst_510 = arith.constant 1.600000e+01 : f32
    %1065 = vector.broadcast %cst_510 : f32 to vector<1x92xf32>
    %1066 = arith.divf %1064, %1065 : vector<1x92xf32>
    %cst_511 = arith.constant 9.99999974E-6 : f32
    %1067 = vector.broadcast %cst_511 : f32 to vector<1x92xf32>
    %1068 = arith.addf %1066, %1067 : vector<1x92xf32>
    %1069 = math.rsqrt %1068 : vector<1x92xf32>
    %1070 = arith.mulf %1054, %1069 : vector<1x92xf32>
    %1071 = arith.mulf %1059, %1070 : vector<1x92xf32>
    %1072 = arith.subf %1055, %1071 : vector<1x92xf32>
    %1073 = vector.broadcast %1070 : vector<1x92xf32> to vector<16x92xf32>
    %1074 = arith.mulf %1053, %1073 : vector<16x92xf32>
    %1075 = vector.broadcast %1072 : vector<1x92xf32> to vector<16x92xf32>
    %1076 = arith.addf %1074, %1075 : vector<16x92xf32>
    %cst_512 = arith.constant 0.000000e+00 : f32
    %1077 = vector.broadcast %cst_512 : f32 to vector<16x92xf32>
    %1078 = arith.maximumf %1076, %1077 : vector<16x92xf32>
    %c0_513 = arith.constant 0 : index
    %c0_514 = arith.constant 0 : index
    %1079 = vector.load %arg2[%c0_513, %c0_514] : memref<2x16xf32, #tpu.memory_space<vmem>>, vector<2x16xf32>
    %cst_515 = arith.constant dense<0.000000e+00> : vector<2x92xf32>
    %1080 = tpu.matmul %1079, %1078, %cst_515 {dimension_numbers = #tpu.dot_dimension_numbers<[1], [0], [0], [1], [0, 0, 1, 1], [], []>} : vector<2x16xf32>, vector<16x92xf32>, vector<2x92xf32> -> vector<2x92xf32>
    %c0_516 = arith.constant 0 : index
    %c0_517 = arith.constant 0 : index
    %1081 = vector.load %arg61[%c0_516, %c0_517] : memref<92x8xf32, #tpu.memory_space<vmem>>, vector<92x8xf32>
    %cst_518 = arith.constant dense<0.000000e+00> : vector<2x8xf32>
    %1082 = tpu.matmul %1080, %1081, %cst_518 {dimension_numbers = #tpu.dot_dimension_numbers<[1], [0], [0], [1], [0, 0, 1, 1], [], []>} : vector<2x92xf32>, vector<92x8xf32>, vector<2x8xf32> -> vector<2x8xf32>
    %c0_519 = arith.constant 0 : index
    %c0_520 = arith.constant 0 : index
    %1083 = vector.load %arg62[%c0_519, %c0_520] : memref<1x8xf32, #tpu.memory_space<vmem>>, vector<1x8xf32>
    %1084 = vector.broadcast %1083 : vector<1x8xf32> to vector<2x8xf32>
    %1085 = arith.addf %1082, %1084 : vector<2x8xf32>
    %c0_521 = arith.constant 0 : index
    %c0_522 = arith.constant 0 : index
    %1086 = vector.load %arg63[%c0_521, %c0_522] : memref<2x8xf32, #tpu.memory_space<vmem>>, vector<2x8xf32>
    tpu.vector_store %arg63[%c0_521, %c0_522], %1085 {strides = array<i32>} : memref<2x8xf32, #tpu.memory_space<vmem>>, vector<2x8xf32>,
    return
  }
}

</mosaic_0001>

<bundles_post_ra>
// kernel: graph_densenet_forward.1
= control target key start
LH: loop header
LB: loop body
LE: loop exit
PB: predicated region body
PF: predicated region fallthrough
CT: control target
= control target key end

     0   :  { %s14623_s6 = smov 1   ;;  %s14624_s10 = smov 2   ;;  %s16217_s0 = inlined_call_operand.smem [shape: u32[64], index: -1, kind: input, shape index: {}] }
   0x1   :  { %s14774_s5 = sld [smem:[%s16217_s0]]   ;;  %s14625_s14 = smov 3  }
   0x2   :  { %s14779_s9 = sld [smem:[%s16217_s0 + %s14623_s6]]   ;;  %s14626_s18 = smov 4  }
   0x3   :  { %s14784_s13 = sld [smem:[%s16217_s0 + %s14624_s10]]   ;;  %s14627_s22 = smov 5  }
   0x4   :  { %s14789_s17 = sld [smem:[%s16217_s0 + %s14625_s14]]   ;;  %s14628_s26 = smov 6  }
   0x5   :  { %s14794_s21 = sld [smem:[%s16217_s0 + %s14626_s18]]   ;;  %s14629_s30 = smov 7  }
   0x6   :  { %s14799_s25 = sld [smem:[%s16217_s0 + %s14627_s22]]   ;;  %s14630_s4 = smov 8  }
   0x7   :  { %16264 = sst [smem:[#allocation134_spill]] %s14774_s5  ;;  %s14631_s10 = smov 9  }
   0x8   :  { %s14804_s29 = sld [smem:[%s16217_s0 + %s14628_s26]]   ;;  %s14632_s15 = smov 10  }
   0x9   :  { %16265 = sst [smem:[#allocation135_spill]] %s14784_s13  ;;  %s14633_s20 = smov 11  }
   0xa   :  { %s14809_s3 = sld [smem:[%s16217_s0 + %s14629_s30]]   ;;  %s14634_s26 = smov 12  }
   0xb   :  { %16266 = sst [smem:[#allocation136_spill]] %s14794_s21  ;;  %s14635_s1 = smov 13  }
   0xc   :  { %s14814_s8 = sld [smem:[%s16217_s0 + %s14630_s4]]   ;;  %s14636_s7 = smov 14  }
   0xd   :  { %s14819_s14 = sld [smem:[%s16217_s0 + %s14631_s10]]   ;;  %s14638_s22 = smov 16  }
   0xe   :  { %16267 = sst [smem:[#allocation137_spill]] %s14804_s29  ;;  %s14639_s28 = smov 17  }
   0xf   :  { %s14824_s19 = sld [smem:[%s16217_s0 + %s14632_s15]]   ;;  %s14637_s15 = smov 15  }
  0x10   :  { %s14829_s24 = sld [smem:[%s16217_s0 + %s14633_s20]]  }
  0x11   :  { %s14834_s30 = sld [smem:[%s16217_s0 + %s14634_s26]]  }
  0x12   :  { %16268 = sst [smem:[#allocation138_spill]] %s14814_s8 }
  0x13   :  { %s14839_s6 = sld [smem:[%s16217_s0 + %s14635_s1]]  }
  0x14   :  { %s14844_s12 = sld [smem:[%s16217_s0 + %s14636_s7]]   ;;  %s14640_s7 = smov 18  }
  0x15   :  { %16269 = sst [smem:[#allocation139_spill]] %s14824_s19 }
  0x16   :  { %s14849_s20 = sld [smem:[%s16217_s0 + %s14637_s15]]   ;;  %s14641_s15 = smov 19  }
  0x17   :  { %16270 = sst [smem:[#allocation140_spill]] %s14834_s30 }
  0x18   :  { %s14854_s27 = sld [smem:[%s16217_s0 + %s14638_s22]]   ;;  %s14642_s22 = smov 20  }
  0x19   :  { %s14859_s4 = sld [smem:[%s16217_s0 + %s14639_s28]]   ;;  %s14643_s28 = smov 21  }
  0x1a   :  { %16271 = sst [smem:[#allocation141_spill]] %s14844_s12 }
  0x1b   :  { %s14864_s12 = sld [smem:[%s16217_s0 + %s14640_s7]]   ;;  %s14644_s7 = smov 22  }
  0x1c   :  { %s14869_s30 = sld [smem:[%s16217_s0 + %s14641_s15]]   ;;  %s14645_s15 = smov 23  }
  0x1d   :  { %s14879_s19 = sld [smem:[%s16217_s0 + %s14643_s28]]   ;;  %s14647_s28 = smov 25  }
  0x1e   :  { %16272 = sst [smem:[#allocation142_spill]] %s14854_s27 }
  0x1f   :  { %s14874_s27 = sld [smem:[%s16217_s0 + %s14642_s22]]   ;;  %s14646_s22 = smov 24  }
  0x20   :  { %s14889_s8 = sld [smem:[%s16217_s0 + %s14645_s15]]   ;;  %s14649_s15 = smov 27  }
  0x21   :  { %16273 = sst [smem:[#allocation143_spill]] %s14864_s12 }
  0x22   :  { %s14884_s12 = sld [smem:[%s16217_s0 + %s14644_s7]]   ;;  %s14648_s7 = smov 26  }
  0x23   :  { %s14899_s29 = sld [smem:[%s16217_s0 + %s14647_s28]]   ;;  %s14651_s28 = smov 29  }
  0x24   :  { %s14909_s21 = sld [smem:[%s16217_s0 + %s14649_s15]]   ;;  %s14653_s15 = smov 31  }
  0x25   :  { %16274 = sst [smem:[#allocation144_spill]] %s14874_s27 }
  0x26   :  { %s14894_s27 = sld [smem:[%s16217_s0 + %s14646_s22]]   ;;  %s14650_s22 = smov 28  }
  0x27   :  { %s14919_s13 = sld [smem:[%s16217_s0 + %s14651_s28]]   ;;  %s14655_s28 = smov 33  }
  0x28   :  { %16275 = sst [smem:[#allocation145_spill]] %s14884_s12 }
  0x29   :  { %s14904_s12 = sld [smem:[%s16217_s0 + %s14648_s7]]   ;;  %s14652_s7 = smov 30  }
  0x2a   :  { %s14929_s5 = sld [smem:[%s16217_s0 + %s14653_s15]]   ;;  %s14657_s15 = smov 35  }
  0x2c   :  { %16276 = sst [smem:[#allocation146_spill]] %s14894_s27 }
  0x2d   :  { %s14914_s27 = sld [smem:[%s16217_s0 + %s14650_s22]]   ;;  %s14654_s22 = smov 32  }
  0x2e   :  { %16279 = sst [smem:[#allocation149_spill]] %s14919_s13 }
  0x2f   :  { %16277 = sst [smem:[#allocation147_spill]] %s14904_s12 }
  0x30   :  { %s14924_s12 = sld [smem:[%s16217_s0 + %s14652_s7]]   ;;  %s14656_s7 = smov 34  }
  0x31   :  { %16281 = sst [smem:[#allocation151_spill]] %s14929_s5 }
  0x32   :  { %s14939_s13 = sld [smem:[%s16217_s0 + %s14655_s28]]   ;;  %s14659_s28 = smov 37  }
  0x33   :  { %16278 = sst [smem:[#allocation148_spill]] %s14914_s27 }
  0x34   :  { %s14934_s27 = sld [smem:[%s16217_s0 + %s14654_s22]]   ;;  %s14658_s22 = smov 36  }
  0x35   :  { %s14949_s5 = sld [smem:[%s16217_s0 + %s14657_s15]]   ;;  %s14661_s15 = smov 39  }
  0x36   :  { %16280 = sst [smem:[#allocation150_spill]] %s14924_s12 }
  0x37   :  { %s14944_s12 = sld [smem:[%s16217_s0 + %s14656_s7]]   ;;  %s14660_s7 = smov 38  }
  0x38   :  { %16283 = sst [smem:[#allocation153_spill]] %s14939_s13 }
  0x39   :  { %s14959_s13 = sld [smem:[%s16217_s0 + %s14659_s28]]   ;;  %s14663_s28 = smov 41  }
  0x3a   :  { %16282 = sst [smem:[#allocation152_spill]] %s14934_s27 }
  0x3b   :  { %16285 = sst [smem:[#allocation155_spill]] %s14949_s5 }
  0x3c   :  { %s14954_s27 = sld [smem:[%s16217_s0 + %s14658_s22]]   ;;  %s14662_s22 = smov 40  }
  0x3d   :  { %16284 = sst [smem:[#allocation154_spill]] %s14944_s12 }
  0x3e   :  { %s14964_s12 = sld [smem:[%s16217_s0 + %s14660_s7]]   ;;  %s14664_s7 = smov 42  }
  0x3f   :  { %16287 = sst [smem:[#allocation157_spill]] %s14959_s13 }
  0x40   :  { %s14969_s5 = sld [smem:[%s16217_s0 + %s14661_s15]]   ;;  %s14665_s15 = smov 43  }
  0x41   :  { %s14979_s13 = sld [smem:[%s16217_s0 + %s14663_s28]]   ;;  %s14667_s28 = smov 45  }
  0x42   :  { %16286 = sst [smem:[#allocation156_spill]] %s14954_s27 }
  0x43   :  { %s14974_s27 = sld [smem:[%s16217_s0 + %s14662_s22]]   ;;  %s14666_s22 = smov 44  }
  0x44   :  { %16288 = sst [smem:[#allocation158_spill]] %s14964_s12 }
  0x45   :  { %s14984_s12 = sld [smem:[%s16217_s0 + %s14664_s7]]   ;;  %s14668_s7 = smov 46  }
  0x46   :  { %16289 = sst [smem:[#allocation159_spill]] %s14969_s5 }
  0x47   :  { %16291 = sst [smem:[#allocation161_spill]] %s14979_s13 }
  0x48   :  { %s14989_s5 = sld [smem:[%s16217_s0 + %s14665_s15]]   ;;  %s14669_s15 = smov 47  }
  0x49   :  { %16290 = sst [smem:[#allocation160_spill]] %s14974_s27 }
  0x4a   :  { %s14994_s27 = sld [smem:[%s16217_s0 + %s14666_s22]]   ;;  %s14670_s22 = smov 48  }
  0x4b   :  { %16292 = sst [smem:[#allocation162_spill]] %s14984_s12 }
  0x4c   :  { %s14999_s13 = sld [smem:[%s16217_s0 + %s14667_s28]]   ;;  %s14671_s28 = smov 49  }
  0x4d   :  { %s15004_s12 = sld [smem:[%s16217_s0 + %s14668_s7]]   ;;  %s14672_s7 = smov 50  }
  0x4e   :  { %16293 = sst [smem:[#allocation163_spill]] %s14989_s5 }
  0x4f   :  { %s15009_s5 = sld [smem:[%s16217_s0 + %s14669_s15]]   ;;  %s14673_s15 = smov 51  }
  0x50   :  { %16294 = sst [smem:[#allocation164_spill]] %s14994_s27 }
  0x51   :  { %s15014_s27 = sld [smem:[%s16217_s0 + %s14670_s22]]   ;;  %s14674_s22 = smov 52  }
  0x52   :  { %16295 = sst [smem:[#allocation165_spill]] %s14999_s13 }
  0x53   :  { %16296 = sst [smem:[#allocation166_spill]] %s15004_s12 }
  0x54   :  { %s15019_s13 = sld [smem:[%s16217_s0 + %s14671_s28]]   ;;  %s14675_s28 = smov 53  }
  0x55   :  { %16297 = sst [smem:[#allocation167_spill]] %s15009_s5 }
  0x56   :  { %s15024_s12 = sld [smem:[%s16217_s0 + %s14672_s7]]   ;;  %s14676_s7 = smov 54  }
  0x57   :  { %16298 = sst [smem:[#allocation168_spill]] %s15014_s27 }
  0x58   :  { %s15029_s5 = sld [smem:[%s16217_s0 + %s14673_s15]]   ;;  %s14677_s15 = smov 55  }
  0x59   :  { %s15034_s27 = sld [smem:[%s16217_s0 + %s14674_s22]]   ;;  %s14678_s22 = smov 56  }
  0x5a   :  { %16299 = sst [smem:[#allocation169_spill]] %s15019_s13 }
  0x5b   :  { %s15039_s13 = sld [smem:[%s16217_s0 + %s14675_s28]]   ;;  %s14679_s28 = smov 57  }
  0x5c   :  { %16300 = sst [smem:[#allocation170_spill]] %s15024_s12 }
  0x5d   :  { %s15044_s12 = sld [smem:[%s16217_s0 + %s14676_s7]]   ;;  %s14680_s7 = smov 58  }
  0x5e   :  { %16301 = sst [smem:[#allocation171_spill]] %s15029_s5 }
  0x5f   :  { %16302 = sst [smem:[#allocation172_spill]] %s15034_s27 }
  0x60   :  { %s15049_s5 = sld [smem:[%s16217_s0 + %s14677_s15]]   ;;  %s14681_s15 = smov 59  }
  0x61   :  { %16303 = sst [smem:[#allocation173_spill]] %s15039_s13 }
  0x62   :  { %s15054_s27 = sld [smem:[%s16217_s0 + %s14678_s22]]   ;;  %s14682_s22 = smov 60  }
  0x63   :  { %16304 = sst [smem:[#allocation174_spill]] %s15044_s12 }
  0x64   :  { %s15059_s13 = sld [smem:[%s16217_s0 + %s14679_s28]]   ;;  %s14683_s28 = smov 61  }
  0x65   :  { %s15064_s12 = sld [smem:[%s16217_s0 + %s14680_s7]]   ;;  %s14684_s7 = smov 62  }
  0x66   :  { %16305 = sst [smem:[#allocation175_spill]] %s15049_s5 }
  0x67   :  { %s15069_s5 = sld [smem:[%s16217_s0 + %s14681_s15]]   ;;  %s14685_s15 = smov 63  }
  0x68   :  { %16306 = sst [smem:[#allocation176_spill]] %s15054_s27 }
  0x69   :  { %s15074_s27 = sld [smem:[%s16217_s0 + %s14682_s22]]  }
  0x6a   :  { %16307 = sst [smem:[#allocation177_spill]] %s15059_s13 }
  0x6b   :  { %16308 = sst [smem:[#allocation178_spill]] %s15064_s12 }
  0x6c   :  { %s15079_s13 = sld [smem:[%s16217_s0 + %s14683_s28]]  }
  0x6d   :  { %16309 = sst [smem:[#allocation179_spill]] %s15069_s5 }
  0x6e   :  { %s15084_s12 = sld [smem:[%s16217_s0 + %s14684_s7]]  }
  0x6f   :  { %s15089_s5 = sld [smem:[%s16217_s0 + %s14685_s15]]  }
  0x70   :  { %132 = vsyncpa [#allocation5], 0 }
  0x71   :  { %133 = vsyncpa [#allocation8], 0 }
  0x72   :  { %134 = vsyncpa [#allocation11], 0 }
  0x73   :  { %135 = vsyncpa [#allocation14], 0 }
  0x74   :  { %136 = vsyncpa [#allocation17], 0 }
  0x75   :  { %137 = vsyncpa [#allocation20], 0 }
  0x76   :  { %138 = vsyncpa [#allocation23], 0 }
  0x77   :  { %139 = vsyncpa [#allocation26], 0 }
  0x78   :  { %140 = vsyncpa [#allocation29], 0 }
  0x79   :  { %141 = vsyncpa [#allocation32], 0 }
  0x7a   :  { %142 = vsyncpa [#allocation35], 0 }
  0x7b   :  { %143 = vsyncpa [#allocation38], 0 }
  0x7c   :  { %144 = vsyncpa [#allocation41], 0 }
  0x7d   :  { %145 = vsyncpa [#allocation44], 0 }
  0x7e   :  { %146 = vsyncpa [#allocation47], 0 }
  0x7f   :  { %147 = vsyncpa [#allocation50], 0 }
  0x80   :  { %148 = vsyncpa [#allocation53], 0 }
  0x81   :  { %149 = vsyncpa [#allocation56], 0 }
  0x82   :  { %150 = vsyncpa [#allocation59], 0 }
  0x83   :  { %151 = vsyncpa [#allocation62], 0 }
  0x84   :  { %152 = vsyncpa [#allocation65], 0 }
  0x85   :  { %153 = vsyncpa [#allocation68], 0 }
  0x86   :  { %154 = vsyncpa [#allocation71], 0 }
  0x87   :  { %155 = vsyncpa [#allocation74], 0 }
  0x88   :  { %156 = vsyncpa [#allocation77], 0 }
  0x89   :  { %157 = vsyncpa [#allocation80], 0 }
  0x8a   :  { %158 = vsyncpa [#allocation83], 0 }
  0x8b   :  { %159 = vsyncpa [#allocation86], 0 }
  0x8c   :  { %160 = vsyncpa [#allocation89], 0 }
  0x8d   :  { %161 = vsyncpa [#allocation92], 0 }
  0x8e   :  { %162 = vsyncpa [#allocation95], 0 }
  0x8f   :  { %163 = vsyncpa [#allocation98], 0 }
  0x90   :  { %164 = vsyncpa [#allocation6], 0  ;;  %s14686_s0 = smov [#allocation7]   ;;  %s14687_s23 = smov [#allocation10]  }
  0x91   :  { %s182_s22 = sshll.u32 %s14686_s0, 4  ;;  %s205_s26 = sshll.u32 %s14687_s23, 4  ;;  %s183_s22 = int_to_ptr.vmem [resolvable:$true] %s182_s22  ;;  %s206_s26 = int_to_ptr.vmem [resolvable:$true] %s205_s26 }
  0x92   :  { %s13149_s28 = scalar_lea.hbm %s14779_s9, 256 }
  0x93   :  { %p13150_p0 = scmp.ne.s32.totalorder %s14779_s9, %s13149_s28  ;;  %p13153_p1 = scmp.lt.u32.totalorder %s13149_s28, %s14779_s9 }
  0x95   :  { %p13155_p2 = pnand %p13153_p1, %p13150_p0 }
  0x97   :  { %13158 = shalt.err (!%p13155_p2)
}
  0x98   :  { %s13159_s1 = scalar_lea.vmem %s183_s22, 256  ;;  %p13164_p4 = scmp.lt.s32.totalorder %s183_s22, %s183_s22 }
  0x99   :  { %p13160_p3 = scmp.ne.s32.totalorder %s183_s22, %s13159_s1  ;;  %p13165_p5 = scmp.lt.s32.totalorder %s13159_s1, %s13159_s1 }
  0x9b   :  { %p13166_p6 = por %p13165_p5, %p13164_p4 }
  0x9d   :  { %p13167_p7 = pnand %p13166_p6, %p13160_p3 }
  0x9f   :  { %13170 = shalt.err (!%p13167_p7)
}
  0xa0   :  { %s14688_s2 = smov 128   ;;  %s14689_s7 = smov 8  }
  0xa1   :  { %188 = dma.hbm_to_vmem [thread:$0]  %s14779_s9, 256, %s183_s22, [#allocation8], %s14688_s2, %s14688_s2, %s14689_s7  }
  0xa2   :  { %s13171_s10 = scalar_lea.hbm %s14789_s17, 128 }
  0xa3   :  { %p13172_p8 = scmp.ne.s32.totalorder %s14789_s17, %s13171_s10  ;;  %p13175_p9 = scmp.lt.u32.totalorder %s13171_s10, %s14789_s17 }
  0xa5   :  { %p13177_p10 = pnand %p13175_p9, %p13172_p8 }
  0xa7   :  { %13180 = shalt.err (!%p13177_p10)
}
  0xa8   :  { %s13181_s11 = scalar_lea.vmem %s206_s26, 128  ;;  %p13186_p12 = scmp.lt.s32.totalorder %s206_s26, %s206_s26 }
  0xa9   :  { %p13182_p11 = scmp.ne.s32.totalorder %s206_s26, %s13181_s11  ;;  %p13187_p13 = scmp.lt.s32.totalorder %s13181_s11, %s13181_s11 }
  0xab   :  { %p13188_p0 = por %p13187_p13, %p13186_p12 }
  0xad   :  { %p13189_p1 = pnand %p13188_p0, %p13182_p11 }
  0xaf   :  { %13192 = shalt.err (!%p13189_p1)
}
  0xb0   :  { %208 = dma.hbm_to_vmem [thread:$0]  %s14789_s17, 128, %s206_s26, [#allocation11]  }
  0xb1   :  { %s14690_s15 = smov [#allocation13]   ;;  %s14691_s9 = smov [#allocation16]  }
  0xb2   :  { %s224_s16 = sshll.u32 %s14690_s15, 4  ;;  %s246_s18 = sshll.u32 %s14691_s9, 4  ;;  %s225_s16 = int_to_ptr.vmem [resolvable:$true] %s224_s16  ;;  %s15102_s18 = int_to_ptr.vmem [resolvable:$true] %s246_s18 }
  0xb3   :  { %s13193_s0 = scalar_lea.hbm %s14799_s25, 1024 }
  0xb4   :  { %p13194_p2 = scmp.ne.s32.totalorder %s14799_s25, %s13193_s0  ;;  %p13197_p3 = scmp.lt.u32.totalorder %s13193_s0, %s14799_s25 }
  0xb6   :  { %p13199_p4 = pnand %p13197_p3, %p13194_p2 }
  0xb8   :  { %13202 = shalt.err (!%p13199_p4)
}
  0xb9   :  { %s13203_s22 = scalar_lea.vmem %s225_s16, 1024  ;;  %p13208_p6 = scmp.lt.s32.totalorder %s225_s16, %s225_s16 }
  0xba   :  { %p13204_p5 = scmp.ne.s32.totalorder %s225_s16, %s13203_s22  ;;  %p13209_p7 = scmp.lt.s32.totalorder %s13203_s22, %s13203_s22 }
  0xbc   :  { %p13210_p8 = por %p13209_p7, %p13208_p6 }
  0xbe   :  { %p13211_p9 = pnand %p13210_p8, %p13204_p5 }
  0xc0   :  { %13214 = shalt.err (!%p13211_p9)
}
  0xc1   :  { %230 = dma.hbm_to_vmem [thread:$0]  %s14799_s25, 1024, %s225_s16, [#allocation14], %s14688_s2, %s14688_s2, %s14689_s7  }
  0xc2   :  { %s13215_s17 = scalar_lea.hbm %s14809_s3, 1024 }
  0xc3   :  { %p13216_p10 = scmp.ne.s32.totalorder %s14809_s3, %s13215_s17  ;;  %p13219_p11 = scmp.lt.u32.totalorder %s13215_s17, %s14809_s3 }
  0xc5   :  { %p13221_p12 = pnand %p13219_p11, %p13216_p10 }
  0xc7   :  { %13224 = shalt.err (!%p13221_p12)
}
  0xc8   :  { %s13225_s23 = scalar_lea.vmem %s15102_s18, 1024  ;;  %p13230_p0 = scmp.lt.s32.totalorder %s15102_s18, %s15102_s18 }
  0xc9   :  { %p13226_p13 = scmp.ne.s32.totalorder %s15102_s18, %s13225_s23  ;;  %p13231_p1 = scmp.lt.s32.totalorder %s13225_s23, %s13225_s23 }
  0xcb   :  { %p13232_p2 = por %p13231_p1, %p13230_p0 }
  0xcd   :  { %p13233_p3 = pnand %p13232_p2, %p13226_p13 }
  0xcf   :  { %13236 = shalt.err (!%p13233_p3)
}
  0xd0   :  { %252 = dma.hbm_to_vmem [thread:$0]  %s14809_s3, 1024, %s15102_s18, [#allocation17], %s14688_s2, %s14688_s2, %s14689_s7  }
  0xd1   :  { %s14692_s25 = smov [#allocation19]   ;;  %s14693_s28 = smov [#allocation22]  }
  0xd2   :  { %s268_s26 = sshll.u32 %s14692_s25, 4  ;;  %s290_s1 = sshll.u32 %s14693_s28, 4  ;;  %s269_s26 = int_to_ptr.vmem [resolvable:$true] %s268_s26  ;;  %s15123_s1 = int_to_ptr.vmem [resolvable:$true] %s290_s1 }
  0xd3   :  { %s13237_s10 = scalar_lea.hbm %s14819_s14, 2048 }
  0xd4   :  { %p13238_p4 = scmp.ne.s32.totalorder %s14819_s14, %s13237_s10  ;;  %p13241_p5 = scmp.lt.u32.totalorder %s13237_s10, %s14819_s14 }
  0xd6   :  { %p13243_p6 = pnand %p13241_p5, %p13238_p4 }
  0xd8   :  { %13246 = shalt.err (!%p13243_p6)
}
  0xd9   :  { %s13247_s11 = scalar_lea.vmem %s269_s26, 2048  ;;  %p13252_p8 = scmp.lt.s32.totalorder %s269_s26, %s269_s26 }
  0xda   :  { %p13248_p7 = scmp.ne.s32.totalorder %s269_s26, %s13247_s11  ;;  %p13253_p9 = scmp.lt.s32.totalorder %s13247_s11, %s13247_s11 }
  0xdc   :  { %p13254_p10 = por %p13253_p9, %p13252_p8 }
  0xde   :  { %p13255_p11 = pnand %p13254_p10, %p13248_p7 }
  0xe0   :  { %13258 = shalt.err (!%p13255_p11)
}
  0xe1   :  { %274 = dma.hbm_to_vmem [thread:$0]  %s14819_s14, 2048, %s269_s26, [#allocation20], %s14688_s2, %s14688_s2, %s14689_s7  }
  0xe2   :  { %s13259_s3 = scalar_lea.hbm %s14829_s24, 1024 }
  0xe3   :  { %p13260_p12 = scmp.ne.s32.totalorder %s14829_s24, %s13259_s3  ;;  %p13263_p13 = scmp.lt.u32.totalorder %s13259_s3, %s14829_s24 }
  0xe5   :  { %p13265_p0 = pnand %p13263_p13, %p13260_p12 }
  0xe7   :  { %13268 = shalt.err (!%p13265_p0)
}
  0xe8   :  { %s13269_s15 = scalar_lea.vmem %s15123_s1, 1024  ;;  %p13274_p2 = scmp.lt.s32.totalorder %s15123_s1, %s15123_s1 }
  0xe9   :  { %p13270_p1 = scmp.ne.s32.totalorder %s15123_s1, %s13269_s15  ;;  %p13275_p3 = scmp.lt.s32.totalorder %s13269_s15, %s13269_s15 }
  0xeb   :  { %p13276_p4 = por %p13275_p3, %p13274_p2 }
  0xed   :  { %p13277_p5 = pnand %p13276_p4, %p13270_p1 }
  0xef   :  { %13280 = shalt.err (!%p13277_p5)
}
  0xf0   :  { %296 = dma.hbm_to_vmem [thread:$0]  %s14829_s24, 1024, %s15123_s1, [#allocation23], %s14688_s2, %s14688_s2, %s14689_s7  }
  0xf1   :  { %s14694_s14 = smov [#allocation25]   ;;  %s14695_s9 = smov [#allocation28]  }
  0xf2   :  { %s312_s16 = sshll.u32 %s14694_s14, 4  ;;  %s334_s18 = sshll.u32 %s14695_s9, 4  ;;  %s313_s16 = int_to_ptr.vmem [resolvable:$true] %s312_s16  ;;  %s15144_s18 = int_to_ptr.vmem [resolvable:$true] %s334_s18 }
  0xf3   :  { %s13281_s0 = scalar_lea.hbm %s14839_s6, 3072 }
  0xf4   :  { %p13282_p6 = scmp.ne.s32.totalorder %s14839_s6, %s13281_s0  ;;  %p13285_p7 = scmp.lt.u32.totalorder %s13281_s0, %s14839_s6 }
  0xf6   :  { %p13287_p8 = pnand %p13285_p7, %p13282_p6 }
  0xf8   :  { %13290 = shalt.err (!%p13287_p8)
}
  0xf9   :  { %s13291_s22 = scalar_lea.vmem %s313_s16, 3072  ;;  %p13296_p10 = scmp.lt.s32.totalorder %s313_s16, %s313_s16 }
  0xfa   :  { %p13292_p9 = scmp.ne.s32.totalorder %s313_s16, %s13291_s22  ;;  %p13297_p11 = scmp.lt.s32.totalorder %s13291_s22, %s13291_s22 }
  0xfc   :  { %p13298_p12 = por %p13297_p11, %p13296_p10 }
  0xfe   :  { %p13299_p13 = pnand %p13298_p12, %p13292_p9 }
 0x100   :  { %13302 = shalt.err (!%p13299_p13)
}
 0x101   :  { %318 = dma.hbm_to_vmem [thread:$0]  %s14839_s6, 3072, %s313_s16, [#allocation26], %s14688_s2, %s14688_s2, %s14689_s7  }
 0x102   :  { %s13303_s24 = scalar_lea.hbm %s14849_s20, 1024 }
 0x103   :  { %p13304_p0 = scmp.ne.s32.totalorder %s14849_s20, %s13303_s24  ;;  %p13307_p1 = scmp.lt.u32.totalorder %s13303_s24, %s14849_s20 }
 0x105   :  { %p13309_p2 = pnand %p13307_p1, %p13304_p0 }
 0x107   :  { %13312 = shalt.err (!%p13309_p2)
}
 0x108   :  { %s13313_s17 = scalar_lea.vmem %s15144_s18, 1024  ;;  %p13318_p4 = scmp.lt.s32.totalorder %s15144_s18, %s15144_s18 }
 0x109   :  { %p13314_p3 = scmp.ne.s32.totalorder %s15144_s18, %s13313_s17  ;;  %p13319_p5 = scmp.lt.s32.totalorder %s13313_s17, %s13313_s17 }
 0x10b   :  { %p13320_p6 = por %p13319_p5, %p13318_p4 }
 0x10d   :  { %p13321_p7 = pnand %p13320_p6, %p13314_p3 }
 0x10f   :  { %13324 = shalt.err (!%p13321_p7)
}
 0x110   :  { %340 = dma.hbm_to_vmem [thread:$0]  %s14849_s20, 1024, %s15144_s18, [#allocation29], %s14688_s2, %s14688_s2, %s14689_s7  }
 0x111   :  { %s14696_s6 = smov [#allocation31]   ;;  %s14697_s25 = smov [#allocation34]  }
 0x112   :  { %s356_s23 = sshll.u32 %s14696_s6, 4  ;;  %s378_s26 = sshll.u32 %s14697_s25, 4  ;;  %s357_s23 = int_to_ptr.vmem [resolvable:$true] %s356_s23  ;;  %s15165_s26 = int_to_ptr.vmem [resolvable:$true] %s378_s26 }
 0x113   :  { %s13325_s28 = scalar_lea.hbm %s14859_s4, 4096 }
 0x114   :  { %p13326_p8 = scmp.ne.s32.totalorder %s14859_s4, %s13325_s28  ;;  %p13329_p9 = scmp.lt.u32.totalorder %s13325_s28, %s14859_s4 }
 0x116   :  { %p13331_p10 = pnand %p13329_p9, %p13326_p8 }
 0x118   :  { %13334 = shalt.err (!%p13331_p10)
}
 0x119   :  { %s13335_s1 = scalar_lea.vmem %s357_s23, 4096  ;;  %p13340_p12 = scmp.lt.s32.totalorder %s357_s23, %s357_s23 }
 0x11a   :  { %p13336_p11 = scmp.ne.s32.totalorder %s357_s23, %s13335_s1  ;;  %p13341_p13 = scmp.lt.s32.totalorder %s13335_s1, %s13335_s1 }
 0x11c   :  { %p13342_p0 = por %p13341_p13, %p13340_p12 }
 0x11e   :  { %p13343_p1 = pnand %p13342_p0, %p13336_p11 }
 0x120   :  { %13346 = shalt.err (!%p13343_p1)
}
 0x121   :  { %362 = dma.hbm_to_vmem [thread:$0]  %s14859_s4, 4096, %s357_s23, [#allocation32], %s14688_s2, %s14688_s2, %s14689_s7  }
 0x122   :  { %s13347_s20 = scalar_lea.hbm %s14869_s30, 2048 }
 0x123   :  { %p13348_p2 = scmp.ne.s32.totalorder %s14869_s30, %s13347_s20  ;;  %p13351_p3 = scmp.lt.u32.totalorder %s13347_s20, %s14869_s30 }
 0x125   :  { %p13353_p4 = pnand %p13351_p3, %p13348_p2 }
 0x127   :  { %13356 = shalt.err (!%p13353_p4)
}
 0x128   :  { %s13357_s10 = scalar_lea.vmem %s15165_s26, 2048  ;;  %p13362_p6 = scmp.lt.s32.totalorder %s15165_s26, %s15165_s26 }
 0x129   :  { %p13358_p5 = scmp.ne.s32.totalorder %s15165_s26, %s13357_s10  ;;  %p13363_p7 = scmp.lt.s32.totalorder %s13357_s10, %s13357_s10 }
 0x12b   :  { %p13364_p8 = por %p13363_p7, %p13362_p6 }
 0x12d   :  { %p13365_p9 = pnand %p13364_p8, %p13358_p5 }
 0x12f   :  { %13368 = shalt.err (!%p13365_p9)
}
 0x130   :  { %384 = dma.hbm_to_vmem [thread:$0]  %s14869_s30, 2048, %s15165_s26, [#allocation35], %s14688_s2, %s14688_s2, %s14689_s7  }
 0x131   :  { %s14698_s4 = smov [#allocation37]   ;;  %s14699_s3 = smov [#allocation40]  }
 0x132   :  { %s400_s11 = sshll.u32 %s14698_s4, 4  ;;  %s422_s15 = sshll.u32 %s14699_s3, 4  ;;  %s401_s11 = int_to_ptr.vmem [resolvable:$true] %s400_s11  ;;  %s15186_s15 = int_to_ptr.vmem [resolvable:$true] %s422_s15 }
 0x133   :  { %s13369_s14 = scalar_lea.hbm %s14879_s19, 1536 }
 0x134   :  { %p13370_p10 = scmp.ne.s32.totalorder %s14879_s19, %s13369_s14  ;;  %p13373_p11 = scmp.lt.u32.totalorder %s13369_s14, %s14879_s19 }
 0x136   :  { %p13375_p12 = pnand %p13373_p11, %p13370_p10 }
 0x138   :  { %13378 = shalt.err (!%p13375_p12)
}
 0x139   :  { %s13379_s16 = scalar_lea.vmem %s401_s11, 1536  ;;  %p13384_p0 = scmp.lt.s32.totalorder %s401_s11, %s401_s11 }
 0x13a   :  { %p13380_p13 = scmp.ne.s32.totalorder %s401_s11, %s13379_s16  ;;  %p13385_p1 = scmp.lt.s32.totalorder %s13379_s16, %s13379_s16 }
 0x13c   :  { %p13386_p2 = por %p13385_p1, %p13384_p0 }
 0x13e   :  { %p13387_p3 = pnand %p13386_p2, %p13380_p13 }
 0x140   :  { %13390 = shalt.err (!%p13387_p3)
}
 0x141   :  { %406 = dma.hbm_to_vmem [thread:$0]  %s14879_s19, 1536, %s401_s11, [#allocation38], %s14688_s2, %s14688_s2, %s14689_s7  }
 0x142   :  { %s13391_s30 = scalar_lea.hbm %s14889_s8, 3072 }
 0x143   :  { %p13392_p4 = scmp.ne.s32.totalorder %s14889_s8, %s13391_s30  ;;  %p13395_p5 = scmp.lt.u32.totalorder %s13391_s30, %s14889_s8 }
 0x145   :  { %p13397_p6 = pnand %p13395_p5, %p13392_p4 }
 0x147   :  { %13400 = shalt.err (!%p13397_p6)
}
 0x148   :  { %s13401_s9 = scalar_lea.vmem %s15186_s15, 3072  ;;  %p13406_p8 = scmp.lt.s32.totalorder %s15186_s15, %s15186_s15 }
 0x149   :  { %p13402_p7 = scmp.ne.s32.totalorder %s15186_s15, %s13401_s9  ;;  %p13407_p9 = scmp.lt.s32.totalorder %s13401_s9, %s13401_s9 }
 0x14b   :  { %p13408_p10 = por %p13407_p9, %p13406_p8 }
 0x14d   :  { %p13409_p11 = pnand %p13408_p10, %p13402_p7 }
 0x14f   :  { %13412 = shalt.err (!%p13409_p11)
}
 0x150   :  { %428 = dma.hbm_to_vmem [thread:$0]  %s14889_s8, 3072, %s15186_s15, [#allocation41], %s14688_s2, %s14688_s2, %s14689_s7  }
 0x151   :  { %s14700_s19 = smov [#allocation43]   ;;  %s14701_s0 = smov [#allocation46]  }
 0x152   :  { %s444_s18 = sshll.u32 %s14700_s19, 4  ;;  %s466_s22 = sshll.u32 %s14701_s0, 4  ;;  %s445_s18 = int_to_ptr.vmem [resolvable:$true] %s444_s18  ;;  %s15207_s22 = int_to_ptr.vmem [resolvable:$true] %s466_s22 }
 0x153   :  { %s13413_s24 = scalar_lea.hbm %s14899_s29, 1536 }
 0x154   :  { %p13414_p12 = scmp.ne.s32.totalorder %s14899_s29, %s13413_s24  ;;  %p13417_p13 = scmp.lt.u32.totalorder %s13413_s24, %s14899_s29 }
 0x156   :  { %p13419_p0 = pnand %p13417_p13, %p13414_p12 }
 0x158   :  { %13422 = shalt.err (!%p13419_p0)
}
 0x159   :  { %s13423_s17 = scalar_lea.vmem %s445_s18, 1536  ;;  %p13428_p2 = scmp.lt.s32.totalorder %s445_s18, %s445_s18 }
 0x15a   :  { %p13424_p1 = scmp.ne.s32.totalorder %s445_s18, %s13423_s17  ;;  %p13429_p3 = scmp.lt.s32.totalorder %s13423_s17, %s13423_s17 }
 0x15c   :  { %p13430_p4 = por %p13429_p3, %p13428_p2 }
 0x15e   :  { %p13431_p5 = pnand %p13430_p4, %p13424_p1 }
 0x160   :  { %13434 = shalt.err (!%p13431_p5)
}
 0x161   :  { %450 = dma.hbm_to_vmem [thread:$0]  %s14899_s29, 1536, %s445_s18, [#allocation44], %s14688_s2, %s14688_s2, %s14689_s7  }
 0x162   :  { %s13435_s8 = scalar_lea.hbm %s14909_s21, 4096 }
 0x163   :  { %p13436_p6 = scmp.ne.s32.totalorder %s14909_s21, %s13435_s8  ;;  %p13439_p7 = scmp.lt.u32.totalorder %s13435_s8, %s14909_s21 }
 0x165   :  { %p13441_p8 = pnand %p13439_p7, %p13436_p6 }
 0x167   :  { %13444 = shalt.err (!%p13441_p8)
}
 0x168   :  { %s13445_s6 = scalar_lea.vmem %s15207_s22, 4096  ;;  %p13450_p10 = scmp.lt.s32.totalorder %s15207_s22, %s15207_s22 }
 0x169   :  { %p13446_p9 = scmp.ne.s32.totalorder %s15207_s22, %s13445_s6  ;;  %p13451_p11 = scmp.lt.s32.totalorder %s13445_s6, %s13445_s6 }
 0x16b   :  { %p13452_p12 = por %p13451_p11, %p13450_p10 }
 0x16d   :  { %p13453_p13 = pnand %p13452_p12, %p13446_p9 }
 0x16f   :  { %13456 = shalt.err (!%p13453_p13)
}
 0x170   :  { %s16310_s29 = sld [smem:[#allocation149_spill]]  ;;  %s14702_s23 = smov [#allocation49]  }
 0x171   :  { %472 = dma.hbm_to_vmem [thread:$0]  %s14909_s21, 4096, %s15207_s22, [#allocation47], %s14688_s2, %s14688_s2, %s14689_s7  }
 0x172   :  { %s488_s25 = sshll.u32 %s14702_s23, 4  ;;  %s14703_s26 = smov [#allocation52]   ;;  %s489_s25 = int_to_ptr.vmem [resolvable:$true] %s488_s25 }
 0x173   :  { %s510_s28 = sshll.u32 %s14703_s26, 4  ;;  %s15228_s28 = int_to_ptr.vmem [resolvable:$true] %s510_s28 }
 0x176   :  { %s13457_s1 = scalar_lea.hbm %s16310_s29, 1536 }
 0x177   :  { %p13458_p0 = scmp.ne.s32.totalorder %s16310_s29, %s13457_s1  ;;  %p13461_p1 = scmp.lt.u32.totalorder %s13457_s1, %s16310_s29 }
 0x179   :  { %p13463_p2 = pnand %p13461_p1, %p13458_p0 }
 0x17b   :  { %13466 = shalt.err (!%p13463_p2)
}
 0x17c   :  { %s13467_s20 = scalar_lea.vmem %s489_s25, 1536  ;;  %p13472_p4 = scmp.lt.s32.totalorder %s489_s25, %s489_s25 }
 0x17d   :  { %p13468_p3 = scmp.ne.s32.totalorder %s489_s25, %s13467_s20  ;;  %p13473_p5 = scmp.lt.s32.totalorder %s13467_s20, %s13467_s20 }
 0x17f   :  { %p13474_p6 = por %p13473_p5, %p13472_p4 }
 0x181   :  { %p13475_p7 = pnand %p13474_p6, %p13468_p3 }
 0x183   :  { %13478 = shalt.err (!%p13475_p7)
}
 0x184   :  { %s16311_s21 = sld [smem:[#allocation151_spill]] }
 0x185   :  { %494 = dma.hbm_to_vmem [thread:$0]  %s16310_s29, 1536, %s489_s25, [#allocation50], %s14688_s2, %s14688_s2, %s14689_s7  }
 0x18a   :  { %s13479_s10 = scalar_lea.hbm %s16311_s21, 5120 }
 0x18b   :  { %p13480_p8 = scmp.ne.s32.totalorder %s16311_s21, %s13479_s10  ;;  %p13483_p9 = scmp.lt.u32.totalorder %s13479_s10, %s16311_s21 }
 0x18d   :  { %p13485_p10 = pnand %p13483_p9, %p13480_p8 }
 0x18f   :  { %13488 = shalt.err (!%p13485_p10)
}
 0x190   :  { %s13489_s4 = scalar_lea.vmem %s15228_s28, 5120  ;;  %p13494_p12 = scmp.lt.s32.totalorder %s15228_s28, %s15228_s28 }
 0x191   :  { %p13490_p11 = scmp.ne.s32.totalorder %s15228_s28, %s13489_s4  ;;  %p13495_p13 = scmp.lt.s32.totalorder %s13489_s4, %s13489_s4 }
 0x193   :  { %p13496_p0 = por %p13495_p13, %p13494_p12 }
 0x195   :  { %p13497_p1 = pnand %p13496_p0, %p13490_p11 }
 0x197   :  { %13500 = shalt.err (!%p13497_p1)
}
 0x198   :  { %s16312_s11 = sld [smem:[#allocation153_spill]]  ;;  %s14704_s3 = smov [#allocation55]  }
 0x199   :  { %516 = dma.hbm_to_vmem [thread:$0]  %s16311_s21, 5120, %s15228_s28, [#allocation53], %s14688_s2, %s14688_s2, %s14689_s7  }
 0x19a   :  { %s532_s15 = sshll.u32 %s14704_s3, 4  ;;  %s14705_s14 = smov [#allocation58]   ;;  %s533_s15 = int_to_ptr.vmem [resolvable:$true] %s532_s15 }
 0x19b   :  { %s554_s16 = sshll.u32 %s14705_s14, 4  ;;  %s15249_s16 = int_to_ptr.vmem [resolvable:$true] %s554_s16 }
 0x19e   :  { %s13501_s30 = scalar_lea.hbm %s16312_s11, 2560 }
 0x19f   :  { %p13502_p2 = scmp.ne.s32.totalorder %s16312_s11, %s13501_s30  ;;  %p13505_p3 = scmp.lt.u32.totalorder %s13501_s30, %s16312_s11 }
 0x1a1   :  { %p13507_p4 = pnand %p13505_p3, %p13502_p2 }
 0x1a3   :  { %13510 = shalt.err (!%p13507_p4)
}
 0x1a4   :  { %s13511_s9 = scalar_lea.vmem %s533_s15, 2560  ;;  %p13516_p6 = scmp.lt.s32.totalorder %s533_s15, %s533_s15 }
 0x1a5   :  { %p13512_p5 = scmp.ne.s32.totalorder %s533_s15, %s13511_s9  ;;  %p13517_p7 = scmp.lt.s32.totalorder %s13511_s9, %s13511_s9 }
 0x1a7   :  { %p13518_p8 = por %p13517_p7, %p13516_p6 }
 0x1a9   :  { %p13519_p9 = pnand %p13518_p8, %p13512_p5 }
 0x1ab   :  { %13522 = shalt.err (!%p13519_p9)
}
 0x1ac   :  { %s16313_s19 = sld [smem:[#allocation155_spill]] }
 0x1ad   :  { %538 = dma.hbm_to_vmem [thread:$0]  %s16312_s11, 2560, %s533_s15, [#allocation56], %s14688_s2, %s14688_s2, %s14689_s7  }
 0x1b2   :  { %s13523_s18 = scalar_lea.hbm %s16313_s19, 2048 }
 0x1b3   :  { %p13524_p10 = scmp.ne.s32.totalorder %s16313_s19, %s13523_s18  ;;  %p13527_p11 = scmp.lt.u32.totalorder %s13523_s18, %s16313_s19 }
 0x1b5   :  { %p13529_p12 = pnand %p13527_p11, %p13524_p10 }
 0x1b7   :  { %13532 = shalt.err (!%p13529_p12)
}
 0x1b8   :  { %s13533_s0 = scalar_lea.vmem %s15249_s16, 2048  ;;  %p13538_p0 = scmp.lt.s32.totalorder %s15249_s16, %s15249_s16 }
 0x1b9   :  { %p13534_p13 = scmp.ne.s32.totalorder %s15249_s16, %s13533_s0  ;;  %p13539_p1 = scmp.lt.s32.totalorder %s13533_s0, %s13533_s0 }
 0x1bb   :  { %p13540_p2 = por %p13539_p1, %p13538_p0 }
 0x1bd   :  { %p13541_p3 = pnand %p13540_p2, %p13534_p13 }
 0x1bf   :  { %13544 = shalt.err (!%p13541_p3)
}
 0x1c0   :  { %s16314_s22 = sld [smem:[#allocation157_spill]]  ;;  %s14706_s24 = smov [#allocation61]  }
 0x1c1   :  { %560 = dma.hbm_to_vmem [thread:$0]  %s16313_s19, 2048, %s15249_s16, [#allocation59], %s14688_s2, %s14688_s2, %s14689_s7  }
 0x1c2   :  { %s576_s17 = sshll.u32 %s14706_s24, 4  ;;  %s14707_s8 = smov [#allocation64]   ;;  %s577_s17 = int_to_ptr.vmem [resolvable:$true] %s576_s17 }
 0x1c3   :  { %s598_s6 = sshll.u32 %s14707_s8, 4  ;;  %s15270_s6 = int_to_ptr.vmem [resolvable:$true] %s598_s6 }
 0x1c6   :  { %s13545_s29 = scalar_lea.hbm %s16314_s22, 3584 }
 0x1c7   :  { %p13546_p4 = scmp.ne.s32.totalorder %s16314_s22, %s13545_s29  ;;  %p13549_p5 = scmp.lt.u32.totalorder %s13545_s29, %s16314_s22 }
 0x1c9   :  { %p13551_p6 = pnand %p13549_p5, %p13546_p4 }
 0x1cb   :  { %13554 = shalt.err (!%p13551_p6)
}
 0x1cc   :  { %s13555_s23 = scalar_lea.vmem %s577_s17, 3584  ;;  %p13560_p8 = scmp.lt.s32.totalorder %s577_s17, %s577_s17 }
 0x1cd   :  { %p13556_p7 = scmp.ne.s32.totalorder %s577_s17, %s13555_s23  ;;  %p13561_p9 = scmp.lt.s32.totalorder %s13555_s23, %s13555_s23 }
 0x1cf   :  { %p13562_p10 = por %p13561_p9, %p13560_p8 }
 0x1d1   :  { %p13563_p11 = pnand %p13562_p10, %p13556_p7 }
 0x1d3   :  { %13566 = shalt.err (!%p13563_p11)
}
 0x1d4   :  { %s16315_s25 = sld [smem:[#allocation159_spill]] }
 0x1d5   :  { %582 = dma.hbm_to_vmem [thread:$0]  %s16314_s22, 3584, %s577_s17, [#allocation62], %s14688_s2, %s14688_s2, %s14689_s7  }
 0x1da   :  { %s13567_s26 = scalar_lea.hbm %s16315_s25, 2048 }
 0x1db   :  { %p13568_p12 = scmp.ne.s32.totalorder %s16315_s25, %s13567_s26  ;;  %p13571_p13 = scmp.lt.u32.totalorder %s13567_s26, %s16315_s25 }
 0x1dd   :  { %p13573_p0 = pnand %p13571_p13, %p13568_p12 }
 0x1df   :  { %13576 = shalt.err (!%p13573_p0)
}
 0x1e0   :  { %s13577_s28 = scalar_lea.vmem %s15270_s6, 2048  ;;  %p13582_p2 = scmp.lt.s32.totalorder %s15270_s6, %s15270_s6 }
 0x1e1   :  { %p13578_p1 = scmp.ne.s32.totalorder %s15270_s6, %s13577_s28  ;;  %p13583_p3 = scmp.lt.s32.totalorder %s13577_s28, %s13577_s28 }
 0x1e3   :  { %p13584_p4 = por %p13583_p3, %p13582_p2 }
 0x1e5   :  { %p13585_p5 = pnand %p13584_p4, %p13578_p1 }
 0x1e7   :  { %13588 = shalt.err (!%p13585_p5)
}
 0x1e8   :  { %s16316_s1 = sld [smem:[#allocation161_spill]]  ;;  %s14708_s20 = smov [#allocation67]  }
 0x1e9   :  { %604 = dma.hbm_to_vmem [thread:$0]  %s16315_s25, 2048, %s15270_s6, [#allocation65], %s14688_s2, %s14688_s2, %s14689_s7  }
 0x1ea   :  { %s620_s21 = sshll.u32 %s14708_s20, 4  ;;  %s14709_s10 = smov [#allocation70]   ;;  %s621_s21 = int_to_ptr.vmem [resolvable:$true] %s620_s21 }
 0x1eb   :  { %s642_s4 = sshll.u32 %s14709_s10, 4  ;;  %s15291_s4 = int_to_ptr.vmem [resolvable:$true] %s642_s4 }
 0x1ee   :  { %s13589_s11 = scalar_lea.hbm %s16316_s1, 4608 }
 0x1ef   :  { %p13590_p6 = scmp.ne.s32.totalorder %s16316_s1, %s13589_s11  ;;  %p13593_p7 = scmp.lt.u32.totalorder %s13589_s11, %s16316_s1 }
 0x1f1   :  { %p13595_p8 = pnand %p13593_p7, %p13590_p6 }
 0x1f3   :  { %13598 = shalt.err (!%p13595_p8)
}
 0x1f4   :  { %s13599_s3 = scalar_lea.vmem %s621_s21, 4608  ;;  %p13604_p10 = scmp.lt.s32.totalorder %s621_s21, %s621_s21 }
 0x1f5   :  { %p13600_p9 = scmp.ne.s32.totalorder %s621_s21, %s13599_s3  ;;  %p13605_p11 = scmp.lt.s32.totalorder %s13599_s3, %s13599_s3 }
 0x1f7   :  { %p13606_p12 = por %p13605_p11, %p13604_p10 }
 0x1f9   :  { %p13607_p13 = pnand %p13606_p12, %p13600_p9 }
 0x1fb   :  { %13610 = shalt.err (!%p13607_p13)
}
 0x1fc   :  { %s16317_s15 = sld [smem:[#allocation163_spill]] }
 0x1fd   :  { %626 = dma.hbm_to_vmem [thread:$0]  %s16316_s1, 4608, %s621_s21, [#allocation68], %s14688_s2, %s14688_s2, %s14689_s7  }
 0x202   :  { %s13611_s14 = scalar_lea.hbm %s16317_s15, 2048 }
 0x203   :  { %p13612_p0 = scmp.ne.s32.totalorder %s16317_s15, %s13611_s14  ;;  %p13615_p1 = scmp.lt.u32.totalorder %s13611_s14, %s16317_s15 }
 0x205   :  { %p13617_p2 = pnand %p13615_p1, %p13612_p0 }
 0x207   :  { %13620 = shalt.err (!%p13617_p2)
}
 0x208   :  { %s13621_s16 = scalar_lea.vmem %s15291_s4, 2048  ;;  %p13626_p4 = scmp.lt.s32.totalorder %s15291_s4, %s15291_s4 }
 0x209   :  { %p13622_p3 = scmp.ne.s32.totalorder %s15291_s4, %s13621_s16  ;;  %p13627_p5 = scmp.lt.s32.totalorder %s13621_s16, %s13621_s16 }
 0x20b   :  { %p13628_p6 = por %p13627_p5, %p13626_p4 }
 0x20d   :  { %p13629_p7 = pnand %p13628_p6, %p13622_p3 }
 0x20f   :  { %13632 = shalt.err (!%p13629_p7)
}
 0x210   :  { %s16318_s30 = sld [smem:[#allocation165_spill]]  ;;  %s14710_s9 = smov [#allocation73]  }
 0x211   :  { %648 = dma.hbm_to_vmem [thread:$0]  %s16317_s15, 2048, %s15291_s4, [#allocation71], %s14688_s2, %s14688_s2, %s14689_s7  }
 0x212   :  { %s664_s19 = sshll.u32 %s14710_s9, 4  ;;  %s14711_s18 = smov [#allocation76]   ;;  %s665_s19 = int_to_ptr.vmem [resolvable:$true] %s664_s19 }
 0x213   :  { %s686_s0 = sshll.u32 %s14711_s18, 4  ;;  %s15312_s0 = int_to_ptr.vmem [resolvable:$true] %s686_s0 }
 0x216   :  { %s13633_s22 = scalar_lea.hbm %s16318_s30, 5632 }
 0x217   :  { %p13634_p8 = scmp.ne.s32.totalorder %s16318_s30, %s13633_s22  ;;  %p13637_p9 = scmp.lt.u32.totalorder %s13633_s22, %s16318_s30 }
 0x219   :  { %p13639_p10 = pnand %p13637_p9, %p13634_p8 }
 0x21b   :  { %13642 = shalt.err (!%p13639_p10)
}
 0x21c   :  { %s13643_s24 = scalar_lea.vmem %s665_s19, 5632  ;;  %p13648_p12 = scmp.lt.s32.totalorder %s665_s19, %s665_s19 }
 0x21d   :  { %p13644_p11 = scmp.ne.s32.totalorder %s665_s19, %s13643_s24  ;;  %p13649_p13 = scmp.lt.s32.totalorder %s13643_s24, %s13643_s24 }
 0x21f   :  { %p13650_p0 = por %p13649_p13, %p13648_p12 }
 0x221   :  { %p13651_p1 = pnand %p13650_p0, %p13644_p11 }
 0x223   :  { %13654 = shalt.err (!%p13651_p1)
}
 0x224   :  { %s16319_s17 = sld [smem:[#allocation167_spill]] }
 0x225   :  { %670 = dma.hbm_to_vmem [thread:$0]  %s16318_s30, 5632, %s665_s19, [#allocation74], %s14688_s2, %s14688_s2, %s14689_s7  }
 0x22a   :  { %s13655_s8 = scalar_lea.hbm %s16319_s17, 2816 }
 0x22b   :  { %p13656_p2 = scmp.ne.s32.totalorder %s16319_s17, %s13655_s8  ;;  %p13659_p3 = scmp.lt.u32.totalorder %s13655_s8, %s16319_s17 }
 0x22d   :  { %p13661_p4 = pnand %p13659_p3, %p13656_p2 }
 0x22f   :  { %13664 = shalt.err (!%p13661_p4)
}
 0x230   :  { %s13665_s6 = scalar_lea.vmem %s15312_s0, 2816  ;;  %p13670_p6 = scmp.lt.s32.totalorder %s15312_s0, %s15312_s0 }
 0x231   :  { %p13666_p5 = scmp.ne.s32.totalorder %s15312_s0, %s13665_s6  ;;  %p13671_p7 = scmp.lt.s32.totalorder %s13665_s6, %s13665_s6 }
 0x233   :  { %p13672_p8 = por %p13671_p7, %p13670_p6 }
 0x235   :  { %p13673_p9 = pnand %p13672_p8, %p13666_p5 }
 0x237   :  { %13676 = shalt.err (!%p13673_p9)
}
 0x238   :  { %s16320_s29 = sld [smem:[#allocation169_spill]]  ;;  %s14712_s23 = smov [#allocation79]  }
 0x239   :  { %692 = dma.hbm_to_vmem [thread:$0]  %s16319_s17, 2816, %s15312_s0, [#allocation77], %s14688_s2, %s14688_s2, %s14689_s7  }
 0x23a   :  { %s708_s25 = sshll.u32 %s14712_s23, 4  ;;  %s14713_s26 = smov [#allocation82]   ;;  %s709_s25 = int_to_ptr.vmem [resolvable:$true] %s708_s25 }
 0x23b   :  { %s730_s28 = sshll.u32 %s14713_s26, 4  ;;  %s15333_s28 = int_to_ptr.vmem [resolvable:$true] %s730_s28 }
 0x23e   :  { %s13677_s1 = scalar_lea.hbm %s16320_s29, 2048 }
 0x23f   :  { %p13678_p10 = scmp.ne.s32.totalorder %s16320_s29, %s13677_s1  ;;  %p13681_p11 = scmp.lt.u32.totalorder %s13677_s1, %s16320_s29 }
 0x241   :  { %p13683_p12 = pnand %p13681_p11, %p13678_p10 }
 0x243   :  { %13686 = shalt.err (!%p13683_p12)
}
 0x244   :  { %s13687_s20 = scalar_lea.vmem %s709_s25, 2048  ;;  %p13692_p0 = scmp.lt.s32.totalorder %s709_s25, %s709_s25 }
 0x245   :  { %p13688_p13 = scmp.ne.s32.totalorder %s709_s25, %s13687_s20  ;;  %p13693_p1 = scmp.lt.s32.totalorder %s13687_s20, %s13687_s20 }
 0x247   :  { %p13694_p2 = por %p13693_p1, %p13692_p0 }
 0x249   :  { %p13695_p3 = pnand %p13694_p2, %p13688_p13 }
 0x24b   :  { %13698 = shalt.err (!%p13695_p3)
}
 0x24c   :  { %s16321_s21 = sld [smem:[#allocation171_spill]] }
 0x24d   :  { %714 = dma.hbm_to_vmem [thread:$0]  %s16320_s29, 2048, %s709_s25, [#allocation80], %s14688_s2, %s14688_s2, %s14689_s7  }
 0x252   :  { %s13699_s10 = scalar_lea.hbm %s16321_s21, 3840 }
 0x253   :  { %p13700_p4 = scmp.ne.s32.totalorder %s16321_s21, %s13699_s10  ;;  %p13703_p5 = scmp.lt.u32.totalorder %s13699_s10, %s16321_s21 }
 0x255   :  { %p13705_p6 = pnand %p13703_p5, %p13700_p4 }
 0x257   :  { %13708 = shalt.err (!%p13705_p6)
}
 0x258   :  { %s13709_s4 = scalar_lea.vmem %s15333_s28, 3840  ;;  %p13714_p8 = scmp.lt.s32.totalorder %s15333_s28, %s15333_s28 }
 0x259   :  { %p13710_p7 = scmp.ne.s32.totalorder %s15333_s28, %s13709_s4  ;;  %p13715_p9 = scmp.lt.s32.totalorder %s13709_s4, %s13709_s4 }
 0x25b   :  { %p13716_p10 = por %p13715_p9, %p13714_p8 }
 0x25d   :  { %p13717_p11 = pnand %p13716_p10, %p13710_p7 }
 0x25f   :  { %13720 = shalt.err (!%p13717_p11)
}
 0x260   :  { %s16322_s11 = sld [smem:[#allocation173_spill]]  ;;  %s14714_s3 = smov [#allocation85]  }
 0x261   :  { %736 = dma.hbm_to_vmem [thread:$0]  %s16321_s21, 3840, %s15333_s28, [#allocation83], %s14688_s2, %s14688_s2, %s14689_s7  }
 0x262   :  { %s752_s15 = sshll.u32 %s14714_s3, 4  ;;  %s14715_s14 = smov [#allocation88]   ;;  %s753_s15 = int_to_ptr.vmem [resolvable:$true] %s752_s15 }
 0x263   :  { %s774_s16 = sshll.u32 %s14715_s14, 4  ;;  %s15354_s16 = int_to_ptr.vmem [resolvable:$true] %s774_s16 }
 0x266   :  { %s13721_s30 = scalar_lea.hbm %s16322_s11, 2048 }
 0x267   :  { %p13722_p12 = scmp.ne.s32.totalorder %s16322_s11, %s13721_s30  ;;  %p13725_p13 = scmp.lt.u32.totalorder %s13721_s30, %s16322_s11 }
 0x269   :  { %p13727_p0 = pnand %p13725_p13, %p13722_p12 }
 0x26b   :  { %13730 = shalt.err (!%p13727_p0)
}
 0x26c   :  { %s13731_s9 = scalar_lea.vmem %s753_s15, 2048  ;;  %p13736_p2 = scmp.lt.s32.totalorder %s753_s15, %s753_s15 }
 0x26d   :  { %p13732_p1 = scmp.ne.s32.totalorder %s753_s15, %s13731_s9  ;;  %p13737_p3 = scmp.lt.s32.totalorder %s13731_s9, %s13731_s9 }
 0x26f   :  { %p13738_p4 = por %p13737_p3, %p13736_p2 }
 0x271   :  { %p13739_p5 = pnand %p13738_p4, %p13732_p1 }
 0x273   :  { %13742 = shalt.err (!%p13739_p5)
}
 0x274   :  { %s16323_s19 = sld [smem:[#allocation175_spill]] }
 0x275   :  { %758 = dma.hbm_to_vmem [thread:$0]  %s16322_s11, 2048, %s753_s15, [#allocation86], %s14688_s2, %s14688_s2, %s14689_s7  }
 0x27a   :  { %s13743_s18 = scalar_lea.hbm %s16323_s19, 4864 }
 0x27b   :  { %p13744_p6 = scmp.ne.s32.totalorder %s16323_s19, %s13743_s18  ;;  %p13747_p7 = scmp.lt.u32.totalorder %s13743_s18, %s16323_s19 }
 0x27d   :  { %p13749_p8 = pnand %p13747_p7, %p13744_p6 }
 0x27f   :  { %13752 = shalt.err (!%p13749_p8)
}
 0x280   :  { %s13753_s0 = scalar_lea.vmem %s15354_s16, 4864  ;;  %p13758_p10 = scmp.lt.s32.totalorder %s15354_s16, %s15354_s16 }
 0x281   :  { %p13754_p9 = scmp.ne.s32.totalorder %s15354_s16, %s13753_s0  ;;  %p13759_p11 = scmp.lt.s32.totalorder %s13753_s0, %s13753_s0 }
 0x283   :  { %p13760_p12 = por %p13759_p11, %p13758_p10 }
 0x285   :  { %p13761_p13 = pnand %p13760_p12, %p13754_p9 }
 0x287   :  { %13764 = shalt.err (!%p13761_p13)
}
 0x288   :  { %s16324_s22 = sld [smem:[#allocation177_spill]]  ;;  %s14716_s24 = smov [#allocation91]  }
 0x289   :  { %780 = dma.hbm_to_vmem [thread:$0]  %s16323_s19, 4864, %s15354_s16, [#allocation89], %s14688_s2, %s14688_s2, %s14689_s7  }
 0x28a   :  { %s796_s17 = sshll.u32 %s14716_s24, 4  ;;  %s14717_s8 = smov [#allocation94]   ;;  %s797_s17 = int_to_ptr.vmem [resolvable:$true] %s796_s17 }
 0x28b   :  { %s818_s6 = sshll.u32 %s14717_s8, 4  ;;  %s15375_s6 = int_to_ptr.vmem [resolvable:$true] %s818_s6 }
 0x28e   :  { %s13765_s29 = scalar_lea.hbm %s16324_s22, 2048 }
 0x28f   :  { %p13766_p0 = scmp.ne.s32.totalorder %s16324_s22, %s13765_s29  ;;  %p13769_p1 = scmp.lt.u32.totalorder %s13765_s29, %s16324_s22 }
 0x291   :  { %p13771_p2 = pnand %p13769_p1, %p13766_p0 }
 0x293   :  { %13774 = shalt.err (!%p13771_p2)
}
 0x294   :  { %s13775_s23 = scalar_lea.vmem %s797_s17, 2048  ;;  %p13780_p4 = scmp.lt.s32.totalorder %s797_s17, %s797_s17 }
 0x295   :  { %p13776_p3 = scmp.ne.s32.totalorder %s797_s17, %s13775_s23  ;;  %p13781_p5 = scmp.lt.s32.totalorder %s13775_s23, %s13775_s23 }
 0x297   :  { %p13782_p6 = por %p13781_p5, %p13780_p4 }
 0x299   :  { %p13783_p7 = pnand %p13782_p6, %p13776_p3 }
 0x29b   :  { %13786 = shalt.err (!%p13783_p7)
}
 0x29c   :  { %s16325_s25 = sld [smem:[#allocation179_spill]] }
 0x29d   :  { %802 = dma.hbm_to_vmem [thread:$0]  %s16324_s22, 2048, %s797_s17, [#allocation92], %s14688_s2, %s14688_s2, %s14689_s7  }
 0x2a2   :  { %s13787_s26 = scalar_lea.hbm %s16325_s25, 5888 }
 0x2a3   :  { %p13788_p8 = scmp.ne.s32.totalorder %s16325_s25, %s13787_s26  ;;  %p13791_p9 = scmp.lt.u32.totalorder %s13787_s26, %s16325_s25 }
 0x2a5   :  { %p13793_p10 = pnand %p13791_p9, %p13788_p8 }
 0x2a7   :  { %13796 = shalt.err (!%p13793_p10)
}
 0x2a8   :  { %s13797_s28 = scalar_lea.vmem %s15375_s6, 5888  ;;  %p13802_p12 = scmp.lt.s32.totalorder %s15375_s6, %s15375_s6 }
 0x2a9   :  { %p13798_p11 = scmp.ne.s32.totalorder %s15375_s6, %s13797_s28  ;;  %p13803_p13 = scmp.lt.s32.totalorder %s13797_s28, %s13797_s28 }
 0x2ab   :  { %p13804_p0 = por %p13803_p13, %p13802_p12 }
 0x2ad   :  { %p13805_p1 = pnand %p13804_p0, %p13798_p11 }
 0x2af   :  { %13808 = shalt.err (!%p13805_p1)
}
 0x2b0   :  { %824 = dma.hbm_to_vmem [thread:$0]  %s16325_s25, 5888, %s15375_s6, [#allocation95], %s14688_s2, %s14688_s2, %s14689_s7  }
 0x2b1   :  { %s14718_s1 = smov [#allocation97]   ;;  %s14719_s21 = smov [#allocation4]  }
 0x2b2   :  { %s840_s20 = sshll.u32 %s14718_s1, 4  ;;  %s170_s10 = sshll.u32 %s14719_s21, 4  ;;  %s841_s20 = int_to_ptr.vmem [resolvable:$true] %s840_s20  ;;  %s15396_s10 = int_to_ptr.vmem [resolvable:$true] %s170_s10 }
 0x2b3   :  { %s13809_s4 = scalar_lea.hbm %s15079_s13, 1536 }
 0x2b4   :  { %p13810_p2 = scmp.ne.s32.totalorder %s15079_s13, %s13809_s4  ;;  %p13813_p3 = scmp.lt.u32.totalorder %s13809_s4, %s15079_s13 }
 0x2b6   :  { %p13815_p4 = pnand %p13813_p3, %p13810_p2 }
 0x2b8   :  { %13818 = shalt.err (!%p13815_p4)
}
 0x2b9   :  { %s13819_s11 = scalar_lea.vmem %s841_s20, 1536  ;;  %p13824_p6 = scmp.lt.s32.totalorder %s841_s20, %s841_s20 }
 0x2ba   :  { %p13820_p5 = scmp.ne.s32.totalorder %s841_s20, %s13819_s11  ;;  %p13825_p7 = scmp.lt.s32.totalorder %s13819_s11, %s13819_s11 }
 0x2bc   :  { %p13826_p8 = por %p13825_p7, %p13824_p6 }
 0x2be   :  { %p13827_p9 = pnand %p13826_p8, %p13820_p5 }
 0x2c0   :  { %13830 = shalt.err (!%p13827_p9)
}
 0x2c1   :  { %s16326_s3 = sld [smem:[#allocation134_spill]] }
 0x2c2   :  { %846 = dma.hbm_to_vmem [thread:$0]  %s15079_s13, 1536, %s841_s20, [#allocation98], %s14688_s2, %s14688_s2, %s14689_s7  }
 0x2c7   :  { %s13831_s15 = scalar_lea.hbm %s16326_s3, 256 }
 0x2c8   :  { %p13832_p10 = scmp.ne.s32.totalorder %s16326_s3, %s13831_s15  ;;  %p13835_p11 = scmp.lt.u32.totalorder %s13831_s15, %s16326_s3 }
 0x2ca   :  { %p13837_p12 = pnand %p13835_p11, %p13832_p10 }
 0x2cc   :  { %13840 = shalt.err (!%p13837_p12)
}
 0x2cd   :  { %s13841_s14 = scalar_lea.vmem %s15396_s10, 256  ;;  %p13846_p0 = scmp.lt.s32.totalorder %s15396_s10, %s15396_s10 }
 0x2ce   :  { %p13842_p13 = scmp.ne.s32.totalorder %s15396_s10, %s13841_s14  ;;  %p13847_p1 = scmp.lt.s32.totalorder %s13841_s14, %s13841_s14 }
 0x2d0   :  { %p13848_p2 = por %p13847_p1, %p13846_p0 }
 0x2d2   :  { %p13849_p3 = pnand %p13848_p2, %p13842_p13 }
 0x2d4   :  { %13852 = shalt.err (!%p13849_p3)
}
 0x2d5   :  { %s16327_s13 = sld [smem:[#allocation135_spill]]  ;;  %s14720_s16 = smov [#allocation9]  }
 0x2d6   :  { %176 = dma.hbm_to_vmem [thread:$0]  %s16326_s3, 256, %s15396_s10, [#allocation5], %s14688_s2, %s14688_s2, %s14689_s7  }
 0x2d7   :  { %s195_s30 = sshll.u32 %s14720_s16, 4  ;;  %s14721_s9 = smov [#allocation12]   ;;  %s196_s30 = int_to_ptr.vmem [resolvable:$true] %s195_s30 }
 0x2d8   :  { %s215_s19 = sshll.u32 %s14721_s9, 4  ;;  %s216_s19 = int_to_ptr.vmem [resolvable:$true] %s215_s19 }
 0x2db   :  { %s13853_s18 = scalar_lea.hbm %s16327_s13, 32 }
 0x2dc   :  { %p13854_p4 = scmp.ne.s32.totalorder %s16327_s13, %s13853_s18  ;;  %p13857_p5 = scmp.lt.u32.totalorder %s13853_s18, %s16327_s13 }
 0x2de   :  { %p13859_p6 = pnand %p13857_p5, %p13854_p4 }
 0x2e0   :  { %13862 = shalt.err (!%p13859_p6)
}
 0x2e1   :  { %s13863_s0 = scalar_lea.vmem %s196_s30, 32  ;;  %p13868_p8 = scmp.lt.s32.totalorder %s196_s30, %s196_s30 }
 0x2e2   :  { %p13864_p7 = scmp.ne.s32.totalorder %s196_s30, %s13863_s0  ;;  %p13869_p9 = scmp.lt.s32.totalorder %s13863_s0, %s13863_s0 }
 0x2e4   :  { %p13870_p10 = por %p13869_p9, %p13868_p8 }
 0x2e6   :  { %p13871_p11 = pnand %p13870_p10, %p13864_p7 }
 0x2e8   :  { %13874 = shalt.err (!%p13871_p11)
}
 0x2e9   :  { %s16328_s2 = sld [smem:[#allocation136_spill]] }
 0x2ea   :  { %198 = dma.hbm_to_vmem [thread:$0]  %s16327_s13, 32, %s196_s30, [#allocation8]  }
 0x2ef   :  { %s13875_s7 = scalar_lea.hbm %s16328_s2, 64 }
 0x2f0   :  { %p13876_p12 = scmp.ne.s32.totalorder %s16328_s2, %s13875_s7  ;;  %p13879_p13 = scmp.lt.u32.totalorder %s13875_s7, %s16328_s2 }
 0x2f2   :  { %p13881_p0 = pnand %p13879_p13, %p13876_p12 }
 0x2f4   :  { %13884 = shalt.err (!%p13881_p0)
}
 0x2f5   :  { %s13885_s22 = scalar_lea.vmem %s216_s19, 64  ;;  %p13890_p2 = scmp.lt.s32.totalorder %s216_s19, %s216_s19 }
 0x2f6   :  { %p13886_p1 = scmp.ne.s32.totalorder %s216_s19, %s13885_s22  ;;  %p13891_p3 = scmp.lt.s32.totalorder %s13885_s22, %s13885_s22 }
 0x2f8   :  { %p13892_p4 = por %p13891_p3, %p13890_p2 }
 0x2fa   :  { %p13893_p5 = pnand %p13892_p4, %p13886_p1 }
 0x2fc   :  { %13896 = shalt.err (!%p13893_p5)
}
 0x2fd   :  { %s16329_s24 = sld [smem:[#allocation137_spill]]  ;;  %s14722_s17 = smov [#allocation15]  }
 0x2fe   :  { %218 = dma.hbm_to_vmem [thread:$0]  %s16328_s2, 64, %s216_s19, [#allocation11]  }
 0x2ff   :  { %s237_s8 = sshll.u32 %s14722_s17, 4  ;;  %s14723_s6 = smov [#allocation18]   ;;  %s238_s8 = int_to_ptr.vmem [resolvable:$true] %s237_s8 }
 0x300   :  { %s259_s29 = sshll.u32 %s14723_s6, 4  ;;  %s260_s29 = int_to_ptr.vmem [resolvable:$true] %s259_s29 }
 0x303   :  { %s13897_s23 = scalar_lea.hbm %s16329_s24, 64 }
 0x304   :  { %p13898_p6 = scmp.ne.s32.totalorder %s16329_s24, %s13897_s23  ;;  %p13901_p7 = scmp.lt.u32.totalorder %s13897_s23, %s16329_s24 }
 0x306   :  { %p13903_p8 = pnand %p13901_p7, %p13898_p6 }
 0x308   :  { %13906 = shalt.err (!%p13903_p8)
}
 0x309   :  { %s13907_s25 = scalar_lea.vmem %s238_s8, 64  ;;  %p13912_p10 = scmp.lt.s32.totalorder %s238_s8, %s238_s8 }
 0x30a   :  { %p13908_p9 = scmp.ne.s32.totalorder %s238_s8, %s13907_s25  ;;  %p13913_p11 = scmp.lt.s32.totalorder %s13907_s25, %s13907_s25 }
 0x30c   :  { %p13914_p12 = por %p13913_p11, %p13912_p10 }
 0x30e   :  { %p13915_p13 = pnand %p13914_p12, %p13908_p9 }
 0x310   :  { %13918 = shalt.err (!%p13915_p13)
}
 0x311   :  { %s16330_s26 = sld [smem:[#allocation138_spill]] }
 0x312   :  { %240 = dma.hbm_to_vmem [thread:$0]  %s16329_s24, 64, %s238_s8, [#allocation14]  }
 0x317   :  { %s13919_s28 = scalar_lea.hbm %s16330_s26, 64 }
 0x318   :  { %p13920_p0 = scmp.ne.s32.totalorder %s16330_s26, %s13919_s28  ;;  %p13923_p1 = scmp.lt.u32.totalorder %s13919_s28, %s16330_s26 }
 0x31a   :  { %p13925_p2 = pnand %p13923_p1, %p13920_p0 }
 0x31c   :  { %13928 = shalt.err (!%p13925_p2)
}
 0x31d   :  { %s13929_s1 = scalar_lea.vmem %s260_s29, 64  ;;  %p13934_p4 = scmp.lt.s32.totalorder %s260_s29, %s260_s29 }
 0x31e   :  { %p13930_p3 = scmp.ne.s32.totalorder %s260_s29, %s13929_s1  ;;  %p13935_p5 = scmp.lt.s32.totalorder %s13929_s1, %s13929_s1 }
 0x320   :  { %p13936_p6 = por %p13935_p5, %p13934_p4 }
 0x322   :  { %p13937_p7 = pnand %p13936_p6, %p13930_p3 }
 0x324   :  { %13940 = shalt.err (!%p13937_p7)
}
 0x325   :  { %s16331_s20 = sld [smem:[#allocation139_spill]]  ;;  %s14724_s21 = smov [#allocation21]  }
 0x326   :  { %262 = dma.hbm_to_vmem [thread:$0]  %s16330_s26, 64, %s260_s29, [#allocation17]  }
 0x327   :  { %s281_s10 = sshll.u32 %s14724_s21, 4  ;;  %s14725_s4 = smov [#allocation24]   ;;  %s282_s10 = int_to_ptr.vmem [resolvable:$true] %s281_s10 }
 0x328   :  { %s303_s11 = sshll.u32 %s14725_s4, 4  ;;  %s304_s11 = int_to_ptr.vmem [resolvable:$true] %s303_s11 }
 0x32b   :  { %s13941_s3 = scalar_lea.hbm %s16331_s20, 64 }
 0x32c   :  { %p13942_p8 = scmp.ne.s32.totalorder %s16331_s20, %s13941_s3  ;;  %p13945_p9 = scmp.lt.u32.totalorder %s13941_s3, %s16331_s20 }
 0x32e   :  { %p13947_p10 = pnand %p13945_p9, %p13942_p8 }
 0x330   :  { %13950 = shalt.err (!%p13947_p10)
}
 0x331   :  { %s13951_s15 = scalar_lea.vmem %s282_s10, 64  ;;  %p13956_p12 = scmp.lt.s32.totalorder %s282_s10, %s282_s10 }
 0x332   :  { %p13952_p11 = scmp.ne.s32.totalorder %s282_s10, %s13951_s15  ;;  %p13957_p13 = scmp.lt.s32.totalorder %s13951_s15, %s13951_s15 }
 0x334   :  { %p13958_p0 = por %p13957_p13, %p13956_p12 }
 0x336   :  { %p13959_p1 = pnand %p13958_p0, %p13952_p11 }
 0x338   :  { %13962 = shalt.err (!%p13959_p1)
}
 0x339   :  { %s16332_s14 = sld [smem:[#allocation140_spill]] }
 0x33a   :  { %284 = dma.hbm_to_vmem [thread:$0]  %s16331_s20, 64, %s282_s10, [#allocation20]  }
 0x33f   :  { %s13963_s13 = scalar_lea.hbm %s16332_s14, 64 }
 0x340   :  { %p13964_p2 = scmp.ne.s32.totalorder %s16332_s14, %s13963_s13  ;;  %p13967_p3 = scmp.lt.u32.totalorder %s13963_s13, %s16332_s14 }
 0x342   :  { %p13969_p4 = pnand %p13967_p3, %p13964_p2 }
 0x344   :  { %13972 = shalt.err (!%p13969_p4)
}
 0x345   :  { %s13973_s16 = scalar_lea.vmem %s304_s11, 64  ;;  %p13978_p6 = scmp.lt.s32.totalorder %s304_s11, %s304_s11 }
 0x346   :  { %p13974_p5 = scmp.ne.s32.totalorder %s304_s11, %s13973_s16  ;;  %p13979_p7 = scmp.lt.s32.totalorder %s13973_s16, %s13973_s16 }
 0x348   :  { %p13980_p8 = por %p13979_p7, %p13978_p6 }
 0x34a   :  { %p13981_p9 = pnand %p13980_p8, %p13974_p5 }
 0x34c   :  { %13984 = shalt.err (!%p13981_p9)
}
 0x34d   :  { %s16333_s30 = sld [smem:[#allocation141_spill]]  ;;  %s14726_s9 = smov [#allocation27]  }
 0x34e   :  { %306 = dma.hbm_to_vmem [thread:$0]  %s16332_s14, 64, %s304_s11, [#allocation23]  }
 0x34f   :  { %s325_s19 = sshll.u32 %s14726_s9, 4  ;;  %s14727_s18 = smov [#allocation30]   ;;  %s326_s19 = int_to_ptr.vmem [resolvable:$true] %s325_s19 }
 0x350   :  { %s347_s0 = sshll.u32 %s14727_s18, 4  ;;  %s348_s0 = int_to_ptr.vmem [resolvable:$true] %s347_s0 }
 0x353   :  { %s13985_s2 = scalar_lea.hbm %s16333_s30, 64 }
 0x354   :  { %p13986_p10 = scmp.ne.s32.totalorder %s16333_s30, %s13985_s2  ;;  %p13989_p11 = scmp.lt.u32.totalorder %s13985_s2, %s16333_s30 }
 0x356   :  { %p13991_p12 = pnand %p13989_p11, %p13986_p10 }
 0x358   :  { %13994 = shalt.err (!%p13991_p12)
}
 0x359   :  { %s13995_s7 = scalar_lea.vmem %s326_s19, 64  ;;  %p14000_p0 = scmp.lt.s32.totalorder %s326_s19, %s326_s19 }
 0x35a   :  { %p13996_p13 = scmp.ne.s32.totalorder %s326_s19, %s13995_s7  ;;  %p14001_p1 = scmp.lt.s32.totalorder %s13995_s7, %s13995_s7 }
 0x35c   :  { %p14002_p2 = por %p14001_p1, %p14000_p0 }
 0x35e   :  { %p14003_p3 = pnand %p14002_p2, %p13996_p13 }
 0x360   :  { %14006 = shalt.err (!%p14003_p3)
}
 0x361   :  { %s16334_s22 = sld [smem:[#allocation142_spill]] }
 0x362   :  { %328 = dma.hbm_to_vmem [thread:$0]  %s16333_s30, 64, %s326_s19, [#allocation26]  }
 0x367   :  { %s14007_s24 = scalar_lea.hbm %s16334_s22, 64 }
 0x368   :  { %p14008_p4 = scmp.ne.s32.totalorder %s16334_s22, %s14007_s24  ;;  %p14011_p5 = scmp.lt.u32.totalorder %s14007_s24, %s16334_s22 }
 0x36a   :  { %p14013_p6 = pnand %p14011_p5, %p14008_p4 }
 0x36c   :  { %14016 = shalt.err (!%p14013_p6)
}
 0x36d   :  { %s14017_s17 = scalar_lea.vmem %s348_s0, 64  ;;  %p14022_p8 = scmp.lt.s32.totalorder %s348_s0, %s348_s0 }
 0x36e   :  { %p14018_p7 = scmp.ne.s32.totalorder %s348_s0, %s14017_s17  ;;  %p14023_p9 = scmp.lt.s32.totalorder %s14017_s17, %s14017_s17 }
 0x370   :  { %p14024_p10 = por %p14023_p9, %p14022_p8 }
 0x372   :  { %p14025_p11 = pnand %p14024_p10, %p14018_p7 }
 0x374   :  { %14028 = shalt.err (!%p14025_p11)
}
 0x375   :  { %s16335_s8 = sld [smem:[#allocation143_spill]]  ;;  %s14728_s6 = smov [#allocation33]  }
 0x376   :  { %350 = dma.hbm_to_vmem [thread:$0]  %s16334_s22, 64, %s348_s0, [#allocation29]  }
 0x377   :  { %s369_s29 = sshll.u32 %s14728_s6, 4  ;;  %s14729_s23 = smov [#allocation36]   ;;  %s370_s29 = int_to_ptr.vmem [resolvable:$true] %s369_s29 }
 0x378   :  { %s391_s25 = sshll.u32 %s14729_s23, 4  ;;  %s392_s25 = int_to_ptr.vmem [resolvable:$true] %s391_s25 }
 0x37b   :  { %s14029_s26 = scalar_lea.hbm %s16335_s8, 64 }
 0x37c   :  { %p14030_p12 = scmp.ne.s32.totalorder %s16335_s8, %s14029_s26  ;;  %p14033_p13 = scmp.lt.u32.totalorder %s14029_s26, %s16335_s8 }
 0x37e   :  { %p14035_p0 = pnand %p14033_p13, %p14030_p12 }
 0x380   :  { %14038 = shalt.err (!%p14035_p0)
}
 0x381   :  { %s14039_s28 = scalar_lea.vmem %s370_s29, 64  ;;  %p14044_p2 = scmp.lt.s32.totalorder %s370_s29, %s370_s29 }
 0x382   :  { %p14040_p1 = scmp.ne.s32.totalorder %s370_s29, %s14039_s28  ;;  %p14045_p3 = scmp.lt.s32.totalorder %s14039_s28, %s14039_s28 }
 0x384   :  { %p14046_p4 = por %p14045_p3, %p14044_p2 }
 0x386   :  { %p14047_p5 = pnand %p14046_p4, %p14040_p1 }
 0x388   :  { %14050 = shalt.err (!%p14047_p5)
}
 0x389   :  { %s16336_s1 = sld [smem:[#allocation144_spill]] }
 0x38a   :  { %372 = dma.hbm_to_vmem [thread:$0]  %s16335_s8, 64, %s370_s29, [#allocation32]  }
 0x38f   :  { %s14051_s20 = scalar_lea.hbm %s16336_s1, 64 }
 0x390   :  { %p14052_p6 = scmp.ne.s32.totalorder %s16336_s1, %s14051_s20  ;;  %p14055_p7 = scmp.lt.u32.totalorder %s14051_s20, %s16336_s1 }
 0x392   :  { %p14057_p8 = pnand %p14055_p7, %p14052_p6 }
 0x394   :  { %14060 = shalt.err (!%p14057_p8)
}
 0x395   :  { %s14061_s21 = scalar_lea.vmem %s392_s25, 64  ;;  %p14066_p10 = scmp.lt.s32.totalorder %s392_s25, %s392_s25 }
 0x396   :  { %p14062_p9 = scmp.ne.s32.totalorder %s392_s25, %s14061_s21  ;;  %p14067_p11 = scmp.lt.s32.totalorder %s14061_s21, %s14061_s21 }
 0x398   :  { %p14068_p12 = por %p14067_p11, %p14066_p10 }
 0x39a   :  { %p14069_p13 = pnand %p14068_p12, %p14062_p9 }
 0x39c   :  { %14072 = shalt.err (!%p14069_p13)
}
 0x39d   :  { %s16337_s10 = sld [smem:[#allocation145_spill]]  ;;  %s14730_s4 = smov [#allocation39]  }
 0x39e   :  { %394 = dma.hbm_to_vmem [thread:$0]  %s16336_s1, 64, %s392_s25, [#allocation35]  }
 0x39f   :  { %s413_s11 = sshll.u32 %s14730_s4, 4  ;;  %s14731_s3 = smov [#allocation42]   ;;  %s414_s11 = int_to_ptr.vmem [resolvable:$true] %s413_s11 }
 0x3a0   :  { %s435_s15 = sshll.u32 %s14731_s3, 4  ;;  %s436_s15 = int_to_ptr.vmem [resolvable:$true] %s435_s15 }
 0x3a3   :  { %s14073_s14 = scalar_lea.hbm %s16337_s10, 64 }
 0x3a4   :  { %p14074_p0 = scmp.ne.s32.totalorder %s16337_s10, %s14073_s14  ;;  %p14077_p1 = scmp.lt.u32.totalorder %s14073_s14, %s16337_s10 }
 0x3a6   :  { %p14079_p2 = pnand %p14077_p1, %p14074_p0 }
 0x3a8   :  { %14082 = shalt.err (!%p14079_p2)
}
 0x3a9   :  { %s14083_s13 = scalar_lea.vmem %s414_s11, 64  ;;  %p14088_p4 = scmp.lt.s32.totalorder %s414_s11, %s414_s11 }
 0x3aa   :  { %p14084_p3 = scmp.ne.s32.totalorder %s414_s11, %s14083_s13  ;;  %p14089_p5 = scmp.lt.s32.totalorder %s14083_s13, %s14083_s13 }
 0x3ac   :  { %p14090_p6 = por %p14089_p5, %p14088_p4 }
 0x3ae   :  { %p14091_p7 = pnand %p14090_p6, %p14084_p3 }
 0x3b0   :  { %14094 = shalt.err (!%p14091_p7)
}
 0x3b1   :  { %s16338_s16 = sld [smem:[#allocation146_spill]] }
 0x3b2   :  { %416 = dma.hbm_to_vmem [thread:$0]  %s16337_s10, 64, %s414_s11, [#allocation38]  }
 0x3b7   :  { %s14095_s30 = scalar_lea.hbm %s16338_s16, 64 }
 0x3b8   :  { %p14096_p8 = scmp.ne.s32.totalorder %s16338_s16, %s14095_s30  ;;  %p14099_p9 = scmp.lt.u32.totalorder %s14095_s30, %s16338_s16 }
 0x3ba   :  { %p14101_p10 = pnand %p14099_p9, %p14096_p8 }
 0x3bc   :  { %14104 = shalt.err (!%p14101_p10)
}
 0x3bd   :  { %s14105_s9 = scalar_lea.vmem %s436_s15, 64  ;;  %p14110_p12 = scmp.lt.s32.totalorder %s436_s15, %s436_s15 }
 0x3be   :  { %p14106_p11 = scmp.ne.s32.totalorder %s436_s15, %s14105_s9  ;;  %p14111_p13 = scmp.lt.s32.totalorder %s14105_s9, %s14105_s9 }
 0x3c0   :  { %p14112_p0 = por %p14111_p13, %p14110_p12 }
 0x3c2   :  { %p14113_p1 = pnand %p14112_p0, %p14106_p11 }
 0x3c4   :  { %14116 = shalt.err (!%p14113_p1)
}
 0x3c5   :  { %s16339_s19 = sld [smem:[#allocation147_spill]]  ;;  %s14732_s18 = smov [#allocation45]  }
 0x3c6   :  { %438 = dma.hbm_to_vmem [thread:$0]  %s16338_s16, 64, %s436_s15, [#allocation41]  }
 0x3c7   :  { %s457_s0 = sshll.u32 %s14732_s18, 4  ;;  %s14733_s2 = smov [#allocation48]   ;;  %s458_s0 = int_to_ptr.vmem [resolvable:$true] %s457_s0 }
 0x3c8   :  { %s479_s7 = sshll.u32 %s14733_s2, 4  ;;  %s480_s7 = int_to_ptr.vmem [resolvable:$true] %s479_s7 }
 0x3cb   :  { %s14117_s22 = scalar_lea.hbm %s16339_s19, 64 }
 0x3cc   :  { %p14118_p2 = scmp.ne.s32.totalorder %s16339_s19, %s14117_s22  ;;  %p14121_p3 = scmp.lt.u32.totalorder %s14117_s22, %s16339_s19 }
 0x3ce   :  { %p14123_p4 = pnand %p14121_p3, %p14118_p2 }
 0x3d0   :  { %14126 = shalt.err (!%p14123_p4)
}
 0x3d1   :  { %s14127_s24 = scalar_lea.vmem %s458_s0, 64  ;;  %p14132_p6 = scmp.lt.s32.totalorder %s458_s0, %s458_s0 }
 0x3d2   :  { %p14128_p5 = scmp.ne.s32.totalorder %s458_s0, %s14127_s24  ;;  %p14133_p7 = scmp.lt.s32.totalorder %s14127_s24, %s14127_s24 }
 0x3d4   :  { %p14134_p8 = por %p14133_p7, %p14132_p6 }
 0x3d6   :  { %p14135_p9 = pnand %p14134_p8, %p14128_p5 }
 0x3d8   :  { %14138 = shalt.err (!%p14135_p9)
}
 0x3d9   :  { %s16340_s17 = sld [smem:[#allocation148_spill]] }
 0x3da   :  { %460 = dma.hbm_to_vmem [thread:$0]  %s16339_s19, 64, %s458_s0, [#allocation44]  }
 0x3df   :  { %s14139_s8 = scalar_lea.hbm %s16340_s17, 64 }
 0x3e0   :  { %p14140_p10 = scmp.ne.s32.totalorder %s16340_s17, %s14139_s8  ;;  %p14143_p11 = scmp.lt.u32.totalorder %s14139_s8, %s16340_s17 }
 0x3e2   :  { %p14145_p12 = pnand %p14143_p11, %p14140_p10 }
 0x3e4   :  { %14148 = shalt.err (!%p14145_p12)
}
 0x3e5   :  { %s14149_s6 = scalar_lea.vmem %s480_s7, 64  ;;  %p14154_p0 = scmp.lt.s32.totalorder %s480_s7, %s480_s7 }
 0x3e6   :  { %p14150_p13 = scmp.ne.s32.totalorder %s480_s7, %s14149_s6  ;;  %p14155_p1 = scmp.lt.s32.totalorder %s14149_s6, %s14149_s6 }
 0x3e8   :  { %p14156_p2 = por %p14155_p1, %p14154_p0 }
 0x3ea   :  { %p14157_p3 = pnand %p14156_p2, %p14150_p13 }
 0x3ec   :  { %14160 = shalt.err (!%p14157_p3)
}
 0x3ed   :  { %s16341_s29 = sld [smem:[#allocation150_spill]]  ;;  %s14734_s23 = smov [#allocation51]  }
 0x3ee   :  { %482 = dma.hbm_to_vmem [thread:$0]  %s16340_s17, 64, %s480_s7, [#allocation47]  }
 0x3ef   :  { %s501_s25 = sshll.u32 %s14734_s23, 4  ;;  %s14735_s26 = smov [#allocation54]   ;;  %s502_s25 = int_to_ptr.vmem [resolvable:$true] %s501_s25 }
 0x3f0   :  { %s523_s28 = sshll.u32 %s14735_s26, 4  ;;  %s524_s28 = int_to_ptr.vmem [resolvable:$true] %s523_s28 }
 0x3f3   :  { %s14161_s1 = scalar_lea.hbm %s16341_s29, 64 }
 0x3f4   :  { %p14162_p4 = scmp.ne.s32.totalorder %s16341_s29, %s14161_s1  ;;  %p14165_p5 = scmp.lt.u32.totalorder %s14161_s1, %s16341_s29 }
 0x3f6   :  { %p14167_p6 = pnand %p14165_p5, %p14162_p4 }
 0x3f8   :  { %14170 = shalt.err (!%p14167_p6)
}
 0x3f9   :  { %s14171_s20 = scalar_lea.vmem %s502_s25, 64  ;;  %p14176_p8 = scmp.lt.s32.totalorder %s502_s25, %s502_s25 }
 0x3fa   :  { %p14172_p7 = scmp.ne.s32.totalorder %s502_s25, %s14171_s20  ;;  %p14177_p9 = scmp.lt.s32.totalorder %s14171_s20, %s14171_s20 }
 0x3fc   :  { %p14178_p10 = por %p14177_p9, %p14176_p8 }
 0x3fe   :  { %p14179_p11 = pnand %p14178_p10, %p14172_p7 }
 0x400   :  { %14182 = shalt.err (!%p14179_p11)
}
 0x401   :  { %s16342_s21 = sld [smem:[#allocation152_spill]] }
 0x402   :  { %504 = dma.hbm_to_vmem [thread:$0]  %s16341_s29, 64, %s502_s25, [#allocation50]  }
 0x407   :  { %s14183_s10 = scalar_lea.hbm %s16342_s21, 64 }
 0x408   :  { %p14184_p12 = scmp.ne.s32.totalorder %s16342_s21, %s14183_s10  ;;  %p14187_p13 = scmp.lt.u32.totalorder %s14183_s10, %s16342_s21 }
 0x40a   :  { %p14189_p0 = pnand %p14187_p13, %p14184_p12 }
 0x40c   :  { %14192 = shalt.err (!%p14189_p0)
}
 0x40d   :  { %s14193_s4 = scalar_lea.vmem %s524_s28, 64  ;;  %p14198_p2 = scmp.lt.s32.totalorder %s524_s28, %s524_s28 }
 0x40e   :  { %p14194_p1 = scmp.ne.s32.totalorder %s524_s28, %s14193_s4  ;;  %p14199_p3 = scmp.lt.s32.totalorder %s14193_s4, %s14193_s4 }
 0x410   :  { %p14200_p4 = por %p14199_p3, %p14198_p2 }
 0x412   :  { %p14201_p5 = pnand %p14200_p4, %p14194_p1 }
 0x414   :  { %14204 = shalt.err (!%p14201_p5)
}
 0x415   :  { %s16343_s11 = sld [smem:[#allocation154_spill]]  ;;  %s14736_s3 = smov [#allocation57]  }
 0x416   :  { %526 = dma.hbm_to_vmem [thread:$0]  %s16342_s21, 64, %s524_s28, [#allocation53]  }
 0x417   :  { %s545_s15 = sshll.u32 %s14736_s3, 4  ;;  %s14737_s14 = smov [#allocation60]   ;;  %s546_s15 = int_to_ptr.vmem [resolvable:$true] %s545_s15 }
 0x418   :  { %s567_s13 = sshll.u32 %s14737_s14, 4  ;;  %s568_s13 = int_to_ptr.vmem [resolvable:$true] %s567_s13 }
 0x41b   :  { %s14205_s16 = scalar_lea.hbm %s16343_s11, 64 }
 0x41c   :  { %p14206_p6 = scmp.ne.s32.totalorder %s16343_s11, %s14205_s16  ;;  %p14209_p7 = scmp.lt.u32.totalorder %s14205_s16, %s16343_s11 }
 0x41e   :  { %p14211_p8 = pnand %p14209_p7, %p14206_p6 }
 0x420   :  { %14214 = shalt.err (!%p14211_p8)
}
 0x421   :  { %s14215_s30 = scalar_lea.vmem %s546_s15, 64  ;;  %p14220_p10 = scmp.lt.s32.totalorder %s546_s15, %s546_s15 }
 0x422   :  { %p14216_p9 = scmp.ne.s32.totalorder %s546_s15, %s14215_s30  ;;  %p14221_p11 = scmp.lt.s32.totalorder %s14215_s30, %s14215_s30 }
 0x424   :  { %p14222_p12 = por %p14221_p11, %p14220_p10 }
 0x426   :  { %p14223_p13 = pnand %p14222_p12, %p14216_p9 }
 0x428   :  { %14226 = shalt.err (!%p14223_p13)
}
 0x429   :  { %s16344_s9 = sld [smem:[#allocation156_spill]] }
 0x42a   :  { %548 = dma.hbm_to_vmem [thread:$0]  %s16343_s11, 64, %s546_s15, [#allocation56]  }
 0x42f   :  { %s14227_s19 = scalar_lea.hbm %s16344_s9, 64 }
 0x430   :  { %p14228_p0 = scmp.ne.s32.totalorder %s16344_s9, %s14227_s19  ;;  %p14231_p1 = scmp.lt.u32.totalorder %s14227_s19, %s16344_s9 }
 0x432   :  { %p14233_p2 = pnand %p14231_p1, %p14228_p0 }
 0x434   :  { %14236 = shalt.err (!%p14233_p2)
}
 0x435   :  { %s14237_s18 = scalar_lea.vmem %s568_s13, 64  ;;  %p14242_p4 = scmp.lt.s32.totalorder %s568_s13, %s568_s13 }
 0x436   :  { %p14238_p3 = scmp.ne.s32.totalorder %s568_s13, %s14237_s18  ;;  %p14243_p5 = scmp.lt.s32.totalorder %s14237_s18, %s14237_s18 }
 0x438   :  { %p14244_p6 = por %p14243_p5, %p14242_p4 }
 0x43a   :  { %p14245_p7 = pnand %p14244_p6, %p14238_p3 }
 0x43c   :  { %14248 = shalt.err (!%p14245_p7)
}
 0x43d   :  { %s16345_s0 = sld [smem:[#allocation158_spill]]  ;;  %s14738_s2 = smov [#allocation63]  }
 0x43e   :  { %570 = dma.hbm_to_vmem [thread:$0]  %s16344_s9, 64, %s568_s13, [#allocation59]  }
 0x43f   :  { %s589_s7 = sshll.u32 %s14738_s2, 4  ;;  %s14739_s22 = smov [#allocation66]   ;;  %s590_s7 = int_to_ptr.vmem [resolvable:$true] %s589_s7 }
 0x440   :  { %s611_s24 = sshll.u32 %s14739_s22, 4  ;;  %s612_s24 = int_to_ptr.vmem [resolvable:$true] %s611_s24 }
 0x443   :  { %s14249_s17 = scalar_lea.hbm %s16345_s0, 64 }
 0x444   :  { %p14250_p8 = scmp.ne.s32.totalorder %s16345_s0, %s14249_s17  ;;  %p14253_p9 = scmp.lt.u32.totalorder %s14249_s17, %s16345_s0 }
 0x446   :  { %p14255_p10 = pnand %p14253_p9, %p14250_p8 }
 0x448   :  { %14258 = shalt.err (!%p14255_p10)
}
 0x449   :  { %s14259_s8 = scalar_lea.vmem %s590_s7, 64  ;;  %p14264_p12 = scmp.lt.s32.totalorder %s590_s7, %s590_s7 }
 0x44a   :  { %p14260_p11 = scmp.ne.s32.totalorder %s590_s7, %s14259_s8  ;;  %p14265_p13 = scmp.lt.s32.totalorder %s14259_s8, %s14259_s8 }
 0x44c   :  { %p14266_p0 = por %p14265_p13, %p14264_p12 }
 0x44e   :  { %p14267_p1 = pnand %p14266_p0, %p14260_p11 }
 0x450   :  { %14270 = shalt.err (!%p14267_p1)
}
 0x451   :  { %s16346_s6 = sld [smem:[#allocation160_spill]] }
 0x452   :  { %592 = dma.hbm_to_vmem [thread:$0]  %s16345_s0, 64, %s590_s7, [#allocation62]  }
 0x457   :  { %s14271_s29 = scalar_lea.hbm %s16346_s6, 64 }
 0x458   :  { %p14272_p2 = scmp.ne.s32.totalorder %s16346_s6, %s14271_s29  ;;  %p14275_p3 = scmp.lt.u32.totalorder %s14271_s29, %s16346_s6 }
 0x45a   :  { %p14277_p4 = pnand %p14275_p3, %p14272_p2 }
 0x45c   :  { %14280 = shalt.err (!%p14277_p4)
}
 0x45d   :  { %s14281_s23 = scalar_lea.vmem %s612_s24, 64  ;;  %p14286_p6 = scmp.lt.s32.totalorder %s612_s24, %s612_s24 }
 0x45e   :  { %p14282_p5 = scmp.ne.s32.totalorder %s612_s24, %s14281_s23  ;;  %p14287_p7 = scmp.lt.s32.totalorder %s14281_s23, %s14281_s23 }
 0x460   :  { %p14288_p8 = por %p14287_p7, %p14286_p6 }
 0x462   :  { %p14289_p9 = pnand %p14288_p8, %p14282_p5 }
 0x464   :  { %14292 = shalt.err (!%p14289_p9)
}
 0x465   :  { %s16347_s25 = sld [smem:[#allocation162_spill]]  ;;  %s14740_s26 = smov [#allocation69]  }
 0x466   :  { %614 = dma.hbm_to_vmem [thread:$0]  %s16346_s6, 64, %s612_s24, [#allocation65]  }
 0x467   :  { %s633_s28 = sshll.u32 %s14740_s26, 4  ;;  %s14741_s1 = smov [#allocation72]   ;;  %s634_s28 = int_to_ptr.vmem [resolvable:$true] %s633_s28 }
 0x468   :  { %s655_s20 = sshll.u32 %s14741_s1, 4  ;;  %s656_s20 = int_to_ptr.vmem [resolvable:$true] %s655_s20 }
 0x46b   :  { %s14293_s21 = scalar_lea.hbm %s16347_s25, 64 }
 0x46c   :  { %p14294_p10 = scmp.ne.s32.totalorder %s16347_s25, %s14293_s21  ;;  %p14297_p11 = scmp.lt.u32.totalorder %s14293_s21, %s16347_s25 }
 0x46e   :  { %p14299_p12 = pnand %p14297_p11, %p14294_p10 }
 0x470   :  { %14302 = shalt.err (!%p14299_p12)
}
 0x471   :  { %s14303_s10 = scalar_lea.vmem %s634_s28, 64  ;;  %p14308_p0 = scmp.lt.s32.totalorder %s634_s28, %s634_s28 }
 0x472   :  { %p14304_p13 = scmp.ne.s32.totalorder %s634_s28, %s14303_s10  ;;  %p14309_p1 = scmp.lt.s32.totalorder %s14303_s10, %s14303_s10 }
 0x474   :  { %p14310_p2 = por %p14309_p1, %p14308_p0 }
 0x476   :  { %p14311_p3 = pnand %p14310_p2, %p14304_p13 }
 0x478   :  { %14314 = shalt.err (!%p14311_p3)
}
 0x479   :  { %s16348_s4 = sld [smem:[#allocation164_spill]] }
 0x47a   :  { %636 = dma.hbm_to_vmem [thread:$0]  %s16347_s25, 64, %s634_s28, [#allocation68]  }
 0x47f   :  { %s14315_s11 = scalar_lea.hbm %s16348_s4, 64 }
 0x480   :  { %p14316_p4 = scmp.ne.s32.totalorder %s16348_s4, %s14315_s11  ;;  %p14319_p5 = scmp.lt.u32.totalorder %s14315_s11, %s16348_s4 }
 0x482   :  { %p14321_p6 = pnand %p14319_p5, %p14316_p4 }
 0x484   :  { %14324 = shalt.err (!%p14321_p6)
}
 0x485   :  { %s14325_s3 = scalar_lea.vmem %s656_s20, 64  ;;  %p14330_p8 = scmp.lt.s32.totalorder %s656_s20, %s656_s20 }
 0x486   :  { %p14326_p7 = scmp.ne.s32.totalorder %s656_s20, %s14325_s3  ;;  %p14331_p9 = scmp.lt.s32.totalorder %s14325_s3, %s14325_s3 }
 0x488   :  { %p14332_p10 = por %p14331_p9, %p14330_p8 }
 0x48a   :  { %p14333_p11 = pnand %p14332_p10, %p14326_p7 }
 0x48c   :  { %14336 = shalt.err (!%p14333_p11)
}
 0x48d   :  { %s16349_s15 = sld [smem:[#allocation166_spill]]  ;;  %s14742_s14 = smov [#allocation75]  }
 0x48e   :  { %658 = dma.hbm_to_vmem [thread:$0]  %s16348_s4, 64, %s656_s20, [#allocation71]  }
 0x48f   :  { %s677_s13 = sshll.u32 %s14742_s14, 4  ;;  %s14743_s16 = smov [#allocation78]   ;;  %s678_s13 = int_to_ptr.vmem [resolvable:$true] %s677_s13 }
 0x490   :  { %s699_s30 = sshll.u32 %s14743_s16, 4  ;;  %s700_s30 = int_to_ptr.vmem [resolvable:$true] %s699_s30 }
 0x493   :  { %s14337_s9 = scalar_lea.hbm %s16349_s15, 64 }
 0x494   :  { %p14338_p12 = scmp.ne.s32.totalorder %s16349_s15, %s14337_s9  ;;  %p14341_p13 = scmp.lt.u32.totalorder %s14337_s9, %s16349_s15 }
 0x496   :  { %p14343_p0 = pnand %p14341_p13, %p14338_p12 }
 0x498   :  { %14346 = shalt.err (!%p14343_p0)
}
 0x499   :  { %s14347_s19 = scalar_lea.vmem %s678_s13, 64  ;;  %p14352_p2 = scmp.lt.s32.totalorder %s678_s13, %s678_s13 }
 0x49a   :  { %p14348_p1 = scmp.ne.s32.totalorder %s678_s13, %s14347_s19  ;;  %p14353_p3 = scmp.lt.s32.totalorder %s14347_s19, %s14347_s19 }
 0x49c   :  { %p14354_p4 = por %p14353_p3, %p14352_p2 }
 0x49e   :  { %p14355_p5 = pnand %p14354_p4, %p14348_p1 }
 0x4a0   :  { %14358 = shalt.err (!%p14355_p5)
}
 0x4a1   :  { %s16350_s18 = sld [smem:[#allocation168_spill]] }
 0x4a2   :  { %680 = dma.hbm_to_vmem [thread:$0]  %s16349_s15, 64, %s678_s13, [#allocation74]  }
 0x4a7   :  { %s14359_s0 = scalar_lea.hbm %s16350_s18, 64 }
 0x4a8   :  { %p14360_p6 = scmp.ne.s32.totalorder %s16350_s18, %s14359_s0  ;;  %p14363_p7 = scmp.lt.u32.totalorder %s14359_s0, %s16350_s18 }
 0x4aa   :  { %p14365_p8 = pnand %p14363_p7, %p14360_p6 }
 0x4ac   :  { %14368 = shalt.err (!%p14365_p8)
}
 0x4ad   :  { %s14369_s2 = scalar_lea.vmem %s700_s30, 64  ;;  %p14374_p10 = scmp.lt.s32.totalorder %s700_s30, %s700_s30 }
 0x4ae   :  { %p14370_p9 = scmp.ne.s32.totalorder %s700_s30, %s14369_s2  ;;  %p14375_p11 = scmp.lt.s32.totalorder %s14369_s2, %s14369_s2 }
 0x4b0   :  { %p14376_p12 = por %p14375_p11, %p14374_p10 }
 0x4b2   :  { %p14377_p13 = pnand %p14376_p12, %p14370_p9 }
 0x4b4   :  { %14380 = shalt.err (!%p14377_p13)
}
 0x4b5   :  { %s16351_s7 = sld [smem:[#allocation170_spill]]  ;;  %s14744_s22 = smov [#allocation81]  }
 0x4b6   :  { %702 = dma.hbm_to_vmem [thread:$0]  %s16350_s18, 64, %s700_s30, [#allocation77]  }
 0x4b7   :  { %s721_s24 = sshll.u32 %s14744_s22, 4  ;;  %s14745_s17 = smov [#allocation84]   ;;  %s722_s24 = int_to_ptr.vmem [resolvable:$true] %s721_s24 }
 0x4b8   :  { %s743_s8 = sshll.u32 %s14745_s17, 4  ;;  %s744_s8 = int_to_ptr.vmem [resolvable:$true] %s743_s8 }
 0x4bb   :  { %s14381_s6 = scalar_lea.hbm %s16351_s7, 64 }
 0x4bc   :  { %p14382_p0 = scmp.ne.s32.totalorder %s16351_s7, %s14381_s6  ;;  %p14385_p1 = scmp.lt.u32.totalorder %s14381_s6, %s16351_s7 }
 0x4be   :  { %p14387_p2 = pnand %p14385_p1, %p14382_p0 }
 0x4c0   :  { %14390 = shalt.err (!%p14387_p2)
}
 0x4c1   :  { %s14391_s29 = scalar_lea.vmem %s722_s24, 64  ;;  %p14396_p4 = scmp.lt.s32.totalorder %s722_s24, %s722_s24 }
 0x4c2   :  { %p14392_p3 = scmp.ne.s32.totalorder %s722_s24, %s14391_s29  ;;  %p14397_p5 = scmp.lt.s32.totalorder %s14391_s29, %s14391_s29 }
 0x4c4   :  { %p14398_p6 = por %p14397_p5, %p14396_p4 }
 0x4c6   :  { %p14399_p7 = pnand %p14398_p6, %p14392_p3 }
 0x4c8   :  { %14402 = shalt.err (!%p14399_p7)
}
 0x4c9   :  { %s16352_s23 = sld [smem:[#allocation172_spill]] }
 0x4ca   :  { %724 = dma.hbm_to_vmem [thread:$0]  %s16351_s7, 64, %s722_s24, [#allocation80]  }
 0x4cf   :  { %s14403_s25 = scalar_lea.hbm %s16352_s23, 64 }
 0x4d0   :  { %p14404_p8 = scmp.ne.s32.totalorder %s16352_s23, %s14403_s25  ;;  %p14407_p9 = scmp.lt.u32.totalorder %s14403_s25, %s16352_s23 }
 0x4d2   :  { %p14409_p10 = pnand %p14407_p9, %p14404_p8 }
 0x4d4   :  { %14412 = shalt.err (!%p14409_p10)
}
 0x4d5   :  { %s14413_s26 = scalar_lea.vmem %s744_s8, 64  ;;  %p14418_p12 = scmp.lt.s32.totalorder %s744_s8, %s744_s8 }
 0x4d6   :  { %p14414_p11 = scmp.ne.s32.totalorder %s744_s8, %s14413_s26  ;;  %p14419_p13 = scmp.lt.s32.totalorder %s14413_s26, %s14413_s26 }
 0x4d8   :  { %p14420_p0 = por %p14419_p13, %p14418_p12 }
 0x4da   :  { %p14421_p1 = pnand %p14420_p0, %p14414_p11 }
 0x4dc   :  { %14424 = shalt.err (!%p14421_p1)
}
 0x4dd   :  { %s16353_s28 = sld [smem:[#allocation174_spill]]  ;;  %s14746_s1 = smov [#allocation87]  }
 0x4de   :  { %746 = dma.hbm_to_vmem [thread:$0]  %s16352_s23, 64, %s744_s8, [#allocation83]  }
 0x4df   :  { %s765_s20 = sshll.u32 %s14746_s1, 4  ;;  %s14747_s21 = smov [#allocation90]   ;;  %s766_s20 = int_to_ptr.vmem [resolvable:$true] %s765_s20 }
 0x4e0   :  { %s787_s10 = sshll.u32 %s14747_s21, 4  ;;  %s788_s10 = int_to_ptr.vmem [resolvable:$true] %s787_s10 }
 0x4e3   :  { %s14425_s4 = scalar_lea.hbm %s16353_s28, 64 }
 0x4e4   :  { %p14426_p2 = scmp.ne.s32.totalorder %s16353_s28, %s14425_s4  ;;  %p14429_p3 = scmp.lt.u32.totalorder %s14425_s4, %s16353_s28 }
 0x4e6   :  { %p14431_p4 = pnand %p14429_p3, %p14426_p2 }
 0x4e8   :  { %14434 = shalt.err (!%p14431_p4)
}
 0x4e9   :  { %s14435_s11 = scalar_lea.vmem %s766_s20, 64  ;;  %p14440_p6 = scmp.lt.s32.totalorder %s766_s20, %s766_s20 }
 0x4ea   :  { %p14436_p5 = scmp.ne.s32.totalorder %s766_s20, %s14435_s11  ;;  %p14441_p7 = scmp.lt.s32.totalorder %s14435_s11, %s14435_s11 }
 0x4ec   :  { %p14442_p8 = por %p14441_p7, %p14440_p6 }
 0x4ee   :  { %p14443_p9 = pnand %p14442_p8, %p14436_p5 }
 0x4f0   :  { %14446 = shalt.err (!%p14443_p9)
}
 0x4f1   :  { %s16354_s3 = sld [smem:[#allocation176_spill]] }
 0x4f2   :  { %768 = dma.hbm_to_vmem [thread:$0]  %s16353_s28, 64, %s766_s20, [#allocation86]  }
 0x4f7   :  { %s14447_s15 = scalar_lea.hbm %s16354_s3, 64 }
 0x4f8   :  { %p14448_p10 = scmp.ne.s32.totalorder %s16354_s3, %s14447_s15  ;;  %p14451_p11 = scmp.lt.u32.totalorder %s14447_s15, %s16354_s3 }
 0x4fa   :  { %p14453_p12 = pnand %p14451_p11, %p14448_p10 }
 0x4fc   :  { %14456 = shalt.err (!%p14453_p12)
}
 0x4fd   :  { %s14457_s14 = scalar_lea.vmem %s788_s10, 64  ;;  %p14462_p0 = scmp.lt.s32.totalorder %s788_s10, %s788_s10 }
 0x4fe   :  { %p14458_p13 = scmp.ne.s32.totalorder %s788_s10, %s14457_s14  ;;  %p14463_p1 = scmp.lt.s32.totalorder %s14457_s14, %s14457_s14 }
 0x500   :  { %p14464_p2 = por %p14463_p1, %p14462_p0 }
 0x502   :  { %p14465_p3 = pnand %p14464_p2, %p14458_p13 }
 0x504   :  { %14468 = shalt.err (!%p14465_p3)
}
 0x505   :  { %s16355_s13 = sld [smem:[#allocation178_spill]]  ;;  %s14748_s16 = smov [#allocation93]  }
 0x506   :  { %790 = dma.hbm_to_vmem [thread:$0]  %s16354_s3, 64, %s788_s10, [#allocation89]  }
 0x507   :  { %s809_s30 = sshll.u32 %s14748_s16, 4  ;;  %s14749_s9 = smov [#allocation96]   ;;  %s810_s30 = int_to_ptr.vmem [resolvable:$true] %s809_s30 }
 0x508   :  { %s831_s19 = sshll.u32 %s14749_s9, 4  ;;  %s832_s19 = int_to_ptr.vmem [resolvable:$true] %s831_s19 }
 0x50b   :  { %s14469_s18 = scalar_lea.hbm %s16355_s13, 64 }
 0x50c   :  { %p14470_p4 = scmp.ne.s32.totalorder %s16355_s13, %s14469_s18  ;;  %p14473_p5 = scmp.lt.u32.totalorder %s14469_s18, %s16355_s13 }
 0x50e   :  { %p14475_p6 = pnand %p14473_p5, %p14470_p4 }
 0x510   :  { %14478 = shalt.err (!%p14475_p6)
}
 0x511   :  { %s14479_s0 = scalar_lea.vmem %s810_s30, 64  ;;  %p14484_p8 = scmp.lt.s32.totalorder %s810_s30, %s810_s30 }
 0x512   :  { %p14480_p7 = scmp.ne.s32.totalorder %s810_s30, %s14479_s0  ;;  %p14485_p9 = scmp.lt.s32.totalorder %s14479_s0, %s14479_s0 }
 0x514   :  { %p14486_p10 = por %p14485_p9, %p14484_p8 }
 0x516   :  { %p14487_p11 = pnand %p14486_p10, %p14480_p7 }
 0x518   :  { %14490 = shalt.err (!%p14487_p11)
}
 0x519   :  { %812 = dma.hbm_to_vmem [thread:$0]  %s16355_s13, 64, %s810_s30, [#allocation92]  }
 0x51a   :  { %s14491_s2 = scalar_lea.hbm %s15074_s27, 64 }
 0x51b   :  { %p14492_p12 = scmp.ne.s32.totalorder %s15074_s27, %s14491_s2  ;;  %p14495_p13 = scmp.lt.u32.totalorder %s14491_s2, %s15074_s27 }
 0x51d   :  { %p14497_p0 = pnand %p14495_p13, %p14492_p12 }
 0x51f   :  { %14500 = shalt.err (!%p14497_p0)
}
 0x520   :  { %s14501_s7 = scalar_lea.vmem %s832_s19, 64  ;;  %p14506_p2 = scmp.lt.s32.totalorder %s832_s19, %s832_s19 }
 0x521   :  { %p14502_p1 = scmp.ne.s32.totalorder %s832_s19, %s14501_s7  ;;  %p14507_p3 = scmp.lt.s32.totalorder %s14501_s7, %s14501_s7 }
 0x523   :  { %p14508_p4 = por %p14507_p3, %p14506_p2 }
 0x525   :  { %p14509_p5 = pnand %p14508_p4, %p14502_p1 }
 0x527   :  { %14512 = shalt.err (!%p14509_p5)
}
 0x528   :  { %834 = dma.hbm_to_vmem [thread:$0]  %s15074_s27, 64, %s832_s19, [#allocation95]  }
 0x529   :  { %s14750_s22 = smov [#allocation99]   ;;  %s14513_s17 = scalar_lea.hbm %s15084_s12, 16 }
 0x52a   :  { %s853_s24 = sshll.u32 %s14750_s22, 4  ;;  %p14514_p6 = scmp.ne.s32.totalorder %s15084_s12, %s14513_s17  ;;  %s854_s24 = int_to_ptr.vmem [resolvable:$true] %s853_s24 }
 0x52b   :  { %p14517_p7 = scmp.lt.u32.totalorder %s14513_s17, %s15084_s12 }
 0x52d   :  { %p14519_p8 = pnand %p14517_p7, %p14514_p6 }
 0x52f   :  { %14522 = shalt.err (!%p14519_p8)
}
 0x530   :  { %s14523_s8 = scalar_lea.vmem %s854_s24, 16  ;;  %s14527_s6 = scalar_lea.vmem %s854_s24, 32 }
 0x531   :  { %p14524_p9 = scmp.ne.s32.totalorder %s854_s24, %s14523_s8  ;;  %p14528_p10 = scmp.lt.s32.totalorder %s854_s24, %s854_s24 }
 0x532   :  { %p14529_p11 = scmp.lt.s32.totalorder %s14527_s6, %s14523_s8 }
 0x534   :  { %p14530_p12 = por %p14529_p11, %p14528_p10 }
 0x536   :  { %p14531_p13 = pnand %p14530_p12, %p14524_p9 }
 0x538   :  { %14534 = shalt.err (!%p14531_p13)
}
 0x539   :  { %856 = dma.hbm_to_vmem [thread:$0]  %s15084_s12, 16, %s854_s24, [#allocation98]  }
 0x53a   :  { %14557 = dma.done.wait [#allocation5], 256  }
 0x53b   :  { %14558 = vsyncadd [#allocation5], 4294967040 }
 0x53c   :  { %14559 = dma.done.wait [#allocation8], 288  }
 0x53d   :  { %14560 = vsyncadd [#allocation8], 4294967008 }
 0x53e   :  { %14561 = dma.done.wait [#allocation11], 192  }
 0x53f   :  { %14562 = vsyncadd [#allocation11], 4294967104 }
 0x540   :  { %14563 = dma.done.wait [#allocation14], 1088  }
 0x541   :  { %14564 = vsyncadd [#allocation14], 4294966208 }
 0x542   :  { %14565 = dma.done.wait [#allocation17], 1088  }
 0x543   :  { %14566 = vsyncadd [#allocation17], 4294966208 }
 0x544   :  { %14567 = dma.done.wait [#allocation20], 2112  }
 0x545   :  { %14568 = vsyncadd [#allocation20], 4294965184 }
 0x546   :  { %14569 = dma.done.wait [#allocation23], 1088  }
 0x547   :  { %14570 = vsyncadd [#allocation23], 4294966208 }
 0x548   :  { %14571 = dma.done.wait [#allocation26], 3136  }
 0x549   :  { %14572 = vsyncadd [#allocation26], 4294964160 }
 0x54a   :  { %14573 = dma.done.wait [#allocation29], 1088  }
 0x54b   :  { %14574 = vsyncadd [#allocation29], 4294966208 }
 0x54c   :  { %14575 = dma.done.wait [#allocation32], 4160  }
 0x54d   :  { %14576 = vsyncadd [#allocation32], 4294963136 }
 0x54e   :  { %14577 = dma.done.wait [#allocation35], 2112  }
 0x54f   :  { %14578 = vsyncadd [#allocation35], 4294965184 }
 0x550   :  { %14579 = dma.done.wait [#allocation38], 1600  }
 0x551   :  { %14580 = vsyncadd [#allocation38], 4294965696 }
 0x552   :  { %14581 = dma.done.wait [#allocation41], 3136  }
 0x553   :  { %14582 = vsyncadd [#allocation41], 4294964160 }
 0x554   :  { %14583 = dma.done.wait [#allocation44], 1600  }
 0x555   :  { %14584 = vsyncadd [#allocation44], 4294965696 }
 0x556   :  { %14585 = dma.done.wait [#allocation47], 4160  }
 0x557   :  { %14586 = vsyncadd [#allocation47], 4294963136 }
 0x558   :  { %14587 = dma.done.wait [#allocation50], 1600  }
 0x559   :  { %14588 = vsyncadd [#allocation50], 4294965696 }
 0x55a   :  { %14589 = dma.done.wait [#allocation53], 5184  }
 0x55b   :  { %14590 = vsyncadd [#allocation53], 4294962112 }
 0x55c   :  { %14591 = dma.done.wait [#allocation56], 2624  }
 0x55d   :  { %14592 = vsyncadd [#allocation56], 4294964672 }
 0x55e   :  { %14593 = dma.done.wait [#allocation59], 2112  }
 0x55f   :  { %14594 = vsyncadd [#allocation59], 4294965184 }
 0x560   :  { %14595 = dma.done.wait [#allocation62], 3648  }
 0x561   :  { %14596 = vsyncadd [#allocation62], 4294963648 }
 0x562   :  { %14597 = dma.done.wait [#allocation65], 2112  }
 0x563   :  { %14598 = vsyncadd [#allocation65], 4294965184 }
 0x564   :  { %14599 = dma.done.wait [#allocation68], 4672  }
 0x565   :  { %14600 = vsyncadd [#allocation68], 4294962624 }
 0x566   :  { %14601 = dma.done.wait [#allocation71], 2112  }
 0x567   :  { %14602 = vsyncadd [#allocation71], 4294965184 }
 0x568   :  { %14603 = dma.done.wait [#allocation74], 5696  }
 0x569   :  { %14604 = vsyncadd [#allocation74], 4294961600 }
 0x56a   :  { %14605 = dma.done.wait [#allocation77], 2880  }
 0x56b   :  { %14606 = vsyncadd [#allocation77], 4294964416 }
 0x56c   :  { %14607 = dma.done.wait [#allocation80], 2112  }
 0x56d   :  { %14608 = vsyncadd [#allocation80], 4294965184 }
 0x56e   :  { %14609 = dma.done.wait [#allocation83], 3904  }
 0x56f   :  { %14610 = vsyncadd [#allocation83], 4294963392 }
 0x570   :  { %14611 = dma.done.wait [#allocation86], 2112  }
 0x571   :  { %14612 = vsyncadd [#allocation86], 4294965184 }
 0x572   :  { %14613 = dma.done.wait [#allocation89], 4928  }
 0x573   :  { %14614 = vsyncadd [#allocation89], 4294962368 }
 0x574   :  { %14615 = dma.done.wait [#allocation92], 2112  }
 0x575   :  { %14616 = vsyncadd [#allocation92], 4294965184 }
 0x576   :  { %14617 = dma.done.wait [#allocation95], 5952  }
 0x577   :  { %14618 = vsyncadd [#allocation95], 4294961344 }
 0x578   :  { %14619 = dma.done.wait [#allocation98], 1552  }
 0x579   :  { %14620 = vsyncadd [#allocation98], 4294965744  ;;  %vm1050_vm0 = vcmask 130048   ;;  %v1048_v0 = vld [vmem:[#allocation7] sm:$0xff]  ;;  %v1049_v1 = vld [vmem:[#allocation7 + $0x8] sm:$0xff]  ;;  %s14751_s12 = smov 4   ;;  %v1145_v18 = vlaneseq }
 0x57a   :  { %v15541_v2 = vld [vmem:[#allocation4] sm:$0xff]  ;;  %v11610_v3 = vpack.c.bf16 %v1049_v1, %v1048_v0  ;;  %v15545_v4 = vld [vmem:[#allocation4 + $0x8] sm:$0xff]  ;;  %vm1141_vm1 = vcmask 31744   ;;  %vm1149_vm2 = vcmask 64512   ;;  %v1364_v13 = vld [vmem:[#allocation13 + $0x8] sm:$0xff]  ;;  %vm1231_vm3 = vcmask 261120  }
 0x57b   :  { %10454 = vmatprep.mubr.msk.f32.mxu0 %vm1050_vm0, %v15541_v2  ;;  %v1144_v5 = vld [vmem:[#allocation10] sm:$0xff]  ;;  %v1363_v12 = vld [vmem:[#allocation13] sm:$0xff]  ;;  %v1146_v19 = vshrl.u32 %v1145_v18, 7  ;;  %v1132_v21 = vld [vmem:[#allocation12] sm:$0x7]  ;;  %vm1539_vm4 = vcmask 523264  }
 0x57c   :  { %11611 = vmatprep.subr.bf16.mxu0 %v11610_v3  ;;  %10457 = vmatprep.subr.mxu1 %v1144_v5  ;;  %v11626_v14 = vpack.c.bf16 %v1364_v13, %v1363_v12  ;;  %v1365_v15 = vld [vmem:[#allocation13 + $0x10] sm:$0xff]  ;;  %v1366_v16 = vld [vmem:[#allocation13 + $0x18] sm:$0xff]  ;;  %s14752_s27 = smov 96   ;;  %s14753_s29 = smov 32   ;;  %vm1821_vm5 = vcmask 523520   ;;  %vm2379_vm6 = vcmask 785920  }
 0x57d   :  { %11613 = vmatpush3.bf16.msra.mxu0 %v11610_v3  ;;  %10458 = vmatpush3.msra.mxu1 %v1144_v5  ;;  %v11630_v17 = vpack.c.bf16 %v1366_v16, %v1365_v15  ;;  %v15551_v20 = vsub.s32 0, %v1146_v19  ;;  %v15558_v52 = vsub.s32 1, %v1146_v19  ;;  %v15561_v60 = vsub.s32 2, %v1146_v19  ;;  %v1370_v12 = vld [vmem:[#allocation13 + $0x38] sm:$0xff]  ;;  %s14754_s23 = smov 64   ;;  %s14756_s25 = smov 80  }
 0x57e   :  { %11627 = vmatprep.subr.bf16.mxu0 %v11626_v14  ;;  %vm2496_vm7 = vcmask 785408   ;;  %vm2946_vm8 = vcmask 1048320   ;;  %vm5248_vm9 = vcmask 654336   ;;  %vm5846_vm10 = vcmask 917120   ;;  %s14757_s26 = smov 112   ;;  %s14758_s28 = smov 16  }
 0x57f   :  { %v1148_v22 = vrot.slane %v1132_v21, %v15551_v20  ;;  %vm5967_vm11 = vcmask 916480   ;;  %vm6415_vm12 = vcmask 1048448   ;;  %vm6999_vm13 = vcmask 392320   ;;  %s14759_s1 = smov 88   ;;  %s14761_s20 = smov 120  }
 0x580   :  { %10455 = vmatmul.mubr.msk.f32.vlgmr.msra.gmra.mrb[0].mxu0 %vm1050_vm0, %v15545_v4  ;;  %vm7140_vm14 = vcmask 392192   ;;  %vm7309_vm15 = vcmask 719872   ;;  %s14762_s21 = smov 24   ;;  %s14765_s10 = smov [#allocation100]  }
 0x581   :  { %11629 = vmatpush3.bf16.msra.mxu0 %v11626_v14  ;;  %s9604_s4 = sshll.u32 %s14765_s10, 4  ;;  %s9605_s4 = int_to_ptr.vmem [resolvable:$true] %s9604_s4 }
 0x582   :  { %11631 = vmatprep.subr.bf16.mxu0 %v11630_v17  ;;  %s14535_s11 = scalar_lea.vmem %s9605_s4, 32  ;;  %p14540_p1 = scmp.lt.s32.totalorder %s9605_s4, %s9605_s4 }
 0x583   :  { %p14536_p0 = scmp.ne.s32.totalorder %s9605_s4, %s14535_s11  ;;  %p14541_p2 = scmp.lt.s32.totalorder %s14535_s11, %s14535_s11 }
 0x585   :  { %11633 = vmatpush3.bf16.msra.mxu0 %v11630_v17  ;;  %p14542_p3 = por %p14541_p2, %p14540_p1 }
 0x587   :  { %p14543_p4 = pnand %p14542_p3, %p14536_p0 }
 0x653   :  { %v10456_v6 = vpop.f32.mrb[0].mxu0 }
 0x654   :  { %v1123_v7 = vpop.f32.mrb[1].mxu0 }
 0x655   :  { %1135 = vrot.lane.b32.xlu0 %v1123_v7, %s14751_s12 }
 0x659   :  { %1137 = vrot.lane.b32.xlu0 %v10456_v6, %s14751_s12 }
 0x6c7   :  { %v1136_v8 = vpop.permute.xlu0 %1135 }
 0x6c8   :  { %v1142_v9 = vsel %vm1141_vm1, %v1048_v0, %v1136_v8  ;;  %v1367_v8 = vld [vmem:[#allocation13 + $0x20] sm:$0xff] }
 0x6c9   :  { %10459 = vmatprep.mubr.msk.f32.mxu1 %vm1149_vm2, %v1142_v9  ;;  %v1368_v9 = vld [vmem:[#allocation13 + $0x28] sm:$0xff] }
 0x6cb   :  { %v1138_v10 = vpop.permute.xlu0 %1137 }
 0x6cc   :  { %v1143_v11 = vsel %vm1141_vm1, %v1049_v1, %v1138_v10  ;;  %v11618_v10 = vpack.c.bf16 %v1368_v9, %v1367_v8  ;;  %vm7909_vm1 = vcmask 982720  }
 0x6cd   :  { %10460 = vmatmul.mubr.msk.f32.vlgmr.msra.gmra.mrb[0].mxu1 %vm1149_vm2, %v1143_v11  ;;  %v1369_v11 = vld [vmem:[#allocation13 + $0x30] sm:$0xff]  ;;  %vm8032_vm2 = vcmask 982016  }
 0x6ce   :  { %10466 = vmatprep.mubr.msk.f32.mxu1 %vm1050_vm0, %v15541_v2  ;;  %v11622_v13 = vpack.c.bf16 %v1370_v12, %v1369_v11 }
 0x7a0   :  { %v10461_v23 = vpop.f32.mrb[0].mxu1 }
 0x7a1   :  { %v1228_v24 = vadd.f32 %v10461_v23, %v1148_v22  ;;  %v1222_v25 = vpop.f32.mrb[1].mxu1 }
 0x7a2   :  { %v1223_v26 = vadd.f32 %v1222_v25, %v1148_v22  ;;  %v1588_v22 = vld [vmem:[#allocation16 + $0x8] sm:$0xff]  ;;  %v1590_v25 = vld [vmem:[#allocation16 + $0x18] sm:$0xff] }
 0x7a3   :  { %v1233_v27 = vsel %vm1231_vm3, %v1228_v24, 0.0 }
 0x7a4   :  { %v1232_v28 = vsel %vm1231_vm3, %v1223_v26, 0.0 }
 0x7a5   :  { %v1234_v29 = vadd.f32 %v1233_v27, %v1232_v28  ;;  %v1591_v27 = vld [vmem:[#allocation16 + $0x20] sm:$0xff]  ;;  %v1592_v28 = vld [vmem:[#allocation16 + $0x28] sm:$0xff] }
 0x7a7   :  { %v1235_v30 = vrot.slane %v1234_v29, 4 }
 0x7a9   :  { %v1236_v31 = vadd.f32 %v1235_v30, %v1234_v29  ;;  %v1593_v29 = vld [vmem:[#allocation16 + $0x30] sm:$0xff]  ;;  %v11642_v30 = vpack.c.bf16 %v1592_v28, %v1591_v27  ;;  %v1586_v27 = vld [vmem:[#allocation18] sm:$0x7] }
 0x7aa   :  { %v1764_v28 = vrot.slane %v1586_v27, %v15551_v20 }
 0x7ab   :  { %v1237_v32 = vrot.slane %v1236_v31, 2 }
 0x7ad   :  { %v1238_v33 = vadd.f32 %v1237_v32, %v1236_v31  ;;  %v1594_v31 = vld [vmem:[#allocation16 + $0x38] sm:$0xff] }
 0x7ae   :  { %v11646_v32 = vpack.c.bf16 %v1594_v31, %v1593_v29 }
 0x7af   :  { %v1239_v34 = vrot.slane %v1238_v33, 1 }
 0x7b1   :  { %v1240_v35 = vadd.f32 %v1239_v34, %v1238_v33  ;;  %v1362_v33 = vld [vmem:[#allocation15] sm:$0x7] }
 0x7b2   :  { %v1536_v34 = vrot.slane %v1362_v33, %v15551_v20 }
 0x7b3   :  { %v1242_v36 = vmul.f32 0.0625, %v1240_v35 }
 0x7b5   :  { %v1243_v37 = vsub.f32 %v1223_v26, %v1242_v36  ;;  %v1244_v38 = vsub.f32 %v1228_v24, %v1242_v36 }
 0x7b7   :  { %v1245_v39 = vmul.f32 %v1243_v37, %v1243_v37  ;;  %v1246_v40 = vmul.f32 %v1244_v38, %v1244_v38 }
 0x7b9   :  { %v1247_v41 = vsel %vm1231_vm3, %v1245_v39, 0.0  ;;  %v1248_v42 = vsel %vm1231_vm3, %v1246_v40, 0.0 }
 0x7ba   :  { %v1249_v43 = vadd.f32 %v1248_v42, %v1247_v41 }
 0x7bc   :  { %v1250_v44 = vrot.slane %v1249_v43, 4 }
 0x7be   :  { %v1251_v45 = vadd.f32 %v1250_v44, %v1249_v43 }
 0x7c0   :  { %v1252_v46 = vrot.slane %v1251_v45, 2 }
 0x7c2   :  { %v1253_v47 = vadd.f32 %v1252_v46, %v1251_v45 }
 0x7c4   :  { %v1254_v48 = vrot.slane %v1253_v47, 1 }
 0x7c6   :  { %v1255_v49 = vadd.f32 %v1254_v48, %v1253_v47 }
 0x7c8   :  { %v1256_v50 = vmul.f32 0.0625, %v1255_v49 }
 0x7ca   :  { %v1257_v51 = vadd.f32 1e-05, %v1256_v50 }
 0x7cc   :  { %13081 = vrsqrt.f32 %v1257_v51 }
 0x7d6   :  { %v13082_v53 = vpop.eup %13081 }
 0x7d7   :  { %v1259_v54 = vmul.f32 %v13082_v53, %v1132_v21 }
 0x7d9   :  { %v1260_v55 = vmul.f32 %v1259_v54, %v1242_v36  ;;  %v1268_v56 = vrot.slane %v1259_v54, %v15558_v52 }
 0x7db   :  { %v1262_v57 = vrot.slane %v1260_v55, 7  ;;  %v1269_v58 = vmul.f32 %v1268_v56, %v1223_v26  ;;  %v1270_v59 = vmul.f32 %v1268_v56, %v1228_v24  ;;  %v1589_v24 = vld [vmem:[#allocation16 + $0x10] sm:$0xff] }
 0x7dc   :  { %v11638_v26 = vpack.c.bf16 %v1590_v25, %v1589_v24 }
 0x7dd   :  { %v1264_v61 = vsub.f32 %v1132_v21, %v1262_v57  ;;  %v1587_v21 = vld [vmem:[#allocation16] sm:$0xff] }
 0x7de   :  { %v11634_v23 = vpack.c.bf16 %v1588_v22, %v1587_v21 }
 0x7df   :  { %v1274_v62 = vrot.slane %v1264_v61, %v15561_v60 }
 0x7e1   :  { %v1275_v63 = vadd.f32 %v1274_v62, %v1269_v58  ;;  %v1276_v0 = vadd.f32 %v1274_v62, %v1270_v59 }
 0x7e3   :  { %v1277_v1 = vmax.f32 %v1275_v63, 0.0  ;;  %v1278_v3 = vmax.f32 %v1276_v0, 0.0 }
 0x7e5   :  { %1279 = vst.msk [vmem:[#allocation2] sm:$0xff] %vm1231_vm3, %v1277_v1  ;;  %1280 = vst.msk [vmem:[#allocation2 + $0x10] sm:$0xff] %vm1231_vm3, %v1278_v3  ;;  %v11614_v5 = vpack.c.bf16 %v1278_v3, %v1277_v1 }
 0x7e7   :  { %11615 = vmatprep.subr.bf16.mxu1 %v11614_v5 }
 0x7e8   :  { %11617 = vmatpush3.bf16.msra.mxu1 %v11614_v5 }
 0x7e9   :  { %11619 = vmatprep.subr.bf16.mxu1 %v11618_v10 }
 0x7eb   :  { %10467 = vmatmul.mubr.msk.f32.vlgmr.msra.gmra.mrb[2].mxu1 %vm1050_vm0, %v15545_v4 }
 0x7ec   :  { %v1358_v6 = vld [vmem:[#allocation2] sm:$0xff]  ;;  %v1359_v7 = vld [vmem:[#allocation2 + $0x10] sm:$0xff]  ;;  %11621 = vmatpush3.bf16.msra.mxu1 %v11618_v10 }
 0x7ed   :  { %10488 = vmatprep.mubr.msk.f32.mxu0 %vm1231_vm3, %v1358_v6  ;;  %11623 = vmatprep.subr.bf16.mxu1 %v11622_v13 }
 0x7ee   :  { %10489 = vmatmul.mubr.msk.f32.vlgmr.msra.gmra.mrb[2].mxu0 %vm1231_vm3, %v1359_v7 }
 0x7ef   :  { %10514 = vmatprep.mubr.msk.f32.mxu0 %vm1050_vm0, %v15541_v2 }
 0x7f0   :  { %11625 = vmatpush3.bf16.msra.mxu1 %v11622_v13 }
 0x7f1   :  { %11635 = vmatprep.subr.bf16.mxu1 %v11634_v23 }
 0x8be   :  { %v10468_v14 = vpop.f32.mrb[2].mxu1 }
 0x8bf   :  { %1357 = vst.msk [vmem:[#allocation3 + $0x10] sm:$0xff] %vm1231_vm3, %v10468_v14  ;;  %v1347_v15 = vpop.f32.mrb[3].mxu1 }
 0x8c0   :  { %1356 = vst.msk [vmem:[#allocation3] sm:$0xff] %vm1231_vm3, %v1347_v15 }
 0x8c1   :  { %v10490_v16 = vpop.f32.mrb[2].mxu0 }
 0x8c2   :  { %v1524_v17 = vpop.f32.mrb[3].mxu0 }
 0x8c6   :  { %v1361_v19 = vld [vmem:[#allocation3 + $0x10] sm:$0xff] }
 0x8c7   :  { %v1360_v18 = vld [vmem:[#allocation3] sm:$0xff] }
 0x8c8   :  { %10477 = vmatprep.mubr.msk.f32.mxu1 %vm1231_vm3, %v1360_v18 }
 0x8c9   :  { %10478 = vmatmul.mubr.msk.f32.vlgmr.msra.gmra.mrb[4].mxu1 %vm1231_vm3, %v1361_v19 }
 0x8ca   :  { %11637 = vmatpush3.bf16.msra.mxu1 %v11634_v23 }
 0x8cb   :  { %11639 = vmatprep.subr.bf16.mxu1 %v11638_v26 }
 0x8ce   :  { %11641 = vmatpush3.bf16.msra.mxu1 %v11638_v26 }
 0x8cf   :  { %11643 = vmatprep.subr.bf16.mxu1 %v11642_v30 }
 0x8d2   :  { %11645 = vmatpush3.bf16.msra.mxu1 %v11642_v30 }
 0x8d3   :  { %11647 = vmatprep.subr.bf16.mxu1 %v11646_v32 }
 0x8d6   :  { %11649 = vmatpush3.bf16.msra.mxu1 %v11646_v32 }
 0x99c   :  { %v10479_v35 = vpop.f32.mrb[4].mxu1 }
 0x99d   :  { %v1530_v36 = vadd.f32 %v10490_v16, %v10479_v35  ;;  %v1443_v37 = vpop.f32.mrb[5].mxu1 }
 0x99e   :  { %v1525_v38 = vadd.f32 %v1524_v17, %v1443_v37 }
 0x99f   :  { %v1538_v39 = vadd.f32 %v1536_v34, %v1530_v36 }
 0x9a0   :  { %v1537_v40 = vadd.f32 %v1536_v34, %v1525_v38 }
 0x9a1   :  { %v1541_v41 = vsel %vm1539_vm4, %v1538_v39, 0.0 }
 0x9a2   :  { %v1540_v42 = vsel %vm1539_vm4, %v1537_v40, 0.0 }
 0x9a3   :  { %v1542_v43 = vadd.f32 %v1541_v41, %v1540_v42 }
 0x9a5   :  { %v1543_v44 = vrot.slane %v1542_v43, 4 }
 0x9a7   :  { %v1544_v45 = vadd.f32 %v1543_v44, %v1542_v43 }
 0x9a9   :  { %v1545_v46 = vrot.slane %v1544_v45, 2 }
 0x9ab   :  { %v1546_v47 = vadd.f32 %v1545_v46, %v1544_v45 }
 0x9ad   :  { %v1547_v48 = vrot.slane %v1546_v47, 1 }
 0x9af   :  { %v1548_v49 = vadd.f32 %v1547_v48, %v1546_v47 }
 0x9b1   :  { %v1549_v50 = vmul.f32 0.0625, %v1548_v49 }
 0x9b3   :  { %v1550_v51 = vsub.f32 %v1537_v40, %v1549_v50  ;;  %v1551_v53 = vsub.f32 %v1538_v39, %v1549_v50 }
 0x9b5   :  { %v1552_v54 = vmul.f32 %v1550_v51, %v1550_v51  ;;  %v1553_v55 = vmul.f32 %v1551_v53, %v1551_v53 }
 0x9b7   :  { %v1554_v56 = vsel %vm1539_vm4, %v1552_v54, 0.0  ;;  %v1555_v57 = vsel %vm1539_vm4, %v1553_v55, 0.0 }
 0x9b8   :  { %v1556_v58 = vadd.f32 %v1555_v57, %v1554_v56 }
 0x9ba   :  { %v1557_v59 = vrot.slane %v1556_v58, 4 }
 0x9bc   :  { %v1558_v61 = vadd.f32 %v1557_v59, %v1556_v58 }
 0x9be   :  { %v1559_v62 = vrot.slane %v1558_v61, 2 }
 0x9c0   :  { %v1560_v63 = vadd.f32 %v1559_v62, %v1558_v61 }
 0x9c2   :  { %v1561_v0 = vrot.slane %v1560_v63, 1 }
 0x9c4   :  { %v1562_v1 = vadd.f32 %v1561_v0, %v1560_v63 }
 0x9c6   :  { %v1563_v3 = vmul.f32 0.0625, %v1562_v1 }
 0x9c8   :  { %v1564_v5 = vadd.f32 1e-05, %v1563_v3 }
 0x9ca   :  { %13083 = vrsqrt.f32 %v1564_v5 }
 0x9d4   :  { %v13084_v6 = vpop.eup %13083 }
 0x9d5   :  { %v1566_v7 = vmul.f32 %v13084_v6, %v1362_v33 }
 0x9d7   :  { %v1567_v8 = vmul.f32 %v1566_v7, %v1549_v50  ;;  %v1575_v9 = vrot.slane %v1566_v7, %v15558_v52 }
 0x9d9   :  { %v1569_v10 = vrot.slane %v1567_v8, 7  ;;  %v1576_v11 = vmul.f32 %v1575_v9, %v1537_v40  ;;  %v1577_v12 = vmul.f32 %v1575_v9, %v1538_v39 }
 0x9db   :  { %v1571_v13 = vsub.f32 %v1362_v33, %v1569_v10 }
 0x9dd   :  { %v1581_v14 = vrot.slane %v1571_v13, %v15561_v60 }
 0x9df   :  { %v1582_v15 = vadd.f32 %v1581_v14, %v1576_v11  ;;  %v1583_v16 = vadd.f32 %v1581_v14, %v1577_v12  ;;  %v1922_v14 = vld [vmem:[#allocation19 + $0x40] sm:$0xff] }
 0x9e1   :  { %v1584_v17 = vmax.f32 %v1582_v15, 0.0  ;;  %v1585_v18 = vmax.f32 %v1583_v16, 0.0  ;;  %v1923_v15 = vld [vmem:[#allocation19 + $0x48] sm:$0xff]  ;;  %v1924_v16 = vld [vmem:[#allocation19 + $0x50] sm:$0xff] }
 0x9e3   :  { %10507 = vmatprep.mubr.msk.f32.mxu1 %vm1539_vm4, %v1584_v17  ;;  %v11658_v17 = vpack.c.bf16 %v1923_v15, %v1922_v14 }
 0x9e4   :  { %10508 = vmatmul.mubr.msk.f32.vlgmr.msra.gmra.mrb[6].mxu1 %vm1539_vm4, %v1585_v18  ;;  %v1925_v18 = vld [vmem:[#allocation19 + $0x58] sm:$0xff] }
 0x9e5   :  { %10521 = vmatprep.mubr.msk.f32.mxu1 %vm1050_vm0, %v15541_v2 }
 0xab7   :  { %v10509_v19 = vpop.f32.mrb[6].mxu1 }
 0xab8   :  { %v1667_v21 = vpop.f32.mrb[7].mxu1 }
 0xab9   :  { %v13021_v22 = vpack.i.bf16 %v10509_v19, %v1667_v21 }
 0xabb   :  { %13022 = vrot.lane.b32.xlu1 %v13021_v22, %s14752_s27  ;;  %v1927_v22 = vld [vmem:[#allocation19 + $0x68] sm:$0xff] }
 0xb2d   :  { %v13023_v23 = vpop.permute.xlu1 %13022 }
 0xb2e   :  { %v13025_v24 = vunpack.i.h.bf16 %v13023_v23  ;;  %v13024_v25 = vunpack.i.l.bf16 %v13023_v23 }
 0xb30   :  { %v11650_v26 = vpack.c.bf16 %v13025_v24, %v13024_v25  ;;  %v1928_v24 = vld [vmem:[#allocation19 + $0x70] sm:$0xff]  ;;  %v1929_v25 = vld [vmem:[#allocation19 + $0x78] sm:$0xff] }
 0xb32   :  { %11651 = vmatprep.subr.bf16.mxu0 %v11650_v26 }
 0xb33   :  { %11653 = vmatpush3.bf16.msra.mxu0 %v11650_v26  ;;  %v11670_v26 = vpack.c.bf16 %v1929_v25, %v1928_v24 }
 0xb34   :  { %11659 = vmatprep.subr.bf16.mxu0 %v11658_v17 }
 0xb36   :  { %10515 = vmatmul.mubr.msk.f32.vlgmr.msra.gmra.mrb[4].mxu0 %vm1050_vm0, %v15545_v4 }
 0xb37   :  { %11661 = vmatpush3.bf16.msra.mxu0 %v11658_v17 }
 0xc09   :  { %v10516_v29 = vpop.f32.mrb[4].mxu0 }
 0xc0a   :  { %v1760_v30 = vadd.f32 %v10516_v29, %v10509_v19  ;;  %v1750_v31 = vpop.f32.mrb[5].mxu0  ;;  %v11662_v19 = vpack.c.bf16 %v1925_v18, %v1924_v16 }
 0xc0b   :  { %v1759_v32 = vadd.f32 %v1750_v31, %v1667_v21  ;;  %v1926_v21 = vld [vmem:[#allocation19 + $0x60] sm:$0xff] }
 0xc0c   :  { %v1766_v33 = vadd.f32 %v1764_v28, %v1760_v30  ;;  %11663 = vmatprep.subr.bf16.mxu0 %v11662_v19  ;;  %v11666_v23 = vpack.c.bf16 %v1927_v22, %v1926_v21 }
 0xc0d   :  { %v1765_v34 = vadd.f32 %v1764_v28, %v1759_v32  ;;  %11665 = vmatpush3.bf16.msra.mxu0 %v11662_v19  ;;  %v1915_v28 = vld [vmem:[#allocation19 + $0x8] sm:$0xff] }
 0xc0e   :  { %v1768_v35 = vsel %vm1231_vm3, %v1766_v33, 0.0  ;;  %11667 = vmatprep.subr.bf16.mxu0 %v11666_v23 }
 0xc0f   :  { %v1767_v36 = vsel %vm1231_vm3, %v1765_v34, 0.0 }
 0xc10   :  { %v1769_v37 = vadd.f32 %v1768_v35, %v1767_v36  ;;  %v1916_v36 = vld [vmem:[#allocation19 + $0x10] sm:$0xff] }
 0xc11   :  { %11669 = vmatpush3.bf16.msra.mxu0 %v11666_v23 }
 0xc12   :  { %v1770_v38 = vrot.slane %v1769_v37, 4  ;;  %11671 = vmatprep.subr.bf16.mxu0 %v11670_v26 }
 0xc14   :  { %v1771_v39 = vadd.f32 %v1770_v38, %v1769_v37  ;;  %v1917_v37 = vld [vmem:[#allocation19 + $0x18] sm:$0xff] }
 0xc15   :  { %11673 = vmatpush3.bf16.msra.mxu0 %v11670_v26 }
 0xc16   :  { %v1772_v40 = vrot.slane %v1771_v39, 2 }
 0xc18   :  { %v1773_v41 = vadd.f32 %v1772_v40, %v1771_v39  ;;  %v11678_v39 = vpack.c.bf16 %v1917_v37, %v1916_v36 }
 0xc1a   :  { %v1774_v42 = vrot.slane %v1773_v41, 1 }
 0xc1c   :  { %v1775_v43 = vadd.f32 %v1774_v42, %v1773_v41  ;;  %v1918_v41 = vld [vmem:[#allocation19 + $0x20] sm:$0xff]  ;;  %v1919_v42 = vld [vmem:[#allocation19 + $0x28] sm:$0xff] }
 0xc1e   :  { %v1776_v44 = vmul.f32 0.0625, %v1775_v43 }
 0xc20   :  { %v1777_v45 = vsub.f32 %v1765_v34, %v1776_v44  ;;  %v1778_v46 = vsub.f32 %v1766_v33, %v1776_v44 }
 0xc22   :  { %v1779_v47 = vmul.f32 %v1777_v45, %v1777_v45  ;;  %v1780_v48 = vmul.f32 %v1778_v46, %v1778_v46  ;;  %v1920_v45 = vld [vmem:[#allocation19 + $0x30] sm:$0xff]  ;;  %v1921_v46 = vld [vmem:[#allocation19 + $0x38] sm:$0xff] }
 0xc24   :  { %v1781_v49 = vsel %vm1231_vm3, %v1779_v47, 0.0  ;;  %v1782_v50 = vsel %vm1231_vm3, %v1780_v48, 0.0  ;;  %v11686_v47 = vpack.c.bf16 %v1921_v46, %v1920_v45 }
 0xc25   :  { %v1783_v51 = vadd.f32 %v1782_v50, %v1781_v49  ;;  %v2145_v49 = vld [vmem:[#allocation22] sm:$0xff]  ;;  %v2146_v50 = vld [vmem:[#allocation22 + $0x8] sm:$0xff] }
 0xc27   :  { %v1784_v53 = vrot.slane %v1783_v51, 4 }
 0xc29   :  { %v1785_v54 = vadd.f32 %v1784_v53, %v1783_v51  ;;  %v11690_v51 = vpack.c.bf16 %v2146_v50, %v2145_v49  ;;  %v2147_v53 = vld [vmem:[#allocation22 + $0x10] sm:$0xff] }
 0xc2b   :  { %v1786_v55 = vrot.slane %v1785_v54, 2 }
 0xc2d   :  { %v1787_v56 = vadd.f32 %v1786_v55, %v1785_v54  ;;  %v2148_v54 = vld [vmem:[#allocation22 + $0x18] sm:$0xff] }
 0xc2e   :  { %v11694_v55 = vpack.c.bf16 %v2148_v54, %v2147_v53  ;;  %v2144_v54 = vld [vmem:[#allocation24] sm:$0x7] }
 0xc2f   :  { %v1788_v57 = vrot.slane %v1787_v56, 1 }
 0xc31   :  { %v1789_v58 = vadd.f32 %v1788_v57, %v1787_v56  ;;  %v2149_v56 = vld [vmem:[#allocation22 + $0x20] sm:$0xff]  ;;  %v2150_v57 = vld [vmem:[#allocation22 + $0x28] sm:$0xff] }
 0xc33   :  { %v1790_v59 = vmul.f32 0.0625, %v1789_v58  ;;  %v11698_v58 = vpack.c.bf16 %v2150_v57, %v2149_v56 }
 0xc35   :  { %v1791_v61 = vadd.f32 1e-05, %v1790_v59  ;;  %v2151_v59 = vld [vmem:[#allocation22 + $0x30] sm:$0xff] }
 0xc37   :  { %13085 = vrsqrt.f32 %v1791_v61  ;;  %v2152_v61 = vld [vmem:[#allocation22 + $0x38] sm:$0xff] }
 0xc41   :  { %v13086_v62 = vpop.eup %13085 }
 0xc42   :  { %v1793_v63 = vmul.f32 %v13086_v62, %v1586_v27  ;;  %v11702_v62 = vpack.c.bf16 %v2152_v61, %v2151_v59 }
 0xc44   :  { %v1802_v0 = vrot.slane %v1793_v63, %v15558_v52  ;;  %v1794_v1 = vmul.f32 %v1793_v63, %v1776_v44  ;;  %v11682_v44 = vpack.c.bf16 %v1919_v42, %v1918_v41  ;;  %v1913_v63 = vld [vmem:[#allocation21] sm:$0x7] }
 0xc46   :  { %v1803_v3 = vmul.f32 %v1802_v0, %v1765_v34  ;;  %v1796_v5 = vrot.slane %v1794_v1, 7  ;;  %v1804_v6 = vmul.f32 %v1802_v0, %v1766_v33  ;;  %v2095_v0 = vrot.slane %v1913_v63, %v15551_v20 }
 0xc48   :  { %v1798_v7 = vsub.f32 %v1586_v27, %v1796_v5  ;;  %v1914_v27 = vld [vmem:[#allocation19] sm:$0xff] }
 0xc49   :  { %v11674_v29 = vpack.c.bf16 %v1915_v28, %v1914_v27 }
 0xc4a   :  { %v1808_v8 = vrot.slane %v1798_v7, %v15561_v60 }
 0xc4b   :  { %11675 = vmatprep.subr.bf16.mxu0 %v11674_v29 }
 0xc4c   :  { %v1809_v9 = vadd.f32 %v1808_v8, %v1803_v3  ;;  %v1810_v10 = vadd.f32 %v1808_v8, %v1804_v6 }
 0xc4e   :  { %v1811_v11 = vmax.f32 %v1809_v9, 0.0  ;;  %v1812_v12 = vmax.f32 %v1810_v10, 0.0 }
 0xc50   :  { %v11654_v13 = vpack.c.bf16 %v1812_v12, %v1811_v11 }
 0xc52   :  { %11655 = vmatprep.subr.bf16.mxu1 %v11654_v13 }
 0xc53   :  { %11657 = vmatpush3.bf16.msra.mxu1 %v11654_v13 }
 0xc54   :  { %11691 = vmatprep.subr.bf16.mxu1 %v11690_v51 }
 0xc56   :  { %10522 = vmatmul.mubr.msk.f32.vlgmr.msra.gmra.mrb[8].mxu1 %vm1050_vm0, %v15545_v4 }
 0xc57   :  { %11693 = vmatpush3.bf16.msra.mxu1 %v11690_v51 }
 0xc58   :  { %11695 = vmatprep.subr.bf16.mxu1 %v11694_v55 }
 0xc5b   :  { %11697 = vmatpush3.bf16.msra.mxu1 %v11694_v55  ;;  %v2322_v55 = vrot.slane %v2144_v54, %v15551_v20 }
 0xc5c   :  { %11699 = vmatprep.subr.bf16.mxu1 %v11698_v58 }
 0xc5f   :  { %11701 = vmatpush3.bf16.msra.mxu1 %v11698_v58 }
 0xc60   :  { %11703 = vmatprep.subr.bf16.mxu1 %v11702_v62 }
 0xc63   :  { %11705 = vmatpush3.bf16.msra.mxu1 %v11702_v62 }
 0xd29   :  { %v10523_v30 = vpop.f32.mrb[8].mxu1 }
 0xd2a   :  { %1903 = vrot.lane.b32.xlu0 %v10523_v30, %s14753_s29  ;;  %v1890_v31 = vpop.f32.mrb[9].mxu1 }
 0xd2b   :  { %1901 = vrot.lane.b32.xlu1 %v1890_v31, %s14753_s29 }
 0xd2e   :  { %1817 = vrot.lane.b32.xlu0 %v1812_v12, %s14753_s29 }
 0xd2f   :  { %1815 = vrot.lane.b32.xlu1 %v1811_v11, %s14753_s29 }
 0xd9c   :  { %v1904_v32 = vpop.permute.xlu0 %1903 }
 0xd9d   :  { %1908 = vst.msk [vmem:[#allocation3 + $0x10] sm:$0xff] %vm1821_vm5, %v1904_v32  ;;  %v1902_v33 = vpop.permute.xlu1 %1901 }
 0xd9e   :  { %1907 = vst.msk [vmem:[#allocation3] sm:$0xff] %vm1821_vm5, %v1902_v33 }
 0xda0   :  { %v1818_v34 = vpop.permute.xlu0 %1817 }
 0xda1   :  { %1823 = vst.msk [vmem:[#allocation2 + $0x10] sm:$0xff] %vm1821_vm5, %v1818_v34  ;;  %v1816_v35 = vpop.permute.xlu1 %1815 }
 0xda2   :  { %1822 = vst.msk [vmem:[#allocation2] sm:$0xff] %vm1821_vm5, %v1816_v35  ;;  %vm8482_vm5 = vcmask 195584  }
 0xda4   :  { %v1912_v40 = vld [vmem:[#allocation3 + $0x10] sm:$0xff] }
 0xda5   :  { %v1911_v38 = vld [vmem:[#allocation3] sm:$0xff] }
 0xda6   :  { %10540 = vmatprep.mubr.msk.f32.mxu0 %vm1539_vm4, %v1911_v38 }
 0xda7   :  { %10541 = vmatmul.mubr.msk.f32.vlgmr.msra.gmra.mrb[6].mxu0 %vm1539_vm4, %v1912_v40 }
 0xda8   :  { %11677 = vmatpush3.bf16.msra.mxu0 %v11674_v29  ;;  %v1910_v48 = vld [vmem:[#allocation2 + $0x10] sm:$0xff] }
 0xda9   :  { %11679 = vmatprep.subr.bf16.mxu0 %v11678_v39  ;;  %v1909_v43 = vld [vmem:[#allocation2] sm:$0xff] }
 0xdaa   :  { %10559 = vmatprep.mubr.msk.f32.mxu0 %vm1539_vm4, %v1909_v43 }
 0xdac   :  { %11681 = vmatpush3.bf16.msra.mxu0 %v11678_v39 }
 0xdad   :  { %11683 = vmatprep.subr.bf16.mxu0 %v11682_v44 }
 0xdb0   :  { %11685 = vmatpush3.bf16.msra.mxu0 %v11682_v44 }
 0xdb1   :  { %11687 = vmatprep.subr.bf16.mxu0 %v11686_v47 }
 0xdb4   :  { %11689 = vmatpush3.bf16.msra.mxu0 %v11686_v47 }
 0xdb7   :  { %10560 = vmatmul.mubr.msk.f32.vlgmr.msra.gmra.mrb[6].mxu0 %vm1539_vm4, %v1910_v48 }
 0xe8a   :  { %v10561_v1 = vpop.f32.mrb[6].mxu0 }
 0xe8b   :  { %v2097_v3 = vadd.f32 %v10561_v1, %v2095_v0  ;;  %v2083_v5 = vpop.f32.mrb[7].mxu0 }
 0xe8c   :  { %v2096_v6 = vadd.f32 %v2095_v0, %v2083_v5 }
 0xe8d   :  { %v2099_v7 = vsel %vm1539_vm4, %v2097_v3, 0.0 }
 0xe8e   :  { %v2098_v8 = vsel %vm1539_vm4, %v2096_v6, 0.0 }
 0xe8f   :  { %v2100_v9 = vadd.f32 %v2099_v7, %v2098_v8 }
 0xe91   :  { %v2101_v10 = vrot.slane %v2100_v9, 4 }
 0xe93   :  { %v2102_v11 = vadd.f32 %v2101_v10, %v2100_v9 }
 0xe95   :  { %v2103_v12 = vrot.slane %v2102_v11, 2 }
 0xe97   :  { %v2104_v13 = vadd.f32 %v2103_v12, %v2102_v11 }
 0xe99   :  { %v2105_v14 = vrot.slane %v2104_v13, 1 }
 0xe9b   :  { %v2106_v15 = vadd.f32 %v2105_v14, %v2104_v13 }
 0xe9d   :  { %v2107_v16 = vmul.f32 0.0625, %v2106_v15 }
 0xe9f   :  { %v2108_v17 = vsub.f32 %v2096_v6, %v2107_v16  ;;  %v2109_v18 = vsub.f32 %v2097_v3, %v2107_v16 }
 0xea1   :  { %v2110_v19 = vmul.f32 %v2108_v17, %v2108_v17  ;;  %v2111_v21 = vmul.f32 %v2109_v18, %v2109_v18 }
 0xea3   :  { %v2112_v22 = vsel %vm1539_vm4, %v2110_v19, 0.0  ;;  %v2113_v23 = vsel %vm1539_vm4, %v2111_v21, 0.0 }
 0xea4   :  { %v2114_v24 = vadd.f32 %v2113_v23, %v2112_v22 }
 0xea6   :  { %v2115_v25 = vrot.slane %v2114_v24, 4 }
 0xea8   :  { %v2116_v26 = vadd.f32 %v2115_v25, %v2114_v24 }
 0xeaa   :  { %v2117_v27 = vrot.slane %v2116_v26, 2 }
 0xeac   :  { %v2118_v28 = vadd.f32 %v2117_v27, %v2116_v26 }
 0xeae   :  { %v2119_v29 = vrot.slane %v2118_v28, 1 }
 0xeb0   :  { %v2120_v30 = vadd.f32 %v2119_v29, %v2118_v28 }
 0xeb2   :  { %v2121_v31 = vmul.f32 0.0625, %v2120_v30 }
 0xeb4   :  { %v2122_v32 = vadd.f32 1e-05, %v2121_v31 }
 0xeb6   :  { %13087 = vrsqrt.f32 %v2122_v32 }
 0xec0   :  { %v13088_v33 = vpop.eup %13087 }
 0xec1   :  { %v2124_v34 = vmul.f32 %v13088_v33, %v1913_v63 }
 0xec3   :  { %v2125_v35 = vmul.f32 %v2124_v34, %v2107_v16  ;;  %v2133_v36 = vrot.slane %v2124_v34, %v15558_v52 }
 0xec5   :  { %v2127_v37 = vrot.slane %v2125_v35, 7  ;;  %v2134_v38 = vmul.f32 %v2133_v36, %v2096_v6  ;;  %v2135_v39 = vmul.f32 %v2133_v36, %v2097_v3 }
 0xec7   :  { %v2129_v40 = vsub.f32 %v1913_v63, %v2127_v37 }
 0xec9   :  { %v2139_v41 = vrot.slane %v2129_v40, %v15561_v60  ;;  %v2484_v40 = vld [vmem:[#allocation25 + $0x60] sm:$0xff] }
 0xecb   :  { %v2140_v42 = vadd.f32 %v2139_v41, %v2134_v38  ;;  %v2141_v43 = vadd.f32 %v2139_v41, %v2135_v39  ;;  %v2485_v41 = vld [vmem:[#allocation25 + $0x68] sm:$0xff] }
 0xecd   :  { %v2143_v44 = vmax.f32 %v2141_v43, 0.0  ;;  %v2142_v45 = vmax.f32 %v2140_v42, 0.0  ;;  %v2486_v42 = vld [vmem:[#allocation25 + $0x70] sm:$0xff]  ;;  %v11714_v43 = vpack.c.bf16 %v2485_v41, %v2484_v40 }
 0xecf   :  { %10578 = vmatprep.mubr.msk.f32.mxu1 %vm1539_vm4, %v2142_v45 }
 0xed0   :  { %10579 = vmatmul.mubr.msk.f32.vlgmr.msra.gmra.mrb[10].mxu1 %vm1539_vm4, %v2143_v44  ;;  %v2487_v44 = vld [vmem:[#allocation25 + $0x78] sm:$0xff] }
 0xed1   :  { %10585 = vmatprep.mubr.msk.f32.mxu1 %vm1050_vm0, %v15541_v2  ;;  %v11718_v45 = vpack.c.bf16 %v2487_v44, %v2486_v42 }
 0xfa3   :  { %v10580_v46 = vpop.f32.mrb[10].mxu1 }
 0xfa4   :  { %v2225_v47 = vpop.f32.mrb[11].mxu1 }
 0xfa5   :  { %v13026_v48 = vpack.i.bf16 %v10580_v46, %v2225_v47 }
 0xfa7   :  { %13027 = vrot.lane.b32.xlu1 %v13026_v48, %s14752_s27 }
0x1019   :  { %v13028_v49 = vpop.permute.xlu1 %13027 }
0x101a   :  { %v13030_v50 = vunpack.i.h.bf16 %v13028_v49  ;;  %v13029_v51 = vunpack.i.l.bf16 %v13028_v49  ;;  %v2490_v49 = vld [vmem:[#allocation25 + $0x90] sm:$0xff] }
0x101c   :  { %v11706_v53 = vpack.c.bf16 %v13030_v50, %v13029_v51  ;;  %v2491_v50 = vld [vmem:[#allocation25 + $0x98] sm:$0xff] }
0x101d   :  { %v11726_v51 = vpack.c.bf16 %v2491_v50, %v2490_v49 }
0x101e   :  { %11707 = vmatprep.subr.bf16.mxu1 %v11706_v53 }
0x101f   :  { %11709 = vmatpush3.bf16.msra.mxu1 %v11706_v53  ;;  %v2493_v53 = vld [vmem:[#allocation25 + $0xa8] sm:$0xff] }
0x1022   :  { %10586 = vmatmul.mubr.msk.f32.vlgmr.msra.gmra.mrb[12].mxu1 %vm1050_vm0, %v15545_v4 }
0x1023   :  { %10592 = vmatprep.mubr.msk.f32.mxu1 %vm1050_vm0, %v15541_v2 }
0x10f5   :  { %v10587_v56 = vpop.f32.mrb[12].mxu1 }
0x10f6   :  { %v2318_v57 = vadd.f32 %v10587_v56, %v10580_v46  ;;  %v2308_v58 = vpop.f32.mrb[13].mxu1  ;;  %v2488_v46 = vld [vmem:[#allocation25 + $0x80] sm:$0xff]  ;;  %v2495_v56 = vld [vmem:[#allocation25 + $0xb8] sm:$0xff] }
0x10f7   :  { %v2317_v59 = vadd.f32 %v2308_v58, %v2225_v47  ;;  %v2489_v47 = vld [vmem:[#allocation25 + $0x88] sm:$0xff]  ;;  %v2472_v58 = vld [vmem:[#allocation25] sm:$0xff] }
0x10f8   :  { %v2324_v61 = vadd.f32 %v2322_v55, %v2318_v57  ;;  %v11722_v48 = vpack.c.bf16 %v2489_v47, %v2488_v46 }
0x10f9   :  { %v2323_v62 = vadd.f32 %v2322_v55, %v2317_v59  ;;  %v2494_v55 = vld [vmem:[#allocation25 + $0xb0] sm:$0xff]  ;;  %v2473_v59 = vld [vmem:[#allocation25 + $0x8] sm:$0xff] }
0x10fa   :  { %v2326_v63 = vsel %vm1231_vm3, %v2324_v61, 0.0  ;;  %v11734_v57 = vpack.c.bf16 %v2495_v56, %v2494_v55 }
0x10fb   :  { %v2325_v0 = vsel %vm1231_vm3, %v2323_v62, 0.0 }
0x10fc   :  { %v2327_v1 = vadd.f32 %v2326_v63, %v2325_v0 }
0x10fe   :  { %v2328_v3 = vrot.slane %v2327_v1, 4 }
0x1100   :  { %v2329_v5 = vadd.f32 %v2328_v3, %v2327_v1 }
0x1102   :  { %v2330_v6 = vrot.slane %v2329_v5, 2 }
0x1104   :  { %v2331_v7 = vadd.f32 %v2330_v6, %v2329_v5  ;;  %v2474_v6 = vld [vmem:[#allocation25 + $0x10] sm:$0xff] }
0x1106   :  { %v2332_v8 = vrot.slane %v2331_v7, 1 }
0x1108   :  { %v2333_v2 = vadd.f32 %v2332_v8, %v2331_v7  ;;  %v2475_v7 = vld [vmem:[#allocation25 + $0x18] sm:$0xff] }
0x110a   :  { %v2334_v9 = vmul.f32 0.0625, %v2333_v2  ;;  %v11742_v2 = vpack.c.bf16 %v2475_v7, %v2474_v6 }
0x110c   :  { %v2335_v10 = vsub.f32 %v2323_v62, %v2334_v9  ;;  %v2336_v11 = vsub.f32 %v2324_v61, %v2334_v9 }
0x110e   :  { %v2337_v12 = vmul.f32 %v2335_v10, %v2335_v10  ;;  %v2338_v13 = vmul.f32 %v2336_v11, %v2336_v11  ;;  %v2476_v10 = vld [vmem:[#allocation25 + $0x20] sm:$0xff]  ;;  %v2477_v11 = vld [vmem:[#allocation25 + $0x28] sm:$0xff] }
0x1110   :  { %v2339_v14 = vsel %vm1231_vm3, %v2337_v12, 0.0  ;;  %v2340_v15 = vsel %vm1231_vm3, %v2338_v13, 0.0  ;;  %v11746_v13 = vpack.c.bf16 %v2477_v11, %v2476_v10 }
0x1111   :  { %v2341_v16 = vadd.f32 %v2340_v15, %v2339_v14  ;;  %v2478_v14 = vld [vmem:[#allocation25 + $0x30] sm:$0xff]  ;;  %v2479_v15 = vld [vmem:[#allocation25 + $0x38] sm:$0xff] }
0x1113   :  { %v2342_v17 = vrot.slane %v2341_v16, 4 }
0x1115   :  { %v2343_v18 = vadd.f32 %v2342_v17, %v2341_v16  ;;  %v11750_v16 = vpack.c.bf16 %v2479_v15, %v2478_v14  ;;  %v2480_v17 = vld [vmem:[#allocation25 + $0x40] sm:$0xff] }
0x1117   :  { %v2344_v19 = vrot.slane %v2343_v18, 2 }
0x1119   :  { %v2345_v21 = vadd.f32 %v2344_v19, %v2343_v18  ;;  %v2481_v18 = vld [vmem:[#allocation25 + $0x48] sm:$0xff] }
0x111a   :  { %v11754_v19 = vpack.c.bf16 %v2481_v18, %v2480_v17 }
0x111b   :  { %v2346_v22 = vrot.slane %v2345_v21, 1 }
0x111d   :  { %v2347_v23 = vadd.f32 %v2346_v22, %v2345_v21  ;;  %v2482_v21 = vld [vmem:[#allocation25 + $0x50] sm:$0xff]  ;;  %v2483_v22 = vld [vmem:[#allocation25 + $0x58] sm:$0xff] }
0x111f   :  { %v2348_v24 = vmul.f32 0.0625, %v2347_v23  ;;  %v11758_v23 = vpack.c.bf16 %v2483_v22, %v2482_v21 }
0x1121   :  { %v2349_v25 = vadd.f32 1e-05, %v2348_v24 }
0x1123   :  { %13089 = vrsqrt.f32 %v2349_v25  ;;  %v15640_v25 = vld [vmem:[#allocation4] sm:$0xff] }
0x112d   :  { %v13090_v26 = vpop.eup %13089 }
0x112e   :  { %v2351_v27 = vmul.f32 %v13090_v26, %v2144_v54  ;;  %v2712_v26 = vld [vmem:[#allocation28] sm:$0xff] }
0x1130   :  { %v2360_v28 = vrot.slane %v2351_v27, %v15558_v52  ;;  %v2352_v29 = vmul.f32 %v2351_v27, %v2334_v9  ;;  %v2713_v27 = vld [vmem:[#allocation28 + $0x8] sm:$0xff] }
0x1132   :  { %v2361_v30 = vmul.f32 %v2360_v28, %v2323_v62  ;;  %v2354_v31 = vrot.slane %v2352_v29, 7  ;;  %v2362_v32 = vmul.f32 %v2360_v28, %v2324_v61  ;;  %v11738_v61 = vpack.c.bf16 %v2473_v59, %v2472_v58  ;;  %v2714_v29 = vld [vmem:[#allocation28 + $0x10] sm:$0xff] }
0x1133   :  { %v11762_v28 = vpack.c.bf16 %v2713_v27, %v2712_v26 }
0x1134   :  { %v2356_v33 = vsub.f32 %v2144_v54, %v2354_v31 }
0x1135   :  { %11763 = vmatprep.subr.bf16.mxu0 %v11762_v28 }
0x1136   :  { %v2366_v34 = vrot.slane %v2356_v33, %v15561_v60  ;;  %11765 = vmatpush3.bf16.msra.mxu0 %v11762_v28  ;;  %v2717_v33 = vld [vmem:[#allocation28 + $0x28] sm:$0xff] }
0x1138   :  { %v2367_v35 = vadd.f32 %v2366_v34, %v2361_v30  ;;  %v2368_v36 = vadd.f32 %v2366_v34, %v2362_v32  ;;  %v2715_v30 = vld [vmem:[#allocation28 + $0x18] sm:$0xff]  ;;  %v2716_v32 = vld [vmem:[#allocation28 + $0x20] sm:$0xff] }
0x1139   :  { %v11766_v31 = vpack.c.bf16 %v2715_v30, %v2714_v29  ;;  %v11770_v34 = vpack.c.bf16 %v2717_v33, %v2716_v32  ;;  %v15656_v29 = vld [vmem:[#allocation4 + $0x8] sm:$0xff]  ;;  %v2711_v30 = vld [vmem:[#allocation30] sm:$0x7] }
0x113a   :  { %v2369_v37 = vmax.f32 %v2367_v35, 0.0  ;;  %v2370_v38 = vmax.f32 %v2368_v36, 0.0  ;;  %v2718_v35 = vld [vmem:[#allocation28 + $0x30] sm:$0xff]  ;;  %v2719_v36 = vld [vmem:[#allocation28 + $0x38] sm:$0xff] }
0x113b   :  { %11767 = vmatprep.subr.bf16.mxu0 %v11766_v31 }
0x113c   :  { %v11710_v39 = vpack.c.bf16 %v2370_v38, %v2369_v37  ;;  %11769 = vmatpush3.bf16.msra.mxu0 %v11766_v31  ;;  %v2889_v31 = vrot.slane %v2711_v30, %v15551_v20 }
0x113d   :  { %11771 = vmatprep.subr.bf16.mxu0 %v11770_v34 }
0x113e   :  { %11711 = vmatprep.subr.bf16.mxu1 %v11710_v39 }
0x113f   :  { %11713 = vmatpush3.bf16.msra.mxu1 %v11710_v39 }
0x1140   :  { %11715 = vmatprep.subr.bf16.mxu1 %v11714_v43  ;;  %11773 = vmatpush3.bf16.msra.mxu0 %v11770_v34 }
0x1142   :  { %10593 = vmatmul.mubr.msk.f32.vlgmr.msra.gmra.mrb[14].mxu1 %vm1050_vm0, %v15545_v4  ;;  %v2492_v4 = vld [vmem:[#allocation25 + $0xa0] sm:$0xff] }
0x1143   :  { %11717 = vmatpush3.bf16.msra.mxu1 %v11714_v43  ;;  %v11730_v54 = vpack.c.bf16 %v2493_v53, %v2492_v4 }
0x1144   :  { %11719 = vmatprep.subr.bf16.mxu1 %v11718_v45 }
0x1147   :  { %11721 = vmatpush3.bf16.msra.mxu1 %v11718_v45 }
0x1148   :  { %11723 = vmatprep.subr.bf16.mxu1 %v11722_v48 }
0x114b   :  { %11725 = vmatpush3.bf16.msra.mxu1 %v11722_v48 }
0x114c   :  { %11727 = vmatprep.subr.bf16.mxu1 %v11726_v51 }
0x114f   :  { %11729 = vmatpush3.bf16.msra.mxu1 %v11726_v51 }
0x1150   :  { %11731 = vmatprep.subr.bf16.mxu1 %v11730_v54 }
0x1153   :  { %11733 = vmatpush3.bf16.msra.mxu1 %v11730_v54 }
0x1154   :  { %11735 = vmatprep.subr.bf16.mxu1 %v11734_v57 }
0x1157   :  { %11737 = vmatpush3.bf16.msra.mxu1 %v11734_v57 }
0x1158   :  { %11739 = vmatprep.subr.bf16.mxu1 %v11738_v61 }
0x1215   :  { %v10594_v62 = vpop.f32.mrb[14].mxu1 }
0x1216   :  { %2461 = vrot.lane.b32.xlu1 %v10594_v62, %s14754_s23  ;;  %v2448_v63 = vpop.f32.mrb[15].mxu1 }
0x1217   :  { %2459 = vrot.lane.b32.xlu0 %v2448_v63, %s14754_s23 }
0x121a   :  { %2375 = vrot.lane.b32.xlu1 %v2370_v38, %s14754_s23  ;;  %v2471_v38 = vld [vmem:[#allocation27] sm:$0x7] }
0x121b   :  { %2373 = vrot.lane.b32.xlu0 %v2369_v37, %s14754_s23  ;;  %v11774_v37 = vpack.c.bf16 %v2719_v36, %v2718_v35  ;;  %v2662_v39 = vrot.slane %v2471_v38, %v15551_v20 }
0x121d   :  { %11775 = vmatprep.subr.bf16.mxu0 %v11774_v37 }
0x121e   :  { %11777 = vmatpush3.bf16.msra.mxu0 %v11774_v37 }
0x1288   :  { %v2462_v0 = vpop.permute.xlu1 %2461 }
0x1289   :  { %2466 = vst.msk [vmem:[#allocation3 + $0x10] sm:$0xff] %vm2379_vm6, %v2462_v0  ;;  %v2460_v1 = vpop.permute.xlu0 %2459 }
0x128a   :  { %2465 = vst.msk [vmem:[#allocation3] sm:$0xff] %vm2379_vm6, %v2460_v1 }
0x128c   :  { %v2376_v3 = vpop.permute.xlu1 %2375 }
0x128d   :  { %2381 = vst.msk [vmem:[#allocation2 + $0x10] sm:$0xff] %vm2379_vm6, %v2376_v3  ;;  %v2374_v5 = vpop.permute.xlu0 %2373 }
0x128e   :  { %2380 = vst.msk [vmem:[#allocation2] sm:$0xff] %vm2379_vm6, %v2374_v5 }
0x1290   :  { %v2470_v9 = vld [vmem:[#allocation3 + $0x10] sm:$0xff] }
0x1291   :  { %v2469_v8 = vld [vmem:[#allocation3] sm:$0xff] }
0x1292   :  { %10619 = vmatprep.mubr.msk.f32.mxu1 %vm2496_vm7, %v2469_v8 }
0x1293   :  { %10620 = vmatmul.mubr.msk.f32.vlgmr.msra.gmra.mrb[16].mxu1 %vm2496_vm7, %v2470_v9 }
0x1294   :  { %11741 = vmatpush3.bf16.msra.mxu1 %v11738_v61  ;;  %v2468_v24 = vld [vmem:[#allocation2 + $0x10] sm:$0xff] }
0x1295   :  { %11743 = vmatprep.subr.bf16.mxu1 %v11742_v2  ;;  %v2467_v12 = vld [vmem:[#allocation2] sm:$0xff] }
0x1296   :  { %10646 = vmatprep.mubr.msk.f32.mxu1 %vm2496_vm7, %v2467_v12 }
0x1298   :  { %11745 = vmatpush3.bf16.msra.mxu1 %v11742_v2 }
0x1299   :  { %11747 = vmatprep.subr.bf16.mxu1 %v11746_v13 }
0x129c   :  { %11749 = vmatpush3.bf16.msra.mxu1 %v11746_v13 }
0x129d   :  { %11751 = vmatprep.subr.bf16.mxu1 %v11750_v16 }
0x12a0   :  { %11753 = vmatpush3.bf16.msra.mxu1 %v11750_v16 }
0x12a1   :  { %11755 = vmatprep.subr.bf16.mxu1 %v11754_v19 }
0x12a4   :  { %11757 = vmatpush3.bf16.msra.mxu1 %v11754_v19 }
0x12a5   :  { %11759 = vmatprep.subr.bf16.mxu1 %v11758_v23 }
0x12a8   :  { %11761 = vmatpush3.bf16.msra.mxu1 %v11758_v23 }
0x12ab   :  { %10647 = vmatmul.mubr.msk.f32.vlgmr.msra.gmra.mrb[16].mxu1 %vm2496_vm7, %v2468_v24 }
0x12ac   :  { %10756 = vmatprep.mubr.msk.f32.mxu1 %vm1050_vm0, %v15640_v25 }
0x137e   :  { %v10648_v40 = vpop.f32.mrb[16].mxu1 }
0x137f   :  { %v2664_v41 = vadd.f32 %v10648_v40, %v2662_v39  ;;  %v2650_v42 = vpop.f32.mrb[17].mxu1 }
0x1380   :  { %v2663_v43 = vadd.f32 %v2662_v39, %v2650_v42 }
0x1381   :  { %v2666_v44 = vsel %vm1539_vm4, %v2664_v41, 0.0 }
0x1382   :  { %v2665_v45 = vsel %vm1539_vm4, %v2663_v43, 0.0 }
0x1383   :  { %v2667_v46 = vadd.f32 %v2666_v44, %v2665_v45 }
0x1385   :  { %v2668_v47 = vrot.slane %v2667_v46, 4 }
0x1387   :  { %v2669_v48 = vadd.f32 %v2668_v47, %v2667_v46 }
0x1389   :  { %v2670_v49 = vrot.slane %v2669_v48, 2 }
0x138b   :  { %v2671_v50 = vadd.f32 %v2670_v49, %v2669_v48 }
0x138d   :  { %v2672_v51 = vrot.slane %v2671_v50, 1 }
0x138f   :  { %v2673_v4 = vadd.f32 %v2672_v51, %v2671_v50 }
0x1391   :  { %v2674_v53 = vmul.f32 0.0625, %v2673_v4 }
0x1393   :  { %v2675_v54 = vsub.f32 %v2663_v43, %v2674_v53  ;;  %v2676_v55 = vsub.f32 %v2664_v41, %v2674_v53 }
0x1395   :  { %v2677_v56 = vmul.f32 %v2675_v54, %v2675_v54  ;;  %v2678_v57 = vmul.f32 %v2676_v55, %v2676_v55 }
0x1397   :  { %v2679_v58 = vsel %vm1539_vm4, %v2677_v56, 0.0  ;;  %v2680_v59 = vsel %vm1539_vm4, %v2678_v57, 0.0 }
0x1398   :  { %v2681_v61 = vadd.f32 %v2680_v59, %v2679_v58 }
0x139a   :  { %v2682_v62 = vrot.slane %v2681_v61, 4 }
0x139c   :  { %v2683_v63 = vadd.f32 %v2682_v62, %v2681_v61 }
0x139e   :  { %v2684_v0 = vrot.slane %v2683_v63, 2 }
0x13a0   :  { %v2685_v1 = vadd.f32 %v2684_v0, %v2683_v63 }
0x13a2   :  { %v2686_v3 = vrot.slane %v2685_v1, 1 }
0x13a4   :  { %v2687_v5 = vadd.f32 %v2686_v3, %v2685_v1 }
0x13a6   :  { %v2688_v6 = vmul.f32 0.0625, %v2687_v5 }
0x13a8   :  { %v2689_v7 = vadd.f32 1e-05, %v2688_v6 }
0x13aa   :  { %13091 = vrsqrt.f32 %v2689_v7 }
0x13b4   :  { %v13092_v8 = vpop.eup %13091 }
0x13b5   :  { %v2691_v2 = vmul.f32 %v13092_v8, %v2471_v38 }
0x13b7   :  { %v2692_v9 = vmul.f32 %v2691_v2, %v2674_v53  ;;  %v2700_v10 = vrot.slane %v2691_v2, %v15558_v52 }
0x13b9   :  { %v2694_v11 = vrot.slane %v2692_v9, 7  ;;  %v2701_v12 = vmul.f32 %v2700_v10, %v2663_v43  ;;  %v2702_v13 = vmul.f32 %v2700_v10, %v2664_v41 }
0x13bb   :  { %v2696_v14 = vsub.f32 %v2471_v38, %v2694_v11 }
0x13bd   :  { %v2706_v15 = vrot.slane %v2696_v14, %v15561_v60 }
0x13bf   :  { %v2707_v16 = vadd.f32 %v2706_v15, %v2701_v12  ;;  %v2708_v17 = vadd.f32 %v2706_v15, %v2702_v13  ;;  %v3055_v15 = vld [vmem:[#allocation31 + $0x80] sm:$0xff] }
0x13c1   :  { %v2710_v18 = vmax.f32 %v2708_v17, 0.0  ;;  %v2709_v19 = vmax.f32 %v2707_v16, 0.0  ;;  %v3056_v16 = vld [vmem:[#allocation31 + $0x88] sm:$0xff]  ;;  %v3057_v17 = vld [vmem:[#allocation31 + $0x90] sm:$0xff] }
0x13c3   :  { %10665 = vmatprep.mubr.msk.f32.mxu0 %vm1539_vm4, %v2709_v19  ;;  %v3058_v19 = vld [vmem:[#allocation31 + $0x98] sm:$0xff] }
0x13c4   :  { %10666 = vmatmul.mubr.msk.f32.vlgmr.msra.gmra.mrb[8].mxu0 %vm1539_vm4, %v2710_v18  ;;  %v11786_v18 = vpack.c.bf16 %v3056_v16, %v3055_v15 }
0x13c5   :  { %10672 = vmatprep.mubr.msk.f32.mxu0 %vm1050_vm0, %v15640_v25 }
0x1497   :  { %v10667_v21 = vpop.f32.mrb[8].mxu0 }
0x1498   :  { %v2792_v22 = vpop.f32.mrb[9].mxu0 }
0x1499   :  { %v13031_v23 = vpack.i.bf16 %v10667_v21, %v2792_v22 }
0x149b   :  { %13032 = vrot.lane.b32.xlu0 %v13031_v23, %s14752_s27  ;;  %v3060_v23 = vld [vmem:[#allocation31 + $0xa8] sm:$0xff] }
0x150d   :  { %v13033_v24 = vpop.permute.xlu0 %13032 }
0x150e   :  { %v13035_v26 = vunpack.i.h.bf16 %v13033_v24  ;;  %v13034_v27 = vunpack.i.l.bf16 %v13033_v24 }
0x1510   :  { %v11778_v28 = vpack.c.bf16 %v13035_v26, %v13034_v27  ;;  %v3061_v26 = vld [vmem:[#allocation31 + $0xb0] sm:$0xff]  ;;  %v3062_v27 = vld [vmem:[#allocation31 + $0xb8] sm:$0xff] }
0x1512   :  { %11779 = vmatprep.subr.bf16.mxu0 %v11778_v28 }
0x1513   :  { %11781 = vmatpush3.bf16.msra.mxu0 %v11778_v28  ;;  %v11798_v28 = vpack.c.bf16 %v3062_v27, %v3061_v26 }
0x1516   :  { %10673 = vmatmul.mubr.msk.f32.vlgmr.msra.gmra.mrb[10].mxu0 %vm1050_vm0, %v15656_v29 }
0x1517   :  { %10679 = vmatprep.mubr.msk.f32.mxu0 %vm1050_vm0, %v15640_v25 }
0x15e9   :  { %v10674_v32 = vpop.f32.mrb[10].mxu0 }
0x15ea   :  { %v2885_v33 = vadd.f32 %v10674_v32, %v10667_v21  ;;  %v2875_v34 = vpop.f32.mrb[11].mxu0  ;;  %v11790_v21 = vpack.c.bf16 %v3058_v19, %v3057_v17 }
0x15eb   :  { %v2884_v35 = vadd.f32 %v2875_v34, %v2792_v22  ;;  %v3059_v22 = vld [vmem:[#allocation31 + $0xa0] sm:$0xff]  ;;  %v3066_v34 = vld [vmem:[#allocation31 + $0xd8] sm:$0xff] }
0x15ec   :  { %v2891_v36 = vadd.f32 %v2889_v31, %v2885_v33  ;;  %v11794_v24 = vpack.c.bf16 %v3060_v23, %v3059_v22  ;;  %v3065_v33 = vld [vmem:[#allocation31 + $0xd0] sm:$0xff] }
0x15ed   :  { %v2890_v37 = vadd.f32 %v2889_v31, %v2884_v35  ;;  %v3064_v31 = vld [vmem:[#allocation31 + $0xc8] sm:$0xff]  ;;  %v11806_v35 = vpack.c.bf16 %v3066_v34, %v3065_v33 }
0x15ee   :  { %v2893_v38 = vsel %vm1231_vm3, %v2891_v36, 0.0 }
0x15ef   :  { %v2892_v39 = vsel %vm1231_vm3, %v2890_v37, 0.0 }
0x15f0   :  { %v2894_v40 = vadd.f32 %v2893_v38, %v2892_v39  ;;  %v3069_v39 = vld [vmem:[#allocation31 + $0xf0] sm:$0xff] }
0x15f2   :  { %v2895_v41 = vrot.slane %v2894_v40, 4 }
0x15f4   :  { %v2896_v42 = vadd.f32 %v2895_v41, %v2894_v40  ;;  %v3070_v40 = vld [vmem:[#allocation31 + $0xf8] sm:$0xff] }
0x15f5   :  { %v11814_v41 = vpack.c.bf16 %v3070_v40, %v3069_v39 }
0x15f6   :  { %v2897_v43 = vrot.slane %v2896_v42, 2 }
0x15f8   :  { %v2898_v44 = vadd.f32 %v2897_v43, %v2896_v42  ;;  %v3039_v42 = vld [vmem:[#allocation31] sm:$0xff]  ;;  %v3040_v43 = vld [vmem:[#allocation31 + $0x8] sm:$0xff] }
0x15fa   :  { %v2899_v45 = vrot.slane %v2898_v44, 1 }
0x15fc   :  { %v2900_v46 = vadd.f32 %v2899_v45, %v2898_v44  ;;  %v11818_v44 = vpack.c.bf16 %v3040_v43, %v3039_v42 }
0x15fe   :  { %v2901_v47 = vmul.f32 0.0625, %v2900_v46 }
0x1600   :  { %v2902_v48 = vsub.f32 %v2890_v37, %v2901_v47  ;;  %v2903_v49 = vsub.f32 %v2891_v36, %v2901_v47 }
0x1602   :  { %v2904_v50 = vmul.f32 %v2902_v48, %v2902_v48  ;;  %v2905_v51 = vmul.f32 %v2903_v49, %v2903_v49 }
0x1604   :  { %v2906_v4 = vsel %vm1231_vm3, %v2904_v50, 0.0  ;;  %v2907_v53 = vsel %vm1231_vm3, %v2905_v51, 0.0  ;;  %v3041_v51 = vld [vmem:[#allocation31 + $0x10] sm:$0xff] }
0x1605   :  { %v2908_v54 = vadd.f32 %v2907_v53, %v2906_v4  ;;  %v3042_v4 = vld [vmem:[#allocation31 + $0x18] sm:$0xff] }
0x1607   :  { %v2909_v55 = vrot.slane %v2908_v54, 4 }
0x1609   :  { %v2910_v56 = vadd.f32 %v2909_v55, %v2908_v54  ;;  %v11822_v54 = vpack.c.bf16 %v3042_v4, %v3041_v51 }
0x160b   :  { %v2911_v57 = vrot.slane %v2910_v56, 2 }
0x160d   :  { %v2912_v58 = vadd.f32 %v2911_v57, %v2910_v56  ;;  %v3043_v56 = vld [vmem:[#allocation31 + $0x20] sm:$0xff]  ;;  %v3044_v57 = vld [vmem:[#allocation31 + $0x28] sm:$0xff] }
0x160f   :  { %v2913_v59 = vrot.slane %v2912_v58, 1 }
0x1611   :  { %v2914_v61 = vadd.f32 %v2913_v59, %v2912_v58  ;;  %v11826_v59 = vpack.c.bf16 %v3044_v57, %v3043_v56 }
0x1613   :  { %v2915_v62 = vmul.f32 0.0625, %v2914_v61  ;;  %v3045_v61 = vld [vmem:[#allocation31 + $0x30] sm:$0xff] }
0x1615   :  { %v2916_v63 = vadd.f32 1e-05, %v2915_v62  ;;  %v3046_v62 = vld [vmem:[#allocation31 + $0x38] sm:$0xff] }
0x1617   :  { %13093 = vrsqrt.f32 %v2916_v63  ;;  %v11830_v63 = vpack.c.bf16 %v3046_v62, %v3045_v61  ;;  %v3366_v61 = vld [vmem:[#allocation34 + $0x48] sm:$0xff] }
0x1621   :  { %v13094_v0 = vpop.eup %13093 }
0x1622   :  { %v2918_v1 = vmul.f32 %v13094_v0, %v2711_v30  ;;  %v3047_v0 = vld [vmem:[#allocation31 + $0x40] sm:$0xff] }
0x1624   :  { %v2927_v3 = vrot.slane %v2918_v1, %v15558_v52  ;;  %v2919_v5 = vmul.f32 %v2918_v1, %v2901_v47  ;;  %v3048_v1 = vld [vmem:[#allocation31 + $0x48] sm:$0xff] }
0x1626   :  { %v2928_v6 = vmul.f32 %v2927_v3, %v2890_v37  ;;  %v2921_v7 = vrot.slane %v2919_v5, 7  ;;  %v2929_v8 = vmul.f32 %v2927_v3, %v2891_v36  ;;  %v3067_v36 = vld [vmem:[#allocation31 + $0xe0] sm:$0xff]  ;;  %v3068_v37 = vld [vmem:[#allocation31 + $0xe8] sm:$0xff]  ;;  %v11834_v3 = vpack.c.bf16 %v3048_v1, %v3047_v0  ;;  %v3049_v5 = vld [vmem:[#allocation31 + $0x50] sm:$0xff] }
0x1627   :  { %v11810_v38 = vpack.c.bf16 %v3068_v37, %v3067_v36 }
0x1628   :  { %v2923_v2 = vsub.f32 %v2711_v30, %v2921_v7  ;;  %v3063_v30 = vld [vmem:[#allocation31 + $0xc0] sm:$0xff] }
0x1629   :  { %v11802_v32 = vpack.c.bf16 %v3064_v31, %v3063_v30 }
0x162a   :  { %v2933_v9 = vrot.slane %v2923_v2, %v15561_v60  ;;  %v3052_v2 = vld [vmem:[#allocation31 + $0x68] sm:$0xff] }
0x162c   :  { %v2934_v10 = vadd.f32 %v2933_v9, %v2928_v6  ;;  %v2935_v11 = vadd.f32 %v2933_v9, %v2929_v8  ;;  %v3050_v6 = vld [vmem:[#allocation31 + $0x58] sm:$0xff]  ;;  %v3051_v8 = vld [vmem:[#allocation31 + $0x60] sm:$0xff] }
0x162d   :  { %v11838_v7 = vpack.c.bf16 %v3050_v6, %v3049_v5  ;;  %v11842_v9 = vpack.c.bf16 %v3052_v2, %v3051_v8  ;;  %v3368_v5 = vld [vmem:[#allocation34 + $0x58] sm:$0xff]  ;;  %v3370_v8 = vld [vmem:[#allocation34 + $0x68] sm:$0xff] }
0x162e   :  { %v2936_v12 = vmax.f32 %v2934_v10, 0.0  ;;  %v2937_v13 = vmax.f32 %v2935_v11, 0.0  ;;  %v3053_v10 = vld [vmem:[#allocation31 + $0x70] sm:$0xff]  ;;  %v3054_v11 = vld [vmem:[#allocation31 + $0x78] sm:$0xff] }
0x1630   :  { %v11782_v14 = vpack.c.bf16 %v2937_v13, %v2936_v12 }
0x1632   :  { %11783 = vmatprep.subr.bf16.mxu0 %v11782_v14 }
0x1633   :  { %11785 = vmatpush3.bf16.msra.mxu0 %v11782_v14  ;;  %v3038_v14 = vld [vmem:[#allocation33] sm:$0x7] }
0x1634   :  { %11787 = vmatprep.subr.bf16.mxu0 %v11786_v18  ;;  %v3224_v15 = vrot.slane %v3038_v14, %v15551_v20 }
0x1636   :  { %10680 = vmatmul.mubr.msk.f32.vlgmr.msra.gmra.mrb[12].mxu0 %vm1050_vm0, %v15656_v29 }
0x1637   :  { %11789 = vmatpush3.bf16.msra.mxu0 %v11786_v18 }
0x1638   :  { %11791 = vmatprep.subr.bf16.mxu0 %v11790_v21 }
0x163b   :  { %11793 = vmatpush3.bf16.msra.mxu0 %v11790_v21 }
0x163c   :  { %11795 = vmatprep.subr.bf16.mxu0 %v11794_v24 }
0x163f   :  { %11797 = vmatpush3.bf16.msra.mxu0 %v11794_v24 }
0x1640   :  { %11799 = vmatprep.subr.bf16.mxu0 %v11798_v28 }
0x1643   :  { %11801 = vmatpush3.bf16.msra.mxu0 %v11798_v28 }
0x1644   :  { %11803 = vmatprep.subr.bf16.mxu0 %v11802_v32 }
0x1647   :  { %11805 = vmatpush3.bf16.msra.mxu0 %v11802_v32 }
0x1648   :  { %11807 = vmatprep.subr.bf16.mxu0 %v11806_v35 }
0x164b   :  { %11809 = vmatpush3.bf16.msra.mxu0 %v11806_v35 }
0x164c   :  { %11811 = vmatprep.subr.bf16.mxu0 %v11810_v38 }
0x164f   :  { %11813 = vmatpush3.bf16.msra.mxu0 %v11810_v38 }
0x1650   :  { %11815 = vmatprep.subr.bf16.mxu0 %v11814_v41 }
0x1653   :  { %11817 = vmatpush3.bf16.msra.mxu0 %v11814_v41 }
0x1654   :  { %11819 = vmatprep.subr.bf16.mxu0 %v11818_v44 }
0x1709   :  { %v10681_v45 = vpop.f32.mrb[12].mxu0 }
0x170a   :  { %3028 = vrot.lane.b32.xlu0 %v10681_v45, %s14752_s27  ;;  %v3015_v46 = vpop.f32.mrb[13].mxu0 }
0x170b   :  { %3026 = vrot.lane.b32.xlu1 %v3015_v46, %s14752_s27 }
0x170e   :  { %2942 = vrot.lane.b32.xlu0 %v2937_v13, %s14752_s27 }
0x170f   :  { %2940 = vrot.lane.b32.xlu1 %v2936_v12, %s14752_s27  ;;  %v11846_v12 = vpack.c.bf16 %v3054_v11, %v3053_v10  ;;  %v3372_v10 = vld [vmem:[#allocation34 + $0x78] sm:$0xff] }
0x177c   :  { %v3029_v47 = vpop.permute.xlu0 %3028 }
0x177d   :  { %3033 = vst.msk [vmem:[#allocation3 + $0x10] sm:$0xff] %vm2946_vm8, %v3029_v47  ;;  %v3027_v48 = vpop.permute.xlu1 %3026 }
0x177e   :  { %3032 = vst.msk [vmem:[#allocation3] sm:$0xff] %vm2946_vm8, %v3027_v48 }
0x1780   :  { %v2943_v49 = vpop.permute.xlu0 %2942 }
0x1781   :  { %2948 = vst.msk [vmem:[#allocation2 + $0x10] sm:$0xff] %vm2946_vm8, %v2943_v49  ;;  %v2941_v50 = vpop.permute.xlu1 %2940 }
0x1782   :  { %2947 = vst.msk [vmem:[#allocation2] sm:$0xff] %vm2946_vm8, %v2941_v50 }
0x1784   :  { %v3037_v55 = vld [vmem:[#allocation3 + $0x10] sm:$0xff] }
0x1785   :  { %v3036_v53 = vld [vmem:[#allocation3] sm:$0xff] }
0x1786   :  { %10714 = vmatprep.mubr.f32.mxu0 %v3036_v53 }
0x1787   :  { %10715 = vmatmul.mubr.f32.vlgmr.msra.gmra.mrb[14].mxu0 %v3037_v55 }
0x1788   :  { %11821 = vmatpush3.bf16.msra.mxu0 %v11818_v44  ;;  %v3035_v13 = vld [vmem:[#allocation2 + $0x10] sm:$0xff] }
0x1789   :  { %11823 = vmatprep.subr.bf16.mxu0 %v11822_v54  ;;  %v3034_v58 = vld [vmem:[#allocation2] sm:$0xff] }
0x178a   :  { %10749 = vmatprep.mubr.f32.mxu0 %v3034_v58 }
0x178c   :  { %11825 = vmatpush3.bf16.msra.mxu0 %v11822_v54 }
0x178d   :  { %11827 = vmatprep.subr.bf16.mxu0 %v11826_v59 }
0x1790   :  { %11829 = vmatpush3.bf16.msra.mxu0 %v11826_v59  ;;  %v3365_v59 = vld [vmem:[#allocation34 + $0x40] sm:$0xff] }
0x1791   :  { %11831 = vmatprep.subr.bf16.mxu0 %v11830_v63  ;;  %v11854_v1 = vpack.c.bf16 %v3366_v61, %v3365_v59 }
0x1794   :  { %11833 = vmatpush3.bf16.msra.mxu0 %v11830_v63 }
0x1795   :  { %11835 = vmatprep.subr.bf16.mxu0 %v11834_v3 }
0x1798   :  { %11837 = vmatpush3.bf16.msra.mxu0 %v11834_v3  ;;  %v3367_v3 = vld [vmem:[#allocation34 + $0x50] sm:$0xff] }
0x1799   :  { %11839 = vmatprep.subr.bf16.mxu0 %v11838_v7  ;;  %v11858_v6 = vpack.c.bf16 %v3368_v5, %v3367_v3 }
0x179c   :  { %11841 = vmatpush3.bf16.msra.mxu0 %v11838_v7  ;;  %v3369_v7 = vld [vmem:[#allocation34 + $0x60] sm:$0xff] }
0x179d   :  { %11843 = vmatprep.subr.bf16.mxu0 %v11842_v9  ;;  %v11862_v2 = vpack.c.bf16 %v3370_v8, %v3369_v7 }
0x17a0   :  { %11845 = vmatpush3.bf16.msra.mxu0 %v11842_v9  ;;  %v3371_v9 = vld [vmem:[#allocation34 + $0x70] sm:$0xff] }
0x17a1   :  { %11847 = vmatprep.subr.bf16.mxu0 %v11846_v12  ;;  %v11866_v11 = vpack.c.bf16 %v3372_v10, %v3371_v9 }
0x17a4   :  { %11849 = vmatpush3.bf16.msra.mxu0 %v11846_v12  ;;  %v3357_v12 = vld [vmem:[#allocation34] sm:$0xff] }
0x17a7   :  { %10750 = vmatmul.mubr.f32.vlgmr.msra.gmra.mrb[14].mxu0 %v3035_v13  ;;  %v3358_v13 = vld [vmem:[#allocation34 + $0x8] sm:$0xff] }
0x17a8   :  { %10828 = vmatprep.mubr.msk.f32.mxu0 %vm1050_vm0, %v15640_v25 }
0x187a   :  { %v10751_v16 = vpop.f32.mrb[14].mxu0 }
0x187b   :  { %v3226_v17 = vadd.f32 %v10751_v16, %v3224_v15  ;;  %v3212_v18 = vpop.f32.mrb[15].mxu0 }
0x187c   :  { %v3225_v19 = vadd.f32 %v3224_v15, %v3212_v18  ;;  %v3360_v18 = vld [vmem:[#allocation34 + $0x18] sm:$0xff] }
0x187d   :  { %v3228_v21 = vsel %vm1539_vm4, %v3226_v17, 0.0 }
0x187e   :  { %v3227_v22 = vsel %vm1539_vm4, %v3225_v19, 0.0 }
0x187f   :  { %v3229_v23 = vadd.f32 %v3228_v21, %v3227_v22 }
0x1881   :  { %v3230_v24 = vrot.slane %v3229_v23, 4 }
0x1883   :  { %v3231_v26 = vadd.f32 %v3230_v24, %v3229_v23  ;;  %v3361_v23 = vld [vmem:[#allocation34 + $0x20] sm:$0xff]  ;;  %v3362_v24 = vld [vmem:[#allocation34 + $0x28] sm:$0xff] }
0x1885   :  { %v3232_v27 = vrot.slane %v3231_v26, 2 }
0x1887   :  { %v3233_v28 = vadd.f32 %v3232_v27, %v3231_v26  ;;  %v11878_v27 = vpack.c.bf16 %v3362_v24, %v3361_v23 }
0x1889   :  { %v3234_v30 = vrot.slane %v3233_v28, 1 }
0x188b   :  { %v3235_v31 = vadd.f32 %v3234_v30, %v3233_v28  ;;  %v3363_v28 = vld [vmem:[#allocation34 + $0x30] sm:$0xff]  ;;  %v3364_v30 = vld [vmem:[#allocation34 + $0x38] sm:$0xff] }
0x188d   :  { %v3236_v32 = vmul.f32 0.0625, %v3235_v31  ;;  %v11882_v31 = vpack.c.bf16 %v3364_v30, %v3363_v28 }
0x188f   :  { %v3237_v33 = vsub.f32 %v3225_v19, %v3236_v32  ;;  %v3238_v34 = vsub.f32 %v3226_v17, %v3236_v32 }
0x1891   :  { %v3239_v35 = vmul.f32 %v3237_v33, %v3237_v33  ;;  %v3240_v36 = vmul.f32 %v3238_v34, %v3238_v34  ;;  %v3588_v33 = vld [vmem:[#allocation37] sm:$0xff]  ;;  %v3589_v34 = vld [vmem:[#allocation37 + $0x8] sm:$0xff] }
0x1893   :  { %v3241_v37 = vsel %vm1539_vm4, %v3239_v35, 0.0  ;;  %v3242_v38 = vsel %vm1539_vm4, %v3240_v36, 0.0  ;;  %v11886_v35 = vpack.c.bf16 %v3589_v34, %v3588_v33  ;;  %v3590_v36 = vld [vmem:[#allocation37 + $0x10] sm:$0xff] }
0x1894   :  { %v3243_v39 = vadd.f32 %v3242_v38, %v3241_v37  ;;  %v3591_v37 = vld [vmem:[#allocation37 + $0x18] sm:$0xff] }
0x1895   :  { %v11890_v38 = vpack.c.bf16 %v3591_v37, %v3590_v36 }
0x1896   :  { %v3244_v40 = vrot.slane %v3243_v39, 4 }
0x1898   :  { %v3245_v41 = vadd.f32 %v3244_v40, %v3243_v39  ;;  %v3592_v39 = vld [vmem:[#allocation37 + $0x20] sm:$0xff]  ;;  %v3593_v40 = vld [vmem:[#allocation37 + $0x28] sm:$0xff] }
0x189a   :  { %v3246_v42 = vrot.slane %v3245_v41, 2 }
0x189c   :  { %v3247_v43 = vadd.f32 %v3246_v42, %v3245_v41  ;;  %v11894_v41 = vpack.c.bf16 %v3593_v40, %v3592_v39  ;;  %v3594_v42 = vld [vmem:[#allocation37 + $0x30] sm:$0xff] }
0x189e   :  { %v3248_v44 = vrot.slane %v3247_v43, 1 }
0x18a0   :  { %v3249_v45 = vadd.f32 %v3248_v44, %v3247_v43  ;;  %v3595_v43 = vld [vmem:[#allocation37 + $0x38] sm:$0xff] }
0x18a1   :  { %v11898_v44 = vpack.c.bf16 %v3595_v43, %v3594_v42  ;;  %v3587_v43 = vld [vmem:[#allocation39] sm:$0x7] }
0x18a2   :  { %v3250_v46 = vmul.f32 0.0625, %v3249_v45  ;;  %v3596_v45 = vld [vmem:[#allocation37 + $0x40] sm:$0xff] }
0x18a4   :  { %v3251_v47 = vadd.f32 1e-05, %v3250_v46  ;;  %v3597_v46 = vld [vmem:[#allocation37 + $0x48] sm:$0xff] }
0x18a6   :  { %13095 = vrsqrt.f32 %v3251_v47  ;;  %v11902_v47 = vpack.c.bf16 %v3597_v46, %v3596_v45 }
0x18b0   :  { %v13096_v48 = vpop.eup %13095 }
0x18b1   :  { %v3253_v49 = vmul.f32 %v13096_v48, %v3038_v14  ;;  %v3598_v48 = vld [vmem:[#allocation37 + $0x50] sm:$0xff] }
0x18b3   :  { %v3254_v50 = vmul.f32 %v3253_v49, %v3236_v32  ;;  %v3262_v51 = vrot.slane %v3253_v49, %v15558_v52  ;;  %v3599_v49 = vld [vmem:[#allocation37 + $0x58] sm:$0xff] }
0x18b5   :  { %v3256_v4 = vrot.slane %v3254_v50, 7  ;;  %v3263_v53 = vmul.f32 %v3262_v51, %v3225_v19  ;;  %v3264_v54 = vmul.f32 %v3262_v51, %v3226_v17  ;;  %v3359_v17 = vld [vmem:[#allocation34 + $0x10] sm:$0xff]  ;;  %v11906_v50 = vpack.c.bf16 %v3599_v49, %v3598_v48  ;;  %v3356_v51 = vld [vmem:[#allocation36] sm:$0x7] }
0x18b6   :  { %v11874_v21 = vpack.c.bf16 %v3360_v18, %v3359_v17 }
0x18b7   :  { %v3258_v55 = vsub.f32 %v3038_v14, %v3256_v4  ;;  %v11870_v14 = vpack.c.bf16 %v3358_v13, %v3357_v12  ;;  %v3538_v4 = vrot.slane %v3356_v51, %v15551_v20 }
0x18b9   :  { %v3268_v56 = vrot.slane %v3258_v55, %v15561_v60 }
0x18bb   :  { %v3269_v57 = vadd.f32 %v3268_v56, %v3263_v53  ;;  %v3270_v58 = vadd.f32 %v3268_v56, %v3264_v54 }
0x18bd   :  { %v3271_v62 = vmax.f32 %v3269_v57, 0.0  ;;  %v3272_v63 = vmax.f32 %v3270_v58, 0.0 }
0x18bf   :  { %3273 = vst.msk [vmem:[#allocation2] sm:$0xff] %vm1539_vm4, %v3271_v62  ;;  %3274 = vst.msk [vmem:[#allocation2 + $0x10] sm:$0xff] %vm1539_vm4, %v3272_v63  ;;  %v11850_v0 = vpack.c.bf16 %v3272_v63, %v3271_v62 }
0x18c1   :  { %11851 = vmatprep.subr.bf16.mxu1 %v11850_v0 }
0x18c2   :  { %11853 = vmatpush3.bf16.msra.mxu1 %v11850_v0 }
0x18c3   :  { %11855 = vmatprep.subr.bf16.mxu1 %v11854_v1 }
0x18c5   :  { %10757 = vmatmul.mubr.msk.f32.vlgmr.msra.gmra.mrb[18].mxu1 %vm1050_vm0, %v15656_v29 }
0x18c6   :  { %11857 = vmatpush3.bf16.msra.mxu1 %v11854_v1  ;;  %v3352_v26 = vld [vmem:[#allocation2] sm:$0xff]  ;;  %v3353_v32 = vld [vmem:[#allocation2 + $0x10] sm:$0xff] }
0x18c7   :  { %11859 = vmatprep.subr.bf16.mxu1 %v11858_v6 }
0x18ca   :  { %11861 = vmatpush3.bf16.msra.mxu1 %v11858_v6 }
0x18cb   :  { %11863 = vmatprep.subr.bf16.mxu1 %v11862_v2 }
0x18ce   :  { %11865 = vmatpush3.bf16.msra.mxu1 %v11862_v2 }
0x18cf   :  { %11867 = vmatprep.subr.bf16.mxu1 %v11866_v11 }
0x18d2   :  { %11869 = vmatpush3.bf16.msra.mxu1 %v11866_v11 }
0x18d3   :  { %11871 = vmatprep.subr.bf16.mxu1 %v11870_v14 }
0x1998   :  { %v10758_v15 = vpop.f32.mrb[18].mxu1 }
0x1999   :  { %3351 = vst.msk [vmem:[#allocation3 + $0x10] sm:$0xff] %vm1539_vm4, %v10758_v15  ;;  %v3341_v16 = vpop.f32.mrb[19].mxu1 }
0x199a   :  { %3350 = vst.msk [vmem:[#allocation3] sm:$0xff] %vm1539_vm4, %v3341_v16 }
0x19a0   :  { %v3355_v22 = vld [vmem:[#allocation3 + $0x10] sm:$0xff] }
0x19a1   :  { %v3354_v19 = vld [vmem:[#allocation3] sm:$0xff] }
0x19a2   :  { %10775 = vmatprep.mubr.msk.f32.mxu1 %vm1539_vm4, %v3354_v19 }
0x19a3   :  { %10776 = vmatmul.mubr.msk.f32.vlgmr.msra.gmra.mrb[20].mxu1 %vm1539_vm4, %v3355_v22 }
0x19a4   :  { %11873 = vmatpush3.bf16.msra.mxu1 %v11870_v14  ;;  %10794 = vmatprep.mubr.msk.f32.mxu1 %vm1539_vm4, %v3352_v26 }
0x19a5   :  { %11875 = vmatprep.subr.bf16.mxu1 %v11874_v21 }
0x19a8   :  { %11877 = vmatpush3.bf16.msra.mxu1 %v11874_v21 }
0x19a9   :  { %11879 = vmatprep.subr.bf16.mxu1 %v11878_v27 }
0x19ac   :  { %11881 = vmatpush3.bf16.msra.mxu1 %v11878_v27 }
0x19ad   :  { %11883 = vmatprep.subr.bf16.mxu1 %v11882_v31 }
0x19b0   :  { %11885 = vmatpush3.bf16.msra.mxu1 %v11882_v31 }
0x19b1   :  { %11887 = vmatprep.subr.bf16.mxu1 %v11886_v35 }
0x19b3   :  { %10795 = vmatmul.mubr.msk.f32.vlgmr.msra.gmra.mrb[20].mxu1 %vm1539_vm4, %v3353_v32  ;;  %vm8480_vm4 = vcmask 1048512  }
0x19b4   :  { %11889 = vmatpush3.bf16.msra.mxu1 %v11886_v35 }
0x19b5   :  { %11891 = vmatprep.subr.bf16.mxu1 %v11890_v38 }
0x19b8   :  { %11893 = vmatpush3.bf16.msra.mxu1 %v11890_v38 }
0x19b9   :  { %11895 = vmatprep.subr.bf16.mxu1 %v11894_v41 }
0x19bc   :  { %11897 = vmatpush3.bf16.msra.mxu1 %v11894_v41 }
0x19bd   :  { %11899 = vmatprep.subr.bf16.mxu1 %v11898_v44 }
0x19c0   :  { %11901 = vmatpush3.bf16.msra.mxu1 %v11898_v44  ;;  %v3769_v44 = vrot.slane %v3587_v43, %v15551_v20 }
0x19c1   :  { %11903 = vmatprep.subr.bf16.mxu1 %v11902_v47 }
0x19c4   :  { %11905 = vmatpush3.bf16.msra.mxu1 %v11902_v47 }
0x19c5   :  { %11907 = vmatprep.subr.bf16.mxu1 %v11906_v50 }
0x19c8   :  { %11909 = vmatpush3.bf16.msra.mxu1 %v11906_v50 }
0x1a86   :  { %v10796_v53 = vpop.f32.mrb[20].mxu1 }
0x1a87   :  { %v3540_v54 = vadd.f32 %v10796_v53, %v3538_v4  ;;  %v3526_v55 = vpop.f32.mrb[21].mxu1 }
0x1a88   :  { %v3539_v56 = vadd.f32 %v3538_v4, %v3526_v55 }
0x1a89   :  { %v3542_v57 = vsel %vm2496_vm7, %v3540_v54, 0.0 }
0x1a8a   :  { %v3541_v58 = vsel %vm2496_vm7, %v3539_v56, 0.0 }
0x1a8b   :  { %v3543_v59 = vadd.f32 %v3542_v57, %v3541_v58 }
0x1a8d   :  { %v3544_v61 = vrot.slane %v3543_v59, 4 }
0x1a8f   :  { %v3545_v62 = vadd.f32 %v3544_v61, %v3543_v59 }
0x1a91   :  { %v3546_v63 = vrot.slane %v3545_v62, 2 }
0x1a93   :  { %v3547_v0 = vadd.f32 %v3546_v63, %v3545_v62 }
0x1a95   :  { %v3548_v1 = vrot.slane %v3547_v0, 1 }
0x1a97   :  { %v3549_v3 = vadd.f32 %v3548_v1, %v3547_v0 }
0x1a99   :  { %v3550_v5 = vmul.f32 0.0625, %v3549_v3 }
0x1a9b   :  { %v3551_v6 = vsub.f32 %v3539_v56, %v3550_v5  ;;  %v3552_v7 = vsub.f32 %v3540_v54, %v3550_v5 }
0x1a9d   :  { %v3553_v8 = vmul.f32 %v3551_v6, %v3551_v6  ;;  %v3554_v2 = vmul.f32 %v3552_v7, %v3552_v7 }
0x1a9f   :  { %v3555_v9 = vsel %vm2496_vm7, %v3553_v8, 0.0  ;;  %v3556_v10 = vsel %vm2496_vm7, %v3554_v2, 0.0 }
0x1aa0   :  { %v3557_v11 = vadd.f32 %v3556_v10, %v3555_v9 }
0x1aa2   :  { %v3558_v12 = vrot.slane %v3557_v11, 4 }
0x1aa4   :  { %v3559_v13 = vadd.f32 %v3558_v12, %v3557_v11 }
0x1aa6   :  { %v3560_v14 = vrot.slane %v3559_v13, 2 }
0x1aa8   :  { %v3561_v15 = vadd.f32 %v3560_v14, %v3559_v13 }
0x1aaa   :  { %v3562_v16 = vrot.slane %v3561_v15, 1 }
0x1aac   :  { %v3563_v17 = vadd.f32 %v3562_v16, %v3561_v15 }
0x1aae   :  { %v3564_v18 = vmul.f32 0.0625, %v3563_v17 }
0x1ab0   :  { %v3565_v19 = vadd.f32 1e-05, %v3564_v18 }
0x1ab2   :  { %13097 = vrsqrt.f32 %v3565_v19 }
0x1abc   :  { %v13098_v21 = vpop.eup %13097 }
0x1abd   :  { %v3567_v22 = vmul.f32 %v13098_v21, %v3356_v51 }
0x1abf   :  { %v3568_v23 = vmul.f32 %v3567_v22, %v3550_v5  ;;  %v3576_v24 = vrot.slane %v3567_v22, %v15558_v52 }
0x1ac1   :  { %v3570_v26 = vrot.slane %v3568_v23, 7  ;;  %v3577_v27 = vmul.f32 %v3576_v24, %v3539_v56  ;;  %v3578_v28 = vmul.f32 %v3576_v24, %v3540_v54 }
0x1ac3   :  { %v3572_v30 = vsub.f32 %v3356_v51, %v3570_v26 }
0x1ac5   :  { %v3582_v31 = vrot.slane %v3572_v30, %v15561_v60  ;;  %v3930_v30 = vld [vmem:[#allocation40 + $0x60] sm:$0xff] }
0x1ac7   :  { %v3583_v32 = vadd.f32 %v3582_v31, %v3577_v27  ;;  %v3584_v33 = vadd.f32 %v3582_v31, %v3578_v28  ;;  %v3931_v31 = vld [vmem:[#allocation40 + $0x68] sm:$0xff] }
0x1ac9   :  { %v3586_v34 = vmax.f32 %v3584_v33, 0.0  ;;  %v3585_v35 = vmax.f32 %v3583_v32, 0.0  ;;  %v3932_v32 = vld [vmem:[#allocation40 + $0x70] sm:$0xff]  ;;  %v11918_v33 = vpack.c.bf16 %v3931_v31, %v3930_v30  ;;  %v4168_v31 = vld [vmem:[#allocation43 + $0x58] sm:$0xff] }
0x1aca   :  { %v4167_v30 = vld [vmem:[#allocation43 + $0x50] sm:$0xff] }
0x1acb   :  { %10821 = vmatprep.mubr.msk.f32.mxu1 %vm2496_vm7, %v3585_v35 }
0x1acc   :  { %10822 = vmatmul.mubr.msk.f32.vlgmr.msra.gmra.mrb[22].mxu1 %vm2496_vm7, %v3586_v34  ;;  %v3933_v34 = vld [vmem:[#allocation40 + $0x78] sm:$0xff] }
0x1acd   :  { %v11922_v35 = vpack.c.bf16 %v3933_v34, %v3932_v32  ;;  %v11986_v32 = vpack.c.bf16 %v4168_v31, %v4167_v30 }
0x1b9f   :  { %v10823_v36 = vpop.f32.mrb[22].mxu1 }
0x1ba0   :  { %v3672_v37 = vpop.f32.mrb[23].mxu1 }
0x1ba1   :  { %v13036_v38 = vpack.i.bf16 %v10823_v36, %v3672_v37 }
0x1ba3   :  { %13037 = vrot.lane.b32.xlu1 %v13036_v38, %s14752_s27 }
0x1c15   :  { %v13038_v39 = vpop.permute.xlu1 %13037 }
0x1c16   :  { %v13040_v40 = vunpack.i.h.bf16 %v13038_v39  ;;  %v13039_v41 = vunpack.i.l.bf16 %v13038_v39  ;;  %v3936_v39 = vld [vmem:[#allocation40 + $0x90] sm:$0xff] }
0x1c18   :  { %v11910_v42 = vpack.c.bf16 %v13040_v40, %v13039_v41  ;;  %v3937_v40 = vld [vmem:[#allocation40 + $0x98] sm:$0xff] }
0x1c19   :  { %v11930_v41 = vpack.c.bf16 %v3937_v40, %v3936_v39 }
0x1c1a   :  { %11911 = vmatprep.subr.bf16.mxu0 %v11910_v42 }
0x1c1b   :  { %11913 = vmatpush3.bf16.msra.mxu0 %v11910_v42  ;;  %v3939_v42 = vld [vmem:[#allocation40 + $0xa8] sm:$0xff] }
0x1c1e   :  { %10829 = vmatmul.mubr.msk.f32.vlgmr.msra.gmra.mrb[16].mxu0 %vm1050_vm0, %v15656_v29 }
0x1c1f   :  { %10835 = vmatprep.mubr.msk.f32.mxu0 %vm1050_vm0, %v15640_v25 }
0x1cf1   :  { %v10830_v45 = vpop.f32.mrb[16].mxu0 }
0x1cf2   :  { %v3765_v46 = vadd.f32 %v10830_v45, %v10823_v36  ;;  %v3755_v47 = vpop.f32.mrb[17].mxu0  ;;  %v3934_v36 = vld [vmem:[#allocation40 + $0x80] sm:$0xff]  ;;  %v3941_v45 = vld [vmem:[#allocation40 + $0xb8] sm:$0xff] }
0x1cf3   :  { %v3764_v48 = vadd.f32 %v3755_v47, %v3672_v37  ;;  %v3935_v37 = vld [vmem:[#allocation40 + $0x88] sm:$0xff]  ;;  %v3918_v47 = vld [vmem:[#allocation40] sm:$0xff] }
0x1cf4   :  { %v3771_v49 = vadd.f32 %v3769_v44, %v3765_v46  ;;  %v11926_v38 = vpack.c.bf16 %v3935_v37, %v3934_v36 }
0x1cf5   :  { %v3770_v50 = vadd.f32 %v3769_v44, %v3764_v48  ;;  %v3940_v44 = vld [vmem:[#allocation40 + $0xb0] sm:$0xff]  ;;  %v3919_v48 = vld [vmem:[#allocation40 + $0x8] sm:$0xff] }
0x1cf6   :  { %v3773_v51 = vsel %vm1231_vm3, %v3771_v49, 0.0  ;;  %v11938_v46 = vpack.c.bf16 %v3941_v45, %v3940_v44 }
0x1cf7   :  { %v3772_v4 = vsel %vm1231_vm3, %v3770_v50, 0.0 }
0x1cf8   :  { %v3774_v53 = vadd.f32 %v3773_v51, %v3772_v4 }
0x1cfa   :  { %v3775_v54 = vrot.slane %v3774_v53, 4 }
0x1cfc   :  { %v3776_v55 = vadd.f32 %v3775_v54, %v3774_v53 }
0x1cfe   :  { %v3777_v56 = vrot.slane %v3776_v55, 2 }
0x1d00   :  { %v3778_v57 = vadd.f32 %v3777_v56, %v3776_v55  ;;  %v3920_v56 = vld [vmem:[#allocation40 + $0x10] sm:$0xff] }
0x1d02   :  { %v3779_v58 = vrot.slane %v3778_v57, 1 }
0x1d04   :  { %v3780_v25 = vadd.f32 %v3779_v58, %v3778_v57  ;;  %v3921_v57 = vld [vmem:[#allocation40 + $0x18] sm:$0xff] }
0x1d06   :  { %v3781_v59 = vmul.f32 0.0625, %v3780_v25  ;;  %v11946_v25 = vpack.c.bf16 %v3921_v57, %v3920_v56 }
0x1d08   :  { %v3782_v61 = vsub.f32 %v3770_v50, %v3781_v59  ;;  %v3783_v62 = vsub.f32 %v3771_v49, %v3781_v59 }
0x1d0a   :  { %v3784_v63 = vmul.f32 %v3782_v61, %v3782_v61  ;;  %v3785_v0 = vmul.f32 %v3783_v62, %v3783_v62  ;;  %v3922_v61 = vld [vmem:[#allocation40 + $0x20] sm:$0xff]  ;;  %v3923_v62 = vld [vmem:[#allocation40 + $0x28] sm:$0xff] }
0x1d0c   :  { %v3786_v1 = vsel %vm1231_vm3, %v3784_v63, 0.0  ;;  %v3787_v3 = vsel %vm1231_vm3, %v3785_v0, 0.0  ;;  %v11950_v0 = vpack.c.bf16 %v3923_v62, %v3922_v61 }
0x1d0d   :  { %v3788_v5 = vadd.f32 %v3787_v3, %v3786_v1  ;;  %v3924_v1 = vld [vmem:[#allocation40 + $0x30] sm:$0xff]  ;;  %v3925_v3 = vld [vmem:[#allocation40 + $0x38] sm:$0xff] }
0x1d0f   :  { %v3789_v6 = vrot.slane %v3788_v5, 4 }
0x1d11   :  { %v3790_v7 = vadd.f32 %v3789_v6, %v3788_v5  ;;  %v11954_v5 = vpack.c.bf16 %v3925_v3, %v3924_v1  ;;  %v3926_v6 = vld [vmem:[#allocation40 + $0x40] sm:$0xff] }
0x1d13   :  { %v3791_v8 = vrot.slane %v3790_v7, 2 }
0x1d15   :  { %v3792_v2 = vadd.f32 %v3791_v8, %v3790_v7  ;;  %v3927_v7 = vld [vmem:[#allocation40 + $0x48] sm:$0xff] }
0x1d16   :  { %v11958_v8 = vpack.c.bf16 %v3927_v7, %v3926_v6 }
0x1d17   :  { %v3793_v9 = vrot.slane %v3792_v2, 1 }
0x1d19   :  { %v3794_v10 = vadd.f32 %v3793_v9, %v3792_v2  ;;  %v3928_v2 = vld [vmem:[#allocation40 + $0x50] sm:$0xff]  ;;  %v3929_v9 = vld [vmem:[#allocation40 + $0x58] sm:$0xff] }
0x1d1b   :  { %v3795_v11 = vmul.f32 0.0625, %v3794_v10  ;;  %v11962_v10 = vpack.c.bf16 %v3929_v9, %v3928_v2 }
0x1d1d   :  { %v3796_v12 = vadd.f32 1e-05, %v3795_v11 }
0x1d1f   :  { %13099 = vrsqrt.f32 %v3796_v12  ;;  %v4157_v12 = vld [vmem:[#allocation43] sm:$0xff] }
0x1d29   :  { %v13100_v13 = vpop.eup %13099 }
0x1d2a   :  { %v3798_v14 = vmul.f32 %v13100_v13, %v3587_v43  ;;  %v4158_v13 = vld [vmem:[#allocation43 + $0x8] sm:$0xff] }
0x1d2c   :  { %v3807_v15 = vrot.slane %v3798_v14, %v15558_v52  ;;  %v3799_v16 = vmul.f32 %v3798_v14, %v3781_v59  ;;  %v11966_v14 = vpack.c.bf16 %v4158_v13, %v4157_v12  ;;  %v15742_v13 = vld [vmem:[#allocation4] sm:$0xff] }
0x1d2e   :  { %v3808_v17 = vmul.f32 %v3807_v15, %v3770_v50  ;;  %v3801_v18 = vrot.slane %v3799_v16, 7  ;;  %v3809_v19 = vmul.f32 %v3807_v15, %v3771_v49  ;;  %v11942_v49 = vpack.c.bf16 %v3919_v48, %v3918_v47  ;;  %11967 = vmatprep.subr.bf16.mxu1 %v11966_v14  ;;  %v4159_v15 = vld [vmem:[#allocation43 + $0x10] sm:$0xff]  ;;  %v4160_v16 = vld [vmem:[#allocation43 + $0x18] sm:$0xff] }
0x1d2f   :  { %11969 = vmatpush3.bf16.msra.mxu1 %v11966_v14 }
0x1d30   :  { %v3803_v21 = vsub.f32 %v3587_v43, %v3801_v18  ;;  %v4161_v18 = vld [vmem:[#allocation43 + $0x20] sm:$0xff] }
0x1d32   :  { %v3813_v22 = vrot.slane %v3803_v21, %v15561_v60 }
0x1d34   :  { %v3814_v23 = vadd.f32 %v3813_v22, %v3808_v17  ;;  %v3815_v24 = vadd.f32 %v3813_v22, %v3809_v19  ;;  %v11970_v17 = vpack.c.bf16 %v4160_v16, %v4159_v15  ;;  %v4162_v19 = vld [vmem:[#allocation43 + $0x28] sm:$0xff]  ;;  %v4163_v22 = vld [vmem:[#allocation43 + $0x30] sm:$0xff] }
0x1d35   :  { %v11974_v21 = vpack.c.bf16 %v4162_v19, %v4161_v18 }
0x1d36   :  { %v3816_v26 = vmax.f32 %v3814_v23, 0.0  ;;  %v3817_v27 = vmax.f32 %v3815_v24, 0.0  ;;  %11971 = vmatprep.subr.bf16.mxu1 %v11970_v17  ;;  %v4164_v23 = vld [vmem:[#allocation43 + $0x38] sm:$0xff] }
0x1d37   :  { %11973 = vmatpush3.bf16.msra.mxu1 %v11970_v17  ;;  %v11978_v24 = vpack.c.bf16 %v4164_v23, %v4163_v22  ;;  %v15747_v22 = vld [vmem:[#allocation4 + $0x8] sm:$0xff]  ;;  %v4156_v23 = vld [vmem:[#allocation45] sm:$0x7] }
0x1d38   :  { %v11914_v28 = vpack.c.bf16 %v3817_v27, %v3816_v26  ;;  %11975 = vmatprep.subr.bf16.mxu1 %v11974_v21 }
0x1d3a   :  { %11915 = vmatprep.subr.bf16.mxu0 %v11914_v28 }
0x1d3b   :  { %11917 = vmatpush3.bf16.msra.mxu0 %v11914_v28  ;;  %11977 = vmatpush3.bf16.msra.mxu1 %v11974_v21 }
0x1d3c   :  { %11919 = vmatprep.subr.bf16.mxu0 %v11918_v33  ;;  %11979 = vmatprep.subr.bf16.mxu1 %v11978_v24 }
0x1d3e   :  { %10836 = vmatmul.mubr.msk.f32.vlgmr.msra.gmra.mrb[18].mxu0 %vm1050_vm0, %v15656_v29  ;;  %v3938_v29 = vld [vmem:[#allocation40 + $0xa0] sm:$0xff] }
0x1d3f   :  { %11921 = vmatpush3.bf16.msra.mxu0 %v11918_v33  ;;  %v11934_v43 = vpack.c.bf16 %v3939_v42, %v3938_v29  ;;  %11981 = vmatpush3.bf16.msra.mxu1 %v11978_v24  ;;  %v3917_v33 = vld [vmem:[#allocation42] sm:$0x7]  ;;  %v4338_v24 = vrot.slane %v4156_v23, %v15551_v20 }
0x1d40   :  { %11923 = vmatprep.subr.bf16.mxu0 %v11922_v35  ;;  %v4107_v34 = vrot.slane %v3917_v33, %v15551_v20 }
0x1d43   :  { %11925 = vmatpush3.bf16.msra.mxu0 %v11922_v35 }
0x1d44   :  { %11927 = vmatprep.subr.bf16.mxu0 %v11926_v38 }
0x1d47   :  { %11929 = vmatpush3.bf16.msra.mxu0 %v11926_v38 }
0x1d48   :  { %11931 = vmatprep.subr.bf16.mxu0 %v11930_v41 }
0x1d4b   :  { %11933 = vmatpush3.bf16.msra.mxu0 %v11930_v41 }
0x1d4c   :  { %11935 = vmatprep.subr.bf16.mxu0 %v11934_v43 }
0x1d4f   :  { %11937 = vmatpush3.bf16.msra.mxu0 %v11934_v43 }
0x1d50   :  { %11939 = vmatprep.subr.bf16.mxu0 %v11938_v46 }
0x1d53   :  { %11941 = vmatpush3.bf16.msra.mxu0 %v11938_v46 }
0x1d54   :  { %11943 = vmatprep.subr.bf16.mxu0 %v11942_v49 }
0x1e11   :  { %v10837_v50 = vpop.f32.mrb[18].mxu0 }
0x1e12   :  { %3907 = vrot.lane.b32.xlu1 %v10837_v50, %s14754_s23  ;;  %v3894_v51 = vpop.f32.mrb[19].mxu0 }
0x1e13   :  { %3905 = vrot.lane.b32.xlu0 %v3894_v51, %s14754_s23 }
0x1e16   :  { %3822 = vrot.lane.b32.xlu1 %v3817_v27, %s14754_s23  ;;  %v4166_v27 = vld [vmem:[#allocation43 + $0x48] sm:$0xff] }
0x1e17   :  { %3820 = vrot.lane.b32.xlu0 %v3816_v26, %s14754_s23  ;;  %v4165_v26 = vld [vmem:[#allocation43 + $0x40] sm:$0xff] }
0x1e18   :  { %v11982_v28 = vpack.c.bf16 %v4166_v27, %v4165_v26 }
0x1e1a   :  { %11983 = vmatprep.subr.bf16.mxu1 %v11982_v28 }
0x1e1b   :  { %11985 = vmatpush3.bf16.msra.mxu1 %v11982_v28 }
0x1e1c   :  { %11987 = vmatprep.subr.bf16.mxu1 %v11986_v32 }
0x1e1f   :  { %11989 = vmatpush3.bf16.msra.mxu1 %v11986_v32 }
0x1e84   :  { %v3908_v4 = vpop.permute.xlu1 %3907 }
0x1e85   :  { %3912 = vst.msk [vmem:[#allocation3 + $0x10] sm:$0xff] %vm2379_vm6, %v3908_v4  ;;  %v3906_v53 = vpop.permute.xlu0 %3905 }
0x1e86   :  { %3911 = vst.msk [vmem:[#allocation3] sm:$0xff] %vm2379_vm6, %v3906_v53 }
0x1e88   :  { %v3823_v54 = vpop.permute.xlu1 %3822 }
0x1e89   :  { %3827 = vst.msk [vmem:[#allocation2 + $0x10] sm:$0xff] %vm2379_vm6, %v3823_v54  ;;  %v3821_v55 = vpop.permute.xlu0 %3820 }
0x1e8a   :  { %3826 = vst.msk [vmem:[#allocation2] sm:$0xff] %vm2379_vm6, %v3821_v55  ;;  %vm9210_vm6 = vcmask 457728  }
0x1e8c   :  { %v3916_v59 = vld [vmem:[#allocation3 + $0x10] sm:$0xff] }
0x1e8d   :  { %v3915_v58 = vld [vmem:[#allocation3] sm:$0xff] }
0x1e8e   :  { %10862 = vmatprep.mubr.msk.f32.mxu0 %vm2496_vm7, %v3915_v58 }
0x1e8f   :  { %10863 = vmatmul.mubr.msk.f32.vlgmr.msra.gmra.mrb[20].mxu0 %vm2496_vm7, %v3916_v59 }
0x1e90   :  { %11945 = vmatpush3.bf16.msra.mxu0 %v11942_v49  ;;  %v3914_v11 = vld [vmem:[#allocation2 + $0x10] sm:$0xff] }
0x1e91   :  { %11947 = vmatprep.subr.bf16.mxu0 %v11946_v25  ;;  %v3913_v63 = vld [vmem:[#allocation2] sm:$0xff] }
0x1e92   :  { %10889 = vmatprep.mubr.msk.f32.mxu0 %vm2496_vm7, %v3913_v63 }
0x1e94   :  { %11949 = vmatpush3.bf16.msra.mxu0 %v11946_v25 }
0x1e95   :  { %11951 = vmatprep.subr.bf16.mxu0 %v11950_v0 }
0x1e98   :  { %11953 = vmatpush3.bf16.msra.mxu0 %v11950_v0 }
0x1e99   :  { %11955 = vmatprep.subr.bf16.mxu0 %v11954_v5 }
0x1e9c   :  { %11957 = vmatpush3.bf16.msra.mxu0 %v11954_v5 }
0x1e9d   :  { %11959 = vmatprep.subr.bf16.mxu0 %v11958_v8 }
0x1ea0   :  { %11961 = vmatpush3.bf16.msra.mxu0 %v11958_v8 }
0x1ea1   :  { %11963 = vmatprep.subr.bf16.mxu0 %v11962_v10 }
0x1ea4   :  { %11965 = vmatpush3.bf16.msra.mxu0 %v11962_v10 }
0x1ea7   :  { %10890 = vmatmul.mubr.msk.f32.vlgmr.msra.gmra.mrb[20].mxu0 %vm2496_vm7, %v3914_v11 }
0x1f7a   :  { %v10891_v35 = vpop.f32.mrb[20].mxu0 }
0x1f7b   :  { %v4109_v36 = vadd.f32 %v10891_v35, %v4107_v34  ;;  %v4095_v37 = vpop.f32.mrb[21].mxu0 }
0x1f7c   :  { %v4108_v38 = vadd.f32 %v4107_v34, %v4095_v37 }
0x1f7d   :  { %v4111_v39 = vsel %vm2496_vm7, %v4109_v36, 0.0 }
0x1f7e   :  { %v4110_v40 = vsel %vm2496_vm7, %v4108_v38, 0.0 }
0x1f7f   :  { %v4112_v41 = vadd.f32 %v4111_v39, %v4110_v40 }
0x1f81   :  { %v4113_v29 = vrot.slane %v4112_v41, 4 }
0x1f83   :  { %v4114_v42 = vadd.f32 %v4113_v29, %v4112_v41 }
0x1f85   :  { %v4115_v43 = vrot.slane %v4114_v42, 2 }
0x1f87   :  { %v4116_v44 = vadd.f32 %v4115_v43, %v4114_v42 }
0x1f89   :  { %v4117_v45 = vrot.slane %v4116_v44, 1 }
0x1f8b   :  { %v4118_v46 = vadd.f32 %v4117_v45, %v4116_v44 }
0x1f8d   :  { %v4119_v47 = vmul.f32 0.0625, %v4118_v46 }
0x1f8f   :  { %v4120_v48 = vsub.f32 %v4108_v38, %v4119_v47  ;;  %v4121_v49 = vsub.f32 %v4109_v36, %v4119_v47 }
0x1f91   :  { %v4122_v50 = vmul.f32 %v4120_v48, %v4120_v48  ;;  %v4123_v51 = vmul.f32 %v4121_v49, %v4121_v49 }
0x1f93   :  { %v4124_v4 = vsel %vm2496_vm7, %v4122_v50, 0.0  ;;  %v4125_v53 = vsel %vm2496_vm7, %v4123_v51, 0.0 }
0x1f94   :  { %v4126_v54 = vadd.f32 %v4125_v53, %v4124_v4 }
0x1f96   :  { %v4127_v55 = vrot.slane %v4126_v54, 4 }
0x1f98   :  { %v4128_v56 = vadd.f32 %v4127_v55, %v4126_v54 }
0x1f9a   :  { %v4129_v57 = vrot.slane %v4128_v56, 2 }
0x1f9c   :  { %v4130_v58 = vadd.f32 %v4129_v57, %v4128_v56 }
0x1f9e   :  { %v4131_v25 = vrot.slane %v4130_v58, 1 }
0x1fa0   :  { %v4132_v59 = vadd.f32 %v4131_v25, %v4130_v58 }
0x1fa2   :  { %v4133_v61 = vmul.f32 0.0625, %v4132_v59 }
0x1fa4   :  { %v4134_v62 = vadd.f32 1e-05, %v4133_v61 }
0x1fa6   :  { %13101 = vrsqrt.f32 %v4134_v62 }
0x1fb0   :  { %v13102_v63 = vpop.eup %13101 }
0x1fb1   :  { %v4136_v0 = vmul.f32 %v13102_v63, %v3917_v33 }
0x1fb3   :  { %v4137_v1 = vmul.f32 %v4136_v0, %v4119_v47  ;;  %v4145_v3 = vrot.slane %v4136_v0, %v15558_v52 }
0x1fb5   :  { %v4139_v5 = vrot.slane %v4137_v1, 7  ;;  %v4146_v6 = vmul.f32 %v4145_v3, %v4108_v38  ;;  %v4147_v7 = vmul.f32 %v4145_v3, %v4109_v36 }
0x1fb7   :  { %v4141_v8 = vsub.f32 %v3917_v33, %v4139_v5 }
0x1fb9   :  { %v4151_v2 = vrot.slane %v4141_v8, %v15561_v60 }
0x1fbb   :  { %v4152_v9 = vadd.f32 %v4151_v2, %v4146_v6  ;;  %v4153_v10 = vadd.f32 %v4151_v2, %v4147_v7  ;;  %v4503_v2 = vld [vmem:[#allocation46 + $0x80] sm:$0xff] }
0x1fbd   :  { %v4155_v11 = vmax.f32 %v4153_v10, 0.0  ;;  %v4154_v12 = vmax.f32 %v4152_v9, 0.0  ;;  %v4504_v9 = vld [vmem:[#allocation46 + $0x88] sm:$0xff]  ;;  %v4505_v10 = vld [vmem:[#allocation46 + $0x90] sm:$0xff] }
0x1fbf   :  { %10916 = vmatprep.mubr.msk.f32.mxu1 %vm2496_vm7, %v4154_v12  ;;  %v4506_v12 = vld [vmem:[#allocation46 + $0x98] sm:$0xff] }
0x1fc0   :  { %10917 = vmatmul.mubr.msk.f32.vlgmr.msra.gmra.mrb[24].mxu1 %vm2496_vm7, %v4155_v11  ;;  %v11998_v11 = vpack.c.bf16 %v4504_v9, %v4503_v2  ;;  %v4723_v2 = vld [vmem:[#allocation49 + $0x8] sm:$0xff] }
0x1fc1   :  { %10923 = vmatprep.mubr.msk.f32.mxu1 %vm1050_vm0, %v15742_v13 }
0x2093   :  { %v10918_v14 = vpop.f32.mrb[24].mxu1 }
0x2094   :  { %v4241_v15 = vpop.f32.mrb[25].mxu1 }
0x2095   :  { %v13041_v16 = vpack.i.bf16 %v10918_v14, %v4241_v15 }
0x2097   :  { %13042 = vrot.lane.b32.xlu0 %v13041_v16, %s14752_s27  ;;  %v4508_v16 = vld [vmem:[#allocation46 + $0xa8] sm:$0xff] }
0x2109   :  { %v13043_v17 = vpop.permute.xlu0 %13042 }
0x210a   :  { %v13045_v18 = vunpack.i.h.bf16 %v13043_v17  ;;  %v13044_v19 = vunpack.i.l.bf16 %v13043_v17 }
0x210c   :  { %v11990_v21 = vpack.c.bf16 %v13045_v18, %v13044_v19  ;;  %v4509_v18 = vld [vmem:[#allocation46 + $0xb0] sm:$0xff]  ;;  %v4510_v19 = vld [vmem:[#allocation46 + $0xb8] sm:$0xff] }
0x210e   :  { %11991 = vmatprep.subr.bf16.mxu1 %v11990_v21 }
0x210f   :  { %11993 = vmatpush3.bf16.msra.mxu1 %v11990_v21  ;;  %v12010_v21 = vpack.c.bf16 %v4510_v19, %v4509_v18  ;;  %v4729_v18 = vld [vmem:[#allocation49 + $0x38] sm:$0xff] }
0x2112   :  { %10924 = vmatmul.mubr.msk.f32.vlgmr.msra.gmra.mrb[26].mxu1 %vm1050_vm0, %v15747_v22 }
0x2113   :  { %10930 = vmatprep.mubr.msk.f32.mxu1 %vm1050_vm0, %v15742_v13 }
0x21e5   :  { %v10925_v26 = vpop.f32.mrb[26].mxu1 }
0x21e6   :  { %v4334_v27 = vadd.f32 %v10925_v26, %v10918_v14  ;;  %v4324_v28 = vpop.f32.mrb[27].mxu1  ;;  %v12002_v14 = vpack.c.bf16 %v4506_v12, %v4505_v10  ;;  %v4724_v10 = vld [vmem:[#allocation49 + $0x10] sm:$0xff] }
0x21e7   :  { %v4333_v30 = vadd.f32 %v4324_v28, %v4241_v15  ;;  %v4507_v15 = vld [vmem:[#allocation46 + $0xa0] sm:$0xff]  ;;  %v4514_v28 = vld [vmem:[#allocation46 + $0xd8] sm:$0xff] }
0x21e8   :  { %v4340_v31 = vadd.f32 %v4338_v24, %v4334_v27  ;;  %v12006_v17 = vpack.c.bf16 %v4508_v16, %v4507_v15  ;;  %v4513_v27 = vld [vmem:[#allocation46 + $0xd0] sm:$0xff] }
0x21e9   :  { %v4339_v32 = vadd.f32 %v4338_v24, %v4333_v30  ;;  %v4512_v24 = vld [vmem:[#allocation46 + $0xc8] sm:$0xff]  ;;  %v12018_v30 = vpack.c.bf16 %v4514_v28, %v4513_v27  ;;  %v4733_v27 = vld [vmem:[#allocation49 + $0x58] sm:$0xff] }
0x21ea   :  { %v4342_v33 = vsel %vm1231_vm3, %v4340_v31, 0.0  ;;  %v4727_v15 = vld [vmem:[#allocation49 + $0x28] sm:$0xff] }
0x21eb   :  { %v4341_v34 = vsel %vm1231_vm3, %v4339_v32, 0.0 }
0x21ec   :  { %v4343_v35 = vadd.f32 %v4342_v33, %v4341_v34  ;;  %v4517_v34 = vld [vmem:[#allocation46 + $0xf0] sm:$0xff] }
0x21ee   :  { %v4344_v36 = vrot.slane %v4343_v35, 4 }
0x21f0   :  { %v4345_v37 = vadd.f32 %v4344_v36, %v4343_v35  ;;  %v4518_v35 = vld [vmem:[#allocation46 + $0xf8] sm:$0xff] }
0x21f1   :  { %v12026_v36 = vpack.c.bf16 %v4518_v35, %v4517_v34 }
0x21f2   :  { %v4346_v38 = vrot.slane %v4345_v37, 2 }
0x21f4   :  { %v4347_v39 = vadd.f32 %v4346_v38, %v4345_v37  ;;  %v4487_v37 = vld [vmem:[#allocation46] sm:$0xff]  ;;  %v4488_v38 = vld [vmem:[#allocation46 + $0x8] sm:$0xff] }
0x21f6   :  { %v4348_v40 = vrot.slane %v4347_v39, 1 }
0x21f8   :  { %v4349_v41 = vadd.f32 %v4348_v40, %v4347_v39  ;;  %v12030_v39 = vpack.c.bf16 %v4488_v38, %v4487_v37 }
0x21fa   :  { %v4350_v29 = vmul.f32 0.0625, %v4349_v41 }
0x21fc   :  { %v4351_v42 = vsub.f32 %v4339_v32, %v4350_v29  ;;  %v4352_v43 = vsub.f32 %v4340_v31, %v4350_v29 }
0x21fe   :  { %v4353_v44 = vmul.f32 %v4351_v42, %v4351_v42  ;;  %v4354_v45 = vmul.f32 %v4352_v43, %v4352_v43 }
0x2200   :  { %v4355_v46 = vsel %vm1231_vm3, %v4353_v44, 0.0  ;;  %v4356_v47 = vsel %vm1231_vm3, %v4354_v45, 0.0  ;;  %v4489_v45 = vld [vmem:[#allocation46 + $0x10] sm:$0xff] }
0x2201   :  { %v4357_v48 = vadd.f32 %v4356_v47, %v4355_v46  ;;  %v4490_v46 = vld [vmem:[#allocation46 + $0x18] sm:$0xff] }
0x2203   :  { %v4358_v49 = vrot.slane %v4357_v48, 4 }
0x2205   :  { %v4359_v50 = vadd.f32 %v4358_v49, %v4357_v48  ;;  %v12034_v48 = vpack.c.bf16 %v4490_v46, %v4489_v45 }
0x2207   :  { %v4360_v51 = vrot.slane %v4359_v50, 2 }
0x2209   :  { %v4361_v4 = vadd.f32 %v4360_v51, %v4359_v50  ;;  %v4491_v50 = vld [vmem:[#allocation46 + $0x20] sm:$0xff]  ;;  %v4492_v51 = vld [vmem:[#allocation46 + $0x28] sm:$0xff] }
0x220b   :  { %v4362_v53 = vrot.slane %v4361_v4, 1 }
0x220d   :  { %v4363_v54 = vadd.f32 %v4362_v53, %v4361_v4  ;;  %v12038_v53 = vpack.c.bf16 %v4492_v51, %v4491_v50 }
0x220f   :  { %v4364_v55 = vmul.f32 0.0625, %v4363_v54  ;;  %v4493_v54 = vld [vmem:[#allocation46 + $0x30] sm:$0xff] }
0x2211   :  { %v4365_v56 = vadd.f32 1e-05, %v4364_v55  ;;  %v4494_v55 = vld [vmem:[#allocation46 + $0x38] sm:$0xff] }
0x2213   :  { %13103 = vrsqrt.f32 %v4365_v56  ;;  %v12042_v56 = vpack.c.bf16 %v4494_v55, %v4493_v54 }
0x221d   :  { %v13104_v57 = vpop.eup %13103 }
0x221e   :  { %v4367_v58 = vmul.f32 %v13104_v57, %v4156_v23  ;;  %v4495_v57 = vld [vmem:[#allocation46 + $0x40] sm:$0xff] }
0x2220   :  { %v4376_v25 = vrot.slane %v4367_v58, %v15558_v52  ;;  %v4368_v59 = vmul.f32 %v4367_v58, %v4350_v29  ;;  %v4496_v58 = vld [vmem:[#allocation46 + $0x48] sm:$0xff] }
0x2222   :  { %v4377_v61 = vmul.f32 %v4376_v25, %v4339_v32  ;;  %v4370_v62 = vrot.slane %v4368_v59, 7  ;;  %v4378_v63 = vmul.f32 %v4376_v25, %v4340_v31  ;;  %v4515_v31 = vld [vmem:[#allocation46 + $0xe0] sm:$0xff]  ;;  %v4516_v32 = vld [vmem:[#allocation46 + $0xe8] sm:$0xff]  ;;  %v12046_v25 = vpack.c.bf16 %v4496_v58, %v4495_v57  ;;  %v4497_v59 = vld [vmem:[#allocation46 + $0x50] sm:$0xff] }
0x2223   :  { %v12022_v33 = vpack.c.bf16 %v4516_v32, %v4515_v31 }
0x2224   :  { %v4372_v0 = vsub.f32 %v4156_v23, %v4370_v62  ;;  %v4511_v23 = vld [vmem:[#allocation46 + $0xc0] sm:$0xff] }
0x2225   :  { %v12014_v26 = vpack.c.bf16 %v4512_v24, %v4511_v23  ;;  %v4731_v23 = vld [vmem:[#allocation49 + $0x48] sm:$0xff] }
0x2226   :  { %v4382_v1 = vrot.slane %v4372_v0, %v15561_v60  ;;  %v4500_v0 = vld [vmem:[#allocation46 + $0x68] sm:$0xff] }
0x2228   :  { %v4383_v3 = vadd.f32 %v4382_v1, %v4377_v61  ;;  %v4384_v5 = vadd.f32 %v4382_v1, %v4378_v63  ;;  %v4498_v61 = vld [vmem:[#allocation46 + $0x58] sm:$0xff]  ;;  %v4499_v63 = vld [vmem:[#allocation46 + $0x60] sm:$0xff] }
0x2229   :  { %v12050_v62 = vpack.c.bf16 %v4498_v61, %v4497_v59  ;;  %v12054_v1 = vpack.c.bf16 %v4500_v0, %v4499_v63 }
0x222a   :  { %v4385_v6 = vmax.f32 %v4383_v3, 0.0  ;;  %v4386_v7 = vmax.f32 %v4384_v5, 0.0  ;;  %v4501_v3 = vld [vmem:[#allocation46 + $0x70] sm:$0xff]  ;;  %v4502_v5 = vld [vmem:[#allocation46 + $0x78] sm:$0xff] }
0x222c   :  { %v11994_v8 = vpack.c.bf16 %v4386_v7, %v4385_v6 }
0x222e   :  { %11995 = vmatprep.subr.bf16.mxu1 %v11994_v8 }
0x222f   :  { %11997 = vmatpush3.bf16.msra.mxu1 %v11994_v8  ;;  %v4722_v8 = vld [vmem:[#allocation49] sm:$0xff] }
0x2230   :  { %11999 = vmatprep.subr.bf16.mxu1 %v11998_v11  ;;  %v12062_v9 = vpack.c.bf16 %v4723_v2, %v4722_v8 }
0x2232   :  { %10931 = vmatmul.mubr.msk.f32.vlgmr.msra.gmra.mrb[28].mxu1 %vm1050_vm0, %v15747_v22  ;;  %12063 = vmatprep.subr.bf16.mxu0 %v12062_v9 }
0x2233   :  { %12001 = vmatpush3.bf16.msra.mxu1 %v11998_v11  ;;  %12065 = vmatpush3.bf16.msra.mxu0 %v12062_v9  ;;  %v4725_v11 = vld [vmem:[#allocation49 + $0x18] sm:$0xff] }
0x2234   :  { %12003 = vmatprep.subr.bf16.mxu1 %v12002_v14  ;;  %v12066_v12 = vpack.c.bf16 %v4725_v11, %v4724_v10 }
0x2236   :  { %12067 = vmatprep.subr.bf16.mxu0 %v12066_v12 }
0x2237   :  { %12005 = vmatpush3.bf16.msra.mxu1 %v12002_v14  ;;  %12069 = vmatpush3.bf16.msra.mxu0 %v12066_v12  ;;  %v4726_v14 = vld [vmem:[#allocation49 + $0x20] sm:$0xff] }
0x2238   :  { %12007 = vmatprep.subr.bf16.mxu1 %v12006_v17  ;;  %v12070_v16 = vpack.c.bf16 %v4727_v15, %v4726_v14 }
0x223a   :  { %12071 = vmatprep.subr.bf16.mxu0 %v12070_v16 }
0x223b   :  { %12009 = vmatpush3.bf16.msra.mxu1 %v12006_v17  ;;  %12073 = vmatpush3.bf16.msra.mxu0 %v12070_v16  ;;  %v4728_v17 = vld [vmem:[#allocation49 + $0x30] sm:$0xff] }
0x223c   :  { %12011 = vmatprep.subr.bf16.mxu1 %v12010_v21  ;;  %v12074_v19 = vpack.c.bf16 %v4729_v18, %v4728_v17 }
0x223e   :  { %12075 = vmatprep.subr.bf16.mxu0 %v12074_v19 }
0x223f   :  { %12013 = vmatpush3.bf16.msra.mxu1 %v12010_v21  ;;  %12077 = vmatpush3.bf16.msra.mxu0 %v12074_v19  ;;  %v4730_v21 = vld [vmem:[#allocation49 + $0x40] sm:$0xff] }
0x2240   :  { %12015 = vmatprep.subr.bf16.mxu1 %v12014_v26  ;;  %v12078_v24 = vpack.c.bf16 %v4731_v23, %v4730_v21 }
0x2242   :  { %12079 = vmatprep.subr.bf16.mxu0 %v12078_v24 }
0x2243   :  { %12017 = vmatpush3.bf16.msra.mxu1 %v12014_v26  ;;  %12081 = vmatpush3.bf16.msra.mxu0 %v12078_v24  ;;  %v4732_v26 = vld [vmem:[#allocation49 + $0x50] sm:$0xff]  ;;  %v5040_v24 = vld [vmem:[#allocation52] sm:$0xff] }
0x2244   :  { %12019 = vmatprep.subr.bf16.mxu1 %v12018_v30  ;;  %v12082_v28 = vpack.c.bf16 %v4733_v27, %v4732_v26  ;;  %v5041_v26 = vld [vmem:[#allocation52 + $0x8] sm:$0xff] }
0x2245   :  { %v12125_v27 = vpack.c.bf16 %v5041_v26, %v5040_v24 }
0x2246   :  { %12083 = vmatprep.subr.bf16.mxu0 %v12082_v28 }
0x2247   :  { %12021 = vmatpush3.bf16.msra.mxu1 %v12018_v30  ;;  %12085 = vmatpush3.bf16.msra.mxu0 %v12082_v28  ;;  %v4486_v30 = vld [vmem:[#allocation48] sm:$0x7]  ;;  %v14755_v28 = vmov 0.0|0.0  }
0x2248   :  { %12023 = vmatprep.subr.bf16.mxu1 %v12022_v33  ;;  %v4672_v31 = vrot.slane %v4486_v30, %v15551_v20 }
0x224b   :  { %12025 = vmatpush3.bf16.msra.mxu1 %v12022_v33 }
0x224c   :  { %12027 = vmatprep.subr.bf16.mxu1 %v12026_v36 }
0x224f   :  { %12029 = vmatpush3.bf16.msra.mxu1 %v12026_v36 }
0x2250   :  { %12031 = vmatprep.subr.bf16.mxu1 %v12030_v39 }
0x2305   :  { %v10932_v40 = vpop.f32.mrb[28].mxu1 }
0x2306   :  { %4476 = vrot.lane.b32.xlu0 %v10932_v40, %s14752_s27  ;;  %v4463_v41 = vpop.f32.mrb[29].mxu1 }
0x2307   :  { %4474 = vrot.lane.b32.xlu1 %v4463_v41, %s14752_s27 }
0x230a   :  { %4391 = vrot.lane.b32.xlu0 %v4386_v7, %s14752_s27 }
0x230b   :  { %4389 = vrot.lane.b32.xlu1 %v4385_v6, %s14752_s27  ;;  %v12058_v6 = vpack.c.bf16 %v4502_v5, %v4501_v3 }
0x2378   :  { %v4477_v29 = vpop.permute.xlu0 %4476 }
0x2379   :  { %4481 = vst.msk [vmem:[#allocation3 + $0x10] sm:$0xff] %vm2946_vm8, %v4477_v29  ;;  %v4475_v42 = vpop.permute.xlu1 %4474 }
0x237a   :  { %4480 = vst.msk [vmem:[#allocation3] sm:$0xff] %vm2946_vm8, %v4475_v42 }
0x237c   :  { %v4392_v43 = vpop.permute.xlu0 %4391 }
0x237d   :  { %4396 = vst.msk [vmem:[#allocation2 + $0x10] sm:$0xff] %vm2946_vm8, %v4392_v43  ;;  %v4390_v44 = vpop.permute.xlu1 %4389 }
0x237e   :  { %4395 = vst.msk [vmem:[#allocation2] sm:$0xff] %vm2946_vm8, %v4390_v44  ;;  %vm9522_vm8 = vcmask 1043456  }
0x2380   :  { %v15773_v49 = vld [vmem:[#allocation3 + $0x10] sm:$0xff] }
0x2381   :  { %v15770_v47 = vld [vmem:[#allocation3] sm:$0xff] }
0x2382   :  { %10965 = vmatprep.mubr.f32.mxu1 %v15770_v47 }
0x2383   :  { %10966 = vmatmul.mubr.f32.vlgmr.msra.gmra.mrb[30].mxu1 %v15773_v49 }
0x2384   :  { %12033 = vmatpush3.bf16.msra.mxu1 %v12030_v39  ;;  %v15779_v7 = vld [vmem:[#allocation2 + $0x10] sm:$0xff] }
0x2385   :  { %12035 = vmatprep.subr.bf16.mxu1 %v12034_v48  ;;  %v15776_v4 = vld [vmem:[#allocation2] sm:$0xff] }
0x2386   :  { %11000 = vmatprep.mubr.f32.mxu1 %v15776_v4 }
0x2388   :  { %12037 = vmatpush3.bf16.msra.mxu1 %v12034_v48 }
0x2389   :  { %12039 = vmatprep.subr.bf16.mxu1 %v12038_v53 }
0x238c   :  { %12041 = vmatpush3.bf16.msra.mxu1 %v12038_v53 }
0x238d   :  { %12043 = vmatprep.subr.bf16.mxu1 %v12042_v56 }
0x2390   :  { %12045 = vmatpush3.bf16.msra.mxu1 %v12042_v56 }
0x2391   :  { %12047 = vmatprep.subr.bf16.mxu1 %v12046_v25 }
0x2394   :  { %12049 = vmatpush3.bf16.msra.mxu1 %v12046_v25 }
0x2395   :  { %12051 = vmatprep.subr.bf16.mxu1 %v12050_v62 }
0x2398   :  { %12053 = vmatpush3.bf16.msra.mxu1 %v12050_v62 }
0x2399   :  { %12055 = vmatprep.subr.bf16.mxu1 %v12054_v1 }
0x239c   :  { %12057 = vmatpush3.bf16.msra.mxu1 %v12054_v1 }
0x239d   :  { %12059 = vmatprep.subr.bf16.mxu1 %v12058_v6 }
0x23a0   :  { %12061 = vmatpush3.bf16.msra.mxu1 %v12058_v6 }
0x23a1   :  { %12124 = vmatprep.subr.bf16.mxu1 %v14755_v28 }
0x23a3   :  { %11001 = vmatmul.mubr.f32.vlgmr.msra.gmra.mrb[30].mxu1 %v15779_v7 }
0x23a4   :  { %12126 = vmatpush1.bf16.msra.mxu1 %v12125_v27 }
0x23a5   :  { %12127 = vmatprep.subr.bf16.mxu1 %v14755_v28 }
0x2476   :  { %v11002_v32 = vpop.f32.mrb[30].mxu1 }
0x2477   :  { %v4674_v33 = vadd.f32 %v11002_v32, %v4672_v31  ;;  %v4660_v34 = vpop.f32.mrb[31].mxu1 }
0x2478   :  { %v4673_v35 = vadd.f32 %v4672_v31, %v4660_v34  ;;  %v5043_v31 = vld [vmem:[#allocation52 + $0x18] sm:$0xff]  ;;  %v5045_v34 = vld [vmem:[#allocation52 + $0x28] sm:$0xff] }
0x2479   :  { %v4676_v36 = vsel %vm2496_vm7, %v4674_v33, 0.0 }
0x247a   :  { %v4675_v37 = vsel %vm2496_vm7, %v4673_v35, 0.0 }
0x247b   :  { %v4677_v38 = vadd.f32 %v4676_v36, %v4675_v37  ;;  %v5046_v36 = vld [vmem:[#allocation52 + $0x30] sm:$0xff]  ;;  %v5047_v37 = vld [vmem:[#allocation52 + $0x38] sm:$0xff] }
0x247d   :  { %v4678_v39 = vrot.slane %v4677_v38, 4 }
0x247f   :  { %v4679_v40 = vadd.f32 %v4678_v39, %v4677_v38  ;;  %v12134_v38 = vpack.c.bf16 %v5047_v37, %v5046_v36  ;;  %v5048_v39 = vld [vmem:[#allocation52 + $0x40] sm:$0xff] }
0x2481   :  { %v4680_v41 = vrot.slane %v4679_v40, 2 }
0x2483   :  { %v4681_v29 = vadd.f32 %v4680_v41, %v4679_v40  ;;  %v5049_v40 = vld [vmem:[#allocation52 + $0x48] sm:$0xff] }
0x2484   :  { %v12137_v41 = vpack.c.bf16 %v5049_v40, %v5048_v39 }
0x2485   :  { %v4682_v42 = vrot.slane %v4681_v29, 1 }
0x2487   :  { %v4683_v43 = vadd.f32 %v4682_v42, %v4681_v29  ;;  %v5050_v29 = vld [vmem:[#allocation52 + $0x50] sm:$0xff]  ;;  %v5051_v42 = vld [vmem:[#allocation52 + $0x58] sm:$0xff] }
0x2489   :  { %v4684_v44 = vmul.f32 0.0625, %v4683_v43  ;;  %v12140_v43 = vpack.c.bf16 %v5051_v42, %v5050_v29 }
0x248b   :  { %v4685_v45 = vsub.f32 %v4673_v35, %v4684_v44  ;;  %v4686_v46 = vsub.f32 %v4674_v33, %v4684_v44 }
0x248d   :  { %v4687_v48 = vmul.f32 %v4685_v45, %v4685_v45  ;;  %v4688_v50 = vmul.f32 %v4686_v46, %v4686_v46  ;;  %v5053_v45 = vld [vmem:[#allocation52 + $0x68] sm:$0xff] }
0x248f   :  { %v4689_v51 = vsel %vm2496_vm7, %v4687_v48, 0.0  ;;  %v4690_v53 = vsel %vm2496_vm7, %v4688_v50, 0.0  ;;  %v5054_v48 = vld [vmem:[#allocation52 + $0x70] sm:$0xff]  ;;  %v5055_v50 = vld [vmem:[#allocation52 + $0x78] sm:$0xff] }
0x2490   :  { %v4691_v54 = vadd.f32 %v4690_v53, %v4689_v51  ;;  %v12146_v51 = vpack.c.bf16 %v5055_v50, %v5054_v48  ;;  %v5056_v53 = vld [vmem:[#allocation52 + $0x80] sm:$0xff] }
0x2492   :  { %v4692_v55 = vrot.slane %v4691_v54, 4 }
0x2494   :  { %v4693_v56 = vadd.f32 %v4692_v55, %v4691_v54  ;;  %v5057_v54 = vld [vmem:[#allocation52 + $0x88] sm:$0xff] }
0x2495   :  { %v12149_v55 = vpack.c.bf16 %v5057_v54, %v5056_v53  ;;  %v5061_v53 = vld [vmem:[#allocation52 + $0xa8] sm:$0xff] }
0x2496   :  { %v4694_v57 = vrot.slane %v4693_v56, 2 }
0x2498   :  { %v4695_v58 = vadd.f32 %v4694_v57, %v4693_v56  ;;  %v5058_v56 = vld [vmem:[#allocation52 + $0x90] sm:$0xff]  ;;  %v5059_v57 = vld [vmem:[#allocation52 + $0x98] sm:$0xff] }
0x249a   :  { %v4696_v25 = vrot.slane %v4695_v58, 1 }
0x249c   :  { %v4697_v59 = vadd.f32 %v4696_v25, %v4695_v58  ;;  %v12152_v58 = vpack.c.bf16 %v5059_v57, %v5058_v56  ;;  %v4721_v25 = vld [vmem:[#allocation51] sm:$0x7] }
0x249d   :  { %v5063_v56 = vld [vmem:[#allocation52 + $0xb8] sm:$0xff] }
0x249e   :  { %v4698_v61 = vmul.f32 0.0625, %v4697_v59  ;;  %v4903_v59 = vrot.slane %v4721_v25, %v15551_v20 }
0x24a0   :  { %v4699_v62 = vadd.f32 1e-05, %v4698_v61 }
0x24a2   :  { %13105 = vrsqrt.f32 %v4699_v62 }
0x24ac   :  { %v13106_v63 = vpop.eup %13105 }
0x24ad   :  { %v4701_v0 = vmul.f32 %v13106_v63, %v4486_v30 }
0x24af   :  { %v4702_v1 = vmul.f32 %v4701_v0, %v4684_v44  ;;  %v4710_v3 = vrot.slane %v4701_v0, %v15558_v52  ;;  %v5052_v44 = vld [vmem:[#allocation52 + $0x60] sm:$0xff] }
0x24b0   :  { %v12143_v46 = vpack.c.bf16 %v5053_v45, %v5052_v44 }
0x24b1   :  { %v4704_v5 = vrot.slane %v4702_v1, 7  ;;  %v4711_v6 = vmul.f32 %v4710_v3, %v4673_v35  ;;  %v4712_v8 = vmul.f32 %v4710_v3, %v4674_v33  ;;  %v5044_v33 = vld [vmem:[#allocation52 + $0x20] sm:$0xff] }
0x24b2   :  { %v12131_v35 = vpack.c.bf16 %v5045_v34, %v5044_v33 }
0x24b3   :  { %v4706_v2 = vsub.f32 %v4486_v30, %v4704_v5  ;;  %v5042_v30 = vld [vmem:[#allocation52 + $0x10] sm:$0xff] }
0x24b4   :  { %v12128_v32 = vpack.c.bf16 %v5043_v31, %v5042_v30 }
0x24b5   :  { %v4716_v9 = vrot.slane %v4706_v2, %v15561_v60 }
0x24b6   :  { %12129 = vmatpush1.bf16.msra.mxu1 %v12128_v32 }
0x24b7   :  { %v4717_v10 = vadd.f32 %v4716_v9, %v4711_v6  ;;  %v4718_v11 = vadd.f32 %v4716_v9, %v4712_v8  ;;  %12130 = vmatprep.subr.bf16.mxu1 %v14755_v28 }
0x24b9   :  { %v4720_v12 = vmax.f32 %v4718_v11, 0.0  ;;  %v4719_v14 = vmax.f32 %v4717_v10, 0.0 }
0x24ba   :  { %12132 = vmatpush1.bf16.msra.mxu1 %v12131_v35 }
0x24bb   :  { %11027 = vmatprep.mubr.msk.f32.mxu0 %vm2496_vm7, %v4719_v14  ;;  %12133 = vmatprep.subr.bf16.mxu1 %v14755_v28 }
0x24bc   :  { %11028 = vmatmul.mubr.msk.f32.vlgmr.msra.gmra.mrb[22].mxu0 %vm2496_vm7, %v4720_v12  ;;  %vm14763_vm7 = vmmov 0  }
0x24bd   :  { %11034 = vmatprep.mubr.msk.f32.mxu0 %vm1050_vm0, %v15742_v13 }
0x24be   :  { %12135 = vmatpush1.bf16.msra.mxu1 %v12134_v38 }
0x24bf   :  { %12136 = vmatprep.subr.bf16.mxu1 %v14755_v28 }
0x24c2   :  { %12138 = vmatpush1.bf16.msra.mxu1 %v12137_v41 }
0x24c3   :  { %12139 = vmatprep.subr.bf16.mxu1 %v14755_v28 }
0x24c6   :  { %12141 = vmatpush1.bf16.msra.mxu1 %v12140_v43 }
0x24c7   :  { %12142 = vmatprep.subr.bf16.mxu1 %v14755_v28 }
0x24ca   :  { %12144 = vmatpush1.bf16.msra.mxu1 %v12143_v46 }
0x24cb   :  { %12145 = vmatprep.subr.bf16.mxu1 %v14755_v28 }
0x24ce   :  { %12147 = vmatpush1.bf16.msra.mxu1 %v12146_v51  ;;  %v5060_v51 = vld [vmem:[#allocation52 + $0xa0] sm:$0xff] }
0x24cf   :  { %12148 = vmatprep.subr.bf16.mxu1 %v14755_v28  ;;  %v12095_v54 = vpack.c.bf16 %v5061_v53, %v5060_v51 }
0x24d2   :  { %12150 = vmatpush1.bf16.msra.mxu1 %v12149_v55  ;;  %v5062_v55 = vld [vmem:[#allocation52 + $0xb0] sm:$0xff] }
0x24d3   :  { %12151 = vmatprep.subr.bf16.mxu1 %v14755_v28 }
0x24d6   :  { %12153 = vmatpush1.bf16.msra.mxu1 %v12152_v58  ;;  %v12098_v58 = vpack.c.bf16 %v5063_v56, %v5062_v55 }
0x258f   :  { %v15793_v15 = vpop.f32.mrb[22].mxu0 }
0x2590   :  { %v15795_v16 = vpop.f32.mrb[23].mxu0 }
0x2591   :  { %v13046_v17 = vpack.i.bf16 %v15793_v15, %v15795_v16 }
0x2593   :  { %13047 = vrot.lane.b32.xlu1 %v13046_v17, %s14752_s27 }
0x2605   :  { %v13048_v18 = vpop.permute.xlu1 %13047 }
0x2606   :  { %v13050_v19 = vunpack.i.h.bf16 %v13048_v18  ;;  %v13049_v21 = vunpack.i.l.bf16 %v13048_v18 }
0x2608   :  { %v12086_v23 = vpack.c.bf16 %v13050_v19, %v13049_v21 }
0x260a   :  { %12087 = vmatprep.subr.bf16.mxu0 %v12086_v23 }
0x260b   :  { %12089 = vmatpush3.bf16.msra.mxu0 %v12086_v23 }
0x260e   :  { %11035 = vmatmul.mubr.msk.f32.vlgmr.msra.gmra.mrb[24].mxu0 %vm1050_vm0, %v15747_v22 }
0x260f   :  { %11041 = vmatprep.mubr.msk.f32.mxu0 %vm1050_vm0, %v15742_v13 }
0x26e1   :  { %v11036_v61 = vpop.f32.mrb[24].mxu0 }
0x26e2   :  { %v4899_v62 = vadd.f32 %v11036_v61, %v15793_v15  ;;  %v4889_v63 = vpop.f32.mrb[25].mxu0 }
0x26e3   :  { %v4898_v0 = vadd.f32 %v4889_v63, %v15795_v16  ;;  %v5066_v63 = vld [vmem:[#allocation52 + $0xd0] sm:$0xff] }
0x26e4   :  { %v4905_v1 = vadd.f32 %v4903_v59, %v4899_v62 }
0x26e5   :  { %v4904_v3 = vadd.f32 %v4903_v59, %v4898_v0  ;;  %v5065_v59 = vld [vmem:[#allocation52 + $0xc8] sm:$0xff]  ;;  %v5067_v0 = vld [vmem:[#allocation52 + $0xd8] sm:$0xff] }
0x26e6   :  { %v4907_v5 = vsel %vm1231_vm3, %v4905_v1, 0.0 }
0x26e7   :  { %v4906_v6 = vsel %vm1231_vm3, %v4904_v3, 0.0 }
0x26e8   :  { %v4908_v8 = vadd.f32 %v4907_v5, %v4906_v6  ;;  %v5069_v5 = vld [vmem:[#allocation52 + $0xe8] sm:$0xff] }
0x26ea   :  { %v4909_v2 = vrot.slane %v4908_v8, 4 }
0x26ec   :  { %v4910_v9 = vadd.f32 %v4909_v2, %v4908_v8  ;;  %v5071_v8 = vld [vmem:[#allocation52 + $0xf8] sm:$0xff] }
0x26ee   :  { %v4911_v10 = vrot.slane %v4910_v9, 2 }
0x26f0   :  { %v4912_v11 = vadd.f32 %v4911_v10, %v4910_v9  ;;  %v5072_v9 = vld [vmem:[#allocation52 + $0x100] sm:$0xff]  ;;  %v5073_v10 = vld [vmem:[#allocation52 + $0x108] sm:$0xff] }
0x26f2   :  { %v4913_v12 = vrot.slane %v4912_v11, 1 }
0x26f4   :  { %v4914_v14 = vadd.f32 %v4913_v12, %v4912_v11  ;;  %v5074_v11 = vld [vmem:[#allocation52 + $0x110] sm:$0xff]  ;;  %v5075_v12 = vld [vmem:[#allocation52 + $0x118] sm:$0xff] }
0x26f6   :  { %v4915_v17 = vmul.f32 0.0625, %v4914_v14  ;;  %v12116_v14 = vpack.c.bf16 %v5075_v12, %v5074_v11 }
0x26f8   :  { %v4916_v18 = vsub.f32 %v4904_v3, %v4915_v17  ;;  %v4917_v19 = vsub.f32 %v4905_v1, %v4915_v17 }
0x26fa   :  { %v4918_v15 = vmul.f32 %v4916_v18, %v4916_v18  ;;  %v4919_v21 = vmul.f32 %v4917_v19, %v4917_v19  ;;  %v5077_v18 = vld [vmem:[#allocation52 + $0x128] sm:$0xff] }
0x26fc   :  { %v4920_v16 = vsel %vm1231_vm3, %v4918_v15, 0.0  ;;  %v4921_v23 = vsel %vm1231_vm3, %v4919_v21, 0.0  ;;  %v5078_v15 = vld [vmem:[#allocation52 + $0x130] sm:$0xff]  ;;  %v5079_v21 = vld [vmem:[#allocation52 + $0x138] sm:$0xff] }
0x26fd   :  { %v4922_v24 = vadd.f32 %v4921_v23, %v4920_v16  ;;  %v12122_v16 = vpack.c.bf16 %v5079_v21, %v5078_v15 }
0x26ff   :  { %v4923_v26 = vrot.slane %v4922_v24, 4 }
0x2701   :  { %v4924_v27 = vadd.f32 %v4923_v26, %v4922_v24 }
0x2703   :  { %v4925_v30 = vrot.slane %v4924_v27, 2 }
0x2705   :  { %v4926_v31 = vadd.f32 %v4925_v30, %v4924_v27 }
0x2707   :  { %v4927_v32 = vrot.slane %v4926_v31, 1 }
0x2709   :  { %v4928_v33 = vadd.f32 %v4927_v32, %v4926_v31 }
0x270b   :  { %v4929_v34 = vmul.f32 0.0625, %v4928_v33 }
0x270d   :  { %v4930_v35 = vadd.f32 1e-05, %v4929_v34  ;;  %v5039_v34 = vld [vmem:[#allocation54] sm:$0x7] }
0x270f   :  { %13107 = vrsqrt.f32 %v4930_v35 }
0x2719   :  { %v13108_v36 = vpop.eup %13107 }
0x271a   :  { %v4932_v37 = vmul.f32 %v13108_v36, %v4721_v25 }
0x271c   :  { %v4941_v38 = vrot.slane %v4932_v37, %v15558_v52  ;;  %v4933_v39 = vmul.f32 %v4932_v37, %v4915_v17  ;;  %v5076_v17 = vld [vmem:[#allocation52 + $0x120] sm:$0xff]  ;;  %v5245_v37 = vrot.slane %v5039_v34, %v15551_v20 }
0x271d   :  { %v12119_v19 = vpack.c.bf16 %v5077_v18, %v5076_v17  ;;  %v5389_v18 = vld [vmem:[#allocation55 + $0x50] sm:$0xff] }
0x271e   :  { %v4942_v40 = vmul.f32 %v4941_v38, %v4904_v3  ;;  %v4935_v41 = vrot.slane %v4933_v39, 7  ;;  %v4943_v29 = vmul.f32 %v4941_v38, %v4905_v1  ;;  %v12104_v1 = vpack.c.bf16 %v5067_v0, %v5066_v63  ;;  %v5068_v3 = vld [vmem:[#allocation52 + $0xe0] sm:$0xff] }
0x271f   :  { %v12107_v6 = vpack.c.bf16 %v5069_v5, %v5068_v3 }
0x2720   :  { %v4937_v42 = vsub.f32 %v4721_v25, %v4935_v41  ;;  %v5064_v25 = vld [vmem:[#allocation52 + $0xc0] sm:$0xff] }
0x2721   :  { %v12101_v62 = vpack.c.bf16 %v5065_v59, %v5064_v25 }
0x2722   :  { %v4947_v43 = vrot.slane %v4937_v42, %v15561_v60 }
0x2724   :  { %v4948_v44 = vadd.f32 %v4947_v43, %v4942_v40  ;;  %v4949_v45 = vadd.f32 %v4947_v43, %v4943_v29 }
0x2726   :  { %v4950_v46 = vmax.f32 %v4948_v44, 0.0  ;;  %v4951_v48 = vmax.f32 %v4949_v45, 0.0 }
0x2728   :  { %4952 = vst.msk [vmem:[#allocation2 + $0x8] sm:$0xff] %vm1231_vm3, %v4950_v46  ;;  %4953 = vst.msk [vmem:[#allocation2 + $0x18] sm:$0xff] %vm1231_vm3, %v4951_v48  ;;  %v12090_v50 = vpack.c.bf16 %v4951_v48, %v4950_v46 }
0x272a   :  { %12091 = vmatprep.subr.bf16.mxu0 %v12090_v50 }
0x272b   :  { %12093 = vmatpush3.bf16.msra.mxu0 %v12090_v50 }
0x272c   :  { %12094 = vmatprep.subr.bf16.mxu0 %v14755_v28 }
0x272e   :  { %11042 = vmatmul.mubr.msk.f32.vlgmr.msra.gmra.mrb[26].mxu0 %vm1050_vm0, %v15747_v22 }
0x272f   :  { %v5032_v57 = vld [vmem:[#allocation2 + $0x8] sm:$0xff]  ;;  %12096 = vmatpush1.bf16.msra.mxu0 %v12095_v54  ;;  %v5034_v61 = vld [vmem:[#allocation2 + $0x18] sm:$0xff] }
0x2730   :  { %9773 = vmatprep.mubr.msk.f32.mxu1 %vm1231_vm3, %v5032_v57  ;;  %12097 = vmatprep.subr.bf16.mxu0 %v14755_v28 }
0x2731   :  { %5232 = vmatmul.mubr.f32.vlgmr.msra.gmra.mrb[32].mxu1 %v15776_v4  ;;  %v5070_v4 = vld [vmem:[#allocation52 + $0xf0] sm:$0xff] }
0x2732   :  { %9774 = vmatprep.mubr.msk.f32.mxu1 %vm1231_vm3, %v5034_v61  ;;  %v12110_v2 = vpack.c.bf16 %v5071_v8, %v5070_v4 }
0x2733   :  { %12099 = vmatpush1.bf16.msra.mxu0 %v12098_v58 }
0x2734   :  { %12100 = vmatprep.subr.bf16.mxu0 %v14755_v28 }
0x2735   :  { %5237 = vmatmul.mubr.f32.gmra.mrb[34].mxu1 %v15779_v7  ;;  %v12113_v7 = vpack.c.bf16 %v5073_v10, %v5072_v9 }
0x2737   :  { %12102 = vmatpush1.bf16.msra.mxu0 %v12101_v62 }
0x2738   :  { %12103 = vmatprep.subr.bf16.mxu0 %v14755_v28 }
0x273b   :  { %12105 = vmatpush1.bf16.msra.mxu0 %v12104_v1 }
0x273c   :  { %12106 = vmatprep.subr.bf16.mxu0 %v14755_v28 }
0x273f   :  { %12108 = vmatpush1.bf16.msra.mxu0 %v12107_v6 }
0x2740   :  { %12109 = vmatprep.subr.bf16.mxu0 %v14755_v28 }
0x2743   :  { %12111 = vmatpush1.bf16.msra.mxu0 %v12110_v2 }
0x2744   :  { %12112 = vmatprep.subr.bf16.mxu0 %v14755_v28 }
0x2747   :  { %12114 = vmatpush1.bf16.msra.mxu0 %v12113_v7 }
0x2748   :  { %12115 = vmatprep.subr.bf16.mxu0 %v14755_v28 }
0x274b   :  { %12117 = vmatpush1.bf16.msra.mxu0 %v12116_v14 }
0x274c   :  { %12118 = vmatprep.subr.bf16.mxu0 %v14755_v28 }
0x274f   :  { %12120 = vmatpush1.bf16.msra.mxu0 %v12119_v19  ;;  %v5390_v19 = vld [vmem:[#allocation55 + $0x58] sm:$0xff] }
0x2750   :  { %12121 = vmatprep.subr.bf16.mxu0 %v14755_v28 }
0x2753   :  { %12123 = vmatpush1.bf16.msra.mxu0 %v12122_v16 }
0x2801   :  { %v11043_v23 = vpop.f32.mrb[26].mxu0 }
0x2802   :  { %5030 = vst.msk [vmem:[#allocation3 + $0x18] sm:$0xff] %vm1231_vm3, %v11043_v23  ;;  %v5020_v24 = vpop.f32.mrb[27].mxu0  ;;  %v12158_v23 = vpack.c.bf16 %v5390_v19, %v5389_v18  ;;  %v5624_v18 = vld [vmem:[#allocation58 + $0x70] sm:$0xff] }
0x2803   :  { %5029 = vst.msk [vmem:[#allocation3 + $0x8] sm:$0xff] %vm1231_vm3, %v5020_v24  ;;  %v5391_v24 = vld [vmem:[#allocation55 + $0x60] sm:$0xff] }
0x2804   :  { %v5233_v26 = vpop.f32.mrb[32].mxu1 }
0x2805   :  { %v5235_v27 = vpop.f32.mrb[33].mxu1 }
0x2808   :  { %v5238_v30 = vpop.f32.mrb[34].mxu1 }
0x2809   :  { %v5240_v31 = vpop.f32.mrb[35].mxu1  ;;  %v5038_v33 = vld [vmem:[#allocation3 + $0x18] sm:$0xff] }
0x280a   :  { %v5036_v32 = vld [vmem:[#allocation3 + $0x8] sm:$0xff]  ;;  %v5394_v31 = vld [vmem:[#allocation55 + $0x78] sm:$0xff] }
0x280b   :  { %9771 = vmatprep.mubr.msk.f32.mxu0 %vm1231_vm3, %v5036_v32 }
0x280c   :  { %5151 = vmatmul.mubr.f32.vlgmr.msra.gmra.mrb[28].mxu0 %v15770_v47 }
0x280d   :  { %9772 = vmatprep.mubr.msk.f32.mxu0 %vm1231_vm3, %v5038_v33  ;;  %v5395_v33 = vld [vmem:[#allocation55 + $0x80] sm:$0xff] }
0x2810   :  { %5156 = vmatmul.mubr.f32.gmra.mrb[30].mxu0 %v15773_v49 }
0x2811   :  { %11048 = vmatprep.mubr.msk.f32.mxu0 %vm1050_vm0, %v15742_v13 }
0x28df   :  { %v5152_v35 = vpop.f32.mrb[28].mxu0 }
0x28e0   :  { %v5234_v36 = vadd.f32 %v5233_v26, %v5152_v35  ;;  %v5154_v38 = vpop.f32.mrb[29].mxu0  ;;  %v5392_v26 = vld [vmem:[#allocation55 + $0x68] sm:$0xff] }
0x28e1   :  { %v12162_v27 = vpack.c.bf16 %v5392_v26, %v5391_v24 }
0x28e2   :  { %v5246_v40 = vadd.f32 %v5245_v37, %v5234_v36  ;;  %v5397_v36 = vld [vmem:[#allocation55 + $0x90] sm:$0xff] }
0x28e3   :  { %v5157_v39 = vpop.f32.mrb[30].mxu0 }
0x28e4   :  { %v5239_v41 = vadd.f32 %v5238_v30, %v5157_v39  ;;  %v5159_v29 = vpop.f32.mrb[31].mxu0  ;;  %v5249_v42 = vsel %vm5248_vm9, %v5246_v40, 0.0  ;;  %v5393_v30 = vld [vmem:[#allocation55 + $0x70] sm:$0xff]  ;;  %v5379_v39 = vld [vmem:[#allocation55] sm:$0xff] }
0x28e5   :  { %v12166_v32 = vpack.c.bf16 %v5394_v31, %v5393_v30 }
0x28e6   :  { %v5247_v47 = vadd.f32 %v5245_v37, %v5239_v41  ;;  %v5398_v37 = vld [vmem:[#allocation55 + $0x98] sm:$0xff] }
0x28e7   :  { %v12174_v38 = vpack.c.bf16 %v5398_v37, %v5397_v36 }
0x28e8   :  { %v5250_v43 = vsel %vm5248_vm9, %v5247_v47, 0.0 }
0x28e9   :  { %v5251_v49 = vadd.f32 %v5250_v43, %v5249_v42  ;;  %v5382_v42 = vld [vmem:[#allocation55 + $0x18] sm:$0xff] }
0x28eb   :  { %v5252_v44 = vrot.slane %v5251_v49, 4 }
0x28ed   :  { %v5253_v45 = vadd.f32 %v5252_v44, %v5251_v49 }
0x28ef   :  { %v5254_v13 = vrot.slane %v5253_v45, 2 }
0x28f1   :  { %v5255_v46 = vadd.f32 %v5254_v13, %v5253_v45  ;;  %v5383_v45 = vld [vmem:[#allocation55 + $0x20] sm:$0xff]  ;;  %v5384_v13 = vld [vmem:[#allocation55 + $0x28] sm:$0xff] }
0x28f3   :  { %v5256_v48 = vrot.slane %v5255_v46, 1 }
0x28f5   :  { %v5257_v50 = vadd.f32 %v5256_v48, %v5255_v46  ;;  %v12186_v48 = vpack.c.bf16 %v5384_v13, %v5383_v45 }
0x28f7   :  { %v5258_v51 = vmul.f32 0.0625, %v5257_v50  ;;  %v5385_v50 = vld [vmem:[#allocation55 + $0x30] sm:$0xff] }
0x28f9   :  { %v5259_v53 = vsub.f32 %v5246_v40, %v5258_v51  ;;  %v5260_v54 = vsub.f32 %v5247_v47, %v5258_v51 }
0x28fb   :  { %v5261_v55 = vmul.f32 %v5259_v53, %v5259_v53  ;;  %v5262_v56 = vmul.f32 %v5260_v54, %v5260_v54  ;;  %v5387_v54 = vld [vmem:[#allocation55 + $0x40] sm:$0xff] }
0x28fd   :  { %v5263_v57 = vsel %vm5248_vm9, %v5261_v55, 0.0  ;;  %v5264_v58 = vsel %vm5248_vm9, %v5262_v56, 0.0  ;;  %v5388_v55 = vld [vmem:[#allocation55 + $0x48] sm:$0xff] }
0x28fe   :  { %v5265_v25 = vadd.f32 %v5264_v58, %v5263_v57  ;;  %v12194_v56 = vpack.c.bf16 %v5388_v55, %v5387_v54  ;;  %v15866_v58 = vld [vmem:[#allocation4] sm:$0xff] }
0x2900   :  { %v5266_v59 = vrot.slane %v5265_v25, 4 }
0x2902   :  { %v5267_v61 = vadd.f32 %v5266_v59, %v5265_v25  ;;  %v5610_v25 = vld [vmem:[#allocation58] sm:$0xff]  ;;  %v5611_v59 = vld [vmem:[#allocation58 + $0x8] sm:$0xff] }
0x2904   :  { %v5268_v62 = vrot.slane %v5267_v61, 2 }
0x2906   :  { %v5269_v63 = vadd.f32 %v5268_v62, %v5267_v61  ;;  %v12198_v61 = vpack.c.bf16 %v5611_v59, %v5610_v25  ;;  %v5612_v62 = vld [vmem:[#allocation58 + $0x10] sm:$0xff] }
0x2908   :  { %v5270_v0 = vrot.slane %v5269_v63, 1  ;;  %12199 = vmatprep.subr.bf16.mxu1 %v12198_v61 }
0x2909   :  { %12201 = vmatpush3.bf16.msra.mxu1 %v12198_v61 }
0x290a   :  { %v5271_v1 = vadd.f32 %v5270_v0, %v5269_v63  ;;  %v5613_v63 = vld [vmem:[#allocation58 + $0x18] sm:$0xff] }
0x290b   :  { %v12202_v0 = vpack.c.bf16 %v5613_v63, %v5612_v62 }
0x290c   :  { %v5272_v3 = vmul.f32 0.0625, %v5271_v1  ;;  %v5614_v1 = vld [vmem:[#allocation58 + $0x20] sm:$0xff] }
0x290d   :  { %12203 = vmatprep.subr.bf16.mxu1 %v12202_v0 }
0x290e   :  { %v5273_v5 = vadd.f32 1e-05, %v5272_v3  ;;  %12205 = vmatpush3.bf16.msra.mxu1 %v12202_v0  ;;  %v5615_v3 = vld [vmem:[#allocation58 + $0x28] sm:$0xff] }
0x2910   :  { %13109 = vrsqrt.f32 %v5273_v5  ;;  %v12206_v5 = vpack.c.bf16 %v5615_v3, %v5614_v1 }
0x2912   :  { %12207 = vmatprep.subr.bf16.mxu1 %v12206_v5 }
0x2913   :  { %12209 = vmatpush3.bf16.msra.mxu1 %v12206_v5 }
0x291a   :  { %v13110_v6 = vpop.eup %13109 }
0x291b   :  { %v5275_v4 = vmul.f32 %v13110_v6, %v5039_v34  ;;  %v5616_v6 = vld [vmem:[#allocation58 + $0x30] sm:$0xff] }
0x291d   :  { %v5284_v8 = vrot.slane %v5275_v4, %v15558_v52  ;;  %v5276_v2 = vmul.f32 %v5275_v4, %v5258_v51  ;;  %v5386_v51 = vld [vmem:[#allocation55 + $0x38] sm:$0xff] }
0x291e   :  { %v12190_v53 = vpack.c.bf16 %v5386_v51, %v5385_v50  ;;  %v5617_v4 = vld [vmem:[#allocation58 + $0x38] sm:$0xff] }
0x291f   :  { %v5286_v9 = vmul.f32 %v5284_v8, %v5247_v47  ;;  %v5278_v10 = vrot.slane %v5276_v2, 7  ;;  %v5285_v7 = vmul.f32 %v5284_v8, %v5246_v40  ;;  %v5380_v40 = vld [vmem:[#allocation55 + $0x8] sm:$0xff]  ;;  %v5381_v47 = vld [vmem:[#allocation55 + $0x10] sm:$0xff]  ;;  %v12210_v8 = vpack.c.bf16 %v5617_v4, %v5616_v6 }
0x2920   :  { %v12178_v41 = vpack.c.bf16 %v5380_v40, %v5379_v39  ;;  %v12182_v49 = vpack.c.bf16 %v5382_v42, %v5381_v47  ;;  %v5618_v2 = vld [vmem:[#allocation58 + $0x40] sm:$0xff] }
0x2921   :  { %v5280_v11 = vsub.f32 %v5039_v34, %v5278_v10  ;;  %v5396_v34 = vld [vmem:[#allocation55 + $0x88] sm:$0xff]  ;;  %12211 = vmatprep.subr.bf16.mxu1 %v12210_v8 }
0x2922   :  { %v12170_v35 = vpack.c.bf16 %v5396_v34, %v5395_v33  ;;  %12213 = vmatpush3.bf16.msra.mxu1 %v12210_v8 }
0x2923   :  { %v5290_v12 = vrot.slane %v5280_v11, %v15561_v60  ;;  %v5621_v11 = vld [vmem:[#allocation58 + $0x58] sm:$0xff] }
0x2925   :  { %v5291_v14 = vadd.f32 %v5290_v12, %v5285_v7  ;;  %v5292_v17 = vadd.f32 %v5290_v12, %v5286_v9  ;;  %v5619_v9 = vld [vmem:[#allocation58 + $0x48] sm:$0xff]  ;;  %v5620_v7 = vld [vmem:[#allocation58 + $0x50] sm:$0xff] }
0x2926   :  { %v12214_v10 = vpack.c.bf16 %v5619_v9, %v5618_v2  ;;  %v12218_v12 = vpack.c.bf16 %v5621_v11, %v5620_v7  ;;  %v15874_v2 = vld [vmem:[#allocation4 + $0x8] sm:$0xff] }
0x2927   :  { %v5293_v15 = vmax.f32 %v5291_v14, 0.0  ;;  %v5294_v21 = vmax.f32 %v5292_v17, 0.0  ;;  %v5622_v14 = vld [vmem:[#allocation58 + $0x60] sm:$0xff]  ;;  %v5623_v17 = vld [vmem:[#allocation58 + $0x68] sm:$0xff] }
0x2928   :  { %12215 = vmatprep.subr.bf16.mxu1 %v12214_v10  ;;  %v12222_v19 = vpack.c.bf16 %v5623_v17, %v5622_v14  ;;  %v5609_v9 = vld [vmem:[#allocation60] sm:$0x7] }
0x2929   :  { %5295 = vst.msk [vmem:[#allocation2] sm:$0xff] %vm5248_vm9, %v5293_v15  ;;  %5296 = vst.msk [vmem:[#allocation2 + $0x10] sm:$0xff] %vm5248_vm9, %v5294_v21  ;;  %v12154_v16 = vpack.c.bf16 %v5294_v21, %v5293_v15  ;;  %12217 = vmatpush3.bf16.msra.mxu1 %v12214_v10  ;;  %v5625_v15 = vld [vmem:[#allocation58 + $0x78] sm:$0xff]  ;;  %v5789_v10 = vrot.slane %v5609_v9, %v15551_v20 }
0x292a   :  { %12219 = vmatprep.subr.bf16.mxu1 %v12218_v12  ;;  %v12226_v21 = vpack.c.bf16 %v5625_v15, %v5624_v18 }
0x292b   :  { %12155 = vmatprep.subr.bf16.mxu0 %v12154_v16 }
0x292c   :  { %12157 = vmatpush3.bf16.msra.mxu0 %v12154_v16  ;;  %v5378_v16 = vld [vmem:[#allocation57] sm:$0x7] }
0x292d   :  { %12159 = vmatprep.subr.bf16.mxu0 %v12158_v23  ;;  %12221 = vmatpush3.bf16.msra.mxu1 %v12218_v12 }
0x292e   :  { %12223 = vmatprep.subr.bf16.mxu1 %v12222_v19 }
0x292f   :  { %11049 = vmatmul.mubr.msk.f32.vlgmr.msra.gmra.mrb[32].mxu0 %vm1050_vm0, %v15747_v22 }
0x2930   :  { %12161 = vmatpush3.bf16.msra.mxu0 %v12158_v23  ;;  %v5374_v46 = vld [vmem:[#allocation2] sm:$0xff]  ;;  %v5375_v57 = vld [vmem:[#allocation2 + $0x10] sm:$0xff]  ;;  %v5564_v23 = vrot.slane %v5378_v16, %v15551_v20 }
0x2931   :  { %12163 = vmatprep.subr.bf16.mxu0 %v12162_v27  ;;  %12225 = vmatpush3.bf16.msra.mxu1 %v12222_v19 }
0x2932   :  { %12227 = vmatprep.subr.bf16.mxu1 %v12226_v21 }
0x2934   :  { %12165 = vmatpush3.bf16.msra.mxu0 %v12162_v27 }
0x2935   :  { %12167 = vmatprep.subr.bf16.mxu0 %v12166_v32  ;;  %12229 = vmatpush3.bf16.msra.mxu1 %v12226_v21 }
0x2938   :  { %12169 = vmatpush3.bf16.msra.mxu0 %v12166_v32 }
0x2939   :  { %12171 = vmatprep.subr.bf16.mxu0 %v12170_v35 }
0x293c   :  { %12173 = vmatpush3.bf16.msra.mxu0 %v12170_v35 }
0x293d   :  { %12175 = vmatprep.subr.bf16.mxu0 %v12174_v38 }
0x2940   :  { %12177 = vmatpush3.bf16.msra.mxu0 %v12174_v38 }
0x2941   :  { %12179 = vmatprep.subr.bf16.mxu0 %v12178_v41 }
0x2a02   :  { %v11050_v22 = vpop.f32.mrb[32].mxu0 }
0x2a03   :  { %5373 = vst.msk [vmem:[#allocation3 + $0x10] sm:$0xff] %vm5248_vm9, %v11050_v22  ;;  %v5363_v29 = vpop.f32.mrb[33].mxu0 }
0x2a04   :  { %5372 = vst.msk [vmem:[#allocation3] sm:$0xff] %vm5248_vm9, %v5363_v29 }
0x2a0a   :  { %v5377_v44 = vld [vmem:[#allocation3 + $0x10] sm:$0xff] }
0x2a0b   :  { %v5376_v43 = vld [vmem:[#allocation3] sm:$0xff] }
0x2a0c   :  { %11071 = vmatprep.mubr.msk.f32.mxu0 %vm5248_vm9, %v5376_v43 }
0x2a0d   :  { %11072 = vmatmul.mubr.msk.f32.vlgmr.msra.gmra.mrb[34].mxu0 %vm5248_vm9, %v5377_v44 }
0x2a0e   :  { %12181 = vmatpush3.bf16.msra.mxu0 %v12178_v41  ;;  %11094 = vmatprep.mubr.msk.f32.mxu0 %vm5248_vm9, %v5374_v46 }
0x2a0f   :  { %12183 = vmatprep.subr.bf16.mxu0 %v12182_v49 }
0x2a12   :  { %12185 = vmatpush3.bf16.msra.mxu0 %v12182_v49 }
0x2a13   :  { %12187 = vmatprep.subr.bf16.mxu0 %v12186_v48 }
0x2a16   :  { %12189 = vmatpush3.bf16.msra.mxu0 %v12186_v48 }
0x2a17   :  { %12191 = vmatprep.subr.bf16.mxu0 %v12190_v53 }
0x2a1a   :  { %12193 = vmatpush3.bf16.msra.mxu0 %v12190_v53 }
0x2a1b   :  { %12195 = vmatprep.subr.bf16.mxu0 %v12194_v56 }
0x2a1e   :  { %12197 = vmatpush3.bf16.msra.mxu0 %v12194_v56 }
0x2a21   :  { %11095 = vmatmul.mubr.msk.f32.vlgmr.msra.gmra.mrb[34].mxu0 %vm5248_vm9, %v5375_v57  ;;  %vm14764_vm9 = vmmov 1  }
0x2a22   :  { %11136 = vmatprep.mubr.msk.f32.mxu0 %vm1050_vm0, %v15866_v58 }
0x2af4   :  { %v11096_v24 = vpop.f32.mrb[34].mxu0 }
0x2af5   :  { %v5566_v26 = vadd.f32 %v11096_v24, %v5564_v23  ;;  %v5552_v27 = vpop.f32.mrb[35].mxu0 }
0x2af6   :  { %v5565_v30 = vadd.f32 %v5564_v23, %v5552_v27 }
0x2af8   :  { %v5567_v31 = vadd.f32 %v5566_v26, %v5565_v30 }
0x2afa   :  { %v5568_v32 = vrot.slane %v5567_v31, 4 }
0x2afc   :  { %v5569_v33 = vadd.f32 %v5568_v32, %v5567_v31 }
0x2afe   :  { %v5570_v34 = vrot.slane %v5569_v33, 2 }
0x2b00   :  { %v5571_v35 = vadd.f32 %v5570_v34, %v5569_v33 }
0x2b02   :  { %v5572_v36 = vrot.slane %v5571_v35, 1 }
0x2b04   :  { %v5573_v37 = vadd.f32 %v5572_v36, %v5571_v35 }
0x2b06   :  { %v5574_v38 = vmul.f32 0.0625, %v5573_v37 }
0x2b08   :  { %v5575_v39 = vsub.f32 %v5565_v30, %v5574_v38  ;;  %v5576_v40 = vsub.f32 %v5566_v26, %v5574_v38 }
0x2b0a   :  { %v5577_v41 = vmul.f32 %v5575_v39, %v5575_v39  ;;  %v5578_v22 = vmul.f32 %v5576_v40, %v5576_v40 }
0x2b0c   :  { %v5579_v29 = vadd.f32 %v5578_v22, %v5577_v41 }
0x2b0e   :  { %v5580_v47 = vrot.slane %v5579_v29, 4 }
0x2b10   :  { %v5581_v42 = vadd.f32 %v5580_v47, %v5579_v29 }
0x2b12   :  { %v5582_v43 = vrot.slane %v5581_v42, 2 }
0x2b14   :  { %v5583_v49 = vadd.f32 %v5582_v43, %v5581_v42 }
0x2b16   :  { %v5584_v44 = vrot.slane %v5583_v49, 1 }
0x2b18   :  { %v5585_v45 = vadd.f32 %v5584_v44, %v5583_v49 }
0x2b1a   :  { %v5586_v13 = vmul.f32 0.0625, %v5585_v45 }
0x2b1c   :  { %v5587_v46 = vadd.f32 1e-05, %v5586_v13 }
0x2b1e   :  { %13111 = vrsqrt.f32 %v5587_v46 }
0x2b28   :  { %v13112_v48 = vpop.eup %13111 }
0x2b29   :  { %v5589_v50 = vmul.f32 %v13112_v48, %v5378_v16 }
0x2b2b   :  { %v5598_v51 = vrot.slane %v5589_v50, %v15558_v52  ;;  %v5590_v53 = vmul.f32 %v5589_v50, %v5574_v38 }
0x2b2d   :  { %v5599_v54 = vmul.f32 %v5598_v51, %v5565_v30  ;;  %v5600_v55 = vmul.f32 %v5598_v51, %v5566_v26  ;;  %v5592_v56 = vrot.slane %v5590_v53, 7 }
0x2b2f   :  { %v5594_v57 = vsub.f32 %v5378_v16, %v5592_v56 }
0x2b31   :  { %v5604_v25 = vrot.slane %v5594_v57, %v15561_v60 }
0x2b33   :  { %v5605_v59 = vadd.f32 %v5604_v25, %v5599_v54  ;;  %v5606_v61 = vadd.f32 %v5604_v25, %v5600_v55 }
0x2b35   :  { %v5607_v62 = vmax.f32 %v5605_v59, 0.0  ;;  %v5608_v63 = vmax.f32 %v5606_v61, 0.0  ;;  %v5953_v59 = vld [vmem:[#allocation61 + $0x70] sm:$0xff]  ;;  %v5954_v61 = vld [vmem:[#allocation61 + $0x78] sm:$0xff] }
0x2b37   :  { %11129 = vmatprep.mubr.f32.mxu1 %v5607_v62  ;;  %v5955_v62 = vld [vmem:[#allocation61 + $0x80] sm:$0xff] }
0x2b38   :  { %11130 = vmatmul.mubr.f32.vlgmr.msra.gmra.mrb[36].mxu1 %v5608_v63  ;;  %v12238_v63 = vpack.c.bf16 %v5954_v61, %v5953_v59  ;;  %v6183_v59 = vld [vmem:[#allocation64 + $0x20] sm:$0xff]  ;;  %v6184_v61 = vld [vmem:[#allocation64 + $0x28] sm:$0xff] }
0x2b3a   :  { %12239 = vmatprep.subr.bf16.mxu1 %v12238_v63 }
0x2b3b   :  { %12241 = vmatpush3.bf16.msra.mxu1 %v12238_v63  ;;  %v6185_v63 = vld [vmem:[#allocation64 + $0x30] sm:$0xff] }
0x2c0b   :  { %v11131_v0 = vpop.f32.mrb[36].mxu1 }
0x2c0c   :  { %v5692_v1 = vpop.f32.mrb[37].mxu1 }
0x2c0d   :  { %v13051_v3 = vpack.i.bf16 %v11131_v0, %v5692_v1 }
0x2c0f   :  { %13052 = vrot.lane.b32.xlu0 %v13051_v3, %s14752_s27  ;;  %v5957_v3 = vld [vmem:[#allocation61 + $0x90] sm:$0xff] }
0x2c81   :  { %v13053_v5 = vpop.permute.xlu0 %13052 }
0x2c82   :  { %v13055_v6 = vunpack.i.h.bf16 %v13053_v5  ;;  %v13054_v4 = vunpack.i.l.bf16 %v13053_v5  ;;  %v5958_v5 = vld [vmem:[#allocation61 + $0x98] sm:$0xff] }
0x2c84   :  { %v12230_v8 = vpack.c.bf16 %v13055_v6, %v13054_v4  ;;  %v12246_v6 = vpack.c.bf16 %v5958_v5, %v5957_v3  ;;  %v5959_v4 = vld [vmem:[#allocation61 + $0xa0] sm:$0xff]  ;;  %v6188_v5 = vld [vmem:[#allocation64 + $0x48] sm:$0xff] }
0x2c85   :  { %v6187_v3 = vld [vmem:[#allocation64 + $0x40] sm:$0xff] }
0x2c86   :  { %12231 = vmatprep.subr.bf16.mxu0 %v12230_v8 }
0x2c87   :  { %12233 = vmatpush3.bf16.msra.mxu0 %v12230_v8  ;;  %v5960_v8 = vld [vmem:[#allocation61 + $0xa8] sm:$0xff] }
0x2c8a   :  { %11137 = vmatmul.mubr.msk.f32.vlgmr.msra.gmra.mrb[36].mxu0 %vm1050_vm0, %v15874_v2 }
0x2c8b   :  { %11143 = vmatprep.mubr.msk.f32.mxu0 %vm1050_vm0, %v15866_v58 }
0x2d5d   :  { %v11138_v7 = vpop.f32.mrb[36].mxu0 }
0x2d5e   :  { %v5785_v11 = vadd.f32 %v11138_v7, %v11131_v0  ;;  %v5775_v12 = vpop.f32.mrb[37].mxu0  ;;  %v5956_v0 = vld [vmem:[#allocation61 + $0x88] sm:$0xff]  ;;  %v5962_v7 = vld [vmem:[#allocation61 + $0xb8] sm:$0xff] }
0x2d5f   :  { %v5784_v14 = vadd.f32 %v5775_v12, %v5692_v1  ;;  %v12242_v1 = vpack.c.bf16 %v5956_v0, %v5955_v62  ;;  %v5963_v12 = vld [vmem:[#allocation61 + $0xc0] sm:$0xff]  ;;  %v12302_v62 = vpack.c.bf16 %v6184_v61, %v6183_v59 }
0x2d60   :  { %v5791_v17 = vadd.f32 %v5789_v10, %v5785_v11  ;;  %v6186_v0 = vld [vmem:[#allocation64 + $0x38] sm:$0xff] }
0x2d61   :  { %v5790_v18 = vadd.f32 %v5789_v10, %v5784_v14  ;;  %12243 = vmatprep.subr.bf16.mxu1 %v12242_v1  ;;  %v5961_v10 = vld [vmem:[#allocation61 + $0xb0] sm:$0xff]  ;;  %v5964_v14 = vld [vmem:[#allocation61 + $0xc8] sm:$0xff] }
0x2d62   :  { %v5793_v19 = vsel %vm1231_vm3, %v5791_v17, 0.0  ;;  %12245 = vmatpush3.bf16.msra.mxu1 %v12242_v1  ;;  %v12254_v11 = vpack.c.bf16 %v5962_v7, %v5961_v10  ;;  %v12306_v1 = vpack.c.bf16 %v6186_v0, %v6185_v63  ;;  %v6191_v10 = vld [vmem:[#allocation64 + $0x60] sm:$0xff]  ;;  %v6192_v7 = vld [vmem:[#allocation64 + $0x68] sm:$0xff] }
0x2d63   :  { %v5792_v15 = vsel %vm1231_vm3, %v5790_v18, 0.0  ;;  %12247 = vmatprep.subr.bf16.mxu1 %v12246_v6 }
0x2d64   :  { %v5794_v21 = vadd.f32 %v5793_v19, %v5792_v15  ;;  %v5966_v19 = vld [vmem:[#allocation61 + $0xd8] sm:$0xff] }
0x2d66   :  { %v5795_v16 = vrot.slane %v5794_v21, 4  ;;  %12249 = vmatpush3.bf16.msra.mxu1 %v12246_v6  ;;  %v12310_v6 = vpack.c.bf16 %v6188_v5, %v6187_v3  ;;  %v6516_v5 = vld [vmem:[#allocation67] sm:$0xff] }
0x2d68   :  { %v5796_v23 = vadd.f32 %v5795_v16, %v5794_v21  ;;  %v5939_v21 = vld [vmem:[#allocation61] sm:$0xff]  ;;  %v5940_v16 = vld [vmem:[#allocation61 + $0x8] sm:$0xff] }
0x2d6a   :  { %v5797_v24 = vrot.slane %v5796_v23, 2 }
0x2d6c   :  { %v5798_v26 = vadd.f32 %v5797_v24, %v5796_v23  ;;  %v12266_v23 = vpack.c.bf16 %v5940_v16, %v5939_v21 }
0x2d6e   :  { %v5799_v27 = vrot.slane %v5798_v26, 1 }
0x2d70   :  { %v5800_v30 = vadd.f32 %v5799_v27, %v5798_v26 }
0x2d72   :  { %v5801_v31 = vmul.f32 0.0625, %v5800_v30 }
0x2d74   :  { %v5802_v32 = vsub.f32 %v5790_v18, %v5801_v31  ;;  %v5803_v33 = vsub.f32 %v5791_v17, %v5801_v31 }
0x2d76   :  { %v5804_v34 = vmul.f32 %v5802_v32, %v5802_v32  ;;  %v5805_v35 = vmul.f32 %v5803_v33, %v5803_v33  ;;  %v5941_v33 = vld [vmem:[#allocation61 + $0x10] sm:$0xff] }
0x2d78   :  { %v5806_v36 = vsel %vm1231_vm3, %v5804_v34, 0.0  ;;  %v5807_v37 = vsel %vm1231_vm3, %v5805_v35, 0.0  ;;  %v5942_v34 = vld [vmem:[#allocation61 + $0x18] sm:$0xff] }
0x2d79   :  { %v5808_v38 = vadd.f32 %v5807_v37, %v5806_v36  ;;  %v12270_v36 = vpack.c.bf16 %v5942_v34, %v5941_v33 }
0x2d7b   :  { %v5809_v39 = vrot.slane %v5808_v38, 4 }
0x2d7d   :  { %v5810_v40 = vadd.f32 %v5809_v39, %v5808_v38  ;;  %v5943_v38 = vld [vmem:[#allocation61 + $0x20] sm:$0xff]  ;;  %v5944_v39 = vld [vmem:[#allocation61 + $0x28] sm:$0xff] }
0x2d7f   :  { %v5811_v41 = vrot.slane %v5810_v40, 2 }
0x2d81   :  { %v5812_v22 = vadd.f32 %v5811_v41, %v5810_v40  ;;  %v12274_v41 = vpack.c.bf16 %v5944_v39, %v5943_v38 }
0x2d83   :  { %v5813_v29 = vrot.slane %v5812_v22, 1 }
0x2d85   :  { %v5814_v47 = vadd.f32 %v5813_v29, %v5812_v22  ;;  %v5945_v22 = vld [vmem:[#allocation61 + $0x30] sm:$0xff]  ;;  %v5946_v29 = vld [vmem:[#allocation61 + $0x38] sm:$0xff] }
0x2d87   :  { %v5815_v42 = vmul.f32 0.0625, %v5814_v47  ;;  %v12278_v47 = vpack.c.bf16 %v5946_v29, %v5945_v22 }
0x2d89   :  { %v5816_v43 = vadd.f32 1e-05, %v5815_v42  ;;  %v5947_v42 = vld [vmem:[#allocation61 + $0x40] sm:$0xff] }
0x2d8b   :  { %13113 = vrsqrt.f32 %v5816_v43  ;;  %v5948_v43 = vld [vmem:[#allocation61 + $0x48] sm:$0xff] }
0x2d95   :  { %v13114_v49 = vpop.eup %13113 }
0x2d96   :  { %v5818_v44 = vmul.f32 %v13114_v49, %v5609_v9  ;;  %v12282_v49 = vpack.c.bf16 %v5948_v43, %v5947_v42 }
0x2d98   :  { %v5827_v45 = vrot.slane %v5818_v44, %v15558_v52  ;;  %v5819_v13 = vmul.f32 %v5818_v44, %v5801_v31  ;;  %v5949_v44 = vld [vmem:[#allocation61 + $0x50] sm:$0xff] }
0x2d9a   :  { %v5828_v46 = vmul.f32 %v5827_v45, %v5790_v18  ;;  %v5821_v48 = vrot.slane %v5819_v13, 7  ;;  %v5829_v50 = vmul.f32 %v5827_v45, %v5791_v17  ;;  %v12258_v17 = vpack.c.bf16 %v5964_v14, %v5963_v12  ;;  %v5965_v18 = vld [vmem:[#allocation61 + $0xd0] sm:$0xff]  ;;  %v5950_v45 = vld [vmem:[#allocation61 + $0x58] sm:$0xff] }
0x2d9b   :  { %v12262_v15 = vpack.c.bf16 %v5966_v19, %v5965_v18  ;;  %v12286_v13 = vpack.c.bf16 %v5950_v45, %v5949_v44  ;;  %v12318_v12 = vpack.c.bf16 %v6192_v7, %v6191_v10  ;;  %v6194_v14 = vld [vmem:[#allocation64 + $0x78] sm:$0xff]  ;;  %v6520_v7 = vld [vmem:[#allocation67 + $0x20] sm:$0xff] }
0x2d9c   :  { %v5823_v51 = vsub.f32 %v5609_v9, %v5821_v48  ;;  %v12250_v9 = vpack.c.bf16 %v5960_v8, %v5959_v4  ;;  %v5952_v48 = vld [vmem:[#allocation61 + $0x68] sm:$0xff]  ;;  %v6189_v4 = vld [vmem:[#allocation64 + $0x50] sm:$0xff]  ;;  %v6190_v8 = vld [vmem:[#allocation64 + $0x58] sm:$0xff] }
0x2d9d   :  { %v5938_v18 = vld [vmem:[#allocation63] sm:$0x7] }
0x2d9e   :  { %v5833_v53 = vrot.slane %v5823_v51, %v15561_v60  ;;  %12251 = vmatprep.subr.bf16.mxu1 %v12250_v9  ;;  %v6133_v19 = vrot.slane %v5938_v18, %v15551_v20 }
0x2d9f   :  { %12253 = vmatpush3.bf16.msra.mxu1 %v12250_v9  ;;  %v12314_v9 = vpack.c.bf16 %v6190_v8, %v6189_v4  ;;  %v6518_v4 = vld [vmem:[#allocation67 + $0x10] sm:$0xff] }
0x2da0   :  { %v5834_v54 = vadd.f32 %v5833_v53, %v5828_v46  ;;  %v5835_v55 = vadd.f32 %v5833_v53, %v5829_v50  ;;  %12255 = vmatprep.subr.bf16.mxu1 %v12254_v11  ;;  %v5951_v46 = vld [vmem:[#allocation61 + $0x60] sm:$0xff] }
0x2da1   :  { %v12290_v50 = vpack.c.bf16 %v5952_v48, %v5951_v46  ;;  %v6179_v53 = vld [vmem:[#allocation64] sm:$0xff] }
0x2da2   :  { %v5836_v56 = vmax.f32 %v5834_v54, 0.0  ;;  %v5837_v57 = vmax.f32 %v5835_v55, 0.0  ;;  %v6180_v54 = vld [vmem:[#allocation64 + $0x8] sm:$0xff] }
0x2da3   :  { %12257 = vmatpush3.bf16.msra.mxu1 %v12254_v11  ;;  %v12294_v55 = vpack.c.bf16 %v6180_v54, %v6179_v53  ;;  %v6193_v11 = vld [vmem:[#allocation64 + $0x70] sm:$0xff] }
0x2da4   :  { %v12234_v25 = vpack.c.bf16 %v5837_v57, %v5836_v56  ;;  %12259 = vmatprep.subr.bf16.mxu1 %v12258_v17 }
0x2da6   :  { %12235 = vmatprep.subr.bf16.mxu0 %v12234_v25 }
0x2da7   :  { %12237 = vmatpush3.bf16.msra.mxu0 %v12234_v25  ;;  %12261 = vmatpush3.bf16.msra.mxu1 %v12258_v17  ;;  %v12322_v17 = vpack.c.bf16 %v6194_v14, %v6193_v11  ;;  %v6521_v11 = vld [vmem:[#allocation67 + $0x28] sm:$0xff]  ;;  %v6522_v14 = vld [vmem:[#allocation67 + $0x30] sm:$0xff] }
0x2da8   :  { %12263 = vmatprep.subr.bf16.mxu1 %v12262_v15  ;;  %12295 = vmatprep.subr.bf16.mxu0 %v12294_v55 }
0x2daa   :  { %11144 = vmatmul.mubr.msk.f32.vlgmr.msra.gmra.mrb[38].mxu0 %vm1050_vm0, %v15874_v2 }
0x2dab   :  { %12265 = vmatpush3.bf16.msra.mxu1 %v12262_v15  ;;  %12297 = vmatpush3.bf16.msra.mxu0 %v12294_v55 }
0x2dac   :  { %12267 = vmatprep.subr.bf16.mxu1 %v12266_v23 }
0x2e7d   :  { %v11145_v24 = vpop.f32.mrb[38].mxu0 }
0x2e7e   :  { %5928 = vrot.lane.b32.xlu0 %v11145_v24, %s14756_s25  ;;  %v5915_v26 = vpop.f32.mrb[39].mxu0 }
0x2e7f   :  { %5926 = vrot.lane.b32.xlu1 %v5915_v26, %s14756_s25 }
0x2e82   :  { %5842 = vrot.lane.b32.xlu0 %v5837_v57, %s14756_s25  ;;  %v6182_v57 = vld [vmem:[#allocation64 + $0x18] sm:$0xff] }
0x2e83   :  { %5840 = vrot.lane.b32.xlu1 %v5836_v56, %s14756_s25  ;;  %v6181_v56 = vld [vmem:[#allocation64 + $0x10] sm:$0xff] }
0x2e84   :  { %v12298_v25 = vpack.c.bf16 %v6182_v57, %v6181_v56 }
0x2e86   :  { %12299 = vmatprep.subr.bf16.mxu0 %v12298_v25 }
0x2e87   :  { %12301 = vmatpush3.bf16.msra.mxu0 %v12298_v25 }
0x2e88   :  { %12303 = vmatprep.subr.bf16.mxu0 %v12302_v62 }
0x2e8b   :  { %12305 = vmatpush3.bf16.msra.mxu0 %v12302_v62 }
0x2e8c   :  { %12307 = vmatprep.subr.bf16.mxu0 %v12306_v1 }
0x2e8f   :  { %12309 = vmatpush3.bf16.msra.mxu0 %v12306_v1 }
0x2e90   :  { %12311 = vmatprep.subr.bf16.mxu0 %v12310_v6 }
0x2e93   :  { %12313 = vmatpush3.bf16.msra.mxu0 %v12310_v6  ;;  %v6517_v6 = vld [vmem:[#allocation67 + $0x8] sm:$0xff] }
0x2e94   :  { %12315 = vmatprep.subr.bf16.mxu0 %v12314_v9  ;;  %v12362_v8 = vpack.c.bf16 %v6517_v6, %v6516_v5 }
0x2e97   :  { %12317 = vmatpush3.bf16.msra.mxu0 %v12314_v9  ;;  %v6519_v9 = vld [vmem:[#allocation67 + $0x18] sm:$0xff] }
0x2e98   :  { %12319 = vmatprep.subr.bf16.mxu0 %v12318_v12  ;;  %v12365_v10 = vpack.c.bf16 %v6519_v9, %v6518_v4 }
0x2e9b   :  { %12321 = vmatpush3.bf16.msra.mxu0 %v12318_v12  ;;  %v12368_v12 = vpack.c.bf16 %v6521_v11, %v6520_v7  ;;  %v6532_v7 = vld [vmem:[#allocation67 + $0x80] sm:$0xff]  ;;  %v6533_v11 = vld [vmem:[#allocation67 + $0x88] sm:$0xff] }
0x2e9c   :  { %12323 = vmatprep.subr.bf16.mxu0 %v12322_v17 }
0x2e9f   :  { %12325 = vmatpush3.bf16.msra.mxu0 %v12322_v17  ;;  %v6523_v17 = vld [vmem:[#allocation67 + $0x38] sm:$0xff] }
0x2ef0   :  { %v5929_v27 = vpop.permute.xlu0 %5928 }
0x2ef1   :  { %5933 = vst.msk [vmem:[#allocation3 + $0x10] sm:$0xff] %vm5846_vm10, %v5929_v27  ;;  %v5927_v30 = vpop.permute.xlu1 %5926 }
0x2ef2   :  { %5932 = vst.msk [vmem:[#allocation3] sm:$0xff] %vm5846_vm10, %v5927_v30 }
0x2ef4   :  { %v5843_v31 = vpop.permute.xlu0 %5842 }
0x2ef5   :  { %5848 = vst.msk [vmem:[#allocation2 + $0x10] sm:$0xff] %vm5846_vm10, %v5843_v31  ;;  %v5841_v32 = vpop.permute.xlu1 %5840 }
0x2ef6   :  { %5847 = vst.msk [vmem:[#allocation2] sm:$0xff] %vm5846_vm10, %v5841_v32  ;;  %vm12854_vm10 = vmpackc.low %vm9522_vm8, %vm14764_vm9 }
0x2ef8   :  { %v5937_v37 = vld [vmem:[#allocation3 + $0x10] sm:$0xff] }
0x2ef9   :  { %v5936_v35 = vld [vmem:[#allocation3] sm:$0xff] }
0x2efa   :  { %11174 = vmatprep.mubr.msk.f32.mxu1 %vm5967_vm11, %v5936_v35 }
0x2efb   :  { %11175 = vmatmul.mubr.msk.f32.vlgmr.msra.gmra.mrb[38].mxu1 %vm5967_vm11, %v5937_v37 }
0x2efc   :  { %12269 = vmatpush3.bf16.msra.mxu1 %v12266_v23  ;;  %v5935_v51 = vld [vmem:[#allocation2 + $0x10] sm:$0xff] }
0x2efd   :  { %12271 = vmatprep.subr.bf16.mxu1 %v12270_v36  ;;  %v5934_v40 = vld [vmem:[#allocation2] sm:$0xff] }
0x2efe   :  { %11205 = vmatprep.mubr.msk.f32.mxu1 %vm5967_vm11, %v5934_v40 }
0x2f00   :  { %12273 = vmatpush3.bf16.msra.mxu1 %v12270_v36 }
0x2f01   :  { %12275 = vmatprep.subr.bf16.mxu1 %v12274_v41 }
0x2f04   :  { %12277 = vmatpush3.bf16.msra.mxu1 %v12274_v41 }
0x2f05   :  { %12279 = vmatprep.subr.bf16.mxu1 %v12278_v47 }
0x2f08   :  { %12281 = vmatpush3.bf16.msra.mxu1 %v12278_v47 }
0x2f09   :  { %12283 = vmatprep.subr.bf16.mxu1 %v12282_v49 }
0x2f0c   :  { %12285 = vmatpush3.bf16.msra.mxu1 %v12282_v49 }
0x2f0d   :  { %12287 = vmatprep.subr.bf16.mxu1 %v12286_v13 }
0x2f10   :  { %12289 = vmatpush3.bf16.msra.mxu1 %v12286_v13 }
0x2f11   :  { %12291 = vmatprep.subr.bf16.mxu1 %v12290_v50 }
0x2f14   :  { %12293 = vmatpush3.bf16.msra.mxu1 %v12290_v50 }
0x2f15   :  { %12361 = vmatprep.subr.bf16.mxu1 %v14755_v28 }
0x2f17   :  { %11206 = vmatmul.mubr.msk.f32.vlgmr.msra.gmra.mrb[38].mxu1 %vm5967_vm11, %v5935_v51  ;;  %vm9379_vm11 = vcmask 752640  }
0x2f18   :  { %12363 = vmatpush1.bf16.msra.mxu1 %v12362_v8 }
0x2f19   :  { %12364 = vmatprep.subr.bf16.mxu1 %v14755_v28 }
0x2f1c   :  { %12366 = vmatpush1.bf16.msra.mxu1 %v12365_v10 }
0x2f1d   :  { %12367 = vmatprep.subr.bf16.mxu1 %v14755_v28 }
0x2f20   :  { %12369 = vmatpush1.bf16.msra.mxu1 %v12368_v12  ;;  %v12386_v12 = vpack.c.bf16 %v6533_v11, %v6532_v7  ;;  %v6767_v11 = vld [vmem:[#allocation70 + $0x20] sm:$0xff] }
0x2f21   :  { %12370 = vmatprep.subr.bf16.mxu1 %v14755_v28 }
0x2fea   :  { %v11207_v15 = vpop.f32.mrb[38].mxu1 }
0x2feb   :  { %v6135_v21 = vadd.f32 %v11207_v15, %v6133_v19  ;;  %v6121_v16 = vpop.f32.mrb[39].mxu1  ;;  %v6525_v15 = vld [vmem:[#allocation67 + $0x48] sm:$0xff] }
0x2fec   :  { %v6134_v23 = vadd.f32 %v6133_v19, %v6121_v16  ;;  %v6524_v19 = vld [vmem:[#allocation67 + $0x40] sm:$0xff]  ;;  %v6526_v16 = vld [vmem:[#allocation67 + $0x50] sm:$0xff] }
0x2fee   :  { %v6136_v24 = vadd.f32 %v6135_v21, %v6134_v23 }
0x2ff0   :  { %v6137_v26 = vrot.slane %v6136_v24, 4 }
0x2ff2   :  { %v6138_v27 = vadd.f32 %v6137_v26, %v6136_v24  ;;  %v6528_v26 = vld [vmem:[#allocation67 + $0x60] sm:$0xff] }
0x2ff4   :  { %v6139_v30 = vrot.slane %v6138_v27, 2 }
0x2ff6   :  { %v6140_v31 = vadd.f32 %v6139_v30, %v6138_v27  ;;  %v6529_v27 = vld [vmem:[#allocation67 + $0x68] sm:$0xff] }
0x2ff7   :  { %v12380_v30 = vpack.c.bf16 %v6529_v27, %v6528_v26  ;;  %v6536_v26 = vld [vmem:[#allocation67 + $0xa0] sm:$0xff] }
0x2ff8   :  { %v6141_v32 = vrot.slane %v6140_v31, 1 }
0x2ffa   :  { %v6142_v33 = vadd.f32 %v6141_v32, %v6140_v31  ;;  %v6178_v31 = vld [vmem:[#allocation66] sm:$0x7] }
0x2ffb   :  { %v6358_v32 = vrot.slane %v6178_v31, %v15551_v20 }
0x2ffc   :  { %v6143_v34 = vmul.f32 0.0625, %v6142_v33 }
0x2ffe   :  { %v6144_v35 = vsub.f32 %v6134_v23, %v6143_v34  ;;  %v6145_v36 = vsub.f32 %v6135_v21, %v6143_v34 }
0x3000   :  { %v6146_v37 = vmul.f32 %v6144_v35, %v6144_v35  ;;  %v6147_v38 = vmul.f32 %v6145_v36, %v6145_v36 }
0x3002   :  { %v6148_v39 = vadd.f32 %v6147_v38, %v6146_v37 }
0x3004   :  { %v6149_v40 = vrot.slane %v6148_v39, 4 }
0x3006   :  { %v6150_v41 = vadd.f32 %v6149_v40, %v6148_v39 }
0x3008   :  { %v6151_v22 = vrot.slane %v6150_v41, 2 }
0x300a   :  { %v6152_v29 = vadd.f32 %v6151_v22, %v6150_v41 }
0x300c   :  { %v6153_v47 = vrot.slane %v6152_v29, 1 }
0x300e   :  { %v6154_v42 = vadd.f32 %v6153_v47, %v6152_v29 }
0x3010   :  { %v6155_v43 = vmul.f32 0.0625, %v6154_v42 }
0x3012   :  { %v6156_v49 = vadd.f32 1e-05, %v6155_v43 }
0x3014   :  { %13115 = vrsqrt.f32 %v6156_v49 }
0x301e   :  { %v13116_v44 = vpop.eup %13115 }
0x301f   :  { %v6158_v45 = vmul.f32 %v13116_v44, %v5938_v18 }
0x3021   :  { %v6167_v13 = vrot.slane %v6158_v45, %v15558_v52  ;;  %v6159_v46 = vmul.f32 %v6158_v45, %v6143_v34 }
0x3023   :  { %v6168_v48 = vmul.f32 %v6167_v13, %v6134_v23  ;;  %v6169_v50 = vmul.f32 %v6167_v13, %v6135_v21  ;;  %v6161_v51 = vrot.slane %v6159_v46, 7  ;;  %v12374_v21 = vpack.c.bf16 %v6525_v15, %v6524_v19  ;;  %v6527_v23 = vld [vmem:[#allocation67 + $0x58] sm:$0xff] }
0x3024   :  { %v12377_v24 = vpack.c.bf16 %v6527_v23, %v6526_v16  ;;  %v6534_v23 = vld [vmem:[#allocation67 + $0x90] sm:$0xff] }
0x3025   :  { %v6163_v53 = vsub.f32 %v5938_v18, %v6161_v51  ;;  %v12371_v18 = vpack.c.bf16 %v6523_v17, %v6522_v14 }
0x3027   :  { %v6173_v54 = vrot.slane %v6163_v53, %v15561_v60  ;;  %12372 = vmatpush1.bf16.msra.mxu1 %v12371_v18 }
0x3028   :  { %12373 = vmatprep.subr.bf16.mxu1 %v14755_v28 }
0x3029   :  { %v6174_v55 = vadd.f32 %v6173_v54, %v6168_v48  ;;  %v6175_v56 = vadd.f32 %v6173_v54, %v6169_v50 }
0x302b   :  { %v6176_v57 = vmax.f32 %v6174_v55, 0.0  ;;  %v6177_v25 = vmax.f32 %v6175_v56, 0.0  ;;  %12375 = vmatpush1.bf16.msra.mxu1 %v12374_v21 }
0x302c   :  { %12376 = vmatprep.subr.bf16.mxu1 %v14755_v28 }
0x302d   :  { %11240 = vmatprep.mubr.f32.mxu0 %v6176_v57 }
0x302e   :  { %11241 = vmatmul.mubr.f32.vlgmr.msra.gmra.mrb[40].mxu0 %v6177_v25 }
0x302f   :  { %11247 = vmatprep.mubr.msk.f32.mxu0 %vm1050_vm0, %v15866_v58  ;;  %12378 = vmatpush1.bf16.msra.mxu1 %v12377_v24  ;;  %v6535_v24 = vld [vmem:[#allocation67 + $0x98] sm:$0xff] }
0x3030   :  { %12379 = vmatprep.subr.bf16.mxu1 %v14755_v28  ;;  %v12335_v27 = vpack.c.bf16 %v6535_v24, %v6534_v23  ;;  %v6773_v23 = vld [vmem:[#allocation70 + $0x50] sm:$0xff]  ;;  %v6774_v24 = vld [vmem:[#allocation70 + $0x58] sm:$0xff] }
0x3033   :  { %12381 = vmatpush1.bf16.msra.mxu1 %v12380_v30  ;;  %v6537_v30 = vld [vmem:[#allocation67 + $0xa8] sm:$0xff] }
0x3034   :  { %12382 = vmatprep.subr.bf16.mxu1 %v14755_v28 }
0x3101   :  { %v11242_v59 = vpop.f32.mrb[40].mxu0 }
0x3102   :  { %v6261_v61 = vpop.f32.mrb[41].mxu0 }
0x3103   :  { %v13056_v62 = vpack.i.bf16 %v11242_v59, %v6261_v61 }
0x3105   :  { %13057 = vrot.lane.b32.xlu1 %v13056_v62, %s14752_s27 }
0x3177   :  { %v13058_v63 = vpop.permute.xlu1 %13057 }
0x3178   :  { %v13060_v0 = vunpack.i.h.bf16 %v13058_v63  ;;  %v13059_v1 = vunpack.i.l.bf16 %v13058_v63 }
0x317a   :  { %v12326_v3 = vpack.c.bf16 %v13060_v0, %v13059_v1  ;;  %v6530_v1 = vld [vmem:[#allocation67 + $0x70] sm:$0xff] }
0x317c   :  { %12327 = vmatprep.subr.bf16.mxu0 %v12326_v3 }
0x317d   :  { %12329 = vmatpush3.bf16.msra.mxu0 %v12326_v3  ;;  %v6531_v3 = vld [vmem:[#allocation67 + $0x78] sm:$0xff] }
0x317e   :  { %v12383_v5 = vpack.c.bf16 %v6531_v3, %v6530_v1 }
0x3180   :  { %11248 = vmatmul.mubr.msk.f32.vlgmr.msra.gmra.mrb[42].mxu0 %vm1050_vm0, %v15874_v2  ;;  %12384 = vmatpush1.bf16.msra.mxu1 %v12383_v5 }
0x3181   :  { %11254 = vmatprep.mubr.msk.f32.mxu0 %vm1050_vm0, %v15866_v58  ;;  %12385 = vmatprep.subr.bf16.mxu1 %v14755_v28 }
0x3184   :  { %12387 = vmatpush1.bf16.msra.mxu1 %v12386_v12  ;;  %v6768_v12 = vld [vmem:[#allocation70 + $0x28] sm:$0xff] }
0x3253   :  { %v11249_v33 = vpop.f32.mrb[42].mxu0 }
0x3254   :  { %v6354_v34 = vadd.f32 %v11249_v33, %v11242_v59  ;;  %v6344_v35 = vpop.f32.mrb[43].mxu0  ;;  %v6539_v33 = vld [vmem:[#allocation67 + $0xb8] sm:$0xff] }
0x3255   :  { %v6353_v36 = vadd.f32 %v6344_v35, %v6261_v61  ;;  %v6540_v35 = vld [vmem:[#allocation67 + $0xc0] sm:$0xff] }
0x3256   :  { %v6360_v37 = vadd.f32 %v6358_v32, %v6354_v34 }
0x3257   :  { %v6359_v38 = vadd.f32 %v6358_v32, %v6353_v36  ;;  %v6538_v32 = vld [vmem:[#allocation67 + $0xb0] sm:$0xff]  ;;  %v6541_v36 = vld [vmem:[#allocation67 + $0xc8] sm:$0xff] }
0x3258   :  { %v6362_v39 = vsel %vm1231_vm3, %v6360_v37, 0.0  ;;  %v12341_v34 = vpack.c.bf16 %v6539_v33, %v6538_v32  ;;  %v6778_v33 = vld [vmem:[#allocation70 + $0x78] sm:$0xff] }
0x3259   :  { %v6361_v40 = vsel %vm1231_vm3, %v6359_v38, 0.0 }
0x325a   :  { %v6363_v41 = vadd.f32 %v6362_v39, %v6361_v40  ;;  %v6544_v40 = vld [vmem:[#allocation67 + $0xe0] sm:$0xff] }
0x325c   :  { %v6364_v22 = vrot.slane %v6363_v41, 4 }
0x325e   :  { %v6365_v29 = vadd.f32 %v6364_v22, %v6363_v41  ;;  %v6545_v41 = vld [vmem:[#allocation67 + $0xe8] sm:$0xff] }
0x3260   :  { %v6366_v47 = vrot.slane %v6365_v29, 2 }
0x3262   :  { %v6367_v42 = vadd.f32 %v6366_v47, %v6365_v29  ;;  %v12350_v29 = vpack.c.bf16 %v6545_v41, %v6544_v40  ;;  %v6546_v47 = vld [vmem:[#allocation67 + $0xf0] sm:$0xff] }
0x3264   :  { %v6368_v43 = vrot.slane %v6367_v42, 1 }
0x3266   :  { %v6369_v49 = vadd.f32 %v6368_v43, %v6367_v42  ;;  %v6547_v42 = vld [vmem:[#allocation67 + $0xf8] sm:$0xff] }
0x3268   :  { %v6370_v44 = vmul.f32 0.0625, %v6369_v49  ;;  %v12353_v49 = vpack.c.bf16 %v6547_v42, %v6546_v47 }
0x326a   :  { %v6371_v45 = vsub.f32 %v6359_v38, %v6370_v44  ;;  %v6372_v13 = vsub.f32 %v6360_v37, %v6370_v44 }
0x326c   :  { %v6373_v46 = vmul.f32 %v6371_v45, %v6371_v45  ;;  %v6374_v48 = vmul.f32 %v6372_v13, %v6372_v13 }
0x326e   :  { %v6375_v50 = vsel %vm1231_vm3, %v6373_v46, 0.0  ;;  %v6376_v51 = vsel %vm1231_vm3, %v6374_v48, 0.0  ;;  %v6548_v48 = vld [vmem:[#allocation67 + $0x100] sm:$0xff] }
0x326f   :  { %v6377_v53 = vadd.f32 %v6376_v51, %v6375_v50  ;;  %v6549_v50 = vld [vmem:[#allocation67 + $0x108] sm:$0xff] }
0x3270   :  { %v12356_v51 = vpack.c.bf16 %v6549_v50, %v6548_v48 }
0x3271   :  { %v6378_v54 = vrot.slane %v6377_v53, 4 }
0x3273   :  { %v6379_v55 = vadd.f32 %v6378_v54, %v6377_v53  ;;  %v6550_v53 = vld [vmem:[#allocation67 + $0x110] sm:$0xff]  ;;  %v6551_v54 = vld [vmem:[#allocation67 + $0x118] sm:$0xff] }
0x3275   :  { %v6380_v56 = vrot.slane %v6379_v55, 2 }
0x3277   :  { %v6381_v57 = vadd.f32 %v6380_v56, %v6379_v55  ;;  %v12359_v55 = vpack.c.bf16 %v6551_v54, %v6550_v53 }
0x3279   :  { %v6382_v25 = vrot.slane %v6381_v57, 1 }
0x327b   :  { %v6383_v59 = vadd.f32 %v6382_v25, %v6381_v57 }
0x327d   :  { %v6384_v61 = vmul.f32 0.0625, %v6383_v59 }
0x327f   :  { %v6385_v62 = vadd.f32 1e-05, %v6384_v61 }
0x3281   :  { %13117 = vrsqrt.f32 %v6385_v62 }
0x328b   :  { %v13118_v63 = vpop.eup %13117 }
0x328c   :  { %v6387_v0 = vmul.f32 %v13118_v63, %v6178_v31 }
0x328e   :  { %v6388_v6 = vmul.f32 %v6387_v0, %v6370_v44  ;;  %v6396_v4 = vrot.slane %v6387_v0, %v15558_v52 }
0x3290   :  { %v6390_v8 = vrot.slane %v6388_v6, 7  ;;  %v6397_v9 = vmul.f32 %v6396_v4, %v6359_v38  ;;  %v6398_v10 = vmul.f32 %v6396_v4, %v6360_v37  ;;  %v12344_v37 = vpack.c.bf16 %v6541_v36, %v6540_v35  ;;  %v6543_v38 = vld [vmem:[#allocation67 + $0xd8] sm:$0xff]  ;;  %v6763_v6 = vld [vmem:[#allocation70] sm:$0xff]  ;;  %v6764_v4 = vld [vmem:[#allocation70 + $0x8] sm:$0xff] }
0x3291   :  { %v6515_v35 = vld [vmem:[#allocation69] sm:$0x7] }
0x3292   :  { %v6392_v14 = vsub.f32 %v6178_v31, %v6390_v8  ;;  %v12338_v31 = vpack.c.bf16 %v6537_v30, %v6536_v26  ;;  %v12388_v8 = vpack.c.bf16 %v6764_v4, %v6763_v6  ;;  %v12408_v26 = vpack.c.bf16 %v6774_v24, %v6773_v23  ;;  %v6776_v30 = vld [vmem:[#allocation70 + $0x68] sm:$0xff] }
0x3294   :  { %v6402_v17 = vrot.slane %v6392_v14, %v15561_v60  ;;  %v12396_v14 = vpack.c.bf16 %v6768_v12, %v6767_v11 }
0x3296   :  { %v6403_v18 = vadd.f32 %v6402_v17, %v6397_v9  ;;  %v6404_v19 = vadd.f32 %v6402_v17, %v6398_v10  ;;  %v6765_v9 = vld [vmem:[#allocation70 + $0x10] sm:$0xff]  ;;  %v6766_v10 = vld [vmem:[#allocation70 + $0x18] sm:$0xff] }
0x3297   :  { %v12392_v7 = vpack.c.bf16 %v6766_v10, %v6765_v9  ;;  %v6769_v17 = vld [vmem:[#allocation70 + $0x30] sm:$0xff] }
0x3298   :  { %v6405_v15 = vmax.f32 %v6403_v18, 0.0  ;;  %v6406_v21 = vmax.f32 %v6404_v19, 0.0  ;;  %v6770_v18 = vld [vmem:[#allocation70 + $0x38] sm:$0xff] }
0x3299   :  { %v12400_v19 = vpack.c.bf16 %v6770_v18, %v6769_v17 }
0x329a   :  { %6409 = vrot.lane.b32.xlu0 %v6405_v15, %s14757_s26  ;;  %v12330_v16 = vpack.c.bf16 %v6406_v21, %v6405_v15  ;;  %v6771_v15 = vld [vmem:[#allocation70 + $0x40] sm:$0xff] }
0x329c   :  { %12331 = vmatprep.subr.bf16.mxu0 %v12330_v16 }
0x329d   :  { %12333 = vmatpush3.bf16.msra.mxu0 %v12330_v16 }
0x329e   :  { %6411 = vrot.lane.b32.xlu0 %v6406_v21, %s14757_s26  ;;  %12334 = vmatprep.subr.bf16.mxu0 %v14755_v28  ;;  %v6772_v21 = vld [vmem:[#allocation70 + $0x48] sm:$0xff] }
0x329f   :  { %v12404_v16 = vpack.c.bf16 %v6772_v21, %v6771_v15 }
0x32a0   :  { %11255 = vmatmul.mubr.msk.f32.vlgmr.msra.gmra.mrb[44].mxu0 %vm1050_vm0, %v15874_v2  ;;  %v6542_v2 = vld [vmem:[#allocation67 + $0xd0] sm:$0xff] }
0x32a1   :  { %12336 = vmatpush1.bf16.msra.mxu0 %v12335_v27  ;;  %v12347_v39 = vpack.c.bf16 %v6543_v38, %v6542_v2  ;;  %v6775_v27 = vld [vmem:[#allocation70 + $0x60] sm:$0xff]  ;;  %v6717_v38 = vrot.slane %v6515_v35, %v15551_v20 }
0x32a2   :  { %12337 = vmatprep.subr.bf16.mxu0 %v14755_v28  ;;  %v12412_v32 = vpack.c.bf16 %v6776_v30, %v6775_v27  ;;  %v15968_v30 = vld [vmem:[#allocation4 + $0x8] sm:$0xff] }
0x32a5   :  { %12339 = vmatpush1.bf16.msra.mxu0 %v12338_v31  ;;  %v6777_v31 = vld [vmem:[#allocation70 + $0x70] sm:$0xff] }
0x32a6   :  { %12340 = vmatprep.subr.bf16.mxu0 %v14755_v28 }
0x32a9   :  { %12342 = vmatpush1.bf16.msra.mxu0 %v12341_v34  ;;  %v12416_v34 = vpack.c.bf16 %v6778_v33, %v6777_v31  ;;  %v15972_v31 = vld [vmem:[#allocation4] sm:$0xff] }
0x32aa   :  { %12343 = vmatprep.subr.bf16.mxu0 %v14755_v28  ;;  %v7097_v33 = vld [vmem:[#allocation73 + $0x8] sm:$0xff] }
0x32ad   :  { %12345 = vmatpush1.bf16.msra.mxu0 %v12344_v37 }
0x32ae   :  { %12346 = vmatprep.subr.bf16.mxu0 %v14755_v28 }
0x32b1   :  { %12348 = vmatpush1.bf16.msra.mxu0 %v12347_v39 }
0x32b2   :  { %12349 = vmatprep.subr.bf16.mxu0 %v14755_v28 }
0x32b5   :  { %12351 = vmatpush1.bf16.msra.mxu0 %v12350_v29 }
0x32b6   :  { %12352 = vmatprep.subr.bf16.mxu0 %v14755_v28 }
0x32b9   :  { %12354 = vmatpush1.bf16.msra.mxu0 %v12353_v49 }
0x32ba   :  { %12355 = vmatprep.subr.bf16.mxu0 %v14755_v28 }
0x32bd   :  { %12357 = vmatpush1.bf16.msra.mxu0 %v12356_v51 }
0x32be   :  { %12358 = vmatprep.subr.bf16.mxu0 %v14755_v28 }
0x32c1   :  { %12360 = vmatpush1.bf16.msra.mxu0 %v12359_v55 }
0x32c2   :  { %12389 = vmatprep.subr.bf16.mxu0 %v12388_v8 }
0x330c   :  { %v6410_v22 = vpop.permute.xlu0 %6409 }
0x330d   :  { %6416 = vst.msk [vmem:[#allocation2] sm:$0xff] %vm6415_vm12, %v6410_v22 }
0x330e   :  { %6417 = vst.msk [vmem:[#allocation2 + $0x8] sm:$0xff] %vm1050_vm0, %v6410_v22 }
0x3310   :  { %v6412_v43 = vpop.permute.xlu0 %6411 }
0x3311   :  { %6418 = vst.msk [vmem:[#allocation2 + $0x10] sm:$0xff] %vm6415_vm12, %v6412_v43 }
0x3312   :  { %6419 = vst.msk [vmem:[#allocation2 + $0x18] sm:$0xff] %vm1050_vm0, %v6412_v43 }
0x3314   :  { %v15934_v45 = vld [vmem:[#allocation2] sm:$0xff] }
0x3315   :  { %v6508_v44 = vld [vmem:[#allocation2 + $0x8] sm:$0xff] }
0x3316   :  { %9795 = vmatprep.mubr.msk.f32.mxu1 %vm1050_vm0, %v6508_v44 }
0x3317   :  { %6704 = vmatmul.mubr.f32.vlgmr.msra.gmra.mrb[40].mxu1 %v15934_v45 }
0x3318   :  { %v15939_v46 = vld [vmem:[#allocation2 + $0x10] sm:$0xff] }
0x3319   :  { %v6510_v13 = vld [vmem:[#allocation2 + $0x18] sm:$0xff] }
0x331a   :  { %9796 = vmatprep.mubr.msk.f32.mxu1 %vm1050_vm0, %v6510_v13 }
0x331b   :  { %6709 = vmatmul.mubr.f32.gmra.mrb[42].mxu1 %v15939_v46 }
0x331c   :  { %11296 = vmatprep.mubr.msk.f32.mxu1 %vm1050_vm0, %v15866_v58 }
0x3373   :  { %v11256_v56 = vpop.f32.mrb[44].mxu0 }
0x3374   :  { %v6486_v57 = vpop.f32.mrb[45].mxu0 }
0x3375   :  { %6497 = vrot.lane.b32.xlu1 %v6486_v57, %s14757_s26 }
0x3379   :  { %6499 = vrot.lane.b32.xlu1 %v11256_v56, %s14757_s26 }
0x33e7   :  { %v6498_v25 = vpop.permute.xlu1 %6497 }
0x33e8   :  { %6503 = vst.msk [vmem:[#allocation3] sm:$0xff] %vm6415_vm12, %v6498_v25 }
0x33e9   :  { %6504 = vst.msk [vmem:[#allocation3 + $0x8] sm:$0xff] %vm1050_vm0, %v6498_v25 }
0x33ea   :  { %v6705_v58 = vpop.f32.mrb[40].mxu1 }
0x33eb   :  { %v6707_v59 = vpop.f32.mrb[41].mxu1  ;;  %v6500_v61 = vpop.permute.xlu1 %6499 }
0x33ec   :  { %6505 = vst.msk [vmem:[#allocation3 + $0x10] sm:$0xff] %vm6415_vm12, %v6500_v61  ;;  %vm9596_vm12 = vcmask 58368  }
0x33ed   :  { %6506 = vst.msk [vmem:[#allocation3 + $0x18] sm:$0xff] %vm1050_vm0, %v6500_v61 }
0x33ee   :  { %v6710_v62 = vpop.f32.mrb[42].mxu1 }
0x33ef   :  { %v6712_v63 = vpop.f32.mrb[43].mxu1  ;;  %v15952_v1 = vld [vmem:[#allocation3] sm:$0xff] }
0x33f0   :  { %v6512_v0 = vld [vmem:[#allocation3 + $0x8] sm:$0xff] }
0x33f1   :  { %9793 = vmatprep.mubr.msk.f32.mxu0 %vm1050_vm0, %v6512_v0 }
0x33f2   :  { %6623 = vmatmul.mubr.f32.vlgmr.msra.gmra.mrb[46].mxu0 %v15952_v1 }
0x33f3   :  { %v15956_v5 = vld [vmem:[#allocation3 + $0x10] sm:$0xff]  ;;  %12391 = vmatpush3.bf16.msra.mxu0 %v12388_v8 }
0x33f4   :  { %v6514_v3 = vld [vmem:[#allocation3 + $0x18] sm:$0xff]  ;;  %12393 = vmatprep.subr.bf16.mxu0 %v12392_v7 }
0x33f5   :  { %9794 = vmatprep.mubr.msk.f32.mxu0 %vm1050_vm0, %v6514_v3 }
0x33f6   :  { %6628 = vmatmul.mubr.f32.gmra.mrb[48].mxu0 %v15956_v5 }
0x33f7   :  { %12395 = vmatpush3.bf16.msra.mxu0 %v12392_v7 }
0x33f8   :  { %12397 = vmatprep.subr.bf16.mxu0 %v12396_v14 }
0x33fb   :  { %12399 = vmatpush3.bf16.msra.mxu0 %v12396_v14 }
0x33fc   :  { %12401 = vmatprep.subr.bf16.mxu0 %v12400_v19 }
0x33ff   :  { %12403 = vmatpush3.bf16.msra.mxu0 %v12400_v19 }
0x3400   :  { %12405 = vmatprep.subr.bf16.mxu0 %v12404_v16 }
0x3403   :  { %12407 = vmatpush3.bf16.msra.mxu0 %v12404_v16 }
0x3404   :  { %12409 = vmatprep.subr.bf16.mxu0 %v12408_v26 }
0x3407   :  { %12411 = vmatpush3.bf16.msra.mxu0 %v12408_v26 }
0x3408   :  { %12413 = vmatprep.subr.bf16.mxu0 %v12412_v32 }
0x340b   :  { %12415 = vmatpush3.bf16.msra.mxu0 %v12412_v32  ;;  %v7096_v32 = vld [vmem:[#allocation73] sm:$0xff] }
0x340c   :  { %12417 = vmatprep.subr.bf16.mxu0 %v12416_v34 }
0x340f   :  { %12419 = vmatpush3.bf16.msra.mxu0 %v12416_v34  ;;  %v7098_v34 = vld [vmem:[#allocation73 + $0x10] sm:$0xff] }
0x3410   :  { %12461 = vmatprep.subr.bf16.mxu0 %v14755_v28 }
0x34c5   :  { %v6624_v36 = vpop.f32.mrb[46].mxu0 }
0x34c6   :  { %v6706_v37 = vadd.f32 %v6705_v58, %v6624_v36  ;;  %v6626_v2 = vpop.f32.mrb[47].mxu0  ;;  %v7099_v36 = vld [vmem:[#allocation73 + $0x18] sm:$0xff] }
0x34c7   :  { %v7100_v2 = vld [vmem:[#allocation73 + $0x20] sm:$0xff] }
0x34c8   :  { %v6718_v22 = vadd.f32 %v6717_v38, %v6706_v37  ;;  %v12465_v37 = vpack.c.bf16 %v7099_v36, %v7098_v34 }
0x34c9   :  { %v6629_v39 = vpop.f32.mrb[48].mxu0 }
0x34ca   :  { %v6711_v40 = vadd.f32 %v6710_v62, %v6629_v39  ;;  %v6631_v41 = vpop.f32.mrb[49].mxu0 }
0x34cb   :  { %v7103_v41 = vld [vmem:[#allocation73 + $0x38] sm:$0xff] }
0x34cc   :  { %v6719_v29 = vadd.f32 %v6717_v38, %v6711_v40  ;;  %v7101_v38 = vld [vmem:[#allocation73 + $0x28] sm:$0xff]  ;;  %v7102_v40 = vld [vmem:[#allocation73 + $0x30] sm:$0xff] }
0x34cd   :  { %v12468_v39 = vpack.c.bf16 %v7101_v38, %v7100_v2 }
0x34ce   :  { %v6720_v47 = vadd.f32 %v6719_v29, %v6718_v22 }
0x34d0   :  { %v6721_v42 = vrot.slane %v6720_v47, 4 }
0x34d2   :  { %v6722_v43 = vadd.f32 %v6721_v42, %v6720_v47  ;;  %v7105_v47 = vld [vmem:[#allocation73 + $0x48] sm:$0xff] }
0x34d4   :  { %v6723_v49 = vrot.slane %v6722_v43, 2 }
0x34d6   :  { %v6724_v44 = vadd.f32 %v6723_v49, %v6722_v43  ;;  %v7106_v43 = vld [vmem:[#allocation73 + $0x50] sm:$0xff]  ;;  %v7107_v49 = vld [vmem:[#allocation73 + $0x58] sm:$0xff] }
0x34d8   :  { %v6725_v13 = vrot.slane %v6724_v44, 1 }
0x34da   :  { %v6726_v48 = vadd.f32 %v6725_v13, %v6724_v44  ;;  %v12477_v44 = vpack.c.bf16 %v7107_v49, %v7106_v43  ;;  %v7108_v13 = vld [vmem:[#allocation73 + $0x60] sm:$0xff] }
0x34db   :  { %v7116_v49 = vld [vmem:[#allocation73 + $0xa0] sm:$0xff] }
0x34dc   :  { %v6727_v50 = vmul.f32 0.0625, %v6726_v48  ;;  %v7109_v48 = vld [vmem:[#allocation73 + $0x68] sm:$0xff] }
0x34de   :  { %v6728_v51 = vsub.f32 %v6718_v22, %v6727_v50  ;;  %v6729_v53 = vsub.f32 %v6719_v29, %v6727_v50 }
0x34e0   :  { %v6730_v54 = vmul.f32 %v6728_v51, %v6728_v51  ;;  %v6731_v55 = vmul.f32 %v6729_v53, %v6729_v53  ;;  %v7110_v51 = vld [vmem:[#allocation73 + $0x70] sm:$0xff]  ;;  %v7111_v53 = vld [vmem:[#allocation73 + $0x78] sm:$0xff] }
0x34e2   :  { %v6732_v56 = vadd.f32 %v6731_v55, %v6730_v54  ;;  %v12483_v54 = vpack.c.bf16 %v7111_v53, %v7110_v51  ;;  %v7112_v55 = vld [vmem:[#allocation73 + $0x80] sm:$0xff] }
0x34e4   :  { %v6733_v57 = vrot.slane %v6732_v56, 4 }
0x34e6   :  { %v6734_v25 = vadd.f32 %v6733_v57, %v6732_v56  ;;  %v7113_v56 = vld [vmem:[#allocation73 + $0x88] sm:$0xff] }
0x34e7   :  { %v12486_v57 = vpack.c.bf16 %v7113_v56, %v7112_v55 }
0x34e8   :  { %v6735_v58 = vrot.slane %v6734_v25, 2 }
0x34ea   :  { %v6736_v59 = vadd.f32 %v6735_v58, %v6734_v25  ;;  %v6762_v25 = vld [vmem:[#allocation72] sm:$0x7] }
0x34eb   :  { %v6942_v58 = vrot.slane %v6762_v25, %v15551_v20 }
0x34ec   :  { %v6737_v61 = vrot.slane %v6736_v59, 1 }
0x34ee   :  { %v6738_v62 = vadd.f32 %v6737_v61, %v6736_v59 }
0x34f0   :  { %v6739_v63 = vmul.f32 0.0625, %v6738_v62 }
0x34f2   :  { %v6740_v0 = vadd.f32 1e-05, %v6739_v63 }
0x34f4   :  { %13119 = vrsqrt.f32 %v6740_v0 }
0x34fe   :  { %v13120_v3 = vpop.eup %13119 }
0x34ff   :  { %v6742_v6 = vmul.f32 %v13120_v3, %v6515_v35 }
0x3501   :  { %v6751_v4 = vrot.slane %v6742_v6, %v15558_v52  ;;  %v6743_v8 = vmul.f32 %v6742_v6, %v6727_v50  ;;  %v12480_v50 = vpack.c.bf16 %v7109_v48, %v7108_v13 }
0x3503   :  { %v6753_v9 = vmul.f32 %v6751_v4, %v6719_v29  ;;  %v6745_v10 = vrot.slane %v6743_v8, 7  ;;  %v6752_v7 = vmul.f32 %v6751_v4, %v6718_v22  ;;  %v12471_v22 = vpack.c.bf16 %v7103_v41, %v7102_v40  ;;  %v7104_v29 = vld [vmem:[#allocation73 + $0x40] sm:$0xff]  ;;  %v7115_v40 = vld [vmem:[#allocation73 + $0x98] sm:$0xff] }
0x3504   :  { %v12474_v42 = vpack.c.bf16 %v7105_v47, %v7104_v29 }
0x3505   :  { %v6747_v11 = vsub.f32 %v6515_v35, %v6745_v10  ;;  %v12462_v35 = vpack.c.bf16 %v7097_v33, %v7096_v32 }
0x3507   :  { %v6757_v12 = vrot.slane %v6747_v11, %v15561_v60 }
0x3509   :  { %v6758_v14 = vadd.f32 %v6757_v12, %v6752_v7  ;;  %v6759_v17 = vadd.f32 %v6757_v12, %v6753_v9 }
0x350b   :  { %v6760_v18 = vmax.f32 %v6758_v14, 0.0  ;;  %v6761_v19 = vmax.f32 %v6759_v17, 0.0 }
0x350d   :  { %11289 = vmatprep.mubr.f32.mxu0 %v6760_v18 }
0x350e   :  { %11290 = vmatmul.mubr.f32.vlgmr.msra.gmra.mrb[50].mxu0 %v6761_v19 }
0x350f   :  { %12463 = vmatpush1.bf16.msra.mxu0 %v12462_v35 }
0x3510   :  { %12464 = vmatprep.subr.bf16.mxu0 %v14755_v28 }
0x3513   :  { %12466 = vmatpush1.bf16.msra.mxu0 %v12465_v37 }
0x3514   :  { %12467 = vmatprep.subr.bf16.mxu0 %v14755_v28 }
0x3517   :  { %12469 = vmatpush1.bf16.msra.mxu0 %v12468_v39  ;;  %v7114_v39 = vld [vmem:[#allocation73 + $0x90] sm:$0xff] }
0x3518   :  { %12470 = vmatprep.subr.bf16.mxu0 %v14755_v28  ;;  %v12489_v41 = vpack.c.bf16 %v7115_v40, %v7114_v39 }
0x351b   :  { %12472 = vmatpush1.bf16.msra.mxu0 %v12471_v22 }
0x351c   :  { %12473 = vmatprep.subr.bf16.mxu0 %v14755_v28 }
0x351f   :  { %12475 = vmatpush1.bf16.msra.mxu0 %v12474_v42 }
0x3520   :  { %12476 = vmatprep.subr.bf16.mxu0 %v14755_v28 }
0x3523   :  { %12478 = vmatpush1.bf16.msra.mxu0 %v12477_v44  ;;  %v7117_v44 = vld [vmem:[#allocation73 + $0xa8] sm:$0xff] }
0x3524   :  { %12479 = vmatprep.subr.bf16.mxu0 %v14755_v28  ;;  %v12492_v13 = vpack.c.bf16 %v7117_v44, %v7116_v49  ;;  %v7451_v44 = vld [vmem:[#allocation76 + $0x58] sm:$0xff] }
0x3527   :  { %12481 = vmatpush1.bf16.msra.mxu0 %v12480_v50 }
0x3528   :  { %12482 = vmatprep.subr.bf16.mxu0 %v14755_v28 }
0x352b   :  { %12484 = vmatpush1.bf16.msra.mxu0 %v12483_v54 }
0x352c   :  { %12485 = vmatprep.subr.bf16.mxu0 %v14755_v28 }
0x352f   :  { %12487 = vmatpush1.bf16.msra.mxu0 %v12486_v57  ;;  %v7118_v57 = vld [vmem:[#allocation73 + $0xb0] sm:$0xff] }
0x3530   :  { %12488 = vmatprep.subr.bf16.mxu0 %v14755_v28 }
0x3533   :  { %12490 = vmatpush1.bf16.msra.mxu0 %v12489_v41 }
0x3534   :  { %12491 = vmatprep.subr.bf16.mxu0 %v14755_v28 }
0x3537   :  { %12493 = vmatpush1.bf16.msra.mxu0 %v12492_v13  ;;  %v7452_v13 = vld [vmem:[#allocation76 + $0x60] sm:$0xff] }
0x35e1   :  { %v11291_v15 = vpop.f32.mrb[50].mxu0 }
0x35e2   :  { %v15964_v21 = vpop.f32.mrb[51].mxu0 }
0x35e3   :  { %v13061_v16 = vpack.i.bf16 %v11291_v15, %v15964_v21 }
0x35e5   :  { %13062 = vrot.lane.b32.xlu0 %v13061_v16, %s14752_s27 }
0x3657   :  { %v13063_v23 = vpop.permute.xlu0 %13062 }
0x3658   :  { %v13065_v24 = vunpack.i.h.bf16 %v13063_v23  ;;  %v13064_v26 = vunpack.i.l.bf16 %v13063_v23 }
0x365a   :  { %v12420_v27 = vpack.c.bf16 %v13065_v24, %v13064_v26 }
0x365c   :  { %12421 = vmatprep.subr.bf16.mxu1 %v12420_v27 }
0x365d   :  { %12423 = vmatpush3.bf16.msra.mxu1 %v12420_v27 }
0x3660   :  { %11297 = vmatmul.mubr.msk.f32.vlgmr.msra.gmra.mrb[44].mxu1 %vm1050_vm0, %v15968_v30 }
0x3661   :  { %11303 = vmatprep.mubr.msk.f32.mxu1 %vm1050_vm0, %v15972_v31 }
0x3733   :  { %v11298_v59 = vpop.f32.mrb[44].mxu1 }
0x3734   :  { %v6938_v61 = vadd.f32 %v11298_v59, %v11291_v15  ;;  %v6928_v62 = vpop.f32.mrb[45].mxu1 }
0x3735   :  { %v6937_v63 = vadd.f32 %v6928_v62, %v15964_v21 }
0x3736   :  { %v6944_v0 = vadd.f32 %v6942_v58, %v6938_v61  ;;  %v7121_v61 = vld [vmem:[#allocation73 + $0xc8] sm:$0xff] }
0x3737   :  { %v6943_v3 = vadd.f32 %v6942_v58, %v6937_v63  ;;  %v7120_v58 = vld [vmem:[#allocation73 + $0xc0] sm:$0xff]  ;;  %v7122_v63 = vld [vmem:[#allocation73 + $0xd0] sm:$0xff] }
0x3738   :  { %v6946_v6 = vsel %vm1231_vm3, %v6944_v0, 0.0  ;;  %v12432_v62 = vpack.c.bf16 %v7121_v61, %v7120_v58 }
0x3739   :  { %v6945_v4 = vsel %vm1231_vm3, %v6943_v3, 0.0 }
0x373a   :  { %v6947_v8 = vadd.f32 %v6946_v6, %v6945_v4  ;;  %v7124_v6 = vld [vmem:[#allocation73 + $0xe0] sm:$0xff]  ;;  %v7125_v4 = vld [vmem:[#allocation73 + $0xe8] sm:$0xff] }
0x373c   :  { %v6948_v9 = vrot.slane %v6947_v8, 4 }
0x373e   :  { %v6949_v10 = vadd.f32 %v6948_v9, %v6947_v8  ;;  %v12438_v8 = vpack.c.bf16 %v7125_v4, %v7124_v6  ;;  %v7126_v9 = vld [vmem:[#allocation73 + $0xf0] sm:$0xff] }
0x3740   :  { %v6950_v7 = vrot.slane %v6949_v10, 2 }
0x3742   :  { %v6951_v11 = vadd.f32 %v6950_v7, %v6949_v10  ;;  %v7127_v10 = vld [vmem:[#allocation73 + $0xf8] sm:$0xff] }
0x3743   :  { %v12441_v7 = vpack.c.bf16 %v7127_v10, %v7126_v9 }
0x3744   :  { %v6952_v12 = vrot.slane %v6951_v11, 1 }
0x3746   :  { %v6953_v14 = vadd.f32 %v6952_v12, %v6951_v11  ;;  %v7128_v11 = vld [vmem:[#allocation73 + $0x100] sm:$0xff]  ;;  %v7129_v12 = vld [vmem:[#allocation73 + $0x108] sm:$0xff] }
0x3748   :  { %v6954_v17 = vmul.f32 0.0625, %v6953_v14 }
0x374a   :  { %v6955_v18 = vsub.f32 %v6943_v3, %v6954_v17  ;;  %v6956_v19 = vsub.f32 %v6944_v0, %v6954_v17 }
0x374c   :  { %v6957_v15 = vmul.f32 %v6955_v18, %v6955_v18  ;;  %v6958_v16 = vmul.f32 %v6956_v19, %v6956_v19  ;;  %v7130_v18 = vld [vmem:[#allocation73 + $0x110] sm:$0xff]  ;;  %v7131_v19 = vld [vmem:[#allocation73 + $0x118] sm:$0xff] }
0x374e   :  { %v6959_v21 = vsel %vm1231_vm3, %v6957_v15, 0.0  ;;  %v6960_v23 = vsel %vm1231_vm3, %v6958_v16, 0.0  ;;  %v12447_v16 = vpack.c.bf16 %v7131_v19, %v7130_v18 }
0x374f   :  { %v6961_v24 = vadd.f32 %v6960_v23, %v6959_v21  ;;  %v7132_v21 = vld [vmem:[#allocation73 + $0x120] sm:$0xff]  ;;  %v7133_v23 = vld [vmem:[#allocation73 + $0x128] sm:$0xff] }
0x3751   :  { %v6962_v26 = vrot.slane %v6961_v24, 4 }
0x3753   :  { %v6963_v27 = vadd.f32 %v6962_v26, %v6961_v24  ;;  %v12450_v26 = vpack.c.bf16 %v7133_v23, %v7132_v21 }
0x3755   :  { %v6964_v32 = vrot.slane %v6963_v27, 2 }
0x3757   :  { %v6965_v33 = vadd.f32 %v6964_v32, %v6963_v27  ;;  %v7134_v27 = vld [vmem:[#allocation73 + $0x130] sm:$0xff]  ;;  %v7135_v32 = vld [vmem:[#allocation73 + $0x138] sm:$0xff] }
0x3759   :  { %v6966_v34 = vrot.slane %v6965_v33, 1 }
0x375b   :  { %v6967_v35 = vadd.f32 %v6966_v34, %v6965_v33  ;;  %v12453_v34 = vpack.c.bf16 %v7135_v32, %v7134_v27 }
0x375d   :  { %v6968_v36 = vmul.f32 0.0625, %v6967_v35  ;;  %v7136_v35 = vld [vmem:[#allocation73 + $0x140] sm:$0xff] }
0x375f   :  { %v6969_v37 = vadd.f32 1e-05, %v6968_v36  ;;  %v7137_v36 = vld [vmem:[#allocation73 + $0x148] sm:$0xff] }
0x3761   :  { %13121 = vrsqrt.f32 %v6969_v37  ;;  %v12456_v37 = vpack.c.bf16 %v7137_v36, %v7136_v35 }
0x376b   :  { %v13122_v2 = vpop.eup %13121 }
0x376c   :  { %v6971_v38 = vmul.f32 %v13122_v2, %v6762_v25  ;;  %v7138_v2 = vld [vmem:[#allocation73 + $0x150] sm:$0xff] }
0x376e   :  { %v6972_v22 = vmul.f32 %v6971_v38, %v6954_v17  ;;  %v6980_v29 = vrot.slane %v6971_v38, %v15558_v52  ;;  %v12444_v17 = vpack.c.bf16 %v7129_v12, %v7128_v11 }
0x3770   :  { %v6974_v47 = vrot.slane %v6972_v22, 7  ;;  %v6981_v42 = vmul.f32 %v6980_v29, %v6943_v3  ;;  %v6982_v43 = vmul.f32 %v6980_v29, %v6944_v0  ;;  %v7123_v0 = vld [vmem:[#allocation73 + $0xd8] sm:$0xff] }
0x3771   :  { %v12435_v3 = vpack.c.bf16 %v7123_v0, %v7122_v63 }
0x3772   :  { %v6976_v48 = vsub.f32 %v6762_v25, %v6974_v47  ;;  %v7119_v25 = vld [vmem:[#allocation73 + $0xb8] sm:$0xff] }
0x3773   :  { %v12429_v59 = vpack.c.bf16 %v7119_v25, %v7118_v57 }
0x3774   :  { %v6986_v50 = vrot.slane %v6976_v48, %v15561_v60  ;;  %v7453_v48 = vld [vmem:[#allocation76 + $0x68] sm:$0xff] }
0x3776   :  { %v6987_v51 = vadd.f32 %v6986_v50, %v6981_v42  ;;  %v6988_v53 = vadd.f32 %v6986_v50, %v6982_v43  ;;  %v12498_v50 = vpack.c.bf16 %v7452_v13, %v7451_v44  ;;  %v7457_v44 = vld [vmem:[#allocation76 + $0x88] sm:$0xff]  ;;  %v7458_v13 = vld [vmem:[#allocation76 + $0x90] sm:$0xff] }
0x3778   :  { %v6989_v54 = vmax.f32 %v6987_v51, 0.0  ;;  %v6990_v55 = vmax.f32 %v6988_v53, 0.0  ;;  %v7454_v51 = vld [vmem:[#allocation76 + $0x70] sm:$0xff]  ;;  %12499 = vmatprep.subr.bf16.mxu0 %v12498_v50 }
0x3779   :  { %v12502_v53 = vpack.c.bf16 %v7454_v51, %v7453_v48  ;;  %v12510_v48 = vpack.c.bf16 %v7458_v13, %v7457_v44  ;;  %v7460_v51 = vld [vmem:[#allocation76 + $0xa0] sm:$0xff] }
0x377a   :  { %6993 = vrot.lane.b32.xlu1 %v6989_v54, %s14758_s28  ;;  %v12424_v56 = vpack.c.bf16 %v6990_v55, %v6989_v54  ;;  %v7455_v54 = vld [vmem:[#allocation76 + $0x78] sm:$0xff] }
0x377c   :  { %12425 = vmatprep.subr.bf16.mxu1 %v12424_v56 }
0x377d   :  { %12427 = vmatpush3.bf16.msra.mxu1 %v12424_v56  ;;  %v7095_v56 = vld [vmem:[#allocation75] sm:$0x7] }
0x377e   :  { %6995 = vrot.lane.b32.xlu1 %v6990_v55, %s14758_s28  ;;  %12428 = vmatprep.subr.bf16.mxu1 %v14755_v28  ;;  %v7456_v55 = vld [vmem:[#allocation76 + $0x80] sm:$0xff]  ;;  %v7306_v25 = vrot.slane %v7095_v56, %v15551_v20 }
0x3780   :  { %11304 = vmatmul.mubr.msk.f32.vlgmr.msra.gmra.mrb[46].mxu1 %vm1050_vm0, %v15968_v30 }
0x3781   :  { %12430 = vmatpush1.bf16.msra.mxu1 %v12429_v59 }
0x3782   :  { %12431 = vmatprep.subr.bf16.mxu1 %v14755_v28 }
0x3785   :  { %12433 = vmatpush1.bf16.msra.mxu1 %v12432_v62 }
0x3786   :  { %12434 = vmatprep.subr.bf16.mxu1 %v14755_v28 }
0x3789   :  { %12436 = vmatpush1.bf16.msra.mxu1 %v12435_v3 }
0x378a   :  { %12437 = vmatprep.subr.bf16.mxu1 %v14755_v28 }
0x378d   :  { %12439 = vmatpush1.bf16.msra.mxu1 %v12438_v8 }
0x378e   :  { %12440 = vmatprep.subr.bf16.mxu1 %v14755_v28 }
0x3791   :  { %12442 = vmatpush1.bf16.msra.mxu1 %v12441_v7 }
0x3792   :  { %12443 = vmatprep.subr.bf16.mxu1 %v14755_v28 }
0x3795   :  { %12445 = vmatpush1.bf16.msra.mxu1 %v12444_v17 }
0x3796   :  { %12446 = vmatprep.subr.bf16.mxu1 %v14755_v28 }
0x3799   :  { %12448 = vmatpush1.bf16.msra.mxu1 %v12447_v16 }
0x379a   :  { %12449 = vmatprep.subr.bf16.mxu1 %v14755_v28 }
0x379d   :  { %12451 = vmatpush1.bf16.msra.mxu1 %v12450_v26 }
0x379e   :  { %12452 = vmatprep.subr.bf16.mxu1 %v14755_v28 }
0x37a1   :  { %12454 = vmatpush1.bf16.msra.mxu1 %v12453_v34 }
0x37a2   :  { %12455 = vmatprep.subr.bf16.mxu1 %v14755_v28 }
0x37a5   :  { %12457 = vmatpush1.bf16.msra.mxu1 %v12456_v37 }
0x37a6   :  { %12458 = vmatprep.subr.bf16.mxu1 %v14755_v28 }
0x37ec   :  { %v6994_v14 = vpop.permute.xlu1 %6993 }
0x37ed   :  { %7000 = vst.msk [vmem:[#allocation2 + $0x8] sm:$0xff] %vm6999_vm13, %v6994_v14 }
0x37f0   :  { %v6996_v15 = vpop.permute.xlu1 %6995 }
0x37f1   :  { %7001 = vst.msk [vmem:[#allocation2 + $0x18] sm:$0xff] %vm6999_vm13, %v6996_v15 }
0x37f4   :  { %v7088_v24 = vld [vmem:[#allocation2 + $0x8] sm:$0xff] }
0x37f5   :  { %9803 = vmatprep.mubr.msk.f32.mxu0 %vm7140_vm14, %v7088_v24 }
0x37f6   :  { %7293 = vmatmul.mubr.f32.vlgmr.msra.gmra.mrb[52].mxu0 %v15934_v45  ;;  %v7139_v45 = vld [vmem:[#allocation73 + $0x158] sm:$0xff] }
0x37f7   :  { %v12459_v38 = vpack.c.bf16 %v7139_v45, %v7138_v2  ;;  %12501 = vmatpush3.bf16.msra.mxu0 %v12498_v50  ;;  %v7459_v50 = vld [vmem:[#allocation76 + $0x98] sm:$0xff] }
0x37f8   :  { %v7090_v33 = vld [vmem:[#allocation2 + $0x18] sm:$0xff]  ;;  %12503 = vmatprep.subr.bf16.mxu0 %v12502_v53 }
0x37f9   :  { %9804 = vmatprep.mubr.msk.f32.mxu0 %vm7140_vm14, %v7090_v33  ;;  %12460 = vmatpush1.bf16.msra.mxu1 %v12459_v38 }
0x37fa   :  { %7298 = vmatmul.mubr.f32.gmra.mrb[54].mxu0 %v15939_v46 }
0x37fb   :  { %12505 = vmatpush3.bf16.msra.mxu0 %v12502_v53  ;;  %v12514_v53 = vpack.c.bf16 %v7460_v51, %v7459_v50 }
0x3853   :  { %v11305_v39 = vpop.f32.mrb[46].mxu1 }
0x3854   :  { %v7068_v40 = vpop.f32.mrb[47].mxu1 }
0x3855   :  { %7079 = vrot.lane.b32.xlu0 %v7068_v40, %s14758_s28 }
0x3859   :  { %7081 = vrot.lane.b32.xlu0 %v11305_v39, %s14758_s28 }
0x38c7   :  { %v7080_v46 = vpop.permute.xlu0 %7079 }
0x38c8   :  { %7085 = vst.msk [vmem:[#allocation3 + $0x8] sm:$0xff] %vm6999_vm13, %v7080_v46 }
0x38c9   :  { %v7294_v41 = vpop.f32.mrb[52].mxu0 }
0x38ca   :  { %v7296_v22 = vpop.f32.mrb[53].mxu0 }
0x38cb   :  { %v7082_v29 = vpop.permute.xlu0 %7081 }
0x38cc   :  { %7086 = vst.msk [vmem:[#allocation3 + $0x18] sm:$0xff] %vm6999_vm13, %v7082_v29 }
0x38cd   :  { %v7299_v47 = vpop.f32.mrb[54].mxu0 }
0x38ce   :  { %v7301_v42 = vpop.f32.mrb[55].mxu0 }
0x38cf   :  { %v7092_v43 = vld [vmem:[#allocation3 + $0x8] sm:$0xff] }
0x38d0   :  { %9801 = vmatprep.mubr.msk.f32.mxu1 %vm7140_vm14, %v7092_v43 }
0x38d1   :  { %7212 = vmatmul.mubr.f32.vlgmr.msra.gmra.mrb[48].mxu1 %v15952_v1  ;;  %v12506_v1 = vpack.c.bf16 %v7456_v55, %v7455_v54  ;;  %v7461_v54 = vld [vmem:[#allocation76 + $0xa8] sm:$0xff]  ;;  %v7440_v55 = vld [vmem:[#allocation76] sm:$0xff] }
0x38d3   :  { %v7094_v49 = vld [vmem:[#allocation3 + $0x18] sm:$0xff]  ;;  %12507 = vmatprep.subr.bf16.mxu0 %v12506_v1 }
0x38d4   :  { %9802 = vmatprep.mubr.msk.f32.mxu1 %vm7140_vm14, %v7094_v49  ;;  %12509 = vmatpush3.bf16.msra.mxu0 %v12506_v1  ;;  %v7441_v1 = vld [vmem:[#allocation76 + $0x8] sm:$0xff] }
0x38d5   :  { %7217 = vmatmul.mubr.f32.gmra.mrb[50].mxu1 %v15956_v5  ;;  %12511 = vmatprep.subr.bf16.mxu0 %v12510_v48 }
0x38d6   :  { %11310 = vmatprep.mubr.msk.f32.mxu1 %vm1050_vm0, %v15972_v31 }
0x38d8   :  { %12513 = vmatpush3.bf16.msra.mxu0 %v12510_v48 }
0x38d9   :  { %12515 = vmatprep.subr.bf16.mxu0 %v12514_v53 }
0x38dc   :  { %12517 = vmatpush3.bf16.msra.mxu0 %v12514_v53 }
0x38dd   :  { %11333 = vmatprep.subr.mxu0 %v7461_v54 }
0x38e0   :  { %11334 = vmatpush3.msra.mxu0 %v7461_v54 }
0x39a4   :  { %v7213_v5 = vpop.f32.mrb[48].mxu1 }
0x39a5   :  { %v7295_v57 = vadd.f32 %v7294_v41, %v7213_v5  ;;  %v7215_v58 = vpop.f32.mrb[49].mxu1 }
0x39a6   :  { %v7443_v58 = vld [vmem:[#allocation76 + $0x18] sm:$0xff] }
0x39a7   :  { %v7307_v61 = vadd.f32 %v7306_v25, %v7295_v57 }
0x39a8   :  { %v7218_v59 = vpop.f32.mrb[50].mxu1 }
0x39a9   :  { %v7300_v62 = vadd.f32 %v7299_v47, %v7218_v59  ;;  %v7220_v63 = vpop.f32.mrb[51].mxu1  ;;  %v7310_v3 = vsel %vm7309_vm15, %v7307_v61, 0.0 }
0x39aa   :  { %v7444_v63 = vld [vmem:[#allocation76 + $0x20] sm:$0xff] }
0x39ab   :  { %v7308_v0 = vadd.f32 %v7306_v25, %v7300_v62  ;;  %v7442_v25 = vld [vmem:[#allocation76 + $0x10] sm:$0xff] }
0x39ad   :  { %v7311_v6 = vsel %vm7309_vm15, %v7308_v0, 0.0 }
0x39ae   :  { %v7312_v4 = vadd.f32 %v7311_v6, %v7310_v3 }
0x39b0   :  { %v7313_v8 = vrot.slane %v7312_v4, 4 }
0x39b2   :  { %v7314_v9 = vadd.f32 %v7313_v8, %v7312_v4  ;;  %v7446_v4 = vld [vmem:[#allocation76 + $0x30] sm:$0xff]  ;;  %v7447_v8 = vld [vmem:[#allocation76 + $0x38] sm:$0xff] }
0x39b4   :  { %v7315_v10 = vrot.slane %v7314_v9, 2 }
0x39b6   :  { %v7316_v7 = vadd.f32 %v7315_v10, %v7314_v9  ;;  %v12530_v9 = vpack.c.bf16 %v7447_v8, %v7446_v4  ;;  %v7448_v10 = vld [vmem:[#allocation76 + $0x40] sm:$0xff] }
0x39b8   :  { %v7317_v11 = vrot.slane %v7316_v7, 1 }
0x39ba   :  { %v7318_v12 = vadd.f32 %v7317_v11, %v7316_v7  ;;  %v7449_v7 = vld [vmem:[#allocation76 + $0x48] sm:$0xff] }
0x39bb   :  { %v12534_v11 = vpack.c.bf16 %v7449_v7, %v7448_v10 }
0x39bc   :  { %v7319_v14 = vmul.f32 0.0625, %v7318_v12  ;;  %v7450_v12 = vld [vmem:[#allocation76 + $0x50] sm:$0xff] }
0x39be   :  { %v7320_v17 = vsub.f32 %v7307_v61, %v7319_v14  ;;  %v7321_v18 = vsub.f32 %v7308_v0, %v7319_v14 }
0x39c0   :  { %v7322_v19 = vmul.f32 %v7320_v17, %v7320_v17  ;;  %v7323_v15 = vmul.f32 %v7321_v18, %v7321_v18  ;;  %v7673_v17 = vld [vmem:[#allocation79] sm:$0xff]  ;;  %v7674_v18 = vld [vmem:[#allocation79 + $0x8] sm:$0xff] }
0x39c2   :  { %v7324_v16 = vsel %vm7309_vm15, %v7322_v19, 0.0  ;;  %v7325_v21 = vsel %vm7309_vm15, %v7323_v15, 0.0  ;;  %v12538_v19 = vpack.c.bf16 %v7674_v18, %v7673_v17  ;;  %v7675_v15 = vld [vmem:[#allocation79 + $0x10] sm:$0xff] }
0x39c3   :  { %v7326_v23 = vadd.f32 %v7325_v21, %v7324_v16  ;;  %v7676_v16 = vld [vmem:[#allocation79 + $0x18] sm:$0xff] }
0x39c4   :  { %v12542_v21 = vpack.c.bf16 %v7676_v16, %v7675_v15 }
0x39c5   :  { %v7327_v24 = vrot.slane %v7326_v23, 4 }
0x39c7   :  { %v7328_v26 = vadd.f32 %v7327_v24, %v7326_v23  ;;  %v7677_v23 = vld [vmem:[#allocation79 + $0x20] sm:$0xff]  ;;  %v7678_v24 = vld [vmem:[#allocation79 + $0x28] sm:$0xff] }
0x39c9   :  { %v7329_v27 = vrot.slane %v7328_v26, 2 }
0x39cb   :  { %v7330_v32 = vadd.f32 %v7329_v27, %v7328_v26  ;;  %v12546_v26 = vpack.c.bf16 %v7678_v24, %v7677_v23  ;;  %v7679_v27 = vld [vmem:[#allocation79 + $0x30] sm:$0xff] }
0x39cd   :  { %v7331_v33 = vrot.slane %v7330_v32, 1 }
0x39cf   :  { %v7332_v34 = vadd.f32 %v7331_v33, %v7330_v32  ;;  %v7680_v32 = vld [vmem:[#allocation79 + $0x38] sm:$0xff] }
0x39d0   :  { %v12550_v33 = vpack.c.bf16 %v7680_v32, %v7679_v27 }
0x39d1   :  { %v7333_v35 = vmul.f32 0.0625, %v7332_v34  ;;  %v7681_v34 = vld [vmem:[#allocation79 + $0x40] sm:$0xff] }
0x39d3   :  { %v7334_v36 = vadd.f32 1e-05, %v7333_v35  ;;  %v7682_v35 = vld [vmem:[#allocation79 + $0x48] sm:$0xff] }
0x39d5   :  { %13123 = vrsqrt.f32 %v7334_v36  ;;  %v12554_v36 = vpack.c.bf16 %v7682_v35, %v7681_v34  ;;  %v7672_v35 = vld [vmem:[#allocation81] sm:$0x7] }
0x39df   :  { %v13124_v37 = vpop.eup %13123 }
0x39e0   :  { %v7336_v2 = vmul.f32 %v13124_v37, %v7095_v56  ;;  %v7683_v37 = vld [vmem:[#allocation79 + $0x50] sm:$0xff] }
0x39e2   :  { %v7345_v45 = vrot.slane %v7336_v2, %v15558_v52  ;;  %v7337_v38 = vmul.f32 %v7336_v2, %v7319_v14  ;;  %v7684_v2 = vld [vmem:[#allocation79 + $0x58] sm:$0xff] }
0x39e4   :  { %v7347_v39 = vmul.f32 %v7345_v45, %v7308_v0  ;;  %v7339_v40 = vrot.slane %v7337_v38, 7  ;;  %v7346_v46 = vmul.f32 %v7345_v45, %v7307_v61  ;;  %v12522_v61 = vpack.c.bf16 %v7443_v58, %v7442_v25  ;;  %v7445_v0 = vld [vmem:[#allocation76 + $0x28] sm:$0xff]  ;;  %v7685_v38 = vld [vmem:[#allocation79 + $0x60] sm:$0xff] }
0x39e5   :  { %v12526_v6 = vpack.c.bf16 %v7445_v0, %v7444_v63  ;;  %v12558_v45 = vpack.c.bf16 %v7684_v2, %v7683_v37 }
0x39e6   :  { %v7341_v41 = vsub.f32 %v7095_v56, %v7339_v40  ;;  %v12518_v56 = vpack.c.bf16 %v7441_v1, %v7440_v55  ;;  %v7687_v40 = vld [vmem:[#allocation79 + $0x70] sm:$0xff] }
0x39e8   :  { %v7351_v22 = vrot.slane %v7341_v41, %v15561_v60  ;;  %12519 = vmatprep.subr.bf16.mxu0 %v12518_v56  ;;  %v7688_v41 = vld [vmem:[#allocation79 + $0x78] sm:$0xff] }
0x39ea   :  { %v7352_v29 = vadd.f32 %v7351_v22, %v7346_v46  ;;  %v7353_v47 = vadd.f32 %v7351_v22, %v7347_v39  ;;  %v7686_v39 = vld [vmem:[#allocation79 + $0x68] sm:$0xff]  ;;  %v12566_v22 = vpack.c.bf16 %v7688_v41, %v7687_v40 }
0x39eb   :  { %v12562_v46 = vpack.c.bf16 %v7686_v39, %v7685_v38 }
0x39ec   :  { %v7354_v42 = vmax.f32 %v7352_v29, 0.0  ;;  %v7355_v43 = vmax.f32 %v7353_v47, 0.0  ;;  %v7439_v29 = vld [vmem:[#allocation78] sm:$0x7] }
0x39ed   :  { %v7627_v47 = vrot.slane %v7439_v29, %v15551_v20 }
0x39ee   :  { %7356 = vst.msk [vmem:[#allocation2] sm:$0xff] %vm7309_vm15, %v7354_v42  ;;  %7357 = vst.msk [vmem:[#allocation2 + $0x10] sm:$0xff] %vm7309_vm15, %v7355_v43  ;;  %v12494_v49 = vpack.c.bf16 %v7355_v43, %v7354_v42 }
0x39f0   :  { %12495 = vmatprep.subr.bf16.mxu1 %v12494_v49 }
0x39f1   :  { %12497 = vmatpush3.bf16.msra.mxu1 %v12494_v49 }
0x39f2   :  { %12539 = vmatprep.subr.bf16.mxu1 %v12538_v19 }
0x39f4   :  { %11311 = vmatmul.mubr.msk.f32.vlgmr.msra.gmra.mrb[52].mxu1 %vm1050_vm0, %v15968_v30 }
0x39f5   :  { %v7435_v3 = vld [vmem:[#allocation2] sm:$0xff]  ;;  %v7436_v14 = vld [vmem:[#allocation2 + $0x10] sm:$0xff]  ;;  %12541 = vmatpush3.bf16.msra.mxu1 %v12538_v19 }
0x39f6   :  { %12543 = vmatprep.subr.bf16.mxu1 %v12542_v21 }
0x39f9   :  { %12545 = vmatpush3.bf16.msra.mxu1 %v12542_v21 }
0x39fa   :  { %12547 = vmatprep.subr.bf16.mxu1 %v12546_v26 }
0x39fd   :  { %12549 = vmatpush3.bf16.msra.mxu1 %v12546_v26 }
0x39fe   :  { %12551 = vmatprep.subr.bf16.mxu1 %v12550_v33 }
0x3a01   :  { %12553 = vmatpush3.bf16.msra.mxu1 %v12550_v33 }
0x3a02   :  { %12555 = vmatprep.subr.bf16.mxu1 %v12554_v36 }
0x3a05   :  { %12557 = vmatpush3.bf16.msra.mxu1 %v12554_v36  ;;  %v7852_v36 = vrot.slane %v7672_v35, %v15551_v20 }
0x3a06   :  { %12559 = vmatprep.subr.bf16.mxu1 %v12558_v45 }
0x3a09   :  { %12561 = vmatpush3.bf16.msra.mxu1 %v12558_v45 }
0x3a0a   :  { %12563 = vmatprep.subr.bf16.mxu1 %v12562_v46 }
0x3a0d   :  { %12565 = vmatpush3.bf16.msra.mxu1 %v12562_v46 }
0x3a0e   :  { %12567 = vmatprep.subr.bf16.mxu1 %v12566_v22 }
0x3a11   :  { %12569 = vmatpush3.bf16.msra.mxu1 %v12566_v22 }
0x3ac7   :  { %v11312_v5 = vpop.f32.mrb[52].mxu1 }
0x3ac8   :  { %7434 = vst.msk [vmem:[#allocation3 + $0x10] sm:$0xff] %vm7309_vm15, %v11312_v5  ;;  %v7424_v57 = vpop.f32.mrb[53].mxu1 }
0x3ac9   :  { %7433 = vst.msk [vmem:[#allocation3] sm:$0xff] %vm7309_vm15, %v7424_v57 }
0x3acf   :  { %v7438_v62 = vld [vmem:[#allocation3 + $0x10] sm:$0xff] }
0x3ad0   :  { %v7437_v59 = vld [vmem:[#allocation3] sm:$0xff] }
0x3ad1   :  { %11335 = vmatprep.mubr.msk.f32.mxu0 %vm7309_vm15, %v7437_v59 }
0x3ad2   :  { %11336 = vmatmul.mubr.msk.f32.vlgmr.msra.gmra.mrb[56].mxu0 %vm7309_vm15, %v7438_v62 }
0x3ad3   :  { %12521 = vmatpush3.bf16.msra.mxu0 %v12518_v56  ;;  %11360 = vmatprep.mubr.msk.f32.mxu0 %vm7309_vm15, %v7435_v3 }
0x3ad4   :  { %12523 = vmatprep.subr.bf16.mxu0 %v12522_v61 }
0x3ad7   :  { %12525 = vmatpush3.bf16.msra.mxu0 %v12522_v61 }
0x3ad8   :  { %12527 = vmatprep.subr.bf16.mxu0 %v12526_v6 }
0x3adb   :  { %12529 = vmatpush3.bf16.msra.mxu0 %v12526_v6 }
0x3adc   :  { %12531 = vmatprep.subr.bf16.mxu0 %v12530_v9 }
0x3adf   :  { %12533 = vmatpush3.bf16.msra.mxu0 %v12530_v9 }
0x3ae0   :  { %12535 = vmatprep.subr.bf16.mxu0 %v12534_v11 }
0x3ae3   :  { %12537 = vmatpush3.bf16.msra.mxu0 %v12534_v11 }
0x3ae4   :  { %11358 = vmatprep.subr.mxu0 %v7450_v12 }
0x3ae7   :  { %11359 = vmatpush3.msra.mxu0 %v7450_v12 }
0x3ae8   :  { %11361 = vmatmul.mubr.msk.f32.vlgmr.msra.gmra.mrb[56].mxu0 %vm7309_vm15, %v7436_v14 }
0x3bbb   :  { %v11362_v42 = vpop.f32.mrb[56].mxu0 }
0x3bbc   :  { %v7629_v43 = vadd.f32 %v11362_v42, %v7627_v47  ;;  %v7615_v49 = vpop.f32.mrb[57].mxu0 }
0x3bbd   :  { %v7628_v44 = vadd.f32 %v7627_v47, %v7615_v49 }
0x3bbf   :  { %v7630_v13 = vadd.f32 %v7629_v43, %v7628_v44 }
0x3bc1   :  { %v7631_v48 = vrot.slane %v7630_v13, 4 }
0x3bc3   :  { %v7632_v50 = vadd.f32 %v7631_v48, %v7630_v13 }
0x3bc5   :  { %v7633_v51 = vrot.slane %v7632_v50, 2 }
0x3bc7   :  { %v7634_v53 = vadd.f32 %v7633_v51, %v7632_v50 }
0x3bc9   :  { %v7635_v54 = vrot.slane %v7634_v53, 1 }
0x3bcb   :  { %v7636_v55 = vadd.f32 %v7635_v54, %v7634_v53 }
0x3bcd   :  { %v7637_v1 = vmul.f32 0.0625, %v7636_v55 }
0x3bcf   :  { %v7638_v56 = vsub.f32 %v7628_v44, %v7637_v1  ;;  %v7639_v5 = vsub.f32 %v7629_v43, %v7637_v1 }
0x3bd1   :  { %v7640_v57 = vmul.f32 %v7638_v56, %v7638_v56  ;;  %v7641_v25 = vmul.f32 %v7639_v5, %v7639_v5 }
0x3bd3   :  { %v7642_v58 = vadd.f32 %v7641_v25, %v7640_v57 }
0x3bd5   :  { %v7643_v59 = vrot.slane %v7642_v58, 4 }
0x3bd7   :  { %v7644_v61 = vadd.f32 %v7643_v59, %v7642_v58 }
0x3bd9   :  { %v7645_v62 = vrot.slane %v7644_v61, 2 }
0x3bdb   :  { %v7646_v63 = vadd.f32 %v7645_v62, %v7644_v61 }
0x3bdd   :  { %v7647_v0 = vrot.slane %v7646_v63, 1 }
0x3bdf   :  { %v7648_v3 = vadd.f32 %v7647_v0, %v7646_v63 }
0x3be1   :  { %v7649_v6 = vmul.f32 0.0625, %v7648_v3 }
0x3be3   :  { %v7650_v4 = vadd.f32 1e-05, %v7649_v6 }
0x3be5   :  { %13125 = vrsqrt.f32 %v7650_v4 }
0x3bef   :  { %v13126_v8 = vpop.eup %13125 }
0x3bf0   :  { %v7652_v9 = vmul.f32 %v13126_v8, %v7439_v29 }
0x3bf2   :  { %v7661_v10 = vrot.slane %v7652_v9, %v15558_v52  ;;  %v7653_v7 = vmul.f32 %v7652_v9, %v7637_v1 }
0x3bf4   :  { %v7662_v11 = vmul.f32 %v7661_v10, %v7628_v44  ;;  %v7663_v12 = vmul.f32 %v7661_v10, %v7629_v43  ;;  %v7655_v14 = vrot.slane %v7653_v7, 7 }
0x3bf6   :  { %v7657_v17 = vsub.f32 %v7439_v29, %v7655_v14 }
0x3bf8   :  { %v7667_v18 = vrot.slane %v7657_v17, %v15561_v60 }
0x3bfa   :  { %v7668_v19 = vadd.f32 %v7667_v18, %v7662_v11  ;;  %v7669_v15 = vadd.f32 %v7667_v18, %v7663_v12  ;;  %v8017_v18 = vld [vmem:[#allocation82 + $0x78] sm:$0xff] }
0x3bfc   :  { %v7670_v16 = vmax.f32 %v7668_v19, 0.0  ;;  %v7671_v21 = vmax.f32 %v7669_v15, 0.0  ;;  %v8018_v19 = vld [vmem:[#allocation82 + $0x80] sm:$0xff]  ;;  %v8019_v15 = vld [vmem:[#allocation82 + $0x88] sm:$0xff] }
0x3bfe   :  { %11395 = vmatprep.mubr.f32.mxu1 %v7670_v16  ;;  %v12578_v16 = vpack.c.bf16 %v8018_v19, %v8017_v18  ;;  %v8248_v18 = vld [vmem:[#allocation85 + $0x20] sm:$0xff]  ;;  %v8249_v19 = vld [vmem:[#allocation85 + $0x28] sm:$0xff] }
0x3bff   :  { %11396 = vmatmul.mubr.f32.vlgmr.msra.gmra.mrb[54].mxu1 %v7671_v21  ;;  %v8020_v21 = vld [vmem:[#allocation82 + $0x90] sm:$0xff] }
0x3c00   :  { %11402 = vmatprep.mubr.msk.f32.mxu1 %vm1050_vm0, %v15972_v31 }
0x3cd2   :  { %v11397_v23 = vpop.f32.mrb[54].mxu1 }
0x3cd3   :  { %v7755_v24 = vpop.f32.mrb[55].mxu1 }
0x3cd4   :  { %v13066_v26 = vpack.i.bf16 %v11397_v23, %v7755_v24 }
0x3cd6   :  { %13067 = vrot.lane.b32.xlu1 %v13066_v26, %s14752_s27  ;;  %v8022_v26 = vld [vmem:[#allocation82 + $0xa0] sm:$0xff] }
0x3d48   :  { %v13068_v27 = vpop.permute.xlu1 %13067 }
0x3d49   :  { %v13070_v32 = vunpack.i.h.bf16 %v13068_v27  ;;  %v13069_v33 = vunpack.i.l.bf16 %v13068_v27 }
0x3d4b   :  { %v12570_v34 = vpack.c.bf16 %v13070_v32, %v13069_v33  ;;  %v8023_v32 = vld [vmem:[#allocation82 + $0xa8] sm:$0xff]  ;;  %v8024_v33 = vld [vmem:[#allocation82 + $0xb0] sm:$0xff] }
0x3d4d   :  { %12571 = vmatprep.subr.bf16.mxu1 %v12570_v34 }
0x3d4e   :  { %12573 = vmatpush3.bf16.msra.mxu1 %v12570_v34  ;;  %v12590_v34 = vpack.c.bf16 %v8024_v33, %v8023_v32  ;;  %v8254_v32 = vld [vmem:[#allocation85 + $0x50] sm:$0xff]  ;;  %v8255_v33 = vld [vmem:[#allocation85 + $0x58] sm:$0xff] }
0x3d51   :  { %11403 = vmatmul.mubr.msk.f32.vlgmr.msra.gmra.mrb[56].mxu1 %vm1050_vm0, %v15968_v30 }
0x3d52   :  { %11409 = vmatprep.mubr.msk.f32.mxu1 %vm1050_vm0, %v15972_v31 }
0x3e24   :  { %v11404_v37 = vpop.f32.mrb[56].mxu1 }
0x3e25   :  { %v7848_v2 = vadd.f32 %v11404_v37, %v11397_v23  ;;  %v7838_v45 = vpop.f32.mrb[57].mxu1  ;;  %v12582_v23 = vpack.c.bf16 %v8020_v21, %v8019_v15  ;;  %v8027_v37 = vld [vmem:[#allocation82 + $0xc8] sm:$0xff]  ;;  %v12642_v15 = vpack.c.bf16 %v8249_v19, %v8248_v18 }
0x3e26   :  { %v7847_v38 = vadd.f32 %v7838_v45, %v7755_v24  ;;  %v8021_v24 = vld [vmem:[#allocation82 + $0x98] sm:$0xff]  ;;  %v8251_v21 = vld [vmem:[#allocation85 + $0x38] sm:$0xff] }
0x3e27   :  { %v7854_v39 = vadd.f32 %v7852_v36, %v7848_v2  ;;  %v12586_v27 = vpack.c.bf16 %v8022_v26, %v8021_v24  ;;  %v8028_v2 = vld [vmem:[#allocation82 + $0xd0] sm:$0xff]  ;;  %v8253_v26 = vld [vmem:[#allocation85 + $0x48] sm:$0xff] }
0x3e28   :  { %v7853_v40 = vadd.f32 %v7852_v36, %v7847_v38  ;;  %v8026_v36 = vld [vmem:[#allocation82 + $0xc0] sm:$0xff]  ;;  %v12598_v45 = vpack.c.bf16 %v8028_v2, %v8027_v37  ;;  %v8029_v38 = vld [vmem:[#allocation82 + $0xd8] sm:$0xff]  ;;  %v8259_v2 = vld [vmem:[#allocation85 + $0x78] sm:$0xff] }
0x3e29   :  { %v7856_v46 = vsel %vm1231_vm3, %v7854_v39, 0.0  ;;  %v8252_v24 = vld [vmem:[#allocation85 + $0x40] sm:$0xff] }
0x3e2a   :  { %v7855_v41 = vsel %vm1231_vm3, %v7853_v40, 0.0 }
0x3e2b   :  { %v7857_v22 = vadd.f32 %v7856_v46, %v7855_v41  ;;  %v8031_v46 = vld [vmem:[#allocation82 + $0xe8] sm:$0xff]  ;;  %v8002_v41 = vld [vmem:[#allocation82] sm:$0xff] }
0x3e2d   :  { %v7858_v29 = vrot.slane %v7857_v22, 4 }
0x3e2f   :  { %v7859_v47 = vadd.f32 %v7858_v29, %v7857_v22  ;;  %v8003_v22 = vld [vmem:[#allocation82 + $0x8] sm:$0xff] }
0x3e30   :  { %v12606_v29 = vpack.c.bf16 %v8003_v22, %v8002_v41 }
0x3e31   :  { %v7860_v42 = vrot.slane %v7859_v47, 2 }
0x3e33   :  { %v7861_v43 = vadd.f32 %v7860_v42, %v7859_v47 }
0x3e35   :  { %v7862_v49 = vrot.slane %v7861_v43, 1 }
0x3e37   :  { %v7863_v31 = vadd.f32 %v7862_v49, %v7861_v43 }
0x3e39   :  { %v7864_v44 = vmul.f32 0.0625, %v7863_v31 }
0x3e3b   :  { %v7865_v13 = vsub.f32 %v7853_v40, %v7864_v44  ;;  %v7866_v48 = vsub.f32 %v7854_v39, %v7864_v44 }
0x3e3d   :  { %v7867_v50 = vmul.f32 %v7865_v13, %v7865_v13  ;;  %v7868_v51 = vmul.f32 %v7866_v48, %v7866_v48  ;;  %v8004_v13 = vld [vmem:[#allocation82 + $0x10] sm:$0xff]  ;;  %v8005_v48 = vld [vmem:[#allocation82 + $0x18] sm:$0xff] }
0x3e3f   :  { %v7869_v53 = vsel %vm1231_vm3, %v7867_v50, 0.0  ;;  %v7870_v54 = vsel %vm1231_vm3, %v7868_v51, 0.0  ;;  %v12610_v51 = vpack.c.bf16 %v8005_v48, %v8004_v13 }
0x3e40   :  { %v7871_v55 = vadd.f32 %v7870_v54, %v7869_v53  ;;  %v8006_v54 = vld [vmem:[#allocation82 + $0x20] sm:$0xff] }
0x3e42   :  { %v7872_v1 = vrot.slane %v7871_v55, 4 }
0x3e44   :  { %v7873_v56 = vadd.f32 %v7872_v1, %v7871_v55  ;;  %v8007_v55 = vld [vmem:[#allocation82 + $0x28] sm:$0xff] }
0x3e46   :  { %v7874_v5 = vrot.slane %v7873_v56, 2 }
0x3e48   :  { %v7875_v57 = vadd.f32 %v7874_v5, %v7873_v56  ;;  %v12614_v56 = vpack.c.bf16 %v8007_v55, %v8006_v54  ;;  %v8008_v5 = vld [vmem:[#allocation82 + $0x30] sm:$0xff] }
0x3e4a   :  { %v7876_v25 = vrot.slane %v7875_v57, 1 }
0x3e4c   :  { %v7877_v58 = vadd.f32 %v7876_v25, %v7875_v57  ;;  %v8009_v57 = vld [vmem:[#allocation82 + $0x38] sm:$0xff] }
0x3e4d   :  { %v12618_v25 = vpack.c.bf16 %v8009_v57, %v8008_v5 }
0x3e4e   :  { %v7878_v59 = vmul.f32 0.0625, %v7877_v58  ;;  %v8010_v58 = vld [vmem:[#allocation82 + $0x40] sm:$0xff] }
0x3e50   :  { %v7879_v61 = vadd.f32 1e-05, %v7878_v59  ;;  %v8011_v59 = vld [vmem:[#allocation82 + $0x48] sm:$0xff] }
0x3e52   :  { %13127 = vrsqrt.f32 %v7879_v61  ;;  %v12622_v61 = vpack.c.bf16 %v8011_v59, %v8010_v58 }
0x3e5c   :  { %v13128_v62 = vpop.eup %13127 }
0x3e5d   :  { %v7881_v63 = vmul.f32 %v13128_v62, %v7672_v35  ;;  %v8012_v62 = vld [vmem:[#allocation82 + $0x50] sm:$0xff] }
0x3e5f   :  { %v7890_v0 = vrot.slane %v7881_v63, %v15558_v52  ;;  %v7882_v3 = vmul.f32 %v7881_v63, %v7864_v44  ;;  %v8013_v63 = vld [vmem:[#allocation82 + $0x58] sm:$0xff] }
0x3e61   :  { %v7891_v6 = vmul.f32 %v7890_v0, %v7853_v40  ;;  %v7884_v4 = vrot.slane %v7882_v3, 7  ;;  %v7892_v8 = vmul.f32 %v7890_v0, %v7854_v39  ;;  %v8030_v39 = vld [vmem:[#allocation82 + $0xe0] sm:$0xff]  ;;  %v12626_v0 = vpack.c.bf16 %v8013_v63, %v8012_v62 }
0x3e62   :  { %v12602_v40 = vpack.c.bf16 %v8030_v39, %v8029_v38  ;;  %v8014_v3 = vld [vmem:[#allocation82 + $0x60] sm:$0xff]  ;;  %v8001_v38 = vld [vmem:[#allocation84] sm:$0x7] }
0x3e63   :  { %v7886_v9 = vsub.f32 %v7672_v35, %v7884_v4  ;;  %v8025_v35 = vld [vmem:[#allocation82 + $0xb8] sm:$0xff]  ;;  %v8198_v39 = vrot.slane %v8001_v38, %v15551_v20 }
0x3e65   :  { %v7896_v10 = vrot.slane %v7886_v9, %v15561_v60 }
0x3e67   :  { %v7897_v7 = vadd.f32 %v7896_v10, %v7891_v6  ;;  %v7898_v11 = vadd.f32 %v7896_v10, %v7892_v8  ;;  %v8015_v6 = vld [vmem:[#allocation82 + $0x68] sm:$0xff]  ;;  %v8016_v8 = vld [vmem:[#allocation82 + $0x70] sm:$0xff] }
0x3e68   :  { %v12630_v4 = vpack.c.bf16 %v8015_v6, %v8014_v3  ;;  %v8244_v10 = vld [vmem:[#allocation85] sm:$0xff] }
0x3e69   :  { %v7899_v12 = vmax.f32 %v7897_v7, 0.0  ;;  %v7900_v14 = vmax.f32 %v7898_v11, 0.0  ;;  %v8245_v7 = vld [vmem:[#allocation85 + $0x8] sm:$0xff] }
0x3e6a   :  { %v12634_v11 = vpack.c.bf16 %v8245_v7, %v8244_v10 }
0x3e6b   :  { %v12574_v17 = vpack.c.bf16 %v7900_v14, %v7899_v12 }
0x3e6c   :  { %12635 = vmatprep.subr.bf16.mxu0 %v12634_v11 }
0x3e6d   :  { %12575 = vmatprep.subr.bf16.mxu1 %v12574_v17  ;;  %12637 = vmatpush3.bf16.msra.mxu0 %v12634_v11 }
0x3e6e   :  { %12577 = vmatpush3.bf16.msra.mxu1 %v12574_v17 }
0x3e6f   :  { %12579 = vmatprep.subr.bf16.mxu1 %v12578_v16 }
0x3e71   :  { %11410 = vmatmul.mubr.msk.f32.vlgmr.msra.gmra.mrb[58].mxu1 %vm1050_vm0, %v15968_v30  ;;  %v12594_v30 = vpack.c.bf16 %v8026_v36, %v8025_v35  ;;  %v8256_v35 = vld [vmem:[#allocation85 + $0x60] sm:$0xff]  ;;  %v8257_v36 = vld [vmem:[#allocation85 + $0x68] sm:$0xff] }
0x3e72   :  { %12581 = vmatpush3.bf16.msra.mxu1 %v12578_v16  ;;  %v8250_v16 = vld [vmem:[#allocation85 + $0x30] sm:$0xff]  ;;  %v12658_v37 = vpack.c.bf16 %v8257_v36, %v8256_v35  ;;  %v8586_v36 = vld [vmem:[#allocation88 + $0x20] sm:$0xff] }
0x3e73   :  { %12583 = vmatprep.subr.bf16.mxu1 %v12582_v23 }
0x3e76   :  { %12585 = vmatpush3.bf16.msra.mxu1 %v12582_v23  ;;  %v12646_v23 = vpack.c.bf16 %v8251_v21, %v8250_v16 }
0x3e77   :  { %12587 = vmatprep.subr.bf16.mxu1 %v12586_v27 }
0x3e7a   :  { %12589 = vmatpush3.bf16.msra.mxu1 %v12586_v27  ;;  %v12650_v27 = vpack.c.bf16 %v8253_v26, %v8252_v24  ;;  %v16074_v24 = vld [vmem:[#allocation4 + $0x8] sm:$0xff]  ;;  %v8582_v26 = vld [vmem:[#allocation88] sm:$0xff] }
0x3e7b   :  { %12591 = vmatprep.subr.bf16.mxu1 %v12590_v34 }
0x3e7e   :  { %12593 = vmatpush3.bf16.msra.mxu1 %v12590_v34  ;;  %v12654_v34 = vpack.c.bf16 %v8255_v33, %v8254_v32  ;;  %v8584_v32 = vld [vmem:[#allocation88 + $0x10] sm:$0xff] }
0x3e7f   :  { %12595 = vmatprep.subr.bf16.mxu1 %v12594_v30 }
0x3e82   :  { %12597 = vmatpush3.bf16.msra.mxu1 %v12594_v30  ;;  %v8258_v30 = vld [vmem:[#allocation85 + $0x70] sm:$0xff] }
0x3e83   :  { %12599 = vmatprep.subr.bf16.mxu1 %v12598_v45 }
0x3e86   :  { %12601 = vmatpush3.bf16.msra.mxu1 %v12598_v45  ;;  %v12662_v45 = vpack.c.bf16 %v8259_v2, %v8258_v30  ;;  %v8587_v30 = vld [vmem:[#allocation88 + $0x28] sm:$0xff]  ;;  %v8588_v2 = vld [vmem:[#allocation88 + $0x30] sm:$0xff] }
0x3e87   :  { %12603 = vmatprep.subr.bf16.mxu1 %v12602_v40 }
0x3e8a   :  { %12605 = vmatpush3.bf16.msra.mxu1 %v12602_v40 }
0x3e8b   :  { %11440 = vmatprep.subr.mxu1 %v8031_v46 }
0x3e8e   :  { %11441 = vmatpush3.msra.mxu1 %v8031_v46 }
0x3e8f   :  { %12607 = vmatprep.subr.bf16.mxu1 %v12606_v29 }
0x3f44   :  { %v11411_v47 = vpop.f32.mrb[58].mxu1 }
0x3f45   :  { %7991 = vrot.lane.b32.xlu1 %v11411_v47, %s14759_s1  ;;  %v7978_v42 = vpop.f32.mrb[59].mxu1 }
0x3f46   :  { %7989 = vrot.lane.b32.xlu0 %v7978_v42, %s14759_s1 }
0x3f49   :  { %7905 = vrot.lane.b32.xlu1 %v7900_v14, %s14759_s1  ;;  %v8247_v14 = vld [vmem:[#allocation85 + $0x18] sm:$0xff] }
0x3f4a   :  { %7903 = vrot.lane.b32.xlu0 %v7899_v12, %s14759_s1  ;;  %v8246_v12 = vld [vmem:[#allocation85 + $0x10] sm:$0xff] }
0x3f4b   :  { %v12638_v17 = vpack.c.bf16 %v8247_v14, %v8246_v12  ;;  %v16069_v14 = vld [vmem:[#allocation4] sm:$0xff] }
0x3f4d   :  { %12639 = vmatprep.subr.bf16.mxu0 %v12638_v17 }
0x3f4e   :  { %12641 = vmatpush3.bf16.msra.mxu0 %v12638_v17 }
0x3f4f   :  { %12643 = vmatprep.subr.bf16.mxu0 %v12642_v15 }
0x3f52   :  { %12645 = vmatpush3.bf16.msra.mxu0 %v12642_v15 }
0x3f53   :  { %12647 = vmatprep.subr.bf16.mxu0 %v12646_v23 }
0x3f56   :  { %12649 = vmatpush3.bf16.msra.mxu0 %v12646_v23 }
0x3f57   :  { %12651 = vmatprep.subr.bf16.mxu0 %v12650_v27 }
0x3f5a   :  { %12653 = vmatpush3.bf16.msra.mxu0 %v12650_v27  ;;  %v8583_v27 = vld [vmem:[#allocation88 + $0x8] sm:$0xff] }
0x3f5b   :  { %12655 = vmatprep.subr.bf16.mxu0 %v12654_v34  ;;  %v12702_v33 = vpack.c.bf16 %v8583_v27, %v8582_v26 }
0x3f5e   :  { %12657 = vmatpush3.bf16.msra.mxu0 %v12654_v34  ;;  %v8585_v34 = vld [vmem:[#allocation88 + $0x18] sm:$0xff] }
0x3f5f   :  { %12659 = vmatprep.subr.bf16.mxu0 %v12658_v37  ;;  %v12705_v35 = vpack.c.bf16 %v8585_v34, %v8584_v32  ;;  %v8599_v34 = vld [vmem:[#allocation88 + $0x88] sm:$0xff] }
0x3f62   :  { %12661 = vmatpush3.bf16.msra.mxu0 %v12658_v37  ;;  %v12708_v37 = vpack.c.bf16 %v8587_v30, %v8586_v36 }
0x3f63   :  { %12663 = vmatprep.subr.bf16.mxu0 %v12662_v45 }
0x3f66   :  { %12665 = vmatpush3.bf16.msra.mxu0 %v12662_v45  ;;  %v8589_v45 = vld [vmem:[#allocation88 + $0x38] sm:$0xff] }
0x3fb7   :  { %v7992_v43 = vpop.permute.xlu1 %7991 }
0x3fb8   :  { %7996 = vst.msk [vmem:[#allocation3 + $0x10] sm:$0xff] %vm7909_vm1, %v7992_v43  ;;  %v7990_v49 = vpop.permute.xlu0 %7989 }
0x3fb9   :  { %7995 = vst.msk [vmem:[#allocation3] sm:$0xff] %vm7909_vm1, %v7990_v49 }
0x3fbb   :  { %v7906_v31 = vpop.permute.xlu1 %7905 }
0x3fbc   :  { %7911 = vst.msk [vmem:[#allocation2 + $0x10] sm:$0xff] %vm7909_vm1, %v7906_v31  ;;  %v7904_v44 = vpop.permute.xlu0 %7903 }
0x3fbd   :  { %7910 = vst.msk [vmem:[#allocation2] sm:$0xff] %vm7909_vm1, %v7904_v44 }
0x3fbf   :  { %v8000_v53 = vld [vmem:[#allocation3 + $0x10] sm:$0xff] }
0x3fc0   :  { %v7999_v50 = vld [vmem:[#allocation3] sm:$0xff] }
0x3fc1   :  { %11442 = vmatprep.mubr.msk.f32.mxu1 %vm8032_vm2, %v7999_v50 }
0x3fc2   :  { %11443 = vmatmul.mubr.msk.f32.vlgmr.msra.gmra.mrb[60].mxu1 %vm8032_vm2, %v8000_v53 }
0x3fc3   :  { %12609 = vmatpush3.bf16.msra.mxu1 %v12606_v29  ;;  %v7998_v9 = vld [vmem:[#allocation2 + $0x10] sm:$0xff] }
0x3fc4   :  { %12611 = vmatprep.subr.bf16.mxu1 %v12610_v51  ;;  %v7997_v1 = vld [vmem:[#allocation2] sm:$0xff] }
0x3fc5   :  { %11475 = vmatprep.mubr.msk.f32.mxu1 %vm8032_vm2, %v7997_v1 }
0x3fc7   :  { %12613 = vmatpush3.bf16.msra.mxu1 %v12610_v51 }
0x3fc8   :  { %12615 = vmatprep.subr.bf16.mxu1 %v12614_v56 }
0x3fcb   :  { %12617 = vmatpush3.bf16.msra.mxu1 %v12614_v56 }
0x3fcc   :  { %12619 = vmatprep.subr.bf16.mxu1 %v12618_v25 }
0x3fcf   :  { %12621 = vmatpush3.bf16.msra.mxu1 %v12618_v25 }
0x3fd0   :  { %12623 = vmatprep.subr.bf16.mxu1 %v12622_v61 }
0x3fd3   :  { %12625 = vmatpush3.bf16.msra.mxu1 %v12622_v61 }
0x3fd4   :  { %12627 = vmatprep.subr.bf16.mxu1 %v12626_v0 }
0x3fd7   :  { %12629 = vmatpush3.bf16.msra.mxu1 %v12626_v0 }
0x3fd8   :  { %12631 = vmatprep.subr.bf16.mxu1 %v12630_v4 }
0x3fdb   :  { %12633 = vmatpush3.bf16.msra.mxu1 %v12630_v4 }
0x3fdc   :  { %11473 = vmatprep.subr.mxu1 %v8016_v8 }
0x3fdf   :  { %11474 = vmatpush3.msra.mxu1 %v8016_v8 }
0x3fe0   :  { %11476 = vmatmul.mubr.msk.f32.vlgmr.msra.gmra.mrb[60].mxu1 %vm8032_vm2, %v7998_v9  ;;  %12701 = vmatprep.subr.bf16.mxu1 %v14755_v28 }
0x3fe1   :  { %12703 = vmatpush1.bf16.msra.mxu1 %v12702_v33  ;;  %v8598_v33 = vld [vmem:[#allocation88 + $0x80] sm:$0xff] }
0x3fe2   :  { %12704 = vmatprep.subr.bf16.mxu1 %v14755_v28 }
0x3fe5   :  { %12706 = vmatpush1.bf16.msra.mxu1 %v12705_v35  ;;  %v12726_v35 = vpack.c.bf16 %v8599_v34, %v8598_v33 }
0x3fe6   :  { %12707 = vmatprep.subr.bf16.mxu1 %v14755_v28 }
0x3fe9   :  { %12709 = vmatpush1.bf16.msra.mxu1 %v12708_v37 }
0x3fea   :  { %12710 = vmatprep.subr.bf16.mxu1 %v14755_v28 }
0x40b3   :  { %v11477_v40 = vpop.f32.mrb[60].mxu1 }
0x40b4   :  { %v8200_v46 = vadd.f32 %v11477_v40, %v8198_v39  ;;  %v8186_v41 = vpop.f32.mrb[61].mxu1  ;;  %v8591_v40 = vld [vmem:[#allocation88 + $0x48] sm:$0xff] }
0x40b5   :  { %v8199_v22 = vadd.f32 %v8198_v39, %v8186_v41  ;;  %v8590_v39 = vld [vmem:[#allocation88 + $0x40] sm:$0xff]  ;;  %v8592_v41 = vld [vmem:[#allocation88 + $0x50] sm:$0xff] }
0x40b7   :  { %v8201_v29 = vadd.f32 %v8200_v46, %v8199_v22 }
0x40b9   :  { %v8202_v47 = vrot.slane %v8201_v29, 4 }
0x40bb   :  { %v8203_v42 = vadd.f32 %v8202_v47, %v8201_v29  ;;  %v8594_v47 = vld [vmem:[#allocation88 + $0x60] sm:$0xff] }
0x40bd   :  { %v8204_v43 = vrot.slane %v8203_v42, 2 }
0x40bf   :  { %v8205_v49 = vadd.f32 %v8204_v43, %v8203_v42  ;;  %v8595_v42 = vld [vmem:[#allocation88 + $0x68] sm:$0xff] }
0x40c0   :  { %v12720_v43 = vpack.c.bf16 %v8595_v42, %v8594_v47  ;;  %v8601_v47 = vld [vmem:[#allocation88 + $0x98] sm:$0xff]  ;;  %v8602_v42 = vld [vmem:[#allocation88 + $0xa0] sm:$0xff] }
0x40c1   :  { %v8206_v31 = vrot.slane %v8205_v49, 1 }
0x40c3   :  { %v8207_v44 = vadd.f32 %v8206_v31, %v8205_v49  ;;  %v8243_v49 = vld [vmem:[#allocation87] sm:$0x7] }
0x40c4   :  { %v8423_v31 = vrot.slane %v8243_v49, %v15551_v20 }
0x40c5   :  { %v8208_v13 = vmul.f32 0.0625, %v8207_v44 }
0x40c7   :  { %v8209_v48 = vsub.f32 %v8199_v22, %v8208_v13  ;;  %v8210_v50 = vsub.f32 %v8200_v46, %v8208_v13 }
0x40c9   :  { %v8211_v51 = vmul.f32 %v8209_v48, %v8209_v48  ;;  %v8212_v53 = vmul.f32 %v8210_v50, %v8210_v50 }
0x40cb   :  { %v8213_v54 = vadd.f32 %v8212_v53, %v8211_v51 }
0x40cd   :  { %v8214_v55 = vrot.slane %v8213_v54, 4 }
0x40cf   :  { %v8215_v1 = vadd.f32 %v8214_v55, %v8213_v54 }
0x40d1   :  { %v8216_v56 = vrot.slane %v8215_v1, 2 }
0x40d3   :  { %v8217_v5 = vadd.f32 %v8216_v56, %v8215_v1 }
0x40d5   :  { %v8218_v57 = vrot.slane %v8217_v5, 1 }
0x40d7   :  { %v8219_v25 = vadd.f32 %v8218_v57, %v8217_v5 }
0x40d9   :  { %v8220_v58 = vmul.f32 0.0625, %v8219_v25 }
0x40db   :  { %v8221_v59 = vadd.f32 1e-05, %v8220_v58 }
0x40dd   :  { %13129 = vrsqrt.f32 %v8221_v59 }
0x40e7   :  { %v13130_v61 = vpop.eup %13129 }
0x40e8   :  { %v8223_v62 = vmul.f32 %v13130_v61, %v8001_v38 }
0x40ea   :  { %v8232_v63 = vrot.slane %v8223_v62, %v15558_v52  ;;  %v8224_v0 = vmul.f32 %v8223_v62, %v8208_v13 }
0x40ec   :  { %v8233_v3 = vmul.f32 %v8232_v63, %v8199_v22  ;;  %v8234_v6 = vmul.f32 %v8232_v63, %v8200_v46  ;;  %v8226_v4 = vrot.slane %v8224_v0, 7  ;;  %v12714_v46 = vpack.c.bf16 %v8591_v40, %v8590_v39  ;;  %v8593_v22 = vld [vmem:[#allocation88 + $0x58] sm:$0xff] }
0x40ed   :  { %v12717_v29 = vpack.c.bf16 %v8593_v22, %v8592_v41 }
0x40ee   :  { %v8228_v8 = vsub.f32 %v8001_v38, %v8226_v4  ;;  %v12711_v38 = vpack.c.bf16 %v8589_v45, %v8588_v2  ;;  %v14760_v45 = vmov 0.0  }
0x40f0   :  { %v8238_v9 = vrot.slane %v8228_v8, %v15561_v60  ;;  %12712 = vmatpush1.bf16.msra.mxu1 %v12711_v38  ;;  %v8600_v38 = vld [vmem:[#allocation88 + $0x90] sm:$0xff] }
0x40f1   :  { %12713 = vmatprep.subr.bf16.mxu1 %v14755_v28 }
0x40f2   :  { %v8239_v10 = vadd.f32 %v8238_v9, %v8233_v3  ;;  %v8240_v7 = vadd.f32 %v8238_v9, %v8234_v6 }
0x40f4   :  { %v8241_v11 = vmax.f32 %v8239_v10, 0.0  ;;  %v8242_v12 = vmax.f32 %v8240_v7, 0.0  ;;  %12715 = vmatpush1.bf16.msra.mxu1 %v12714_v46 }
0x40f5   :  { %12716 = vmatprep.subr.bf16.mxu1 %v14755_v28 }
0x40f6   :  { %11510 = vmatprep.mubr.f32.mxu0 %v8241_v11 }
0x40f7   :  { %11511 = vmatmul.mubr.f32.vlgmr.msra.gmra.mrb[58].mxu0 %v8242_v12 }
0x40f8   :  { %11517 = vmatprep.mubr.msk.f32.mxu0 %vm1050_vm0, %v16069_v14  ;;  %12718 = vmatpush1.bf16.msra.mxu1 %v12717_v29 }
0x40f9   :  { %12719 = vmatprep.subr.bf16.mxu1 %v14755_v28 }
0x40fc   :  { %12721 = vmatpush1.bf16.msra.mxu1 %v12720_v43  ;;  %v8603_v43 = vld [vmem:[#allocation88 + $0xa8] sm:$0xff] }
0x40fd   :  { %12722 = vmatprep.subr.bf16.mxu1 %v14755_v28 }
0x41ca   :  { %v11512_v17 = vpop.f32.mrb[58].mxu0 }
0x41cb   :  { %v8326_v18 = vpop.f32.mrb[59].mxu0 }
0x41cc   :  { %v13071_v19 = vpack.i.bf16 %v11512_v17, %v8326_v18 }
0x41ce   :  { %13072 = vrot.lane.b32.xlu0 %v13071_v19, %s14752_s27 }
0x4240   :  { %v13073_v15 = vpop.permute.xlu0 %13072 }
0x4241   :  { %v13075_v16 = vunpack.i.h.bf16 %v13073_v15  ;;  %v13074_v21 = vunpack.i.l.bf16 %v13073_v15  ;;  %v8596_v15 = vld [vmem:[#allocation88 + $0x70] sm:$0xff] }
0x4243   :  { %v12666_v23 = vpack.c.bf16 %v13075_v16, %v13074_v21  ;;  %v8597_v16 = vld [vmem:[#allocation88 + $0x78] sm:$0xff] }
0x4245   :  { %12667 = vmatprep.subr.bf16.mxu0 %v12666_v23 }
0x4246   :  { %12669 = vmatpush3.bf16.msra.mxu0 %v12666_v23  ;;  %v12723_v23 = vpack.c.bf16 %v8597_v16, %v8596_v15 }
0x4248   :  { %12724 = vmatpush1.bf16.msra.mxu1 %v12723_v23 }
0x4249   :  { %11518 = vmatmul.mubr.msk.f32.vlgmr.msra.gmra.mrb[60].mxu0 %vm1050_vm0, %v16074_v24  ;;  %12725 = vmatprep.subr.bf16.mxu1 %v14755_v28 }
0x424a   :  { %11524 = vmatprep.mubr.msk.f32.mxu0 %vm1050_vm0, %v16069_v14 }
0x424c   :  { %12727 = vmatpush1.bf16.msra.mxu1 %v12726_v35 }
0x424d   :  { %8743 = vmatprep.subr.mxu1 %v14760_v45 }
0x4250   :  { %8744 = vmatpush1.msra.mxu1 %v8600_v38  ;;  %v8834_v38 = vld [vmem:[#allocation91 + $0x18] sm:$0xff] }
0x431c   :  { %v11519_v44 = vpop.f32.mrb[60].mxu0 }
0x431d   :  { %v8419_v13 = vadd.f32 %v11519_v44, %v11512_v17  ;;  %v8409_v48 = vpop.f32.mrb[61].mxu0 }
0x431e   :  { %v8418_v50 = vadd.f32 %v8409_v48, %v8326_v18  ;;  %v8606_v48 = vld [vmem:[#allocation88 + $0xc0] sm:$0xff] }
0x431f   :  { %v8425_v51 = vadd.f32 %v8423_v31, %v8419_v13  ;;  %v8605_v13 = vld [vmem:[#allocation88 + $0xb8] sm:$0xff] }
0x4320   :  { %v8424_v53 = vadd.f32 %v8423_v31, %v8418_v50  ;;  %v8604_v31 = vld [vmem:[#allocation88 + $0xb0] sm:$0xff]  ;;  %v12681_v50 = vpack.c.bf16 %v8606_v48, %v8605_v13 }
0x4321   :  { %v8427_v54 = vsel %vm1231_vm3, %v8425_v51, 0.0  ;;  %v12678_v44 = vpack.c.bf16 %v8604_v31, %v8603_v43  ;;  %v8840_v43 = vld [vmem:[#allocation91 + $0x48] sm:$0xff]  ;;  %v8841_v31 = vld [vmem:[#allocation91 + $0x50] sm:$0xff]  ;;  %v8843_v48 = vld [vmem:[#allocation91 + $0x60] sm:$0xff] }
0x4322   :  { %v8426_v55 = vsel %vm1231_vm3, %v8424_v53, 0.0 }
0x4323   :  { %v8428_v1 = vadd.f32 %v8427_v54, %v8426_v55  ;;  %v8609_v55 = vld [vmem:[#allocation88 + $0xd8] sm:$0xff] }
0x4325   :  { %v8429_v56 = vrot.slane %v8428_v1, 4 }
0x4327   :  { %v8430_v5 = vadd.f32 %v8429_v56, %v8428_v1  ;;  %v8610_v1 = vld [vmem:[#allocation88 + $0xe0] sm:$0xff] }
0x4328   :  { %v12687_v56 = vpack.c.bf16 %v8610_v1, %v8609_v55  ;;  %v8581_v1 = vld [vmem:[#allocation90] sm:$0x7] }
0x4329   :  { %v8431_v57 = vrot.slane %v8430_v5, 2 }
0x432b   :  { %v8432_v25 = vadd.f32 %v8431_v57, %v8430_v5  ;;  %v8611_v5 = vld [vmem:[#allocation88 + $0xe8] sm:$0xff]  ;;  %v8612_v57 = vld [vmem:[#allocation88 + $0xf0] sm:$0xff] }
0x432d   :  { %v8433_v58 = vrot.slane %v8432_v25, 1 }
0x432f   :  { %v8434_v59 = vadd.f32 %v8433_v58, %v8432_v25  ;;  %v12690_v58 = vpack.c.bf16 %v8612_v57, %v8611_v5 }
0x4331   :  { %v8435_v61 = vmul.f32 0.0625, %v8434_v59  ;;  %v8613_v59 = vld [vmem:[#allocation88 + $0xf8] sm:$0xff] }
0x4333   :  { %v8436_v62 = vsub.f32 %v8424_v53, %v8435_v61  ;;  %v8437_v63 = vsub.f32 %v8425_v51, %v8435_v61 }
0x4335   :  { %v8438_v0 = vmul.f32 %v8436_v62, %v8436_v62  ;;  %v8439_v3 = vmul.f32 %v8437_v63, %v8437_v63 }
0x4337   :  { %v8440_v6 = vsel %vm1231_vm3, %v8438_v0, 0.0  ;;  %v8441_v4 = vsel %vm1231_vm3, %v8439_v3, 0.0 }
0x4338   :  { %v8442_v8 = vadd.f32 %v8441_v4, %v8440_v6 }
0x433a   :  { %v8443_v9 = vrot.slane %v8442_v8, 4 }
0x433c   :  { %v8444_v10 = vadd.f32 %v8443_v9, %v8442_v8  ;;  %v8615_v8 = vld [vmem:[#allocation88 + $0x108] sm:$0xff]  ;;  %v8616_v9 = vld [vmem:[#allocation88 + $0x110] sm:$0xff] }
0x433e   :  { %v8445_v7 = vrot.slane %v8444_v10, 2 }
0x4340   :  { %v8446_v11 = vadd.f32 %v8445_v7, %v8444_v10  ;;  %v12696_v10 = vpack.c.bf16 %v8616_v9, %v8615_v8  ;;  %v8617_v7 = vld [vmem:[#allocation88 + $0x118] sm:$0xff] }
0x4342   :  { %v8447_v12 = vrot.slane %v8446_v11, 1 }
0x4344   :  { %v8448_v17 = vadd.f32 %v8447_v12, %v8446_v11  ;;  %v8618_v11 = vld [vmem:[#allocation88 + $0x120] sm:$0xff] }
0x4345   :  { %v12699_v12 = vpack.c.bf16 %v8618_v11, %v8617_v7 }
0x4346   :  { %v8449_v18 = vmul.f32 0.0625, %v8448_v17  ;;  %v8619_v17 = vld [vmem:[#allocation88 + $0x128] sm:$0xff] }
0x4348   :  { %v8450_v19 = vadd.f32 1e-05, %v8449_v18 }
0x434a   :  { %13131 = vrsqrt.f32 %v8450_v19 }
0x4354   :  { %v13132_v21 = vpop.eup %13131 }
0x4355   :  { %v8452_v26 = vmul.f32 %v13132_v21, %v8243_v49 }
0x4357   :  { %v8453_v27 = vmul.f32 %v8452_v26, %v8435_v61  ;;  %v8461_v32 = vrot.slane %v8452_v26, %v15558_v52  ;;  %v8614_v61 = vld [vmem:[#allocation88 + $0x100] sm:$0xff] }
0x4358   :  { %v12693_v63 = vpack.c.bf16 %v8614_v61, %v8613_v59 }
0x4359   :  { %v8455_v36 = vrot.slane %v8453_v27, 7  ;;  %v8462_v30 = vmul.f32 %v8461_v32, %v8424_v53  ;;  %v8463_v37 = vmul.f32 %v8461_v32, %v8425_v51  ;;  %v8607_v51 = vld [vmem:[#allocation88 + $0xc8] sm:$0xff]  ;;  %v8608_v53 = vld [vmem:[#allocation88 + $0xd0] sm:$0xff] }
0x435a   :  { %v12684_v54 = vpack.c.bf16 %v8608_v53, %v8607_v51  ;;  %v8845_v51 = vld [vmem:[#allocation91 + $0x70] sm:$0xff] }
0x435b   :  { %v8457_v2 = vsub.f32 %v8243_v49, %v8455_v36  ;;  %v12675_v49 = vpack.c.bf16 %v8602_v42, %v8601_v47  ;;  %v8831_v36 = vld [vmem:[#allocation91] sm:$0xff] }
0x435c   :  { %v8839_v42 = vld [vmem:[#allocation91 + $0x40] sm:$0xff] }
0x435d   :  { %v8467_v39 = vrot.slane %v8457_v2, %v15561_v60  ;;  %v8833_v2 = vld [vmem:[#allocation91 + $0x10] sm:$0xff] }
0x435f   :  { %v8468_v40 = vadd.f32 %v8467_v39, %v8462_v30  ;;  %v8469_v46 = vadd.f32 %v8467_v39, %v8463_v37  ;;  %v8832_v30 = vld [vmem:[#allocation91 + $0x8] sm:$0xff]  ;;  %v12732_v39 = vpack.c.bf16 %v8834_v38, %v8833_v2 }
0x4360   :  { %v12728_v37 = vpack.c.bf16 %v8832_v30, %v8831_v36 }
0x4361   :  { %v8470_v41 = vmax.f32 %v8468_v40, 0.0  ;;  %v8471_v22 = vmax.f32 %v8469_v46, 0.0  ;;  %v8835_v40 = vld [vmem:[#allocation91 + $0x20] sm:$0xff]  ;;  %v8836_v46 = vld [vmem:[#allocation91 + $0x28] sm:$0xff] }
0x4363   :  { %8474 = vrot.lane.b32.xlu1 %v8470_v41, %s14761_s20  ;;  %v12670_v29 = vpack.c.bf16 %v8471_v22, %v8470_v41  ;;  %v12736_v41 = vpack.c.bf16 %v8836_v46, %v8835_v40 }
0x4365   :  { %12671 = vmatprep.subr.bf16.mxu0 %v12670_v29 }
0x4366   :  { %12673 = vmatpush3.bf16.msra.mxu0 %v12670_v29  ;;  %v8838_v29 = vld [vmem:[#allocation91 + $0x38] sm:$0xff] }
0x4367   :  { %8476 = vrot.lane.b32.xlu1 %v8471_v22, %s14761_s20  ;;  %12674 = vmatprep.subr.bf16.mxu0 %v14755_v28  ;;  %v8837_v22 = vld [vmem:[#allocation91 + $0x30] sm:$0xff] }
0x4368   :  { %v12740_v47 = vpack.c.bf16 %v8838_v29, %v8837_v22 }
0x4369   :  { %11525 = vmatmul.mubr.msk.f32.vlgmr.msra.gmra.mrb[62].mxu0 %vm1050_vm0, %v16074_v24 }
0x436a   :  { %12676 = vmatpush1.bf16.msra.mxu0 %v12675_v49  ;;  %v12744_v49 = vpack.c.bf16 %v8840_v43, %v8839_v42 }
0x436b   :  { %12677 = vmatprep.subr.bf16.mxu0 %v14755_v28 }
0x436e   :  { %12679 = vmatpush1.bf16.msra.mxu0 %v12678_v44  ;;  %v8842_v44 = vld [vmem:[#allocation91 + $0x58] sm:$0xff] }
0x436f   :  { %12680 = vmatprep.subr.bf16.mxu0 %v14755_v28  ;;  %v12748_v13 = vpack.c.bf16 %v8842_v44, %v8841_v31 }
0x4372   :  { %12682 = vmatpush1.bf16.msra.mxu0 %v12681_v50  ;;  %v8844_v50 = vld [vmem:[#allocation91 + $0x68] sm:$0xff] }
0x4373   :  { %12683 = vmatprep.subr.bf16.mxu0 %v14755_v28  ;;  %v12752_v53 = vpack.c.bf16 %v8844_v50, %v8843_v48 }
0x4376   :  { %12685 = vmatpush1.bf16.msra.mxu0 %v12684_v54  ;;  %v8846_v54 = vld [vmem:[#allocation91 + $0x78] sm:$0xff] }
0x4377   :  { %12686 = vmatprep.subr.bf16.mxu0 %v14755_v28  ;;  %v12756_v55 = vpack.c.bf16 %v8846_v54, %v8845_v51  ;;  %v9164_v54 = vld [vmem:[#allocation94] sm:$0xff] }
0x437a   :  { %12688 = vmatpush1.bf16.msra.mxu0 %v12687_v56 }
0x437b   :  { %12689 = vmatprep.subr.bf16.mxu0 %v14755_v28 }
0x437e   :  { %12691 = vmatpush1.bf16.msra.mxu0 %v12690_v58 }
0x437f   :  { %12692 = vmatprep.subr.bf16.mxu0 %v14755_v28 }
0x4382   :  { %12694 = vmatpush1.bf16.msra.mxu0 %v12693_v63 }
0x4383   :  { %12695 = vmatprep.subr.bf16.mxu0 %v14755_v28 }
0x4386   :  { %12697 = vmatpush1.bf16.msra.mxu0 %v12696_v10 }
0x4387   :  { %12698 = vmatprep.subr.bf16.mxu0 %v14755_v28 }
0x438a   :  { %12700 = vmatpush1.bf16.msra.mxu0 %v12699_v12 }
0x438b   :  { %8662 = vmatprep.subr.mxu0 %v14760_v45 }
0x438e   :  { %8663 = vmatpush1.msra.mxu0 %v8619_v17 }
0x438f   :  { %12729 = vmatprep.subr.bf16.mxu0 %v12728_v37 }
0x43d5   :  { %v8475_v25 = vpop.permute.xlu1 %8474 }
0x43d6   :  { %8481 = vst.msk [vmem:[#allocation2] sm:$0xff] %vm8480_vm4, %v8475_v25 }
0x43d7   :  { %8483 = vst.msk [vmem:[#allocation2 + $0x8] sm:$0xff] %vm8482_vm5, %v8475_v25  ;;  %v8785_v25 = vrot.slane %v8581_v1, %v15551_v20 }
0x43d9   :  { %v8477_v62 = vpop.permute.xlu1 %8476 }
0x43da   :  { %8484 = vst.msk [vmem:[#allocation2 + $0x10] sm:$0xff] %vm8480_vm4, %v8477_v62 }
0x43db   :  { %8485 = vst.msk [vmem:[#allocation2 + $0x18] sm:$0xff] %vm8482_vm5, %v8477_v62 }
0x43dd   :  { %v16111_v3 = vld [vmem:[#allocation2] sm:$0xff] }
0x43de   :  { %v8574_v0 = vld [vmem:[#allocation2 + $0x8] sm:$0xff] }
0x43df   :  { %9825 = vmatprep.mubr.msk.f32.mxu1 %vm8482_vm5, %v8574_v0 }
0x43e0   :  { %8772 = vmatmul.mubr.f32.vlgmr.msra.gmra.mrb[62].mxu1 %v16111_v3 }
0x43e1   :  { %v16116_v4 = vld [vmem:[#allocation2 + $0x10] sm:$0xff] }
0x43e2   :  { %v8576_v6 = vld [vmem:[#allocation2 + $0x18] sm:$0xff] }
0x43e3   :  { %9826 = vmatprep.mubr.msk.f32.mxu1 %vm8482_vm5, %v8576_v6 }
0x43e4   :  { %8777 = vmatmul.mubr.f32.gmra.mrb[64].mxu1 %v16116_v4 }
0x43e5   :  { %11566 = vmatprep.mubr.msk.f32.mxu1 %vm1050_vm0, %v16069_v14 }
0x443c   :  { %v11526_v18 = vpop.f32.mrb[62].mxu0 }
0x443d   :  { %v8552_v19 = vpop.f32.mrb[63].mxu0 }
0x443e   :  { %8563 = vrot.lane.b32.xlu0 %v8552_v19, %s14761_s20 }
0x4442   :  { %8565 = vrot.lane.b32.xlu0 %v11526_v18, %s14761_s20 }
0x44b0   :  { %v8564_v15 = vpop.permute.xlu0 %8563 }
0x44b1   :  { %8569 = vst.msk [vmem:[#allocation3] sm:$0xff] %vm8480_vm4, %v8564_v15 }
0x44b2   :  { %8570 = vst.msk [vmem:[#allocation3 + $0x8] sm:$0xff] %vm8482_vm5, %v8564_v15 }
0x44b3   :  { %v8773_v16 = vpop.f32.mrb[62].mxu1 }
0x44b4   :  { %v8775_v21 = vpop.f32.mrb[63].mxu1  ;;  %v8566_v23 = vpop.permute.xlu0 %8565 }
0x44b5   :  { %8571 = vst.msk [vmem:[#allocation3 + $0x10] sm:$0xff] %vm8480_vm4, %v8566_v23 }
0x44b6   :  { %8572 = vst.msk [vmem:[#allocation3 + $0x18] sm:$0xff] %vm8482_vm5, %v8566_v23 }
0x44b7   :  { %v8778_v26 = vpop.f32.mrb[64].mxu1 }
0x44b8   :  { %v8780_v27 = vpop.f32.mrb[65].mxu1  ;;  %v16130_v33 = vld [vmem:[#allocation3] sm:$0xff] }
0x44b9   :  { %v8578_v32 = vld [vmem:[#allocation3 + $0x8] sm:$0xff] }
0x44ba   :  { %9823 = vmatprep.mubr.msk.f32.mxu0 %vm8482_vm5, %v8578_v32 }
0x44bb   :  { %8691 = vmatmul.mubr.f32.vlgmr.msra.gmra.mrb[64].mxu0 %v16130_v33 }
0x44bc   :  { %v16134_v35 = vld [vmem:[#allocation3 + $0x10] sm:$0xff]  ;;  %12731 = vmatpush3.bf16.msra.mxu0 %v12728_v37 }
0x44bd   :  { %v8580_v34 = vld [vmem:[#allocation3 + $0x18] sm:$0xff]  ;;  %12733 = vmatprep.subr.bf16.mxu0 %v12732_v39 }
0x44be   :  { %9824 = vmatprep.mubr.msk.f32.mxu0 %vm8482_vm5, %v8580_v34 }
0x44bf   :  { %8696 = vmatmul.mubr.f32.gmra.mrb[66].mxu0 %v16134_v35 }
0x44c0   :  { %12735 = vmatpush3.bf16.msra.mxu0 %v12732_v39 }
0x44c1   :  { %12737 = vmatprep.subr.bf16.mxu0 %v12736_v41 }
0x44c4   :  { %12739 = vmatpush3.bf16.msra.mxu0 %v12736_v41 }
0x44c5   :  { %12741 = vmatprep.subr.bf16.mxu0 %v12740_v47 }
0x44c8   :  { %12743 = vmatpush3.bf16.msra.mxu0 %v12740_v47 }
0x44c9   :  { %12745 = vmatprep.subr.bf16.mxu0 %v12744_v49 }
0x44cc   :  { %12747 = vmatpush3.bf16.msra.mxu0 %v12744_v49 }
0x44cd   :  { %12749 = vmatprep.subr.bf16.mxu0 %v12748_v13 }
0x44d0   :  { %12751 = vmatpush3.bf16.msra.mxu0 %v12748_v13 }
0x44d1   :  { %12753 = vmatprep.subr.bf16.mxu0 %v12752_v53 }
0x44d4   :  { %12755 = vmatpush3.bf16.msra.mxu0 %v12752_v53 }
0x44d5   :  { %12757 = vmatprep.subr.bf16.mxu0 %v12756_v55 }
0x44d8   :  { %12759 = vmatpush3.bf16.msra.mxu0 %v12756_v55  ;;  %v9165_v55 = vld [vmem:[#allocation94 + $0x8] sm:$0xff] }
0x44d9   :  { %12801 = vmatprep.subr.bf16.mxu0 %v14755_v28 }
0x458e   :  { %v8692_v56 = vpop.f32.mrb[64].mxu0 }
0x458f   :  { %v8774_v5 = vadd.f32 %v8773_v16, %v8692_v56  ;;  %v8694_v57 = vpop.f32.mrb[65].mxu0  ;;  %v12802_v56 = vpack.c.bf16 %v9165_v55, %v9164_v54 }
0x4591   :  { %v8786_v62 = vadd.f32 %v8785_v25, %v8774_v5  ;;  %v9167_v5 = vld [vmem:[#allocation94 + $0x18] sm:$0xff] }
0x4592   :  { %v8697_v58 = vpop.f32.mrb[66].mxu0 }
0x4593   :  { %v8779_v59 = vadd.f32 %v8778_v26, %v8697_v58  ;;  %v8699_v61 = vpop.f32.mrb[67].mxu0  ;;  %v9169_v58 = vld [vmem:[#allocation94 + $0x28] sm:$0xff] }
0x4594   :  { %v9170_v61 = vld [vmem:[#allocation94 + $0x30] sm:$0xff] }
0x4595   :  { %v8787_v63 = vadd.f32 %v8785_v25, %v8779_v59  ;;  %v9168_v25 = vld [vmem:[#allocation94 + $0x20] sm:$0xff] }
0x4596   :  { %v12808_v59 = vpack.c.bf16 %v9169_v58, %v9168_v25  ;;  %v9182_v25 = vld [vmem:[#allocation94 + $0x90] sm:$0xff]  ;;  %v9183_v58 = vld [vmem:[#allocation94 + $0x98] sm:$0xff] }
0x4597   :  { %v8788_v0 = vadd.f32 %v8787_v63, %v8786_v62 }
0x4599   :  { %v8789_v6 = vrot.slane %v8788_v0, 4 }
0x459b   :  { %v8790_v8 = vadd.f32 %v8789_v6, %v8788_v0  ;;  %v9173_v0 = vld [vmem:[#allocation94 + $0x48] sm:$0xff] }
0x459d   :  { %v8791_v9 = vrot.slane %v8790_v8, 2 }
0x459f   :  { %v8792_v10 = vadd.f32 %v8791_v9, %v8790_v8  ;;  %v9174_v8 = vld [vmem:[#allocation94 + $0x50] sm:$0xff]  ;;  %v9175_v9 = vld [vmem:[#allocation94 + $0x58] sm:$0xff] }
0x45a1   :  { %v8793_v7 = vrot.slane %v8792_v10, 1 }
0x45a3   :  { %v8794_v11 = vadd.f32 %v8793_v7, %v8792_v10  ;;  %v12817_v10 = vpack.c.bf16 %v9175_v9, %v9174_v8  ;;  %v9176_v7 = vld [vmem:[#allocation94 + $0x60] sm:$0xff] }
0x45a5   :  { %v8795_v12 = vmul.f32 0.0625, %v8794_v11  ;;  %v9177_v11 = vld [vmem:[#allocation94 + $0x68] sm:$0xff] }
0x45a7   :  { %v8796_v17 = vsub.f32 %v8786_v62, %v8795_v12  ;;  %v8797_v18 = vsub.f32 %v8787_v63, %v8795_v12 }
0x45a9   :  { %v8798_v19 = vmul.f32 %v8796_v17, %v8796_v17  ;;  %v8799_v15 = vmul.f32 %v8797_v18, %v8797_v18  ;;  %v9178_v17 = vld [vmem:[#allocation94 + $0x70] sm:$0xff]  ;;  %v9179_v18 = vld [vmem:[#allocation94 + $0x78] sm:$0xff] }
0x45ab   :  { %v8800_v16 = vadd.f32 %v8799_v15, %v8798_v19  ;;  %v12823_v19 = vpack.c.bf16 %v9179_v18, %v9178_v17  ;;  %v9180_v15 = vld [vmem:[#allocation94 + $0x80] sm:$0xff] }
0x45ad   :  { %v8801_v21 = vrot.slane %v8800_v16, 4 }
0x45af   :  { %v8802_v23 = vadd.f32 %v8801_v21, %v8800_v16  ;;  %v9181_v16 = vld [vmem:[#allocation94 + $0x88] sm:$0xff] }
0x45b0   :  { %v12826_v21 = vpack.c.bf16 %v9181_v16, %v9180_v15 }
0x45b1   :  { %v8803_v27 = vrot.slane %v8802_v23, 2 }
0x45b3   :  { %v8804_v26 = vadd.f32 %v8803_v27, %v8802_v23  ;;  %v8830_v23 = vld [vmem:[#allocation93] sm:$0x7] }
0x45b4   :  { %v9010_v27 = vrot.slane %v8830_v23, %v15551_v20 }
0x45b5   :  { %v8805_v32 = vrot.slane %v8804_v26, 1 }
0x45b7   :  { %v8806_v34 = vadd.f32 %v8805_v32, %v8804_v26 }
0x45b9   :  { %v8807_v36 = vmul.f32 0.0625, %v8806_v34 }
0x45bb   :  { %v8808_v30 = vadd.f32 1e-05, %v8807_v36 }
0x45bd   :  { %13133 = vrsqrt.f32 %v8808_v30 }
0x45c7   :  { %v13134_v37 = vpop.eup %13133 }
0x45c8   :  { %v8810_v2 = vmul.f32 %v13134_v37, %v8581_v1 }
0x45ca   :  { %v8819_v38 = vrot.slane %v8810_v2, %v15558_v52  ;;  %v8811_v39 = vmul.f32 %v8810_v2, %v8795_v12  ;;  %v12820_v12 = vpack.c.bf16 %v9177_v11, %v9176_v7 }
0x45cc   :  { %v8821_v40 = vmul.f32 %v8819_v38, %v8787_v63  ;;  %v8813_v46 = vrot.slane %v8811_v39, 7  ;;  %v8820_v41 = vmul.f32 %v8819_v38, %v8786_v62  ;;  %v9171_v62 = vld [vmem:[#allocation94 + $0x38] sm:$0xff] }
0x45cd   :  { %v12811_v63 = vpack.c.bf16 %v9171_v62, %v9170_v61  ;;  %v12829_v61 = vpack.c.bf16 %v9183_v58, %v9182_v25  ;;  %v9207_v25 = vld [vmem:[#allocation94 + $0x158] sm:$0xff] }
0x45ce   :  { %v8815_v22 = vsub.f32 %v8581_v1, %v8813_v46  ;;  %v9166_v1 = vld [vmem:[#allocation94 + $0x10] sm:$0xff] }
0x45cf   :  { %v12805_v57 = vpack.c.bf16 %v9167_v5, %v9166_v1 }
0x45d0   :  { %v8825_v29 = vrot.slane %v8815_v22, %v15561_v60 }
0x45d2   :  { %v8826_v47 = vadd.f32 %v8825_v29, %v8820_v41  ;;  %v8827_v42 = vadd.f32 %v8825_v29, %v8821_v40 }
0x45d4   :  { %v8828_v43 = vmax.f32 %v8826_v47, 0.0  ;;  %v8829_v49 = vmax.f32 %v8827_v42, 0.0 }
0x45d6   :  { %11559 = vmatprep.mubr.f32.mxu0 %v8828_v43 }
0x45d7   :  { %11560 = vmatmul.mubr.f32.vlgmr.msra.gmra.mrb[68].mxu0 %v8829_v49 }
0x45d8   :  { %12803 = vmatpush1.bf16.msra.mxu0 %v12802_v56 }
0x45d9   :  { %12804 = vmatprep.subr.bf16.mxu0 %v14755_v28 }
0x45dc   :  { %12806 = vmatpush1.bf16.msra.mxu0 %v12805_v57 }
0x45dd   :  { %12807 = vmatprep.subr.bf16.mxu0 %v14755_v28 }
0x45e0   :  { %12809 = vmatpush1.bf16.msra.mxu0 %v12808_v59 }
0x45e1   :  { %12810 = vmatprep.subr.bf16.mxu0 %v14755_v28 }
0x45e4   :  { %12812 = vmatpush1.bf16.msra.mxu0 %v12811_v63 }
0x45e5   :  { %12813 = vmatprep.subr.bf16.mxu0 %v14755_v28 }
0x46aa   :  { %v11561_v31 = vpop.f32.mrb[68].mxu0 }
0x46ab   :  { %v8913_v44 = vpop.f32.mrb[69].mxu0 }
0x46ac   :  { %v13076_v13 = vpack.i.bf16 %v11561_v31, %v8913_v44 }
0x46ae   :  { %13077 = vrot.lane.b32.xlu1 %v13076_v13, %s14752_s27 }
0x4720   :  { %v13078_v48 = vpop.permute.xlu1 %13077 }
0x4721   :  { %v13080_v50 = vunpack.i.h.bf16 %v13078_v48  ;;  %v13079_v51 = vunpack.i.l.bf16 %v13078_v48 }
0x4723   :  { %v12760_v53 = vpack.c.bf16 %v13080_v50, %v13079_v51 }
0x4725   :  { %12761 = vmatprep.subr.bf16.mxu1 %v12760_v53 }
0x4726   :  { %12763 = vmatpush3.bf16.msra.mxu1 %v12760_v53 }
0x4729   :  { %11567 = vmatmul.mubr.msk.f32.vlgmr.msra.gmra.mrb[66].mxu1 %vm1050_vm0, %v16074_v24 }
0x472a   :  { %11573 = vmatprep.mubr.msk.f32.mxu1 %vm1050_vm0, %v16069_v14  ;;  %v9172_v14 = vld [vmem:[#allocation94 + $0x40] sm:$0xff] }
0x472b   :  { %v12814_v6 = vpack.c.bf16 %v9173_v0, %v9172_v14  ;;  %v9184_v0 = vld [vmem:[#allocation94 + $0xa0] sm:$0xff] }
0x472d   :  { %12815 = vmatpush1.bf16.msra.mxu0 %v12814_v6  ;;  %v9185_v6 = vld [vmem:[#allocation94 + $0xa8] sm:$0xff] }
0x472e   :  { %12816 = vmatprep.subr.bf16.mxu0 %v14755_v28  ;;  %v12832_v8 = vpack.c.bf16 %v9185_v6, %v9184_v0 }
0x4731   :  { %12818 = vmatpush1.bf16.msra.mxu0 %v12817_v10 }
0x4732   :  { %12819 = vmatprep.subr.bf16.mxu0 %v14755_v28 }
0x4735   :  { %12821 = vmatpush1.bf16.msra.mxu0 %v12820_v12  ;;  %v9186_v12 = vld [vmem:[#allocation94 + $0xb0] sm:$0xff] }
0x4736   :  { %12822 = vmatprep.subr.bf16.mxu0 %v14755_v28 }
0x4739   :  { %12824 = vmatpush1.bf16.msra.mxu0 %v12823_v19 }
0x473a   :  { %12825 = vmatprep.subr.bf16.mxu0 %v14755_v28 }
0x473d   :  { %12827 = vmatpush1.bf16.msra.mxu0 %v12826_v21 }
0x473e   :  { %12828 = vmatprep.subr.bf16.mxu0 %v14755_v28 }
0x4741   :  { %12830 = vmatpush1.bf16.msra.mxu0 %v12829_v61 }
0x4742   :  { %12831 = vmatprep.subr.bf16.mxu0 %v14755_v28 }
0x4745   :  { %12833 = vmatpush1.bf16.msra.mxu0 %v12832_v8 }
0x4746   :  { %9342 = vmatprep.subr.mxu0 %v14760_v45 }
0x4749   :  { %9343 = vmatpush1.msra.mxu0 %v9186_v12  ;;  %v9502_v12 = vld [vmem:[#allocation97 + $0x10] sm:$0xff] }
0x474a   :  { %12837 = vmatprep.subr.bf16.mxu0 %v14755_v28 }
0x47fc   :  { %v11568_v26 = vpop.f32.mrb[66].mxu1 }
0x47fd   :  { %v9006_v32 = vadd.f32 %v11568_v26, %v11561_v31  ;;  %v8996_v34 = vpop.f32.mrb[67].mxu1  ;;  %v9189_v26 = vld [vmem:[#allocation94 + $0xc8] sm:$0xff] }
0x47fe   :  { %v9005_v36 = vadd.f32 %v8996_v34, %v8913_v44  ;;  %v9190_v34 = vld [vmem:[#allocation94 + $0xd0] sm:$0xff] }
0x47ff   :  { %v9012_v30 = vadd.f32 %v9010_v27, %v9006_v32 }
0x4800   :  { %v9011_v37 = vadd.f32 %v9010_v27, %v9005_v36  ;;  %v9188_v27 = vld [vmem:[#allocation94 + $0xc0] sm:$0xff]  ;;  %v12772_v36 = vpack.c.bf16 %v9190_v34, %v9189_v26  ;;  %v9511_v34 = vld [vmem:[#allocation97 + $0x58] sm:$0xf] }
0x4801   :  { %v9014_v2 = vsel %vm1231_vm3, %v9012_v30, 0.0 }
0x4802   :  { %v9013_v38 = vsel %vm1231_vm3, %v9011_v37, 0.0 }
0x4803   :  { %v9015_v39 = vadd.f32 %v9014_v2, %v9013_v38  ;;  %v9193_v38 = vld [vmem:[#allocation94 + $0xe8] sm:$0xff] }
0x4805   :  { %v9016_v40 = vrot.slane %v9015_v39, 4 }
0x4807   :  { %v9017_v46 = vadd.f32 %v9016_v40, %v9015_v39  ;;  %v9194_v39 = vld [vmem:[#allocation94 + $0xf0] sm:$0xff] }
0x4808   :  { %v12778_v40 = vpack.c.bf16 %v9194_v39, %v9193_v38 }
0x4809   :  { %v9018_v41 = vrot.slane %v9017_v46, 2 }
0x480b   :  { %v9019_v22 = vadd.f32 %v9018_v41, %v9017_v46  ;;  %v9196_v46 = vld [vmem:[#allocation94 + $0x100] sm:$0xff] }
0x480d   :  { %v9020_v29 = vrot.slane %v9019_v22, 1 }
0x480f   :  { %v9021_v47 = vadd.f32 %v9020_v29, %v9019_v22  ;;  %v9197_v22 = vld [vmem:[#allocation94 + $0x108] sm:$0xff]  ;;  %v9198_v29 = vld [vmem:[#allocation94 + $0x110] sm:$0xff] }
0x4811   :  { %v9022_v42 = vmul.f32 0.0625, %v9021_v47 }
0x4813   :  { %v9023_v43 = vsub.f32 %v9011_v37, %v9022_v42  ;;  %v9024_v49 = vsub.f32 %v9012_v30, %v9022_v42 }
0x4815   :  { %v9025_v13 = vmul.f32 %v9023_v43, %v9023_v43  ;;  %v9026_v31 = vmul.f32 %v9024_v49, %v9024_v49  ;;  %v9199_v43 = vld [vmem:[#allocation94 + $0x118] sm:$0xff]  ;;  %v9200_v49 = vld [vmem:[#allocation94 + $0x120] sm:$0xff] }
0x4817   :  { %v9027_v44 = vsel %vm1231_vm3, %v9025_v13, 0.0  ;;  %v9028_v48 = vsel %vm1231_vm3, %v9026_v31, 0.0  ;;  %vm9067_vm3 = vcmask 457920   ;;  %v12787_v31 = vpack.c.bf16 %v9200_v49, %v9199_v43 }
0x4818   :  { %v9029_v50 = vadd.f32 %v9028_v48, %v9027_v44  ;;  %v9201_v44 = vld [vmem:[#allocation94 + $0x128] sm:$0xff]  ;;  %v9202_v48 = vld [vmem:[#allocation94 + $0x130] sm:$0xff] }
0x481a   :  { %v9030_v51 = vrot.slane %v9029_v50, 4 }
0x481c   :  { %v9031_v53 = vadd.f32 %v9030_v51, %v9029_v50  ;;  %v12790_v51 = vpack.c.bf16 %v9202_v48, %v9201_v44 }
0x481e   :  { %v9032_v54 = vrot.slane %v9031_v53, 2 }
0x4820   :  { %v9033_v55 = vadd.f32 %v9032_v54, %v9031_v53  ;;  %v9203_v53 = vld [vmem:[#allocation94 + $0x138] sm:$0xff]  ;;  %v9204_v54 = vld [vmem:[#allocation94 + $0x140] sm:$0xff] }
0x4822   :  { %v9034_v1 = vrot.slane %v9033_v55, 1 }
0x4824   :  { %v9035_v56 = vadd.f32 %v9034_v1, %v9033_v55  ;;  %v12793_v1 = vpack.c.bf16 %v9204_v54, %v9203_v53 }
0x4826   :  { %v9036_v5 = vmul.f32 0.0625, %v9035_v56  ;;  %v9205_v56 = vld [vmem:[#allocation94 + $0x148] sm:$0xff] }
0x4828   :  { %v9037_v57 = vadd.f32 1e-05, %v9036_v5  ;;  %v9206_v5 = vld [vmem:[#allocation94 + $0x150] sm:$0xff] }
0x482a   :  { %13135 = vrsqrt.f32 %v9037_v57  ;;  %v12796_v57 = vpack.c.bf16 %v9206_v5, %v9205_v56 }
0x4834   :  { %v13136_v59 = vpop.eup %13135 }
0x4835   :  { %v9039_v62 = vmul.f32 %v13136_v59, %v8830_v23  ;;  %v9209_v59 = vld [vmem:[#allocation94 + $0x168] sm:$0xff] }
0x4837   :  { %v9040_v63 = vmul.f32 %v9039_v62, %v9022_v42  ;;  %v9048_v14 = vrot.slane %v9039_v62, %v15558_v52  ;;  %v12784_v42 = vpack.c.bf16 %v9198_v29, %v9197_v22 }
0x4839   :  { %v9042_v9 = vrot.slane %v9040_v63, 7  ;;  %v9049_v10 = vmul.f32 %v9048_v14, %v9011_v37  ;;  %v9050_v7 = vmul.f32 %v9048_v14, %v9012_v30  ;;  %v9191_v30 = vld [vmem:[#allocation94 + $0xd8] sm:$0xff]  ;;  %v9192_v37 = vld [vmem:[#allocation94 + $0xe0] sm:$0xff] }
0x483a   :  { %v12775_v2 = vpack.c.bf16 %v9192_v37, %v9191_v30  ;;  %v9163_v30 = vld [vmem:[#allocation96] sm:$0x7] }
0x483b   :  { %v9044_v11 = vsub.f32 %v8830_v23, %v9042_v9  ;;  %v9187_v23 = vld [vmem:[#allocation94 + $0xb8] sm:$0xff]  ;;  %v9376_v38 = vrot.slane %v9163_v30, %v15551_v20 }
0x483c   :  { %v12769_v32 = vpack.c.bf16 %v9188_v27, %v9187_v23  ;;  %v9509_v27 = vld [vmem:[#allocation97 + $0x48] sm:$0xff] }
0x483d   :  { %v9054_v17 = vrot.slane %v9044_v11, %v15561_v60  ;;  %v9501_v11 = vld [vmem:[#allocation97 + $0x8] sm:$0xff] }
0x483f   :  { %v9055_v18 = vadd.f32 %v9054_v17, %v9049_v10  ;;  %v9056_v19 = vadd.f32 %v9054_v17, %v9050_v7  ;;  %v9500_v7 = vld [vmem:[#allocation97] sm:$0xff] }
0x4840   :  { %v12838_v17 = vpack.c.bf16 %v9501_v11, %v9500_v7 }
0x4841   :  { %v9057_v15 = vmax.f32 %v9055_v18, 0.0  ;;  %v9058_v16 = vmax.f32 %v9056_v19, 0.0  ;;  %v9503_v18 = vld [vmem:[#allocation97 + $0x18] sm:$0xff] }
0x4842   :  { %v12841_v19 = vpack.c.bf16 %v9503_v18, %v9502_v12 }
0x4843   :  { %9061 = vrot.lane.b32.xlu0 %v9057_v15, %s14762_s21  ;;  %v12764_v21 = vpack.c.bf16 %v9058_v16, %v9057_v15  ;;  %v9505_v15 = vld [vmem:[#allocation97 + $0x28] sm:$0xff] }
0x4845   :  { %12765 = vmatprep.subr.bf16.mxu1 %v12764_v21 }
0x4846   :  { %12767 = vmatpush3.bf16.msra.mxu1 %v12764_v21  ;;  %v9507_v21 = vld [vmem:[#allocation97 + $0x38] sm:$0xff] }
0x4847   :  { %9063 = vrot.lane.b32.xlu0 %v9058_v16, %s14762_s21  ;;  %12768 = vmatprep.subr.bf16.mxu1 %v14755_v28 }
0x4849   :  { %11574 = vmatmul.mubr.msk.f32.vlgmr.msra.gmra.mrb[68].mxu1 %vm1050_vm0, %v16074_v24  ;;  %v9195_v24 = vld [vmem:[#allocation94 + $0xf8] sm:$0xff] }
0x484a   :  { %12770 = vmatpush1.bf16.msra.mxu1 %v12769_v32  ;;  %v12781_v41 = vpack.c.bf16 %v9196_v46, %v9195_v24  ;;  %v9510_v32 = vld [vmem:[#allocation97 + $0x50] sm:$0xff] }
0x484b   :  { %12771 = vmatprep.subr.bf16.mxu1 %v14755_v28 }
0x484e   :  { %12773 = vmatpush1.bf16.msra.mxu1 %v12772_v36  ;;  %v12853_v36 = vpack.c.bf16 %v9511_v34, %v9510_v32 }
0x484f   :  { %12774 = vmatprep.subr.bf16.mxu1 %v14755_v28 }
0x4852   :  { %12776 = vmatpush1.bf16.msra.mxu1 %v12775_v2 }
0x4853   :  { %12777 = vmatprep.subr.bf16.mxu1 %v14755_v28 }
0x4856   :  { %12779 = vmatpush1.bf16.msra.mxu1 %v12778_v40 }
0x4857   :  { %12780 = vmatprep.subr.bf16.mxu1 %v14755_v28 }
0x485a   :  { %12782 = vmatpush1.bf16.msra.mxu1 %v12781_v41 }
0x485b   :  { %12783 = vmatprep.subr.bf16.mxu1 %v14755_v28 }
0x485e   :  { %12785 = vmatpush1.bf16.msra.mxu1 %v12784_v42 }
0x485f   :  { %12786 = vmatprep.subr.bf16.mxu1 %v14755_v28 }
0x4862   :  { %12788 = vmatpush1.bf16.msra.mxu1 %v12787_v31 }
0x4863   :  { %12789 = vmatprep.subr.bf16.mxu1 %v14755_v28 }
0x4866   :  { %12791 = vmatpush1.bf16.msra.mxu1 %v12790_v51 }
0x4867   :  { %12792 = vmatprep.subr.bf16.mxu1 %v14755_v28 }
0x486a   :  { %12794 = vmatpush1.bf16.msra.mxu1 %v12793_v1 }
0x486b   :  { %12795 = vmatprep.subr.bf16.mxu1 %v14755_v28 }
0x486e   :  { %12797 = vmatpush1.bf16.msra.mxu1 %v12796_v57 }
0x486f   :  { %12798 = vmatprep.subr.bf16.mxu1 %v14755_v28 }
0x48b5   :  { %v9062_v47 = vpop.permute.xlu0 %9061 }
0x48b6   :  { %9068 = vst.msk [vmem:[#allocation2 + $0x8] sm:$0xff] %vm9067_vm3, %v9062_v47 }
0x48b9   :  { %v9064_v13 = vpop.permute.xlu0 %9063 }
0x48ba   :  { %9069 = vst.msk [vmem:[#allocation2 + $0x18] sm:$0xff] %vm9067_vm3, %v9064_v13 }
0x48bd   :  { %v9156_v50 = vld [vmem:[#allocation2 + $0x8] sm:$0xff] }
0x48be   :  { %9833 = vmatprep.mubr.msk.f32.mxu0 %vm9210_vm6, %v9156_v50 }
0x48bf   :  { %9363 = vmatmul.mubr.f32.vlgmr.msra.gmra.mrb[70].mxu0 %v16111_v3  ;;  %v9208_v3 = vld [vmem:[#allocation94 + $0x160] sm:$0xff] }
0x48c0   :  { %v12799_v58 = vpack.c.bf16 %v9208_v3, %v9207_v25  ;;  %12839 = vmatpush3.bf16.msra.mxu0 %v12838_v17 }
0x48c1   :  { %v9158_v55 = vld [vmem:[#allocation2 + $0x18] sm:$0xff]  ;;  %12840 = vmatprep.subr.bf16.mxu0 %v14755_v28 }
0x48c2   :  { %9834 = vmatprep.mubr.msk.f32.mxu0 %vm9210_vm6, %v9158_v55  ;;  %12800 = vmatpush1.bf16.msra.mxu1 %v12799_v58 }
0x48c3   :  { %9368 = vmatmul.mubr.f32.gmra.mrb[72].mxu0 %v16116_v4  ;;  %9261 = vmatprep.subr.mxu1 %v14760_v45 }
0x48c4   :  { %11607 = vmatprep.mubr.msk.f32.mxu0 %vm14763_vm7, %v14760_v45  ;;  %12842 = vmatpush3.bf16.msra.mxu0 %v12841_v19  ;;  %v9426_v19 = vld [vmem:[#allocation9] sm:$0x3] }
0x48c5   :  { %12843 = vmatprep.subr.bf16.mxu0 %v14755_v28 }
0x48c6   :  { %9262 = vmatpush1.msra.mxu1 %v9209_v59 }
0x48c7   :  { %12834 = vmatprep.subr.bf16.mxu1 %v14755_v28 }
0x491c   :  { %v11575_v4 = vpop.f32.mrb[68].mxu1 }
0x491d   :  { %v9136_v61 = vpop.f32.mrb[69].mxu1 }
0x491e   :  { %9147 = vrot.lane.b32.xlu1 %v9136_v61, %s14762_s21 }
0x4922   :  { %9149 = vrot.lane.b32.xlu1 %v11575_v4, %s14762_s21 }
0x4990   :  { %v9148_v62 = vpop.permute.xlu1 %9147 }
0x4991   :  { %9153 = vst.msk [vmem:[#allocation3 + $0x8] sm:$0xff] %vm9067_vm3, %v9148_v62 }
0x4992   :  { %v9364_v63 = vpop.f32.mrb[70].mxu0 }
0x4993   :  { %v9366_v14 = vpop.f32.mrb[71].mxu0 }
0x4994   :  { %v9150_v0 = vpop.permute.xlu1 %9149 }
0x4995   :  { %9154 = vst.msk [vmem:[#allocation3 + $0x18] sm:$0xff] %vm9067_vm3, %v9150_v0 }
0x4996   :  { %v9369_v6 = vpop.f32.mrb[72].mxu0 }
0x4997   :  { %v9371_v8 = vpop.f32.mrb[73].mxu0 }
0x4998   :  { %v9160_v9 = vld [vmem:[#allocation3 + $0x8] sm:$0xff] }
0x4999   :  { %9831 = vmatprep.mubr.msk.f32.mxu1 %vm9210_vm6, %v9160_v9 }
0x499a   :  { %9282 = vmatmul.mubr.f32.vlgmr.msra.gmra.mrb[70].mxu1 %v16130_v33  ;;  %v9504_v33 = vld [vmem:[#allocation97 + $0x20] sm:$0xff] }
0x499b   :  { %v12844_v16 = vpack.c.bf16 %v9505_v15, %v9504_v33 }
0x499c   :  { %v9162_v10 = vld [vmem:[#allocation3 + $0x18] sm:$0xff] }
0x499d   :  { %9832 = vmatprep.mubr.msk.f32.mxu1 %vm9210_vm6, %v9162_v10  ;;  %12845 = vmatpush3.bf16.msra.mxu0 %v12844_v16 }
0x499e   :  { %9287 = vmatmul.mubr.f32.gmra.mrb[72].mxu1 %v16134_v35  ;;  %v9506_v35 = vld [vmem:[#allocation97 + $0x30] sm:$0xff]  ;;  %12846 = vmatprep.subr.bf16.mxu0 %v14755_v28 }
0x499f   :  { %11580 = vmatprep.mubr.msk.f32.mxu1 %vm14763_vm7, %v14760_v45  ;;  %v12847_v23 = vpack.c.bf16 %v9507_v21, %v9506_v35  ;;  %v9508_v45 = vld [vmem:[#allocation97 + $0x40] sm:$0xff] }
0x49a0   :  { %v12850_v26 = vpack.c.bf16 %v9509_v27, %v9508_v45 }
0x49a1   :  { %12848 = vmatpush3.bf16.msra.mxu0 %v12847_v23 }
0x49a2   :  { %12849 = vmatprep.subr.bf16.mxu0 %v14755_v28 }
0x49a5   :  { %12851 = vmatpush3.bf16.msra.mxu0 %v12850_v26 }
0x49a6   :  { %12852 = vmatprep.subr.bf16.mxu0 %v14755_v28 }
0x49a9   :  { %12855 = vmatpush3.bf16.msk.msra.mxu0 %vm12854_vm10, %v12853_v36 }
0x4a6d   :  { %v9283_v37 = vpop.f32.mrb[70].mxu1 }
0x4a6e   :  { %v9365_v2 = vadd.f32 %v9364_v63, %v9283_v37  ;;  %v9285_v39 = vpop.f32.mrb[71].mxu1 }
0x4a70   :  { %v9377_v24 = vadd.f32 %v9376_v38, %v9365_v2 }
0x4a71   :  { %v9288_v40 = vpop.f32.mrb[72].mxu1 }
0x4a72   :  { %v9370_v46 = vadd.f32 %v9369_v6, %v9288_v40  ;;  %v9290_v41 = vpop.f32.mrb[73].mxu1  ;;  %v9380_v29 = vsel %vm9379_vm11, %v9377_v24, 0.0 }
0x4a74   :  { %v9378_v22 = vadd.f32 %v9376_v38, %v9370_v46 }
0x4a76   :  { %v9381_v47 = vsel %vm9379_vm11, %v9378_v22, 0.0 }
0x4a77   :  { %v9382_v28 = vadd.f32 %v9381_v47, %v9380_v29 }
0x4a79   :  { %v9383_v42 = vrot.slane %v9382_v28, 4 }
0x4a7b   :  { %v9384_v43 = vadd.f32 %v9383_v42, %v9382_v28 }
0x4a7d   :  { %v9385_v49 = vrot.slane %v9384_v43, 2 }
0x4a7f   :  { %v9386_v13 = vadd.f32 %v9385_v49, %v9384_v43 }
0x4a81   :  { %v9387_v31 = vrot.slane %v9386_v13, 1 }
0x4a83   :  { %v9388_v44 = vadd.f32 %v9387_v31, %v9386_v13 }
0x4a85   :  { %v9389_v48 = vmul.f32 0.0625, %v9388_v44 }
0x4a87   :  { %v9390_v20 = vsub.f32 %v9377_v24, %v9389_v48  ;;  %v9391_v50 = vsub.f32 %v9378_v22, %v9389_v48 }
0x4a89   :  { %v9392_v51 = vmul.f32 %v9390_v20, %v9390_v20  ;;  %v9393_v53 = vmul.f32 %v9391_v50, %v9391_v50 }
0x4a8b   :  { %v9394_v54 = vsel %vm9379_vm11, %v9392_v51, 0.0  ;;  %v9395_v55 = vsel %vm9379_vm11, %v9393_v53, 0.0 }
0x4a8c   :  { %v9396_v1 = vadd.f32 %v9395_v55, %v9394_v54 }
0x4a8e   :  { %v9397_v56 = vrot.slane %v9396_v1, 4 }
0x4a90   :  { %v9398_v5 = vadd.f32 %v9397_v56, %v9396_v1 }
0x4a92   :  { %v9399_v57 = vrot.slane %v9398_v5, 2 }
0x4a94   :  { %v9400_v25 = vadd.f32 %v9399_v57, %v9398_v5 }
0x4a96   :  { %v9401_v3 = vrot.slane %v9400_v25, 1 }
0x4a98   :  { %v9402_v58 = vadd.f32 %v9401_v3, %v9400_v25 }
0x4a9a   :  { %v9403_v59 = vmul.f32 0.0625, %v9402_v58 }
0x4a9c   :  { %v9404_v4 = vadd.f32 1e-05, %v9403_v59 }
0x4a9e   :  { %13137 = vrsqrt.f32 %v9404_v4 }
0x4aa8   :  { %v13138_v61 = vpop.eup %13137 }
0x4aa9   :  { %v9406_v62 = vmul.f32 %v13138_v61, %v9163_v30 }
0x4aab   :  { %v9407_v63 = vmul.f32 %v9406_v62, %v9389_v48  ;;  %v9415_v14 = vrot.slane %v9406_v62, %v15558_v52  ;;  %v9836_v52 = vld [vmem:[#allocation99] ss:$0 sm:$0xff] }
0x4aad   :  { %v9409_v0 = vrot.slane %v9407_v63, 7  ;;  %v9416_v6 = vmul.f32 %v9415_v14, %v9377_v24  ;;  %v9417_v8 = vmul.f32 %v9415_v14, %v9378_v22 }
0x4aaf   :  { %v9411_v9 = vsub.f32 %v9163_v30, %v9409_v0 }
0x4ab1   :  { %v9421_v10 = vrot.slane %v9411_v9, %v15561_v60 }
0x4ab3   :  { %v9423_v7 = vadd.f32 %v9421_v10, %v9417_v8  ;;  %v9422_v11 = vadd.f32 %v9421_v10, %v9416_v6 }
0x4ab5   :  { %v9424_v12 = vmax.f32 %v9422_v11, 0.0  ;;  %v9425_v17 = vmax.f32 %v9423_v7, 0.0 }
0x4ab7   :  { %v12835_v18 = vpack.c.bf16 %v9425_v17, %v9424_v12 }
0x4ab9   :  { %12836 = vmatpush3.bf16.msra.mxu1 %v12835_v18 }
0x4abc   :  { %11581 = vmatmul.mubr.msk.f32.vlgmr.msra.gmra.mrb[74].mxu1 %vm1050_vm0, %v9426_v19 }
0x4b8f   :  { %v9496_v33 = vpop.f32.mrb[74].mxu1 }
0x4b90   :  { %v11582_v15 = vpop.f32.mrb[75].mxu1  ;;  %11608 = vmatmul.mubr.msk.f32.vlgmr.msra.gmra.mrb[74].mxu0 %vm9379_vm11, %v9496_v33 }
0x4c63   :  { %v9592_v16 = vpop.f32.mrb[74].mxu0 }
0x4c64   :  { %v9593_v35 = vadd.f32 %v9836_v52, %v9592_v16  ;;  %v11609_v60 = vpop.f32.mrb[75].mxu0 }
0x4c66   :  { %9597 = vst.msk [vmem:[#allocation100] sm:$0x3] %vm9596_vm12, %v9593_v35 }
0x4c67   :  { %14546 = shalt.err (!%p14543_p4)
}
0x4c68   :  { %s14547_s3 = scalar_lea.hbm %s15089_s5, 32 }
0x4c69   :  { %p14548_p5 = scmp.ne.s32.totalorder %s15089_s5, %s14547_s3  ;;  %p14551_p6 = scmp.lt.u32.totalorder %s14547_s3, %s15089_s5 }
0x4c6b   :  { %p14553_p7 = pnand %p14551_p6, %p14548_p5 }
0x4c6d   :  { %14556 = shalt.err (!%p14553_p7)
}
0x4c6e   :  { %9607 = dma.vmem_to_hbm [thread:$0]  %s9605_s4, 32, %s15089_s5, [#allocation6]  }
0x4c6f   :  { %14621 = dma.done.wait [#allocation6], 32  }
0x4c70   :  { %14622 = vsyncadd [#allocation6], 4294967264 }
0x4c71   :  { %9611 = vsyncpa [#allocation5], 1 }
0x4c72   :  { %9612 = vsyncpa [#allocation8], 1 }
0x4c73   :  { %9613 = vsyncpa [#allocation11], 1 }
0x4c74   :  { %9614 = vsyncpa [#allocation14], 1 }
0x4c75   :  { %9615 = vsyncpa [#allocation17], 1 }
0x4c76   :  { %9616 = vsyncpa [#allocation20], 1 }
0x4c77   :  { %9617 = vsyncpa [#allocation23], 1 }
0x4c78   :  { %9618 = vsyncpa [#allocation26], 1 }
0x4c79   :  { %9619 = vsyncpa [#allocation29], 1 }
0x4c7a   :  { %9620 = vsyncpa [#allocation32], 1 }
0x4c7b   :  { %9621 = vsyncpa [#allocation35], 1 }
0x4c7c   :  { %9622 = vsyncpa [#allocation38], 1 }
0x4c7d   :  { %9623 = vsyncpa [#allocation41], 1 }
0x4c7e   :  { %9624 = vsyncpa [#allocation44], 1 }
0x4c7f   :  { %9625 = vsyncpa [#allocation47], 1 }
0x4c80   :  { %9626 = vsyncpa [#allocation50], 1 }
0x4c81   :  { %9627 = vsyncpa [#allocation53], 1 }
0x4c82   :  { %9628 = vsyncpa [#allocation56], 1 }
0x4c83   :  { %9629 = vsyncpa [#allocation59], 1 }
0x4c84   :  { %9630 = vsyncpa [#allocation62], 1 }
0x4c85   :  { %9631 = vsyncpa [#allocation65], 1 }
0x4c86   :  { %9632 = vsyncpa [#allocation68], 1 }
0x4c87   :  { %9633 = vsyncpa [#allocation71], 1 }
0x4c88   :  { %9634 = vsyncpa [#allocation74], 1 }
0x4c89   :  { %9635 = vsyncpa [#allocation77], 1 }
0x4c8a   :  { %9636 = vsyncpa [#allocation80], 1 }
0x4c8b   :  { %9637 = vsyncpa [#allocation83], 1 }
0x4c8c   :  { %9638 = vsyncpa [#allocation86], 1 }
0x4c8d   :  { %9639 = vsyncpa [#allocation89], 1 }
0x4c8e   :  { %9640 = vsyncpa [#allocation92], 1 }
0x4c8f   :  { %9641 = vsyncpa [#allocation95], 1 }
0x4c90   :  { %9642 = vsyncpa [#allocation98], 1 }
0x4c91   :  { %9643 = vsyncpa [#allocation6], 1 }

</bundles_post_ra>
